<compile_context>
chip_gen: v7x
topology: tpu7x:2x2x1
jax: 0.10.0
libtpu: 0.0.40
codegen_flags: <defaults>
</compile_context>

<pallas_src>
import numpy as np
import jax
import jax.numpy as jnp
from jax.experimental import pallas as pl
from jax.experimental.pallas import tpu as pltpu

EPS = 1e-5
C_IN = 1280
C3 = 16            # channels after the conv stack


def _pick_tk():
    """K-chunk for the first (1280 -> 512) matmul, per TPU generation.

    Lane-aligned divisors of 1280 are {128, 256, 640, 1280}.  Per-grid-step
    overhead is ~0.35us, so deep pipelines only pay off where layer-1 compute
    genuinely overlaps the x/w1 DMA (v5e/v6e); on v7x+ a single step wins.
    """
    try:
        kind = jax.devices()[0].device_kind.lower()
    except Exception:
        return 640
    if "v5" in kind or "v6" in kind or "trillium" in kind:
        return 640          # 2 steps: one overlap stage at minimal stepping cost
    return 1280             # v7x and newer: no K split


# ---------------------------------------------------------------------------
# In-kernel helpers (traced inside the Pallas kernel)
# ---------------------------------------------------------------------------
def _bn_relu(y, gamma, beta):
    """Training-mode BatchNorm (+ affine) followed by ReLU, all in f32.
    Two-pass variance is cancellation-safe (>= 0), so rsqrt never sees < eps."""
    mu = jnp.mean(y, axis=0, keepdims=True)
    d = y - mu
    var = jnp.mean(d * d, axis=0, keepdims=True)
    return jnp.maximum(d * jax.lax.rsqrt(var + EPS) * gamma + beta, 0.0)


def _dot(a, w_bf16):
    """bf16 x bf16 MXU matmul with f32 accumulation."""
    return jnp.dot(a.astype(jnp.bfloat16), w_bf16,
                   preferred_element_type=jnp.float32)


def _make_kernel(B, H, W, n_steps):
    Ho, Wo = H // 2, W // 2

    def finish(y1, g1, be1, w2_ref, g2, be2, w3_ref, g3, be3,
               mw1_ref, mg1, mbe1, mw2_ref, mg2, mbe2, mw3_ref, mb3, o_ref):
        # --- conv stack (1x1 convs == per-pixel channel matmuls) ---
        y = _bn_relu(y1, g1[...], be1[...])                        # (HWB, 512)
        y = _bn_relu(_dot(y, w2_ref[...]), g2[...], be2[...])      # (HWB, 256)
        y = _bn_relu(_dot(y, w3_ref[...]), g3[...], be3[...])      # (HWB, 16)

        # --- MaxPool2d(2,2), vectorized.  Rows are (h, w, b)-major, so a
        # w-pair is two contiguous B-row slabs inside a 2B-row block, and an
        # h-pair is two contiguous Wo-blocks of those.
        yv = y.reshape(H * Wo, 2 * B, C3)
        wm = jnp.maximum(yv[:, :B, :], yv[:, B:, :])               # (H*Wo, B, 16)
        wm = wm.reshape(Ho, 2 * Wo, B, C3)
        pooled = jnp.maximum(wm[:, :Wo], wm[:, Wo:])               # (Ho, Wo, B, 16)

        # --- NCHW flatten folded into the pre-permuted mw1; lane-concat the
        # 9 pooled windows into one (B, 144) tile -> a single K=144 MXU push.
        zin = jnp.concatenate(
            [pooled[ho, wo] for ho in range(Ho) for wo in range(Wo)], axis=1)

        # --- MLP head ---
        z = _bn_relu(_dot(zin, mw1_ref[...]), mg1[...], mbe1[...])  # (B, 256)
        z = _bn_relu(_dot(z, mw2_ref[...]), mg2[...], mbe2[...])    # (B, 64)
        o_ref[...] = _dot(z, mw3_ref[...]) + mb3[...]               # (B, 1)

    if n_steps == 1:
        # No K pipeline: no accumulator scratch, no pl.when phase split.
        def kernel(x_ref, w1_ref, g1, be1, *rest):
            *others, o_ref = rest
            y1 = jnp.dot(x_ref[...], w1_ref[...],
                         preferred_element_type=jnp.float32)
            finish(y1, g1, be1, *others, o_ref)
        return kernel

    def kernel(x_ref, w1_ref, g1, be1, *rest):
        *others, o_ref, acc_ref = rest
        k = pl.program_id(0)

        @pl.when(k == 0)
        def _init():
            acc_ref[...] = jnp.zeros_like(acc_ref)

        # Layer-1 partial product; overlaps the next x/w1 block DMA.
        acc_ref[...] += jnp.dot(x_ref[...], w1_ref[...],
                                preferred_element_type=jnp.float32)

        @pl.when(k == n_steps - 1)
        def _finish():
            finish(acc_ref[...], g1, be1, *others, o_ref)

    return kernel


# ---------------------------------------------------------------------------
# Wrapper
# ---------------------------------------------------------------------------
def domain_classifier_forward(x_nchw, params):
    B, C, H, W = x_nchw.shape
    assert C == C_IN and H % 2 == 0 and W % 2 == 0
    Ho, Wo = H // 2, W // 2
    rows = H * W * B
    tk = _pick_tk()
    assert C % tk == 0
    n_steps = C // tk

    # (h, w, b)-major pixel rows: row = (h*W + w)*B + b.  Every 2x2 pool window
    # is then four contiguous, sublane-aligned B-row slabs.  allow_input_fusion
    # below lets XLA fold this transpose/cast into the kernel's input DMA
    # instead of a standalone HBM pass (no-op if the fusion does not land).
    x = jnp.transpose(x_nchw, (2, 3, 0, 1)).reshape(rows, C).astype(jnp.bfloat16)

    p = params
    bf = lambda a: a.astype(jnp.bfloat16)

    # Fold PyTorch's NCHW flatten (col = c*Ho*Wo + ho*Wo + wo) into a static
    # row permutation of the first MLP weight: new row = (ho*Wo + wo)*16 + c,
    # matching the in-kernel window-major lane concatenation.
    perm = np.arange(C3 * Ho * Wo).reshape(C3, Ho, Wo).transpose(1, 2, 0).reshape(-1)
    lw1r = bf(p["lw1"][perm])

    # Pre-BN biases (cb1/cb2/cb3, lb1/lb2) are intentionally NOT passed: they
    # cancel exactly under training-mode BatchNorm mean subtraction.
    # TODO(synk): if eval-mode BN (running stats) is ever needed, the biases
    # must be reinstated.
    inputs = (
        x,
        bf(p["cw1"]), p["cg1"], p["cbe1"],
        bf(p["cw2"]), p["cg2"], p["cbe2"],
        bf(p["cw3"]), p["cg3"], p["cbe3"],
        lw1r,        p["lg1"], p["lbe1"],
        bf(p["lw2"]), p["lg2"], p["lbe2"],
        bf(p["lw3"]), p["lb3"],
    )

    def full(a):  # whole-array resident block (constant index across the grid)
        return pl.BlockSpec(a.shape, lambda k: (0, 0))

    in_specs = [
        pl.BlockSpec((rows, tk), lambda k: (0, k)),                 # x  : K-chunked
        pl.BlockSpec((tk, p["cw1"].shape[1]), lambda k: (k, 0)),    # w1 : K-chunked
    ] + [full(a) for a in inputs[2:]]

    scratch = [] if n_steps == 1 else [
        pltpu.VMEM((rows, p["cw1"].shape[1]), jnp.float32)          # layer-1 acc
    ]

    out = pl.pallas_call(
        _make_kernel(B, H, W, n_steps),
        out_shape=jax.ShapeDtypeStruct((B, 1), jnp.float32),
        grid_spec=pltpu.PrefetchScalarGridSpec(
            num_scalar_prefetch=0,
            grid=(n_steps,),
            in_specs=in_specs,
            out_specs=pl.BlockSpec((B, 1), lambda k: (0, 0)),
            scratch_shapes=scratch,
        ),
        compiler_params=pltpu.CompilerParams(
            dimension_semantics=("arbitrary",),
            # Let XLA fuse the x transpose/cast and the weight bf16 casts into
            # the kernel's input DMAs; harmless no-op for operands without a
            # fusible producer.
            allow_input_fusion=[True] * len(inputs),
        ),
    )(*inputs)
    return out


# ---------------------------------------------------------------------------
# Pure-JAX f32 reference with the exact PyTorch forward semantics
# (biases included, training-mode BN) for the sanity check.
# ---------------------------------------------------------------------------
def domain_classifier_ref(x_nchw, params):
    B, C, H, W = x_nchw.shape
    p = params

    def bn_relu(y, g, b):
        mu = jnp.mean(y, axis=0, keepdims=True)
        var = jnp.mean((y - mu) ** 2, axis=0, keepdims=True)
        return jnp.maximum((y - mu) * jax.lax.rsqrt(var + EPS) * g + b, 0.0)

    x = jnp.transpose(x_nchw, (0, 2, 3, 1)).reshape(B * H * W, C)
    y = bn_relu(x @ p["cw1"] + p["cb1"], p["cg1"], p["cbe1"])
    y = bn_relu(y @ p["cw2"] + p["cb2"], p["cg2"], p["cbe2"])
    y = bn_relu(y @ p["cw3"] + p["cb3"], p["cg3"], p["cbe3"])
    y = y.reshape(B, H, W, 16)
    y = y.reshape(B, H // 2, 2, W // 2, 2, 16).max(axis=(2, 4))          # MaxPool2d(2,2)
    y = jnp.transpose(y, (0, 3, 1, 2)).reshape(B, 16 * (H // 2) * (W // 2))  # NCHW flatten
    y = bn_relu(y @ p["lw1"] + p["lb1"], p["lg1"], p["lbe1"])
    y = bn_relu(y @ p["lw2"] + p["lb2"], p["lg2"], p["lbe2"])
    return y @ p["lw3"] + p["lb3"]


# ---------------------------------------------------------------------------
# Deterministic parameter initialization (shapes from the module's __init__)
# ---------------------------------------------------------------------------
def init_params(key):
    def lin(k, fin, fout):
        kw, kb = jax.random.split(k)
        bound = 1.0 / np.sqrt(fin)
        w = jax.random.uniform(kw, (fin, fout), jnp.float32, -bound, bound)
        b = jax.random.uniform(kb, (1, fout), jnp.float32, -bound, bound)
        return w, b

    def bn(c):
        return jnp.ones((1, c), jnp.float32), jnp.zeros((1, c), jnp.float32)

    ks = jax.random.split(key, 6)
    p = {}
    p["cw1"], p["cb1"] = lin(ks[0], 1280, 512)   # 1x1 convs == per-pixel linears
    p["cw2"], p["cb2"] = lin(ks[1], 512, 256)
    p["cw3"], p["cb3"] = lin(ks[2], 256, 16)
    p["cg1"], p["cbe1"] = bn(512)
    p["cg2"], p["cbe2"] = bn(256)
    p["cg3"], p["cbe3"] = bn(16)
    p["lw1"], p["lb1"] = lin(ks[3], 16 * 3 * 3, 256)
    p["lw2"], p["lb2"] = lin(ks[4], 256, 64)
    p["lw3"], p["lb3"] = lin(ks[5], 64, 1)
    p["lg1"], p["lbe1"] = bn(256)
    p["lg2"], p["lbe2"] = bn(64)
    return p


if __name__ == "__main__":
    key = jax.random.PRNGKey(0)
    kx, kp = jax.random.split(key)
    # Spatial 6x6 so MaxPool2d(2,2) -> 3x3 and the flatten is 16*3*3 = 144,
    # exactly as Linear(16*3*3, 256) requires.  B=8 keeps the pool slabs
    # sublane-aligned and gives BatchNorm1d a healthy batch.
    B, C, H, W = 8, 1280, 6, 6
    x = jax.random.normal(kx, (B, C, H, W), dtype=jnp.float32)
    params = init_params(kp)

    fwd = jax.jit(domain_classifier_forward)
    out = jax.block_until_ready(fwd(x, params))
    ref = domain_classifier_ref(x, params)

    assert out.shape == (B, 1)
    np.testing.assert_allclose(np.asarray(out), np.asarray(ref),
                               rtol=5e-2, atol=5e-2)
    print("KERNEL_OK")
</pallas_src>

<mosaic_0001>
module attributes {stable_mosaic.version = 11 : i64} {
  func.func @kernel(%arg0: i32, %arg1: memref<288x1280xbf16, #tpu.memory_space<vmem>>, %arg2: memref<1280x512xbf16, #tpu.memory_space<vmem>>, %arg3: memref<1x512xf32, #tpu.memory_space<vmem>>, %arg4: memref<1x512xf32, #tpu.memory_space<vmem>>, %arg5: memref<512x256xbf16, #tpu.memory_space<vmem>>, %arg6: memref<1x256xf32, #tpu.memory_space<vmem>>, %arg7: memref<1x256xf32, #tpu.memory_space<vmem>>, %arg8: memref<256x16xbf16, #tpu.memory_space<vmem>>, %arg9: memref<1x16xf32, #tpu.memory_space<vmem>>, %arg10: memref<1x16xf32, #tpu.memory_space<vmem>>, %arg11: memref<144x256xbf16, #tpu.memory_space<vmem>>, %arg12: memref<1x256xf32, #tpu.memory_space<vmem>>, %arg13: memref<1x256xf32, #tpu.memory_space<vmem>>, %arg14: memref<256x64xbf16, #tpu.memory_space<vmem>>, %arg15: memref<1x64xf32, #tpu.memory_space<vmem>>, %arg16: memref<1x64xf32, #tpu.memory_space<vmem>>, %arg17: memref<64x1xbf16, #tpu.memory_space<vmem>>, %arg18: memref<1x1xf32, #tpu.memory_space<vmem>>, %arg19: memref<8x1xf32, #tpu.memory_space<vmem>>) attributes {dimension_semantics = [#tpu.dimension_semantics<arbitrary>], iteration_bounds = array<i64: 1>, scalar_prefetch = 0 : i64, scratch_operands = 0 : i64, tpu.core_type = #tpu.core_type<tc>, window_params = [{transform_indices = @transform_0, window_bounds = array<i64: 288, 1280>}, {transform_indices = @transform_1, window_bounds = array<i64: 1280, 512>}, {pipeline_mode = #tpu.pipeline_mode<synchronous>, transform_indices = @transform_2, window_bounds = array<i64: 1, 512>}, {pipeline_mode = #tpu.pipeline_mode<synchronous>, transform_indices = @transform_3, window_bounds = array<i64: 1, 512>}, {pipeline_mode = #tpu.pipeline_mode<synchronous>, transform_indices = @transform_4, window_bounds = array<i64: 512, 256>}, {pipeline_mode = #tpu.pipeline_mode<synchronous>, transform_indices = @transform_5, window_bounds = array<i64: 1, 256>}, {pipeline_mode = #tpu.pipeline_mode<synchronous>, transform_indices = @transform_6, window_bounds = array<i64: 1, 256>}, {pipeline_mode = #tpu.pipeline_mode<synchronous>, transform_indices = @transform_7, window_bounds = array<i64: 256, 16>}, {pipeline_mode = #tpu.pipeline_mode<synchronous>, transform_indices = @transform_8, window_bounds = array<i64: 1, 16>}, {pipeline_mode = #tpu.pipeline_mode<synchronous>, transform_indices = @transform_9, window_bounds = array<i64: 1, 16>}, {pipeline_mode = #tpu.pipeline_mode<synchronous>, transform_indices = @transform_10, window_bounds = array<i64: 144, 256>}, {pipeline_mode = #tpu.pipeline_mode<synchronous>, transform_indices = @transform_11, window_bounds = array<i64: 1, 256>}, {pipeline_mode = #tpu.pipeline_mode<synchronous>, transform_indices = @transform_12, window_bounds = array<i64: 1, 256>}, {pipeline_mode = #tpu.pipeline_mode<synchronous>, transform_indices = @transform_13, window_bounds = array<i64: 256, 64>}, {pipeline_mode = #tpu.pipeline_mode<synchronous>, transform_indices = @transform_14, window_bounds = array<i64: 1, 64>}, {pipeline_mode = #tpu.pipeline_mode<synchronous>, transform_indices = @transform_15, window_bounds = array<i64: 1, 64>}, {pipeline_mode = #tpu.pipeline_mode<synchronous>, transform_indices = @transform_16, window_bounds = array<i64: 64, 1>}, {pipeline_mode = #tpu.pipeline_mode<synchronous>, transform_indices = @transform_17, window_bounds = array<i64: 1, 1>}, {pipeline_mode = #tpu.pipeline_mode<synchronous>, transform_indices = @transform_18, window_bounds = array<i64: 8, 1>}]} {
    %c0 = arith.constant 0 : index
    %c0_0 = arith.constant 0 : index
    %0 = vector.load %arg1[%c0, %c0_0] : memref<288x1280xbf16, #tpu.memory_space<vmem>>, vector<288x1280xbf16>
    %c0_1 = arith.constant 0 : index
    %c0_2 = arith.constant 0 : index
    %1 = vector.load %arg2[%c0_1, %c0_2] : memref<1280x512xbf16, #tpu.memory_space<vmem>>, vector<1280x512xbf16>
    %cst = arith.constant dense<0.000000e+00> : vector<288x512xf32>
    %2 = tpu.matmul %0, %1, %cst {dimension_numbers = #tpu.dot_dimension_numbers<[1], [0], [0], [1], [0, 0, 1, 1], [], []>} : vector<288x1280xbf16>, vector<1280x512xbf16>, vector<288x512xf32> -> vector<288x512xf32>
    %c0_3 = arith.constant 0 : index
    %c0_4 = arith.constant 0 : index
    %3 = vector.load %arg3[%c0_3, %c0_4] : memref<1x512xf32, #tpu.memory_space<vmem>>, vector<1x512xf32>
    %c0_5 = arith.constant 0 : index
    %c0_6 = arith.constant 0 : index
    %4 = vector.load %arg4[%c0_5, %c0_6] : memref<1x512xf32, #tpu.memory_space<vmem>>, vector<1x512xf32>
    %cst_7 = arith.constant dense<0.000000e+00> : vector<512xf32>
    %5 = vector.multi_reduction <add>, %2, %cst_7 [0] : vector<288x512xf32> to vector<512xf32>
    %6 = vector.shape_cast %5 : vector<512xf32> to vector<1x512xf32>
    %cst_8 = arith.constant 2.880000e+02 : f32
    %7 = vector.broadcast %cst_8 : f32 to vector<1x512xf32>
    %8 = arith.divf %6, %7 : vector<1x512xf32>
    %9 = vector.broadcast %8 : vector<1x512xf32> to vector<288x512xf32>
    %10 = arith.subf %2, %9 : vector<288x512xf32>
    %11 = arith.mulf %10, %10 : vector<288x512xf32>
    %cst_9 = arith.constant dense<0.000000e+00> : vector<512xf32>
    %12 = vector.multi_reduction <add>, %11, %cst_9 [0] : vector<288x512xf32> to vector<512xf32>
    %13 = vector.shape_cast %12 : vector<512xf32> to vector<1x512xf32>
    %cst_10 = arith.constant 2.880000e+02 : f32
    %14 = vector.broadcast %cst_10 : f32 to vector<1x512xf32>
    %15 = arith.divf %13, %14 : vector<1x512xf32>
    %cst_11 = arith.constant 9.99999974E-6 : f32
    %16 = vector.broadcast %cst_11 : f32 to vector<1x512xf32>
    %17 = arith.addf %15, %16 : vector<1x512xf32>
    %18 = math.rsqrt %17 : vector<1x512xf32>
    %19 = vector.broadcast %18 : vector<1x512xf32> to vector<288x512xf32>
    %20 = arith.mulf %10, %19 : vector<288x512xf32>
    %21 = vector.broadcast %3 : vector<1x512xf32> to vector<288x512xf32>
    %22 = arith.mulf %20, %21 : vector<288x512xf32>
    %23 = vector.broadcast %4 : vector<1x512xf32> to vector<288x512xf32>
    %24 = arith.addf %22, %23 : vector<288x512xf32>
    %cst_12 = arith.constant 0.000000e+00 : f32
    %25 = vector.broadcast %cst_12 : f32 to vector<288x512xf32>
    %26 = arith.maximumf %24, %25 : vector<288x512xf32>
    %c0_13 = arith.constant 0 : index
    %c0_14 = arith.constant 0 : index
    %27 = vector.load %arg5[%c0_13, %c0_14] : memref<512x256xbf16, #tpu.memory_space<vmem>>, vector<512x256xbf16>
    %28 = arith.truncf %26 : vector<288x512xf32> to vector<288x512xbf16>
    %cst_15 = arith.constant dense<0.000000e+00> : vector<288x256xf32>
    %29 = tpu.matmul %28, %27, %cst_15 {dimension_numbers = #tpu.dot_dimension_numbers<[1], [0], [0], [1], [0, 0, 1, 1], [], []>} : vector<288x512xbf16>, vector<512x256xbf16>, vector<288x256xf32> -> vector<288x256xf32>
    %c0_16 = arith.constant 0 : index
    %c0_17 = arith.constant 0 : index
    %30 = vector.load %arg6[%c0_16, %c0_17] : memref<1x256xf32, #tpu.memory_space<vmem>>, vector<1x256xf32>
    %c0_18 = arith.constant 0 : index
    %c0_19 = arith.constant 0 : index
    %31 = vector.load %arg7[%c0_18, %c0_19] : memref<1x256xf32, #tpu.memory_space<vmem>>, vector<1x256xf32>
    %cst_20 = arith.constant dense<0.000000e+00> : vector<256xf32>
    %32 = vector.multi_reduction <add>, %29, %cst_20 [0] : vector<288x256xf32> to vector<256xf32>
    %33 = vector.shape_cast %32 : vector<256xf32> to vector<1x256xf32>
    %cst_21 = arith.constant 2.880000e+02 : f32
    %34 = vector.broadcast %cst_21 : f32 to vector<1x256xf32>
    %35 = arith.divf %33, %34 : vector<1x256xf32>
    %36 = vector.broadcast %35 : vector<1x256xf32> to vector<288x256xf32>
    %37 = arith.subf %29, %36 : vector<288x256xf32>
    %38 = arith.mulf %37, %37 : vector<288x256xf32>
    %cst_22 = arith.constant dense<0.000000e+00> : vector<256xf32>
    %39 = vector.multi_reduction <add>, %38, %cst_22 [0] : vector<288x256xf32> to vector<256xf32>
    %40 = vector.shape_cast %39 : vector<256xf32> to vector<1x256xf32>
    %cst_23 = arith.constant 2.880000e+02 : f32
    %41 = vector.broadcast %cst_23 : f32 to vector<1x256xf32>
    %42 = arith.divf %40, %41 : vector<1x256xf32>
    %cst_24 = arith.constant 9.99999974E-6 : f32
    %43 = vector.broadcast %cst_24 : f32 to vector<1x256xf32>
    %44 = arith.addf %42, %43 : vector<1x256xf32>
    %45 = math.rsqrt %44 : vector<1x256xf32>
    %46 = vector.broadcast %45 : vector<1x256xf32> to vector<288x256xf32>
    %47 = arith.mulf %37, %46 : vector<288x256xf32>
    %48 = vector.broadcast %30 : vector<1x256xf32> to vector<288x256xf32>
    %49 = arith.mulf %47, %48 : vector<288x256xf32>
    %50 = vector.broadcast %31 : vector<1x256xf32> to vector<288x256xf32>
    %51 = arith.addf %49, %50 : vector<288x256xf32>
    %cst_25 = arith.constant 0.000000e+00 : f32
    %52 = vector.broadcast %cst_25 : f32 to vector<288x256xf32>
    %53 = arith.maximumf %51, %52 : vector<288x256xf32>
    %c0_26 = arith.constant 0 : index
    %c0_27 = arith.constant 0 : index
    %54 = vector.load %arg8[%c0_26, %c0_27] : memref<256x16xbf16, #tpu.memory_space<vmem>>, vector<256x16xbf16>
    %55 = arith.truncf %53 : vector<288x256xf32> to vector<288x256xbf16>
    %cst_28 = arith.constant dense<0.000000e+00> : vector<288x16xf32>
    %56 = tpu.matmul %55, %54, %cst_28 {dimension_numbers = #tpu.dot_dimension_numbers<[1], [0], [0], [1], [0, 0, 1, 1], [], []>} : vector<288x256xbf16>, vector<256x16xbf16>, vector<288x16xf32> -> vector<288x16xf32>
    %c0_29 = arith.constant 0 : index
    %c0_30 = arith.constant 0 : index
    %57 = vector.load %arg9[%c0_29, %c0_30] : memref<1x16xf32, #tpu.memory_space<vmem>>, vector<1x16xf32>
    %c0_31 = arith.constant 0 : index
    %c0_32 = arith.constant 0 : index
    %58 = vector.load %arg10[%c0_31, %c0_32] : memref<1x16xf32, #tpu.memory_space<vmem>>, vector<1x16xf32>
    %cst_33 = arith.constant dense<0.000000e+00> : vector<16xf32>
    %59 = vector.multi_reduction <add>, %56, %cst_33 [0] : vector<288x16xf32> to vector<16xf32>
    %60 = vector.shape_cast %59 : vector<16xf32> to vector<1x16xf32>
    %cst_34 = arith.constant 2.880000e+02 : f32
    %61 = vector.broadcast %cst_34 : f32 to vector<1x16xf32>
    %62 = arith.divf %60, %61 : vector<1x16xf32>
    %63 = vector.broadcast %62 : vector<1x16xf32> to vector<288x16xf32>
    %64 = arith.subf %56, %63 : vector<288x16xf32>
    %65 = arith.mulf %64, %64 : vector<288x16xf32>
    %cst_35 = arith.constant dense<0.000000e+00> : vector<16xf32>
    %66 = vector.multi_reduction <add>, %65, %cst_35 [0] : vector<288x16xf32> to vector<16xf32>
    %67 = vector.shape_cast %66 : vector<16xf32> to vector<1x16xf32>
    %cst_36 = arith.constant 2.880000e+02 : f32
    %68 = vector.broadcast %cst_36 : f32 to vector<1x16xf32>
    %69 = arith.divf %67, %68 : vector<1x16xf32>
    %cst_37 = arith.constant 9.99999974E-6 : f32
    %70 = vector.broadcast %cst_37 : f32 to vector<1x16xf32>
    %71 = arith.addf %69, %70 : vector<1x16xf32>
    %72 = math.rsqrt %71 : vector<1x16xf32>
    %73 = vector.broadcast %72 : vector<1x16xf32> to vector<288x16xf32>
    %74 = arith.mulf %64, %73 : vector<288x16xf32>
    %75 = vector.broadcast %57 : vector<1x16xf32> to vector<288x16xf32>
    %76 = arith.mulf %74, %75 : vector<288x16xf32>
    %77 = vector.broadcast %58 : vector<1x16xf32> to vector<288x16xf32>
    %78 = arith.addf %76, %77 : vector<288x16xf32>
    %cst_38 = arith.constant 0.000000e+00 : f32
    %79 = vector.broadcast %cst_38 : f32 to vector<288x16xf32>
    %80 = arith.maximumf %78, %79 : vector<288x16xf32>
    %81 = vector.shape_cast %80 : vector<288x16xf32> to vector<18x16x16xf32>
    %82 = vector.extract_strided_slice %81 {offsets = [0, 0, 0], sizes = [18, 8, 16], strides = [1, 1, 1]} : vector<18x16x16xf32> to vector<18x8x16xf32>
    %83 = vector.extract_strided_slice %81 {offsets = [0, 8, 0], sizes = [18, 8, 16], strides = [1, 1, 1]} : vector<18x16x16xf32> to vector<18x8x16xf32>
    %84 = arith.maximumf %82, %83 : vector<18x8x16xf32>
    %85 = vector.shape_cast %84 : vector<18x8x16xf32> to vector<3x6x8x16xf32>
    %86 = vector.extract_strided_slice %85 {offsets = [0, 0, 0, 0], sizes = [3, 3, 8, 16], strides = [1, 1, 1, 1]} : vector<3x6x8x16xf32> to vector<3x3x8x16xf32>
    %87 = vector.extract_strided_slice %85 {offsets = [0, 3, 0, 0], sizes = [3, 3, 8, 16], strides = [1, 1, 1, 1]} : vector<3x6x8x16xf32> to vector<3x3x8x16xf32>
    %88 = arith.maximumf %86, %87 : vector<3x3x8x16xf32>
    %89 = vector.extract_strided_slice %88 {offsets = [0, 0, 0, 0], sizes = [1, 1, 8, 16], strides = [1, 1, 1, 1]} : vector<3x3x8x16xf32> to vector<1x1x8x16xf32>
    %90 = vector.shape_cast %89 : vector<1x1x8x16xf32> to vector<8x16xf32>
    %91 = vector.extract_strided_slice %88 {offsets = [0, 1, 0, 0], sizes = [1, 1, 8, 16], strides = [1, 1, 1, 1]} : vector<3x3x8x16xf32> to vector<1x1x8x16xf32>
    %92 = vector.shape_cast %91 : vector<1x1x8x16xf32> to vector<8x16xf32>
    %93 = vector.extract_strided_slice %88 {offsets = [0, 2, 0, 0], sizes = [1, 1, 8, 16], strides = [1, 1, 1, 1]} : vector<3x3x8x16xf32> to vector<1x1x8x16xf32>
    %94 = vector.shape_cast %93 : vector<1x1x8x16xf32> to vector<8x16xf32>
    %95 = vector.extract_strided_slice %88 {offsets = [1, 0, 0, 0], sizes = [1, 1, 8, 16], strides = [1, 1, 1, 1]} : vector<3x3x8x16xf32> to vector<1x1x8x16xf32>
    %96 = vector.shape_cast %95 : vector<1x1x8x16xf32> to vector<8x16xf32>
    %97 = vector.extract_strided_slice %88 {offsets = [1, 1, 0, 0], sizes = [1, 1, 8, 16], strides = [1, 1, 1, 1]} : vector<3x3x8x16xf32> to vector<1x1x8x16xf32>
    %98 = vector.shape_cast %97 : vector<1x1x8x16xf32> to vector<8x16xf32>
    %99 = vector.extract_strided_slice %88 {offsets = [1, 2, 0, 0], sizes = [1, 1, 8, 16], strides = [1, 1, 1, 1]} : vector<3x3x8x16xf32> to vector<1x1x8x16xf32>
    %100 = vector.shape_cast %99 : vector<1x1x8x16xf32> to vector<8x16xf32>
    %101 = vector.extract_strided_slice %88 {offsets = [2, 0, 0, 0], sizes = [1, 1, 8, 16], strides = [1, 1, 1, 1]} : vector<3x3x8x16xf32> to vector<1x1x8x16xf32>
    %102 = vector.shape_cast %101 : vector<1x1x8x16xf32> to vector<8x16xf32>
    %103 = vector.extract_strided_slice %88 {offsets = [2, 1, 0, 0], sizes = [1, 1, 8, 16], strides = [1, 1, 1, 1]} : vector<3x3x8x16xf32> to vector<1x1x8x16xf32>
    %104 = vector.shape_cast %103 : vector<1x1x8x16xf32> to vector<8x16xf32>
    %105 = vector.extract_strided_slice %88 {offsets = [2, 2, 0, 0], sizes = [1, 1, 8, 16], strides = [1, 1, 1, 1]} : vector<3x3x8x16xf32> to vector<1x1x8x16xf32>
    %106 = vector.shape_cast %105 : vector<1x1x8x16xf32> to vector<8x16xf32>
    %107 = tpu.concatenate %90, %92, %94, %96, %98, %100, %102, %104, %106 in 1 : vector<8x16xf32>, vector<8x16xf32>, vector<8x16xf32>, vector<8x16xf32>, vector<8x16xf32>, vector<8x16xf32>, vector<8x16xf32>, vector<8x16xf32>, vector<8x16xf32> -> vector<8x144xf32>
    %c0_39 = arith.constant 0 : index
    %c0_40 = arith.constant 0 : index
    %108 = vector.load %arg11[%c0_39, %c0_40] : memref<144x256xbf16, #tpu.memory_space<vmem>>, vector<144x256xbf16>
    %109 = arith.truncf %107 : vector<8x144xf32> to vector<8x144xbf16>
    %cst_41 = arith.constant dense<0.000000e+00> : vector<8x256xf32>
    %110 = tpu.matmul %109, %108, %cst_41 {dimension_numbers = #tpu.dot_dimension_numbers<[1], [0], [0], [1], [0, 0, 1, 1], [], []>} : vector<8x144xbf16>, vector<144x256xbf16>, vector<8x256xf32> -> vector<8x256xf32>
    %c0_42 = arith.constant 0 : index
    %c0_43 = arith.constant 0 : index
    %111 = vector.load %arg12[%c0_42, %c0_43] : memref<1x256xf32, #tpu.memory_space<vmem>>, vector<1x256xf32>
    %c0_44 = arith.constant 0 : index
    %c0_45 = arith.constant 0 : index
    %112 = vector.load %arg13[%c0_44, %c0_45] : memref<1x256xf32, #tpu.memory_space<vmem>>, vector<1x256xf32>
    %cst_46 = arith.constant dense<0.000000e+00> : vector<256xf32>
    %113 = vector.multi_reduction <add>, %110, %cst_46 [0] : vector<8x256xf32> to vector<256xf32>
    %114 = vector.shape_cast %113 : vector<256xf32> to vector<1x256xf32>
    %cst_47 = arith.constant 8.000000e+00 : f32
    %115 = vector.broadcast %cst_47 : f32 to vector<1x256xf32>
    %116 = arith.divf %114, %115 : vector<1x256xf32>
    %117 = vector.broadcast %116 : vector<1x256xf32> to vector<8x256xf32>
    %118 = arith.subf %110, %117 : vector<8x256xf32>
    %119 = arith.mulf %118, %118 : vector<8x256xf32>
    %cst_48 = arith.constant dense<0.000000e+00> : vector<256xf32>
    %120 = vector.multi_reduction <add>, %119, %cst_48 [0] : vector<8x256xf32> to vector<256xf32>
    %121 = vector.shape_cast %120 : vector<256xf32> to vector<1x256xf32>
    %cst_49 = arith.constant 8.000000e+00 : f32
    %122 = vector.broadcast %cst_49 : f32 to vector<1x256xf32>
    %123 = arith.divf %121, %122 : vector<1x256xf32>
    %cst_50 = arith.constant 9.99999974E-6 : f32
    %124 = vector.broadcast %cst_50 : f32 to vector<1x256xf32>
    %125 = arith.addf %123, %124 : vector<1x256xf32>
    %126 = math.rsqrt %125 : vector<1x256xf32>
    %127 = vector.broadcast %126 : vector<1x256xf32> to vector<8x256xf32>
    %128 = arith.mulf %118, %127 : vector<8x256xf32>
    %129 = vector.broadcast %111 : vector<1x256xf32> to vector<8x256xf32>
    %130 = arith.mulf %128, %129 : vector<8x256xf32>
    %131 = vector.broadcast %112 : vector<1x256xf32> to vector<8x256xf32>
    %132 = arith.addf %130, %131 : vector<8x256xf32>
    %cst_51 = arith.constant 0.000000e+00 : f32
    %133 = vector.broadcast %cst_51 : f32 to vector<8x256xf32>
    %134 = arith.maximumf %132, %133 : vector<8x256xf32>
    %c0_52 = arith.constant 0 : index
    %c0_53 = arith.constant 0 : index
    %135 = vector.load %arg14[%c0_52, %c0_53] : memref<256x64xbf16, #tpu.memory_space<vmem>>, vector<256x64xbf16>
    %136 = arith.truncf %134 : vector<8x256xf32> to vector<8x256xbf16>
    %cst_54 = arith.constant dense<0.000000e+00> : vector<8x64xf32>
    %137 = tpu.matmul %136, %135, %cst_54 {dimension_numbers = #tpu.dot_dimension_numbers<[1], [0], [0], [1], [0, 0, 1, 1], [], []>} : vector<8x256xbf16>, vector<256x64xbf16>, vector<8x64xf32> -> vector<8x64xf32>
    %c0_55 = arith.constant 0 : index
    %c0_56 = arith.constant 0 : index
    %138 = vector.load %arg15[%c0_55, %c0_56] : memref<1x64xf32, #tpu.memory_space<vmem>>, vector<1x64xf32>
    %c0_57 = arith.constant 0 : index
    %c0_58 = arith.constant 0 : index
    %139 = vector.load %arg16[%c0_57, %c0_58] : memref<1x64xf32, #tpu.memory_space<vmem>>, vector<1x64xf32>
    %cst_59 = arith.constant dense<0.000000e+00> : vector<64xf32>
    %140 = vector.multi_reduction <add>, %137, %cst_59 [0] : vector<8x64xf32> to vector<64xf32>
    %141 = vector.shape_cast %140 : vector<64xf32> to vector<1x64xf32>
    %cst_60 = arith.constant 8.000000e+00 : f32
    %142 = vector.broadcast %cst_60 : f32 to vector<1x64xf32>
    %143 = arith.divf %141, %142 : vector<1x64xf32>
    %144 = vector.broadcast %143 : vector<1x64xf32> to vector<8x64xf32>
    %145 = arith.subf %137, %144 : vector<8x64xf32>
    %146 = arith.mulf %145, %145 : vector<8x64xf32>
    %cst_61 = arith.constant dense<0.000000e+00> : vector<64xf32>
    %147 = vector.multi_reduction <add>, %146, %cst_61 [0] : vector<8x64xf32> to vector<64xf32>
    %148 = vector.shape_cast %147 : vector<64xf32> to vector<1x64xf32>
    %cst_62 = arith.constant 8.000000e+00 : f32
    %149 = vector.broadcast %cst_62 : f32 to vector<1x64xf32>
    %150 = arith.divf %148, %149 : vector<1x64xf32>
    %cst_63 = arith.constant 9.99999974E-6 : f32
    %151 = vector.broadcast %cst_63 : f32 to vector<1x64xf32>
    %152 = arith.addf %150, %151 : vector<1x64xf32>
    %153 = math.rsqrt %152 : vector<1x64xf32>
    %154 = vector.broadcast %153 : vector<1x64xf32> to vector<8x64xf32>
    %155 = arith.mulf %145, %154 : vector<8x64xf32>
    %156 = vector.broadcast %138 : vector<1x64xf32> to vector<8x64xf32>
    %157 = arith.mulf %155, %156 : vector<8x64xf32>
    %158 = vector.broadcast %139 : vector<1x64xf32> to vector<8x64xf32>
    %159 = arith.addf %157, %158 : vector<8x64xf32>
    %cst_64 = arith.constant 0.000000e+00 : f32
    %160 = vector.broadcast %cst_64 : f32 to vector<8x64xf32>
    %161 = arith.maximumf %159, %160 : vector<8x64xf32>
    %c0_65 = arith.constant 0 : index
    %c0_66 = arith.constant 0 : index
    %162 = vector.load %arg17[%c0_65, %c0_66] : memref<64x1xbf16, #tpu.memory_space<vmem>>, vector<64x1xbf16>
    %163 = arith.truncf %161 : vector<8x64xf32> to vector<8x64xbf16>
    %cst_67 = arith.constant dense<0.000000e+00> : vector<8x1xf32>
    %164 = tpu.matmul %163, %162, %cst_67 {dimension_numbers = #tpu.dot_dimension_numbers<[1], [0], [0], [1], [0, 0, 1, 1], [], []>} : vector<8x64xbf16>, vector<64x1xbf16>, vector<8x1xf32> -> vector<8x1xf32>
    %c0_68 = arith.constant 0 : index
    %c0_69 = arith.constant 0 : index
    %165 = vector.load %arg18[%c0_68, %c0_69] : memref<1x1xf32, #tpu.memory_space<vmem>>, vector<1x1xf32>
    %166 = vector.broadcast %165 : vector<1x1xf32> to vector<8x1xf32>
    %167 = arith.addf %164, %166 : vector<8x1xf32>
    %c0_70 = arith.constant 0 : index
    %c0_71 = arith.constant 0 : index
    %168 = vector.load %arg19[%c0_70, %c0_71] : memref<8x1xf32, #tpu.memory_space<vmem>>, vector<8x1xf32>
    tpu.vector_store %arg19[%c0_70, %c0_71], %167 {strides = array<i32>} : memref<8x1xf32, #tpu.memory_space<vmem>>, vector<8x1xf32>,
    return
  }
  func.func @transform_0(%arg0: i32) -> (i32, i32) {
    %c0_i32 = arith.constant 0 : i32
    %c0_i32_0 = arith.constant 0 : i32
    return %c0_i32, %arg0 : i32, i32
  }
  func.func @transform_1(%arg0: i32) -> (i32, i32) {
    %c0_i32 = arith.constant 0 : i32
    %c0_i32_0 = arith.constant 0 : i32
    return %arg0, %c0_i32 : i32, i32
  }
  func.func @transform_2(%arg0: i32) -> (i32, i32) {
    %c0_i32 = arith.constant 0 : i32
    %c0_i32_0 = arith.constant 0 : i32
    %c0_i32_1 = arith.constant 0 : i32
    return %c0_i32, %c0_i32_0 : i32, i32
  }
  func.func @transform_3(%arg0: i32) -> (i32, i32) {
    %c0_i32 = arith.constant 0 : i32
    %c0_i32_0 = arith.constant 0 : i32
    %c0_i32_1 = arith.constant 0 : i32
    return %c0_i32, %c0_i32_0 : i32, i32
  }
  func.func @transform_4(%arg0: i32) -> (i32, i32) {
    %c0_i32 = arith.constant 0 : i32
    %c0_i32_0 = arith.constant 0 : i32
    %c0_i32_1 = arith.constant 0 : i32
    return %c0_i32, %c0_i32_0 : i32, i32
  }
  func.func @transform_5(%arg0: i32) -> (i32, i32) {
    %c0_i32 = arith.constant 0 : i32
    %c0_i32_0 = arith.constant 0 : i32
    %c0_i32_1 = arith.constant 0 : i32
    return %c0_i32, %c0_i32_0 : i32, i32
  }
  func.func @transform_6(%arg0: i32) -> (i32, i32) {
    %c0_i32 = arith.constant 0 : i32
    %c0_i32_0 = arith.constant 0 : i32
    %c0_i32_1 = arith.constant 0 : i32
    return %c0_i32, %c0_i32_0 : i32, i32
  }
  func.func @transform_7(%arg0: i32) -> (i32, i32) {
    %c0_i32 = arith.constant 0 : i32
    %c0_i32_0 = arith.constant 0 : i32
    %c0_i32_1 = arith.constant 0 : i32
    return %c0_i32, %c0_i32_0 : i32, i32
  }
  func.func @transform_8(%arg0: i32) -> (i32, i32) {
    %c0_i32 = arith.constant 0 : i32
    %c0_i32_0 = arith.constant 0 : i32
    %c0_i32_1 = arith.constant 0 : i32
    return %c0_i32, %c0_i32_0 : i32, i32
  }
  func.func @transform_9(%arg0: i32) -> (i32, i32) {
    %c0_i32 = arith.constant 0 : i32
    %c0_i32_0 = arith.constant 0 : i32
    %c0_i32_1 = arith.constant 0 : i32
    return %c0_i32, %c0_i32_0 : i32, i32
  }
  func.func @transform_10(%arg0: i32) -> (i32, i32) {
    %c0_i32 = arith.constant 0 : i32
    %c0_i32_0 = arith.constant 0 : i32
    %c0_i32_1 = arith.constant 0 : i32
    return %c0_i32, %c0_i32_0 : i32, i32
  }
  func.func @transform_11(%arg0: i32) -> (i32, i32) {
    %c0_i32 = arith.constant 0 : i32
    %c0_i32_0 = arith.constant 0 : i32
    %c0_i32_1 = arith.constant 0 : i32
    return %c0_i32, %c0_i32_0 : i32, i32
  }
  func.func @transform_12(%arg0: i32) -> (i32, i32) {
    %c0_i32 = arith.constant 0 : i32
    %c0_i32_0 = arith.constant 0 : i32
    %c0_i32_1 = arith.constant 0 : i32
    return %c0_i32, %c0_i32_0 : i32, i32
  }
  func.func @transform_13(%arg0: i32) -> (i32, i32) {
    %c0_i32 = arith.constant 0 : i32
    %c0_i32_0 = arith.constant 0 : i32
    %c0_i32_1 = arith.constant 0 : i32
    return %c0_i32, %c0_i32_0 : i32, i32
  }
  func.func @transform_14(%arg0: i32) -> (i32, i32) {
    %c0_i32 = arith.constant 0 : i32
    %c0_i32_0 = arith.constant 0 : i32
    %c0_i32_1 = arith.constant 0 : i32
    return %c0_i32, %c0_i32_0 : i32, i32
  }
  func.func @transform_15(%arg0: i32) -> (i32, i32) {
    %c0_i32 = arith.constant 0 : i32
    %c0_i32_0 = arith.constant 0 : i32
    %c0_i32_1 = arith.constant 0 : i32
    return %c0_i32, %c0_i32_0 : i32, i32
  }
  func.func @transform_16(%arg0: i32) -> (i32, i32) {
    %c0_i32 = arith.constant 0 : i32
    %c0_i32_0 = arith.constant 0 : i32
    %c0_i32_1 = arith.constant 0 : i32
    return %c0_i32, %c0_i32_0 : i32, i32
  }
  func.func @transform_17(%arg0: i32) -> (i32, i32) {
    %c0_i32 = arith.constant 0 : i32
    %c0_i32_0 = arith.constant 0 : i32
    %c0_i32_1 = arith.constant 0 : i32
    return %c0_i32, %c0_i32_0 : i32, i32
  }
  func.func @transform_18(%arg0: i32) -> (i32, i32) {
    %c0_i32 = arith.constant 0 : i32
    %c0_i32_0 = arith.constant 0 : i32
    %c0_i32_1 = arith.constant 0 : i32
    return %c0_i32, %c0_i32_0 : i32, i32
  }
}

</mosaic_0001>

<bundles_post_ra>
// kernel: domain_classifier_forward.2
= control target key start
LH: loop header
LB: loop body
LE: loop exit
PB: predicated region body
PF: predicated region fallthrough
CT: control target
= control target key end

     0   :  { %s29206_s0 = inlined_call_operand.vmem [shape: bf16[288,1280], index: 0, kind: input, shape index: {}]   ;;  %s29207_s1 = inlined_call_operand.vmem [shape: f32[1,512], index: 1, kind: input, shape index: {}]   ;;  %s29208_s2 = inlined_call_operand.vmem [shape: f32[1,512], index: 2, kind: input, shape index: {}]   ;;  %s29209_s3 = inlined_call_operand.vmem [shape: f32[1,256], index: 3, kind: input, shape index: {}]   ;;  %s29210_s4 = inlined_call_operand.vmem [shape: f32[1,256], index: 4, kind: input, shape index: {}]   ;;  %s29211_s5 = inlined_call_operand.vmem [shape: bf16[256,16], index: 5, kind: input, shape index: {}]   ;;  %s29212_s6 = inlined_call_operand.vmem [shape: f32[1,16], index: 6, kind: input, shape index: {}]   ;;  %s29213_s7 = inlined_call_operand.vmem [shape: f32[1,16], index: 7, kind: input, shape index: {}]   ;;  %s29214_s8 = inlined_call_operand.vmem [shape: f32[1,256], index: 8, kind: input, shape index: {}]   ;;  %s29215_s9 = inlined_call_operand.vmem [shape: f32[1,256], index: 9, kind: input, shape index: {}]   ;;  %s29216_s10 = inlined_call_operand.vmem [shape: bf16[256,64], index: 10, kind: input, shape index: {}]   ;;  %s29217_s11 = inlined_call_operand.vmem [shape: f32[1,64], index: 11, kind: input, shape index: {}]   ;;  %s29218_s12 = inlined_call_operand.vmem [shape: f32[1,64], index: 12, kind: input, shape index: {}]   ;;  %s29219_s13 = inlined_call_operand.vmem [shape: bf16[64,1], index: 13, kind: input, shape index: {}]   ;;  %s29220_s14 = inlined_call_operand.<no memory space> [shape: f32[1,1], index: 14, kind: input, shape index: {}]   ;;  %s29221_s15 = inlined_call_operand.vmem [shape: f32[1280,512], index: 15, kind: input, shape index: {}]   ;;  %s29222_s16 = inlined_call_operand.vmem [shape: f32[512,256], index: 16, kind: input, shape index: {}]   ;;  %s29223_s17 = inlined_call_operand.vmem [shape: bf16[144,256], index: 17, kind: input, shape index: {}]   ;;  %s29224_s18 = inlined_call_operand.vmem [shape: f32[8,1], index: 18, kind: output, shape index: {}]  }
   0x1   :  { %29513 = sst [smem:[#allocation127_spill]] %s29206_s0  ;;  %v23_v0 = vstv %s29220_s14 }
   0x2   :  { %29514 = sst [smem:[#allocation128_spill]] %s29207_s1  ;;  %24 = vst [vmem:[#allocation2] sm:$0x1] %v23_v0 }
   0x3   :  { %29515 = sst [smem:[#allocation129_spill]] %s29208_s2 }
   0x4   :  { %v16181_v1 = vld [vmem:[%s29221_s15 + $0x8] sm:$0xff]  ;;  %v61_v3 = vld [vmem:[%s29221_s15] sm:$0xff]  ;;  %s29516_s27 = sld [smem:[#allocation127_spill]]  ;;  %s29754_s24 = sld [smem:[#allocation128_spill]]  ;;  %vm15206_vm0 = vcmask 130048   ;;  %vm15649_vm1 = vcmask 261120  }
   0x5   :  { %v16185_v2 = vld [vmem:[%s29221_s15 + $0x28] sm:$0xff]  ;;  %v16184_v5 = vld [vmem:[%s29221_s15 + $0x20] sm:$0xff]  ;;  %s29757_s26 = sld [smem:[#allocation129_spill]]  ;;  %s21041_s19 = smov 96   ;;  %vm15651_vm2 = vcmask 392192   ;;  %vm15653_vm3 = vcmask 523264  }
   0x6   :  { %v19493_v4 = vpack.c.bf16 %v16185_v2, %v16181_v1  ;;  %v16189_v6 = vld [vmem:[%s29221_s15 + $0x48] sm:$0xff]  ;;  %v19492_v8 = vpack.c.bf16 %v16184_v5, %v61_v3  ;;  %v16188_v10 = vld [vmem:[%s29221_s15 + $0x40] sm:$0xff]  ;;  %vm15655_vm4 = vcmask 654336   ;;  %vm15657_vm5 = vcmask 785408  }
   0x7   :  { %v16193_v7 = vld [vmem:[%s29221_s15 + $0x68] sm:$0xff]  ;;  %v16192_v11 = vld [vmem:[%s29221_s15 + $0x60] sm:$0xff]  ;;  %vm15659_vm6 = vcmask 916480   ;;  %vm21045_vm7 = vmmov 0   ;;  %vm16175_vm8 = vcmask 7168  }
   0x8   :  { %v19497_v9 = vpack.c.bf16 %v16193_v7, %v16189_v6  ;;  %v16197_v12 = vld [vmem:[%s29221_s15 + $0x88] sm:$0xff]  ;;  %9970 = vmatprep.subr.bf16.mxu0 %v19493_v4  ;;  %19915 = vmatprep.subr.bf16.mxu1 %v19493_v4  ;;  %v19496_v14 = vpack.c.bf16 %v16192_v11, %v16188_v10  ;;  %v16196_v16 = vld [vmem:[%s29221_s15 + $0x80] sm:$0xff] }
   0x9   :  { %v16201_v13 = vld [vmem:[%s29221_s15 + $0xa8] sm:$0xff]  ;;  %9971 = vmatpush1.bf16.msra.mxu0 %v19492_v8  ;;  %19931 = vmatpush1.bf16.msra.mxu1 %v19492_v8  ;;  %v16200_v17 = vld [vmem:[%s29221_s15 + $0xa0] sm:$0xff] }
   0xa   :  { %9972 = vmatprep.subr.bf16.mxu0 %v19497_v9  ;;  %19916 = vmatprep.subr.bf16.mxu1 %v19497_v9  ;;  %v19501_v15 = vpack.c.bf16 %v16201_v13, %v16197_v12  ;;  %v16205_v18 = vld [vmem:[%s29221_s15 + $0xc8] sm:$0xff]  ;;  %v19500_v20 = vpack.c.bf16 %v16200_v17, %v16196_v16  ;;  %v16204_v22 = vld [vmem:[%s29221_s15 + $0xc0] sm:$0xff] }
   0xb   :  { %v16209_v19 = vld [vmem:[%s29221_s15 + $0xe8] sm:$0xff]  ;;  %v16208_v23 = vld [vmem:[%s29221_s15 + $0xe0] sm:$0xff] }
   0xc   :  { %v19505_v21 = vpack.c.bf16 %v16209_v19, %v16205_v18  ;;  %v16213_v24 = vld [vmem:[%s29221_s15 + $0x108] sm:$0xff]  ;;  %v19504_v26 = vpack.c.bf16 %v16208_v23, %v16204_v22  ;;  %v16212_v28 = vld [vmem:[%s29221_s15 + $0x100] sm:$0xff] }
   0xd   :  { %9973 = vmatpush1.bf16.msra.mxu0 %v19496_v14  ;;  %19932 = vmatpush1.bf16.msra.mxu1 %v19496_v14  ;;  %v16217_v25 = vld [vmem:[%s29221_s15 + $0x128] sm:$0xff]  ;;  %v16216_v29 = vld [vmem:[%s29221_s15 + $0x120] sm:$0xff] }
   0xe   :  { %9974 = vmatprep.subr.bf16.mxu0 %v19501_v15  ;;  %19917 = vmatprep.subr.bf16.mxu1 %v19501_v15  ;;  %v19509_v27 = vpack.c.bf16 %v16217_v25, %v16213_v24  ;;  %v16221_v30 = vld [vmem:[%s29221_s15 + $0x148] sm:$0xff]  ;;  %v19508_v32 = vpack.c.bf16 %v16216_v29, %v16212_v28  ;;  %v16220_v34 = vld [vmem:[%s29221_s15 + $0x140] sm:$0xff] }
   0xf   :  { %v16225_v31 = vld [vmem:[%s29221_s15 + $0x168] sm:$0xff]  ;;  %v16224_v35 = vld [vmem:[%s29221_s15 + $0x160] sm:$0xff] }
  0x10   :  { %v19513_v33 = vpack.c.bf16 %v16225_v31, %v16221_v30  ;;  %v16229_v36 = vld [vmem:[%s29221_s15 + $0x188] sm:$0xff]  ;;  %v19512_v38 = vpack.c.bf16 %v16224_v35, %v16220_v34  ;;  %v16228_v39 = vld [vmem:[%s29221_s15 + $0x180] sm:$0xff] }
  0x11   :  { %9975 = vmatpush1.bf16.msra.mxu0 %v19500_v20  ;;  %19933 = vmatpush1.bf16.msra.mxu1 %v19500_v20  ;;  %v16233_v37 = vld [vmem:[%s29221_s15 + $0x1a8] sm:$0xff]  ;;  %v16232_v40 = vld [vmem:[%s29221_s15 + $0x1a0] sm:$0xff] }
  0x12   :  { %9976 = vmatprep.subr.bf16.mxu0 %v19505_v21  ;;  %19918 = vmatprep.subr.bf16.mxu1 %v19505_v21  ;;  %v19517_v41 = vpack.c.bf16 %v16233_v37, %v16229_v36  ;;  %v16237_v42 = vld [vmem:[%s29221_s15 + $0x1c8] sm:$0xff]  ;;  %v19516_v46 = vpack.c.bf16 %v16232_v40, %v16228_v39  ;;  %v16236_v48 = vld [vmem:[%s29221_s15 + $0x1c0] sm:$0xff]  ;;  %v16183_v36 = vld [vmem:[%s29221_s15 + $0x18] sm:$0xff] }
  0x13   :  { %v16241_v43 = vld [vmem:[%s29221_s15 + $0x1e8] sm:$0xff]  ;;  %v16240_v49 = vld [vmem:[%s29221_s15 + $0x1e0] sm:$0xff]  ;;  %v16187_v37 = vld [vmem:[%s29221_s15 + $0x38] sm:$0xff] }
  0x14   :  { %v20639_v44 = vld [vmem:[%s29516_s27 + $0x4] ss:$40 sps:$4 sm:$0xff]   ;;  %v19521_v47 = vpack.c.bf16 %v16241_v43, %v16237_v42  ;;  %v19520_v52 = vpack.c.bf16 %v16240_v49, %v16236_v48  ;;  %v19495_v43 = vpack.c.bf16 %v16187_v37, %v16183_v36  ;;  %v16191_v48 = vld [vmem:[%s29221_s15 + $0x58] sm:$0xff]  ;;  %v16214_v36 = vld [vmem:[%s29221_s15 + $0x110] sm:$0xff] }
  0x15   :  { %9977 = vmatpush1.bf16.msra.mxu0 %v19504_v26  ;;  %19934 = vmatpush1.bf16.msra.mxu1 %v19504_v26  ;;  %v20642_v45 = vld [vmem:[%s29516_s27 + $0x284] ss:$40 sps:$4 sm:$0xff]   ;;  %v16195_v49 = vld [vmem:[%s29221_s15 + $0x78] sm:$0xff]  ;;  %v16218_v37 = vld [vmem:[%s29221_s15 + $0x130] sm:$0xff] }
  0x16   :  { %9978 = vmatprep.subr.bf16.mxu0 %v19509_v27  ;;  %19919 = vmatprep.subr.bf16.mxu1 %v19509_v27  ;;  %v16245_v50 = vld [vmem:[%s29221_s15 + $0x208] sm:$0xff]  ;;  %v16244_v53 = vld [vmem:[%s29221_s15 + $0x200] sm:$0xff] }
  0x17   :  { %v16249_v51 = vld [vmem:[%s29221_s15 + $0x228] sm:$0xff]  ;;  %10002 = vmatprep.mubr.bf16.mxu0 %v20639_v44  ;;  %10082 = vmatprep.mubr.bf16.mxu1 %v20642_v45  ;;  %v16248_v54 = vld [vmem:[%s29221_s15 + $0x220] sm:$0xff]  ;;  %v16182_v44 = vld [vmem:[%s29221_s15 + $0x10] sm:$0xff] }
  0x18   :  { %v19525_v55 = vpack.c.bf16 %v16249_v51, %v16245_v50  ;;  %v16253_v56 = vld [vmem:[%s29221_s15 + $0x248] sm:$0xff]  ;;  %v19524_v58 = vpack.c.bf16 %v16248_v54, %v16244_v53  ;;  %v16252_v60 = vld [vmem:[%s29221_s15 + $0x240] sm:$0xff]  ;;  %v16186_v45 = vld [vmem:[%s29221_s15 + $0x30] sm:$0xff] }
  0x19   :  { %9979 = vmatpush1.bf16.msra.mxu0 %v19508_v32  ;;  %19935 = vmatpush1.bf16.msra.mxu1 %v19508_v32  ;;  %v16257_v57 = vld [vmem:[%s29221_s15 + $0x268] sm:$0xff]  ;;  %v16256_v61 = vld [vmem:[%s29221_s15 + $0x260] sm:$0xff]  ;;  %v19494_v54 = vpack.c.bf16 %v16186_v45, %v16182_v44  ;;  %v21521_v44 = vld [vmem:[%s29516_s27 + $0xf4] ss:$40 sps:$4 sm:$0xff]  }
  0x1a   :  { %9980 = vmatprep.subr.bf16.mxu0 %v19513_v33  ;;  %19920 = vmatprep.subr.bf16.mxu1 %v19513_v33  ;;  %v19529_v59 = vpack.c.bf16 %v16257_v57, %v16253_v56  ;;  %v16261_v62 = vld [vmem:[%s29221_s15 + $0x288] sm:$0xff]  ;;  %v19528_v0 = vpack.c.bf16 %v16256_v61, %v16252_v60  ;;  %v16260_v1 = vld [vmem:[%s29221_s15 + $0x280] sm:$0xff]  ;;  %v16194_v56 = vld [vmem:[%s29221_s15 + $0x70] sm:$0xff] }
  0x1b   :  { %v16265_v63 = vld [vmem:[%s29221_s15 + $0x2a8] sm:$0xff]  ;;  %v16264_v3 = vld [vmem:[%s29221_s15 + $0x2a0] sm:$0xff]  ;;  %v21401_v57 = vld [vmem:[%s29516_s27 + $0x54] ss:$40 sps:$4 sm:$0xff]  }
  0x1c   :  { %v19533_v2 = vpack.c.bf16 %v16265_v63, %v16261_v62  ;;  %v16269_v4 = vld [vmem:[%s29221_s15 + $0x2c8] sm:$0xff]  ;;  %v19532_v6 = vpack.c.bf16 %v16264_v3, %v16260_v1  ;;  %v16268_v8 = vld [vmem:[%s29221_s15 + $0x2c0] sm:$0xff]  ;;  %v20645_v60 = vld [vmem:[%s29516_s27 + $0x2d4] ss:$40 sps:$4 sm:$0xff]  }
  0x1d   :  { %9981 = vmatpush1.bf16.msra.mxu0 %v19512_v38  ;;  %19936 = vmatpush1.bf16.msra.mxu1 %v19512_v38  ;;  %v16273_v5 = vld [vmem:[%s29221_s15 + $0x2e8] sm:$0xff]  ;;  %v16272_v9 = vld [vmem:[%s29221_s15 + $0x2e0] sm:$0xff]  ;;  %v16199_v63 = vld [vmem:[%s29221_s15 + $0x98] sm:$0xff] }
  0x1e   :  { %9982 = vmatprep.subr.bf16.mxu0 %v19517_v41  ;;  %19921 = vmatprep.subr.bf16.mxu1 %v19517_v41  ;;  %v19537_v7 = vpack.c.bf16 %v16273_v5, %v16269_v4  ;;  %v16277_v10 = vld [vmem:[%s29221_s15 + $0x308] sm:$0xff]  ;;  %v19536_v12 = vpack.c.bf16 %v16272_v9, %v16268_v8  ;;  %v16276_v13 = vld [vmem:[%s29221_s15 + $0x300] sm:$0xff]  ;;  %v21425_v4 = vld [vmem:[%s29516_s27 + $0x50] ss:$40 sps:$4 sm:$0xff]  }
  0x1f   :  { %v16281_v11 = vld [vmem:[%s29221_s15 + $0x328] sm:$0xff]  ;;  %v16280_v15 = vld [vmem:[%s29221_s15 + $0x320] sm:$0xff]  ;;  %v16198_v8 = vld [vmem:[%s29221_s15 + $0x90] sm:$0xff] }
  0x20   :  { %v19541_v14 = vpack.c.bf16 %v16281_v11, %v16277_v10  ;;  %v16285_v16 = vld [vmem:[%s29221_s15 + $0x348] sm:$0xff]  ;;  %v19540_v18 = vpack.c.bf16 %v16280_v15, %v16276_v13  ;;  %v16284_v20 = vld [vmem:[%s29221_s15 + $0x340] sm:$0xff]  ;;  %v16202_v9 = vld [vmem:[%s29221_s15 + $0xb0] sm:$0xff] }
  0x21   :  { %9983 = vmatpush1.bf16.msra.mxu0 %v19516_v46  ;;  %19937 = vmatpush1.bf16.msra.mxu1 %v19516_v46  ;;  %v16289_v17 = vld [vmem:[%s29221_s15 + $0x368] sm:$0xff]  ;;  %v16288_v21 = vld [vmem:[%s29221_s15 + $0x360] sm:$0xff]  ;;  %v20648_v10 = vld [vmem:[%s29516_s27 + $0x2d0] ss:$40 sps:$4 sm:$0xff]  }
  0x22   :  { %9984 = vmatprep.subr.bf16.mxu0 %v19521_v47  ;;  %19922 = vmatprep.subr.bf16.mxu1 %v19521_v47  ;;  %v19545_v19 = vpack.c.bf16 %v16289_v17, %v16285_v16  ;;  %v16293_v22 = vld [vmem:[%s29221_s15 + $0x388] sm:$0xff]  ;;  %v19544_v24 = vpack.c.bf16 %v16288_v21, %v16284_v20  ;;  %v16292_v26 = vld [vmem:[%s29221_s15 + $0x380] sm:$0xff]  ;;  %v16207_v16 = vld [vmem:[%s29221_s15 + $0xd8] sm:$0xff] }
  0x23   :  { %v16297_v23 = vld [vmem:[%s29221_s15 + $0x3a8] sm:$0xff]  ;;  %v16296_v27 = vld [vmem:[%s29221_s15 + $0x3a0] sm:$0xff]  ;;  %v16211_v17 = vld [vmem:[%s29221_s15 + $0xf8] sm:$0xff] }
  0x24   :  { %v19549_v25 = vpack.c.bf16 %v16297_v23, %v16293_v22  ;;  %v16301_v28 = vld [vmem:[%s29221_s15 + $0x3c8] sm:$0xff]  ;;  %v19548_v30 = vpack.c.bf16 %v16296_v27, %v16292_v26  ;;  %v16300_v31 = vld [vmem:[%s29221_s15 + $0x3c0] sm:$0xff]  ;;  %v16206_v23 = vld [vmem:[%s29221_s15 + $0xd0] sm:$0xff]  ;;  %v19507_v27 = vpack.c.bf16 %v16211_v17, %v16207_v16 }
  0x25   :  { %9985 = vmatpush1.bf16.msra.mxu0 %v19520_v52  ;;  %19938 = vmatpush1.bf16.msra.mxu1 %v19520_v52  ;;  %v16305_v29 = vld [vmem:[%s29221_s15 + $0x3e8] sm:$0xff]  ;;  %v16304_v33 = vld [vmem:[%s29221_s15 + $0x3e0] sm:$0xff]  ;;  %v16215_v26 = vld [vmem:[%s29221_s15 + $0x118] sm:$0xff] }
  0x26   :  { %9986 = vmatprep.subr.bf16.mxu0 %v19525_v55  ;;  %19923 = vmatprep.subr.bf16.mxu1 %v19525_v55  ;;  %v19553_v32 = vpack.c.bf16 %v16305_v29, %v16301_v28  ;;  %v16309_v34 = vld [vmem:[%s29221_s15 + $0x408] sm:$0xff]  ;;  %v19552_v38 = vpack.c.bf16 %v16304_v33, %v16300_v31  ;;  %v16308_v39 = vld [vmem:[%s29221_s15 + $0x400] sm:$0xff]  ;;  %v16190_v55 = vld [vmem:[%s29221_s15 + $0x50] sm:$0xff] }
  0x27   :  { %v16313_v35 = vld [vmem:[%s29221_s15 + $0x428] sm:$0xff]  ;;  %v16312_v40 = vld [vmem:[%s29221_s15 + $0x420] sm:$0xff]  ;;  %v16219_v28 = vld [vmem:[%s29221_s15 + $0x138] sm:$0xff] }
  0x28   :  { %v21363_v41 = vld [vmem:[%s29516_s27] ss:$40 sps:$4 sm:$0xff]   ;;  %v19557_v42 = vpack.c.bf16 %v16313_v35, %v16309_v34  ;;  %v19556_v53 = vpack.c.bf16 %v16312_v40, %v16308_v39  ;;  %v21455_v15 = vld [vmem:[%s29516_s27 + $0xa4] ss:$40 sps:$4 sm:$0xff]   ;;  %v19511_v35 = vpack.c.bf16 %v16219_v28, %v16215_v26  ;;  %v16223_v45 = vld [vmem:[%s29221_s15 + $0x158] sm:$0xff] }
  0x29   :  { %9987 = vmatpush1.bf16.msra.mxu0 %v19524_v58  ;;  %19939 = vmatpush1.bf16.msra.mxu1 %v19524_v58  ;;  %v16317_v46 = vld [vmem:[%s29221_s15 + $0x448] sm:$0xff]  ;;  %v16316_v51 = vld [vmem:[%s29221_s15 + $0x440] sm:$0xff] }
  0x2a   :  { %9988 = vmatprep.subr.bf16.mxu0 %v19529_v59  ;;  %19924 = vmatprep.subr.bf16.mxu1 %v19529_v59  ;;  %v16321_v47 = vld [vmem:[%s29221_s15 + $0x468] sm:$0xff]  ;;  %v16320_v52 = vld [vmem:[%s29221_s15 + $0x460] sm:$0xff]  ;;  %v19499_v59 = vpack.c.bf16 %v16195_v49, %v16191_v48  ;;  %v19510_v48 = vpack.c.bf16 %v16218_v37, %v16214_v36  ;;  %v20657_v49 = vld [vmem:[%s29516_s27 + $0x374] ss:$40 sps:$4 sm:$0xff]  }
  0x2b   :  { %v20640_v50 = vld [vmem:[%s29516_s27 + $0x280] ss:$40 sps:$4 sm:$0xff]   ;;  %v19561_v58 = vpack.c.bf16 %v16321_v47, %v16317_v46  ;;  %v19560_v1 = vpack.c.bf16 %v16320_v52, %v16316_v51  ;;  %v20651_v20 = vld [vmem:[%s29516_s27 + $0x324] ss:$40 sps:$4 sm:$0xff]   ;;  %v16227_v46 = vld [vmem:[%s29221_s15 + $0x178] sm:$0xff] }
  0x2c   :  { %v16325_v61 = vld [vmem:[%s29221_s15 + $0x488] sm:$0xff]  ;;  %v16324_v3 = vld [vmem:[%s29221_s15 + $0x480] sm:$0xff]  ;;  %v16222_v52 = vld [vmem:[%s29221_s15 + $0x150] sm:$0xff] }
  0x2d   :  { %9989 = vmatpush1.bf16.msra.mxu0 %v19528_v0  ;;  %19940 = vmatpush1.bf16.msra.mxu1 %v19528_v0  ;;  %v16329_v62 = vld [vmem:[%s29221_s15 + $0x4a8] sm:$0xff]  ;;  %v16203_v0 = vld [vmem:[%s29221_s15 + $0xb8] sm:$0xff]  ;;  %v16332_v13 = vld [vmem:[%s29221_s15 + $0x4c0] sm:$0xff] }
  0x2e   :  { %9990 = vmatprep.subr.bf16.mxu0 %v19533_v2  ;;  %19925 = vmatprep.subr.bf16.mxu1 %v19533_v2  ;;  %v19498_v2 = vpack.c.bf16 %v16194_v56, %v16190_v55  ;;  %v19565_v5 = vpack.c.bf16 %v16329_v62, %v16325_v61  ;;  %v16333_v11 = vld [vmem:[%s29221_s15 + $0x4c8] sm:$0xff]  ;;  %v16340_v31 = vld [vmem:[%s29221_s15 + $0x500] sm:$0xff]  ;;  %v16231_v55 = vld [vmem:[%s29221_s15 + $0x198] sm:$0xff]  ;;  %v19515_v56 = vpack.c.bf16 %v16227_v46, %v16223_v45 }
  0x2f   :  { %v16341_v21 = vld [vmem:[%s29221_s15 + $0x508] sm:$0xff]  ;;  %v16344_v34 = vld [vmem:[%s29221_s15 + $0x520] sm:$0xff]  ;;  %v21558_v62 = vld [vmem:[%s29516_s27 + $0xf0] ss:$40 sps:$4 sm:$0xff]  }
  0x30   :  { %v16345_v22 = vld [vmem:[%s29221_s15 + $0x528] sm:$0xff]  ;;  %v19572_v47 = vpack.c.bf16 %v16344_v34, %v16340_v31  ;;  %v16376_v28 = vld [vmem:[%s29221_s15 + $0x620] sm:$0xff]  ;;  %v16251_v36 = vld [vmem:[%s29221_s15 + $0x238] sm:$0xff] }
  0x31   :  { %9991 = vmatpush1.bf16.msra.mxu0 %v19532_v6  ;;  %19941 = vmatpush1.bf16.msra.mxu1 %v19532_v6  ;;  %v16328_v6 = vld [vmem:[%s29221_s15 + $0x4a0] sm:$0xff]  ;;  %v19573_v33 = vpack.c.bf16 %v16345_v22, %v16341_v21  ;;  %v16349_v39 = vld [vmem:[%s29221_s15 + $0x548] sm:$0xff]  ;;  %v16242_v22 = vld [vmem:[%s29221_s15 + $0x1f0] sm:$0xff] }
  0x32   :  { %9992 = vmatprep.subr.bf16.mxu0 %v19537_v7  ;;  %19926 = vmatprep.subr.bf16.mxu1 %v19537_v7  ;;  %v19503_v7 = vpack.c.bf16 %v16203_v0, %v16199_v63  ;;  %v16353_v40 = vld [vmem:[%s29221_s15 + $0x568] sm:$0xff]  ;;  %v20660_v63 = vld [vmem:[%s29516_s27 + $0x370] ss:$40 sps:$4 sm:$0xff]   ;;  %v16384_v34 = vld [vmem:[%s29221_s15 + $0x660] sm:$0xff] }
  0x33   :  { %v16361_v51 = vld [vmem:[%s29221_s15 + $0x5a8] sm:$0xff]  ;;  %v16255_v45 = vld [vmem:[%s29221_s15 + $0x258] sm:$0xff] }
  0x34   :  { %v20663_v16 = vld [vmem:[%s29516_s27 + $0x3c4] ss:$40 sps:$4 sm:$0xff]   ;;  %v16259_v46 = vld [vmem:[%s29221_s15 + $0x278] sm:$0xff] }
  0x35   :  { %9993 = vmatpush1.bf16.msra.mxu0 %v19536_v12  ;;  %19942 = vmatpush1.bf16.msra.mxu1 %v19536_v12  ;;  %v16337_v12 = vld [vmem:[%s29221_s15 + $0x4e8] sm:$0xff] }
  0x36   :  { %9994 = vmatprep.subr.bf16.mxu0 %v19541_v14  ;;  %19927 = vmatprep.subr.bf16.mxu1 %v19541_v14  ;;  %v16336_v14 = vld [vmem:[%s29221_s15 + $0x4e0] sm:$0xff] }
  0x37   :  { %v19568_v29 = vpack.c.bf16 %v16336_v14, %v16332_v13  ;;  %v16364_v13 = vld [vmem:[%s29221_s15 + $0x5c0] sm:$0xff] }
  0x38   :  { %v16368_v14 = vld [vmem:[%s29221_s15 + $0x5e0] sm:$0xff] }
  0x39   :  { %9995 = vmatpush1.bf16.msra.mxu0 %v19540_v18  ;;  %19943 = vmatpush1.bf16.msra.mxu1 %v19540_v18  ;;  %v19564_v18 = vpack.c.bf16 %v16328_v6, %v16324_v3  ;;  %v16369_v3 = vld [vmem:[%s29221_s15 + $0x5e8] sm:$0xff]  ;;  %v16230_v6 = vld [vmem:[%s29221_s15 + $0x190] sm:$0xff] }
  0x3a   :  { %9996 = vmatprep.subr.bf16.mxu0 %v19545_v19  ;;  %19928 = vmatprep.subr.bf16.mxu1 %v19545_v19  ;;  %v19502_v19 = vpack.c.bf16 %v16202_v9, %v16198_v8  ;;  %v21581_v9 = vld [vmem:[%s29516_s27 + $0x144] ss:$40 sps:$4 sm:$0xff]  }
  0x3d   :  { %9997 = vmatpush1.bf16.msra.mxu0 %v19544_v24  ;;  %19944 = vmatpush1.bf16.msra.mxu1 %v19544_v24  ;;  %v16210_v24 = vld [vmem:[%s29221_s15 + $0xf0] sm:$0xff] }
  0x3e   :  { %9998 = vmatprep.subr.bf16.mxu0 %v19549_v25  ;;  %19929 = vmatprep.subr.bf16.mxu1 %v19549_v25  ;;  %v19569_v25 = vpack.c.bf16 %v16337_v12, %v16333_v11  ;;  %v16243_v11 = vld [vmem:[%s29221_s15 + $0x1f8] sm:$0xff] }
  0x41   :  { %9999 = vmatpush1.bf16.msra.mxu0 %v19548_v30  ;;  %19945 = vmatpush1.bf16.msra.mxu1 %v19548_v30  ;;  %v19506_v30 = vpack.c.bf16 %v16210_v24, %v16206_v23  ;;  %v19584_v23 = vpack.c.bf16 %v16368_v14, %v16364_v13  ;;  %v21615_v24 = vld [vmem:[%s29516_s27 + $0x140] ss:$40 sps:$4 sm:$0xff]   ;;  %v16262_v13 = vld [vmem:[%s29221_s15 + $0x290] sm:$0xff] }
  0x42   :  { %10000 = vmatprep.subr.bf16.mxu0 %v19553_v32  ;;  %19930 = vmatprep.subr.bf16.mxu1 %v19553_v32  ;;  %v21492_v32 = vld [vmem:[%s29516_s27 + $0xa0] ss:$40 sps:$4 sm:$0xff]   ;;  %v16266_v14 = vld [vmem:[%s29221_s15 + $0x2b0] sm:$0xff] }
  0x45   :  { %10001 = vmatpush1.bf16.msra.mxu0 %v19552_v38  ;;  %19946 = vmatpush1.bf16.msra.mxu1 %v19552_v38  ;;  %v20654_v38 = vld [vmem:[%s29516_s27 + $0x320] ss:$40 sps:$4 sm:$0xff]  }
  0x46   :  { %10183 = vmatprep.subr.bf16.mxu0 %v19557_v42  ;;  %11035 = vmatprep.subr.bf16.mxu1 %v19495_v43  ;;  %v16348_v42 = vld [vmem:[%s29221_s15 + $0x540] sm:$0xff] }
  0x47   :  { %v16352_v43 = vld [vmem:[%s29221_s15 + $0x560] sm:$0xff] }
  0x48   :  { %10003 = vmatmul.mubr.bf16.vlgmr.msra.gmra.mrb[0].mxu0 %v21363_v41  ;;  %10083 = vmatmul.mubr.bf16.vlgmr.msra.gmra.mrb[0].mxu1 %v20640_v50  ;;  %v16357_v50 = vld [vmem:[%s29221_s15 + $0x588] sm:$0xff] }
  0x49   :  { %10184 = vmatpush1.bf16.msra.mxu0 %v19556_v53  ;;  %11036 = vmatpush1.bf16.msra.mxu1 %v19494_v54  ;;  %v16226_v53 = vld [vmem:[%s29221_s15 + $0x170] sm:$0xff]  ;;  %v19577_v54 = vpack.c.bf16 %v16353_v40, %v16349_v39  ;;  %v19581_v0 = vpack.c.bf16 %v16361_v51, %v16357_v50 }
  0x4a   :  { %10185 = vmatprep.subr.bf16.mxu0 %v19561_v58  ;;  %11037 = vmatprep.subr.bf16.mxu1 %v19499_v59  ;;  %v16235_v58 = vld [vmem:[%s29221_s15 + $0x1b8] sm:$0xff]  ;;  %v19576_v59 = vpack.c.bf16 %v16352_v43, %v16348_v42  ;;  %v19514_v61 = vpack.c.bf16 %v16226_v53, %v16222_v52  ;;  %v16246_v39 = vld [vmem:[%s29221_s15 + $0x210] sm:$0xff]  ;;  %v16388_v52 = vld [vmem:[%s29221_s15 + $0x680] sm:$0xff]  ;;  %v19531_v53 = vpack.c.bf16 %v16259_v46, %v16255_v45 }
  0x4b   :  { %10012 = vmatprep.mubr.bf16.mxu0 %v21401_v57  ;;  %10092 = vmatprep.mubr.bf16.mxu1 %v20645_v60  ;;  %v16356_v60 = vld [vmem:[%s29221_s15 + $0x580] sm:$0xff]  ;;  %v16250_v40 = vld [vmem:[%s29221_s15 + $0x230] sm:$0xff]  ;;  %v16425_v45 = vld [vmem:[%s29221_s15 + $0x7a8] sm:$0xff] }
  0x4c   :  { %v20669_v43 = vld [vmem:[%s29516_s27 + $0x414] ss:$40 sps:$4 sm:$0xff]   ;;  %v19526_v50 = vpack.c.bf16 %v16250_v40, %v16246_v39  ;;  %v16412_v39 = vld [vmem:[%s29221_s15 + $0x740] sm:$0xff] }
  0x4d   :  { %10186 = vmatpush1.bf16.msra.mxu0 %v19560_v1  ;;  %11038 = vmatpush1.bf16.msra.mxu1 %v19498_v2  ;;  %v16360_v1 = vld [vmem:[%s29221_s15 + $0x5a0] sm:$0xff]  ;;  %v16365_v2 = vld [vmem:[%s29221_s15 + $0x5c8] sm:$0xff] }
  0x4e   :  { %10187 = vmatprep.subr.bf16.mxu0 %v19565_v5  ;;  %11039 = vmatprep.subr.bf16.mxu1 %v19503_v7  ;;  %v19519_v5 = vpack.c.bf16 %v16235_v58, %v16231_v55  ;;  %v16234_v7 = vld [vmem:[%s29221_s15 + $0x1b0] sm:$0xff]  ;;  %v19580_v8 = vpack.c.bf16 %v16360_v1, %v16356_v60  ;;  %v19585_v12 = vpack.c.bf16 %v16369_v3, %v16365_v2  ;;  %v16392_v58 = vld [vmem:[%s29221_s15 + $0x6a0] sm:$0xff]  ;;  %v16263_v2 = vld [vmem:[%s29221_s15 + $0x298] sm:$0xff] }
  0x4f   :  { %v19518_v17 = vpack.c.bf16 %v16234_v7, %v16230_v6  ;;  %v20672_v55 = vld [vmem:[%s29516_s27 + $0x410] ss:$40 sps:$4 sm:$0xff]   ;;  %v16400_v1 = vld [vmem:[%s29221_s15 + $0x6e0] sm:$0xff] }
  0x50   :  { %10013 = vmatmul.mubr.bf16.gmra.mrb[4].mxu0 %v21425_v4  ;;  %10093 = vmatmul.mubr.bf16.gmra.mrb[4].mxu1 %v20648_v10  ;;  %v16239_v10 = vld [vmem:[%s29221_s15 + $0x1d8] sm:$0xff]  ;;  %v16258_v60 = vld [vmem:[%s29221_s15 + $0x270] sm:$0xff]  ;;  %v21713_v7 = vld [vmem:[%s29516_s27 + $0x1e4] ss:$40 sps:$4 sm:$0xff]  }
  0x51   :  { %10188 = vmatpush1.bf16.msra.mxu0 %v19564_v18  ;;  %11040 = vmatpush1.bf16.msra.mxu1 %v19502_v19  ;;  %v16373_v18 = vld [vmem:[%s29221_s15 + $0x608] sm:$0xff]  ;;  %v19523_v21 = vpack.c.bf16 %v16243_v11, %v16239_v10  ;;  %v16267_v3 = vld [vmem:[%s29221_s15 + $0x2b8] sm:$0xff]  ;;  %v16416_v40 = vld [vmem:[%s29221_s15 + $0x760] sm:$0xff] }
  0x52   :  { %10189 = vmatprep.subr.bf16.mxu0 %v19569_v25  ;;  %10022 = vmatprep.mubr.bf16.mxu0 %v21455_v15  ;;  %v16377_v19 = vld [vmem:[%s29221_s15 + $0x628] sm:$0xff] }
  0x53   :  { %10102 = vmatprep.mubr.bf16.mxu1 %v20651_v20  ;;  %11041 = vmatprep.subr.bf16.mxu1 %v19507_v27  ;;  %v16238_v20 = vld [vmem:[%s29221_s15 + $0x1d0] sm:$0xff]  ;;  %v20666_v25 = vld [vmem:[%s29516_s27 + $0x3c0] ss:$40 sps:$4 sm:$0xff]   ;;  %v19589_v26 = vpack.c.bf16 %v16377_v19, %v16373_v18  ;;  %v16275_v18 = vld [vmem:[%s29221_s15 + $0x2f8] sm:$0xff] }
  0x54   :  { %v16372_v27 = vld [vmem:[%s29221_s15 + $0x600] sm:$0xff]  ;;  %v19522_v31 = vpack.c.bf16 %v16242_v22, %v16238_v20  ;;  %v16405_v10 = vld [vmem:[%s29221_s15 + $0x708] sm:$0xff]  ;;  %v19534_v20 = vpack.c.bf16 %v16266_v14, %v16262_v13 }
  0x55   :  { %10190 = vmatpush1.bf16.msra.mxu0 %v19568_v29  ;;  %11042 = vmatpush1.bf16.msra.mxu1 %v19506_v30  ;;  %v16381_v29 = vld [vmem:[%s29221_s15 + $0x648] sm:$0xff]  ;;  %v19588_v37 = vpack.c.bf16 %v16376_v28, %v16372_v27 }
  0x56   :  { %10191 = vmatprep.subr.bf16.mxu0 %v19573_v33  ;;  %11043 = vmatprep.subr.bf16.mxu1 %v19511_v35  ;;  %v16385_v30 = vld [vmem:[%s29221_s15 + $0x668] sm:$0xff]  ;;  %v16380_v33 = vld [vmem:[%s29221_s15 + $0x640] sm:$0xff]  ;;  %v16247_v35 = vld [vmem:[%s29221_s15 + $0x218] sm:$0xff] }
  0x57   :  { %v19593_v42 = vpack.c.bf16 %v16385_v30, %v16381_v29  ;;  %v19592_v51 = vpack.c.bf16 %v16384_v34, %v16380_v33  ;;  %v20678_v22 = vld [vmem:[%s29516_s27 + $0x460] ss:$40 sps:$4 sm:$0xff]   ;;  %v16270_v30 = vld [vmem:[%s29221_s15 + $0x2d0] sm:$0xff] }
  0x58   :  { %10023 = vmatmul.mubr.bf16.gmra.mrb[8].mxu0 %v21492_v32  ;;  %10103 = vmatmul.mubr.bf16.gmra.mrb[8].mxu1 %v20654_v38  ;;  %v21647_v38 = vld [vmem:[%s29516_s27 + $0x194] ss:$40 sps:$4 sm:$0xff]   ;;  %v16413_v28 = vld [vmem:[%s29221_s15 + $0x748] sm:$0xff] }
  0x59   :  { %10192 = vmatpush1.bf16.msra.mxu0 %v19572_v47  ;;  %11044 = vmatpush1.bf16.msra.mxu1 %v19510_v48  ;;  %v16389_v47 = vld [vmem:[%s29221_s15 + $0x688] sm:$0xff]  ;;  %v21767_v34 = vld [vmem:[%s29516_s27 + $0x234] ss:$40 sps:$4 sm:$0xff]  }
  0x5a   :  { %10193 = vmatprep.subr.bf16.mxu0 %v19577_v54  ;;  %10032 = vmatprep.mubr.bf16.mxu0 %v21521_v44  ;;  %v16393_v48 = vld [vmem:[%s29221_s15 + $0x6a8] sm:$0xff]  ;;  %v21678_v54 = vld [vmem:[%s29516_s27 + $0x190] ss:$40 sps:$4 sm:$0xff]  }
  0x5b   :  { %10112 = vmatprep.mubr.bf16.mxu1 %v20657_v49  ;;  %11045 = vmatprep.subr.bf16.mxu1 %v19515_v56  ;;  %v19527_v49 = vpack.c.bf16 %v16251_v36, %v16247_v35  ;;  %v19597_v56 = vpack.c.bf16 %v16393_v48, %v16389_v47  ;;  %v16417_v29 = vld [vmem:[%s29221_s15 + $0x768] sm:$0xff]  ;;  %v16279_v35 = vld [vmem:[%s29221_s15 + $0x318] sm:$0xff]  ;;  %v16278_v48 = vld [vmem:[%s29221_s15 + $0x310] sm:$0xff] }
  0x5c   :  { %v16283_v36 = vld [vmem:[%s29221_s15 + $0x338] sm:$0xff]  ;;  %v16437_v14 = vld [vmem:[%s29221_s15 + $0x808] sm:$0xff] }
  0x5d   :  { %10194 = vmatpush1.bf16.msra.mxu0 %v19576_v59  ;;  %11046 = vmatpush1.bf16.msra.mxu1 %v19514_v61  ;;  %v16254_v59 = vld [vmem:[%s29221_s15 + $0x250] sm:$0xff]  ;;  %v16397_v61 = vld [vmem:[%s29221_s15 + $0x6c8] sm:$0xff]  ;;  %v19543_v47 = vpack.c.bf16 %v16283_v36, %v16279_v35  ;;  %v20693_v36 = vld [vmem:[%s29516_s27 + $0x5c] ss:$40 sps:$4 sm:$0xff]  }
  0x5e   :  { %10195 = vmatprep.subr.bf16.mxu0 %v19581_v0  ;;  %11047 = vmatprep.subr.bf16.mxu1 %v19519_v5  ;;  %v16396_v0 = vld [vmem:[%s29221_s15 + $0x6c0] sm:$0xff]  ;;  %v19596_v5 = vpack.c.bf16 %v16392_v58, %v16388_v52  ;;  %v19530_v6 = vpack.c.bf16 %v16258_v60, %v16254_v59  ;;  %v21804_v52 = vld [vmem:[%s29516_s27 + $0x230] ss:$40 sps:$4 sm:$0xff]   ;;  %v16429_v58 = vld [vmem:[%s29221_s15 + $0x7c8] sm:$0xff] }
  0x5f   :  { %v19600_v19 = vpack.c.bf16 %v16400_v1, %v16396_v0  ;;  %v16433_v59 = vld [vmem:[%s29221_s15 + $0x7e8] sm:$0xff]  ;;  %v16432_v0 = vld [vmem:[%s29221_s15 + $0x7e0] sm:$0xff] }
  0x60   :  { %10033 = vmatmul.mubr.bf16.gmra.mrb[12].mxu0 %v21558_v62  ;;  %10113 = vmatmul.mubr.bf16.gmra.mrb[12].mxu1 %v20660_v63  ;;  %v16401_v63 = vld [vmem:[%s29221_s15 + $0x6e8] sm:$0xff] }
  0x61   :  { %10196 = vmatpush1.bf16.msra.mxu0 %v19580_v8  ;;  %10042 = vmatprep.mubr.bf16.mxu0 %v21581_v9  ;;  %v20675_v8 = vld [vmem:[%s29516_s27 + $0x464] ss:$40 sps:$4 sm:$0xff]   ;;  %v19601_v11 = vpack.c.bf16 %v16401_v63, %v16397_v61 }
  0x62   :  { %10197 = vmatprep.subr.bf16.mxu0 %v19585_v12  ;;  %10122 = vmatprep.mubr.bf16.mxu1 %v20663_v16  ;;  %v16409_v12 = vld [vmem:[%s29221_s15 + $0x728] sm:$0xff]  ;;  %v19535_v16 = vpack.c.bf16 %v16267_v3, %v16263_v2  ;;  %v16428_v63 = vld [vmem:[%s29221_s15 + $0x7c0] sm:$0xff]  ;;  %v16287_v2 = vld [vmem:[%s29221_s15 + $0x358] sm:$0xff] }
  0x63   :  { %11048 = vmatpush1.bf16.msra.mxu1 %v19518_v17  ;;  %v16271_v17 = vld [vmem:[%s29221_s15 + $0x2d8] sm:$0xff]  ;;  %v20685_v61 = vld [vmem:[%s29516_s27 + $0x504] ss:$40 sps:$4 sm:$0xff]  }
  0x64   :  { %11049 = vmatprep.subr.bf16.mxu1 %v19523_v21  ;;  %v21741_v21 = vld [vmem:[%s29516_s27 + $0x1e0] ss:$40 sps:$4 sm:$0xff]   ;;  %v19539_v27 = vpack.c.bf16 %v16275_v18, %v16271_v17  ;;  %v20689_v1 = vld [vmem:[%s29516_s27 + $0xc] ss:$40 sps:$4 sm:$0xff]   ;;  %v16291_v3 = vld [vmem:[%s29221_s15 + $0x378] sm:$0xff]  ;;  %v19616_v18 = vpack.c.bf16 %v16432_v0, %v16428_v63 }
  0x65   :  { %10198 = vmatpush1.bf16.msra.mxu0 %v19584_v23  ;;  %v19605_v23 = vpack.c.bf16 %v16409_v12, %v16405_v10  ;;  %v16295_v10 = vld [vmem:[%s29221_s15 + $0x398] sm:$0xff]  ;;  %v19547_v13 = vpack.c.bf16 %v16291_v3, %v16287_v2  ;;  %v16449_v35 = vld [vmem:[%s29221_s15 + $0x868] sm:$0xff] }
  0x66   :  { %10199 = vmatprep.subr.bf16.mxu0 %v19589_v26  ;;  %v16408_v26 = vld [vmem:[%s29221_s15 + $0x720] sm:$0xff]  ;;  %v16299_v12 = vld [vmem:[%s29221_s15 + $0x3b8] sm:$0xff]  ;;  %v16461_v0 = vld [vmem:[%s29221_s15 + $0x8c8] sm:$0xff] }
  0x67   :  { %11050 = vmatpush1.bf16.msra.mxu1 %v19522_v31  ;;  %v16274_v31 = vld [vmem:[%s29221_s15 + $0x2f0] sm:$0xff]  ;;  %v20696_v63 = vld [vmem:[%s29516_s27 + $0x58] ss:$40 sps:$4 sm:$0xff]  }
  0x68   :  { %10043 = vmatmul.mubr.bf16.gmra.mrb[16].mxu0 %v21615_v24  ;;  %10123 = vmatmul.mubr.bf16.gmra.mrb[16].mxu1 %v20666_v25  ;;  %v16404_v25 = vld [vmem:[%s29221_s15 + $0x700] sm:$0xff]  ;;  %v19538_v46 = vpack.c.bf16 %v16274_v31, %v16270_v30  ;;  %v16307_v31 = vld [vmem:[%s29221_s15 + $0x3f8] sm:$0xff]  ;;  %v20697_v2 = vld [vmem:[%s29516_s27 + $0xac] ss:$40 sps:$4 sm:$0xff]  }
  0x69   :  { %10200 = vmatpush1.bf16.msra.mxu0 %v19588_v37  ;;  %10052 = vmatprep.mubr.bf16.mxu0 %v21647_v38  ;;  %v19604_v33 = vpack.c.bf16 %v16408_v26, %v16404_v25  ;;  %v19609_v37 = vpack.c.bf16 %v16417_v29, %v16413_v28  ;;  %v16298_v25 = vld [vmem:[%s29221_s15 + $0x3b0] sm:$0xff]  ;;  %v16303_v28 = vld [vmem:[%s29221_s15 + $0x3d8] sm:$0xff]  ;;  %v16436_v29 = vld [vmem:[%s29221_s15 + $0x800] sm:$0xff] }
  0x6a   :  { %10201 = vmatprep.subr.bf16.mxu0 %v19593_v42  ;;  %10132 = vmatprep.mubr.bf16.mxu1 %v20669_v43  ;;  %v20681_v42 = vld [vmem:[%s29516_s27 + $0x4b4] ss:$40 sps:$4 sm:$0xff]   ;;  %v16421_v43 = vld [vmem:[%s29221_s15 + $0x788] sm:$0xff]  ;;  %v16440_v30 = vld [vmem:[%s29221_s15 + $0x820] sm:$0xff] }
  0x6b   :  { %11051 = vmatprep.subr.bf16.mxu1 %v19527_v49  ;;  %v16282_v49 = vld [vmem:[%s29221_s15 + $0x330] sm:$0xff] }
  0x6c   :  { %11052 = vmatpush1.bf16.msra.mxu1 %v19526_v50  ;;  %v19608_v50 = vpack.c.bf16 %v16416_v40, %v16412_v39  ;;  %v19542_v60 = vpack.c.bf16 %v16282_v49, %v16278_v48  ;;  %v16302_v39 = vld [vmem:[%s29221_s15 + $0x3d0] sm:$0xff]  ;;  %v16448_v48 = vld [vmem:[%s29221_s15 + $0x860] sm:$0xff]  ;;  %v16315_v49 = vld [vmem:[%s29221_s15 + $0x438] sm:$0xff] }
  0x6d   :  { %10202 = vmatpush1.bf16.msra.mxu0 %v19592_v51  ;;  %11053 = vmatprep.subr.bf16.mxu1 %v19531_v53  ;;  %v16420_v51 = vld [vmem:[%s29221_s15 + $0x780] sm:$0xff]  ;;  %v20684_v53 = vld [vmem:[%s29516_s27 + $0x4b0] ss:$40 sps:$4 sm:$0xff]  }
  0x6e   :  { %10203 = vmatprep.subr.bf16.mxu0 %v19597_v56  ;;  %v16424_v56 = vld [vmem:[%s29221_s15 + $0x7a0] sm:$0xff]  ;;  %v16306_v40 = vld [vmem:[%s29221_s15 + $0x3f0] sm:$0xff] }
  0x70   :  { %10053 = vmatmul.mubr.bf16.gmra.mrb[20].mxu0 %v21678_v54  ;;  %10133 = vmatmul.mubr.bf16.gmra.mrb[20].mxu1 %v20672_v55  ;;  %v19613_v55 = vpack.c.bf16 %v16425_v45, %v16421_v43  ;;  %v19555_v43 = vpack.c.bf16 %v16307_v31, %v16303_v28  ;;  %v16311_v45 = vld [vmem:[%s29221_s15 + $0x418] sm:$0xff]  ;;  %v16481_v28 = vld [vmem:[%s29221_s15 + $0x968] sm:$0xff]  ;;  %v16322_v31 = vld [vmem:[%s29221_s15 + $0x470] sm:$0xff] }
  0x71   :  { %10204 = vmatpush1.bf16.msra.mxu0 %v19596_v5  ;;  %11054 = vmatpush1.bf16.msra.mxu1 %v19530_v6  ;;  %v19612_v5 = vpack.c.bf16 %v16424_v56, %v16420_v51  ;;  %v16286_v6 = vld [vmem:[%s29221_s15 + $0x350] sm:$0xff]  ;;  %v16457_v51 = vld [vmem:[%s29221_s15 + $0x8a8] sm:$0xff] }
  0x72   :  { %10205 = vmatprep.subr.bf16.mxu0 %v19601_v11  ;;  %10062 = vmatprep.mubr.bf16.mxu0 %v21713_v7  ;;  %v19617_v11 = vpack.c.bf16 %v16433_v59, %v16429_v58  ;;  %v20695_v56 = vld [vmem:[%s29516_s27 + $0x550] ss:$40 sps:$4 sm:$0xff]   ;;  %v19559_v58 = vpack.c.bf16 %v16315_v49, %v16311_v45  ;;  %v16485_v49 = vld [vmem:[%s29221_s15 + $0x988] sm:$0xff] }
  0x73   :  { %10142 = vmatprep.mubr.bf16.mxu1 %v20675_v8  ;;  %11055 = vmatprep.subr.bf16.mxu1 %v19535_v16  ;;  %v16290_v8 = vld [vmem:[%s29221_s15 + $0x370] sm:$0xff]  ;;  %v16441_v16 = vld [vmem:[%s29221_s15 + $0x828] sm:$0xff] }
  0x74   :  { %v19546_v17 = vpack.c.bf16 %v16290_v8, %v16286_v6  ;;  %v19621_v26 = vpack.c.bf16 %v16441_v16, %v16437_v14  ;;  %v16460_v6 = vld [vmem:[%s29221_s15 + $0x8c0] sm:$0xff]  ;;  %v16310_v14 = vld [vmem:[%s29221_s15 + $0x410] sm:$0xff] }
  0x75   :  { %10206 = vmatpush1.bf16.msra.mxu0 %v19600_v19  ;;  %11056 = vmatpush1.bf16.msra.mxu1 %v19534_v20  ;;  %v19551_v19 = vpack.c.bf16 %v16299_v12, %v16295_v10  ;;  %v20687_v20 = vld [vmem:[%s29516_s27 + $0x8] ss:$40 sps:$4 sm:$0xff]   ;;  %v16464_v8 = vld [vmem:[%s29221_s15 + $0x8e0] sm:$0xff] }
  0x76   :  { %10207 = vmatprep.subr.bf16.mxu0 %v19605_v23  ;;  %11057 = vmatprep.subr.bf16.mxu1 %v19539_v27  ;;  %v16294_v23 = vld [vmem:[%s29221_s15 + $0x390] sm:$0xff]  ;;  %v16469_v10 = vld [vmem:[%s29221_s15 + $0x908] sm:$0xff] }
  0x77   :  { %v20691_v27 = vld [vmem:[%s29516_s27 + $0x554] ss:$40 sps:$4 sm:$0xff]   ;;  %v20990_v12 = vld [vmem:[%s29516_s27 + $0x4] ss:$40 sps:$4 sm:$0xff]  }
  0x78   :  { %10063 = vmatmul.mubr.bf16.gmra.mrb[24].mxu0 %v21741_v21  ;;  %10143 = vmatmul.mubr.bf16.gmra.mrb[24].mxu1 %v20678_v22  ;;  %v20690_v22 = vld [vmem:[%s29516_s27 + $0x500] ss:$40 sps:$4 sm:$0xff]   ;;  %v16314_v16 = vld [vmem:[%s29221_s15 + $0x430] sm:$0xff] }
  0x79   :  { %10208 = vmatpush1.bf16.msra.mxu0 %v19604_v33  ;;  %10072 = vmatprep.mubr.bf16.mxu0 %v21767_v34  ;;  %v16445_v33 = vld [vmem:[%s29221_s15 + $0x848] sm:$0xff]  ;;  %v16326_v45 = vld [vmem:[%s29221_s15 + $0x490] sm:$0xff] }
  0x7a   :  { %10209 = vmatprep.subr.bf16.mxu0 %v19609_v37  ;;  %10152 = vmatprep.mubr.bf16.mxu1 %v20681_v42  ;;  %v19550_v37 = vpack.c.bf16 %v16298_v25, %v16294_v23  ;;  %v19620_v42 = vpack.c.bf16 %v16440_v30, %v16436_v29  ;;  %v16468_v23 = vld [vmem:[%s29221_s15 + $0x900] sm:$0xff]  ;;  %v16318_v30 = vld [vmem:[%s29221_s15 + $0x450] sm:$0xff] }
  0x7b   :  { %11058 = vmatpush1.bf16.msra.mxu1 %v19538_v46  ;;  %v19625_v46 = vpack.c.bf16 %v16449_v35, %v16445_v33  ;;  %v16472_v25 = vld [vmem:[%s29221_s15 + $0x920] sm:$0xff]  ;;  %v16327_v33 = vld [vmem:[%s29221_s15 + $0x498] sm:$0xff] }
  0x7c   :  { %11059 = vmatprep.subr.bf16.mxu1 %v19543_v47  ;;  %v16444_v47 = vld [vmem:[%s29221_s15 + $0x840] sm:$0xff]  ;;  %v16331_v35 = vld [vmem:[%s29221_s15 + $0x4b8] sm:$0xff] }
  0x7d   :  { %10210 = vmatpush1.bf16.msra.mxu0 %v19608_v50  ;;  %v16453_v50 = vld [vmem:[%s29221_s15 + $0x888] sm:$0xff] }
  0x7e   :  { %10211 = vmatprep.subr.bf16.mxu0 %v19613_v55  ;;  %v19624_v55 = vpack.c.bf16 %v16448_v48, %v16444_v47  ;;  %v19629_v59 = vpack.c.bf16 %v16457_v51, %v16453_v50  ;;  %v20703_v47 = vld [vmem:[%s29516_s27 + $0x14c] ss:$40 sps:$4 sm:$0xff]   ;;  %v16339_v51 = vld [vmem:[%s29221_s15 + $0x4f8] sm:$0xff] }
  0x7f   :  { %11060 = vmatpush1.bf16.msra.mxu1 %v19542_v60  ;;  %v16452_v60 = vld [vmem:[%s29221_s15 + $0x880] sm:$0xff]  ;;  %v16489_v50 = vld [vmem:[%s29221_s15 + $0x9a8] sm:$0xff] }
  0x80   :  { %10073 = vmatmul.mubr.bf16.gmra.mrb[28].mxu0 %v21804_v52  ;;  %10153 = vmatmul.mubr.bf16.gmra.mrb[28].mxu1 %v20684_v53  ;;  %v19554_v53 = vpack.c.bf16 %v16306_v40, %v16302_v39  ;;  %v16476_v39 = vld [vmem:[%s29221_s15 + $0x940] sm:$0xff] }
  0x81   :  { %10212 = vmatpush1.bf16.msra.mxu0 %v19612_v5  ;;  %10162 = vmatprep.mubr.bf16.mxu1 %v20685_v61  ;;  %v16456_v61 = vld [vmem:[%s29221_s15 + $0x8a0] sm:$0xff] }
  0x82   :  { %10213 = vmatprep.subr.bf16.mxu0 %v19617_v11  ;;  %10215 = vmatprep.mubr.bf16.mxu0 %v20689_v1  ;;  %v16465_v1 = vld [vmem:[%s29221_s15 + $0x8e8] sm:$0xff]  ;;  %v19628_v3 = vpack.c.bf16 %v16456_v61, %v16452_v60  ;;  %v16480_v40 = vld [vmem:[%s29221_s15 + $0x960] sm:$0xff]  ;;  %v16334_v60 = vld [vmem:[%s29221_s15 + $0x4d0] sm:$0xff] }
  0x83   :  { %11061 = vmatprep.subr.bf16.mxu1 %v19547_v13  ;;  %v19633_v5 = vpack.c.bf16 %v16465_v1, %v16461_v0  ;;  %v16473_v11 = vld [vmem:[%s29221_s15 + $0x928] sm:$0xff]  ;;  %v19640_v48 = vpack.c.bf16 %v16480_v40, %v16476_v39  ;;  %v16338_v61 = vld [vmem:[%s29221_s15 + $0x4f0] sm:$0xff]  ;;  %v16343_v1 = vld [vmem:[%s29221_s15 + $0x518] sm:$0xff] }
  0x84   :  { %11062 = vmatpush1.bf16.msra.mxu1 %v19546_v17  ;;  %v20699_v13 = vld [vmem:[%s29516_s27 + $0xa8] ss:$40 sps:$4 sm:$0xff]   ;;  %v19632_v17 = vpack.c.bf16 %v16464_v8, %v16460_v6  ;;  %v16492_v6 = vld [vmem:[%s29221_s15 + $0x9c0] sm:$0xff] }
  0x85   :  { %10214 = vmatpush1.bf16.msra.mxu0 %v19616_v18  ;;  %11063 = vmatprep.subr.bf16.mxu1 %v19551_v19  ;;  %v20700_v18 = vld [vmem:[%s29516_s27 + $0xfc] ss:$40 sps:$4 sm:$0xff]   ;;  %v16362_v40 = vld [vmem:[%s29221_s15 + $0x5b0] sm:$0xff] }
  0x86   :  { %10396 = vmatprep.subr.bf16.mxu0 %v19621_v26  ;;  %v16319_v19 = vld [vmem:[%s29221_s15 + $0x458] sm:$0xff]  ;;  %v16477_v26 = vld [vmem:[%s29221_s15 + $0x948] sm:$0xff]  ;;  %v16496_v8 = vld [vmem:[%s29221_s15 + $0x9e0] sm:$0xff] }
  0x87   :  { %v16512_v39 = vld [vmem:[%s29221_s15 + $0xa60] sm:$0xff] }
  0x88   :  { %10163 = vmatmul.mubr.bf16.gmra.mrb[32].mxu1 %v20690_v22  ;;  %10216 = vmatmul.mubr.bf16.vlgmr.msra.gmra.mrb[0].mxu0 %v20687_v20  ;;  %v16323_v20 = vld [vmem:[%s29221_s15 + $0x478] sm:$0xff]  ;;  %v19637_v22 = vpack.c.bf16 %v16473_v11, %v16469_v10  ;;  %v16342_v10 = vld [vmem:[%s29221_s15 + $0x510] sm:$0xff]  ;;  %v16501_v11 = vld [vmem:[%s29221_s15 + $0xa08] sm:$0xff] }
  0x89   :  { %10172 = vmatprep.mubr.bf16.mxu1 %v20691_v27  ;;  %10225 = vmatprep.mubr.bf16.mxu0 %v20693_v36  ;;  %v19558_v27 = vpack.c.bf16 %v16314_v16, %v16310_v14  ;;  %v19563_v29 = vpack.c.bf16 %v16323_v20, %v16319_v19  ;;  %v19636_v36 = vpack.c.bf16 %v16472_v25, %v16468_v23  ;;  %v16351_v14 = vld [vmem:[%s29221_s15 + $0x558] sm:$0xff]  ;;  %v16509_v23 = vld [vmem:[%s29221_s15 + $0xa48] sm:$0xff] }
  0x8a   :  { %11064 = vmatpush1.bf16.msra.mxu1 %v19550_v37  ;;  %10397 = vmatpush1.bf16.msra.mxu0 %v19620_v42  ;;  %v19641_v37 = vpack.c.bf16 %v16481_v28, %v16477_v26  ;;  %v19562_v42 = vpack.c.bf16 %v16322_v31, %v16318_v30  ;;  %v16355_v16 = vld [vmem:[%s29221_s15 + $0x578] sm:$0xff]  ;;  %v16513_v25 = vld [vmem:[%s29221_s15 + $0xa68] sm:$0xff]  ;;  %v16354_v30 = vld [vmem:[%s29221_s15 + $0x570] sm:$0xff] }
  0x8b   :  { %11065 = vmatprep.subr.bf16.mxu1 %v19555_v43  ;;  %10398 = vmatprep.subr.bf16.mxu0 %v19625_v46  ;;  %v20702_v43 = vld [vmem:[%s29516_s27 + $0xf8] ss:$40 sps:$4 sm:$0xff]   ;;  %v16330_v46 = vld [vmem:[%s29221_s15 + $0x4b0] sm:$0xff]  ;;  %v20706_v19 = vld [vmem:[%s29516_s27 + $0x19c] ss:$40 sps:$4 sm:$0xff]  }
  0x8c   :  { %v16359_v31 = vld [vmem:[%s29221_s15 + $0x598] sm:$0xff] }
  0x8e   :  { %11066 = vmatpush1.bf16.msra.mxu1 %v19554_v53  ;;  %10399 = vmatpush1.bf16.msra.mxu0 %v19624_v55  ;;  %v16484_v53 = vld [vmem:[%s29221_s15 + $0x980] sm:$0xff] }
  0x8f   :  { %11248 = vmatprep.subr.bf16.mxu1 %v19559_v58  ;;  %10400 = vmatprep.subr.bf16.mxu0 %v19629_v59  ;;  %v16488_v55 = vld [vmem:[%s29221_s15 + $0x9a0] sm:$0xff]  ;;  %v16497_v58 = vld [vmem:[%s29221_s15 + $0x9e8] sm:$0xff]  ;;  %v19566_v59 = vpack.c.bf16 %v16330_v46, %v16326_v45  ;;  %v16367_v45 = vld [vmem:[%s29221_s15 + $0x5d8] sm:$0xff] }
  0x90   :  { %10173 = vmatmul.mubr.bf16.gmra.mrb[36].mxu1 %v20695_v56  ;;  %10226 = vmatmul.mubr.bf16.gmra.mrb[4].mxu0 %v20696_v63  ;;  %v16493_v56 = vld [vmem:[%s29221_s15 + $0x9c8] sm:$0xff]  ;;  %v19645_v63 = vpack.c.bf16 %v16489_v50, %v16485_v49  ;;  %v16371_v46 = vld [vmem:[%s29221_s15 + $0x5f8] sm:$0xff] }
  0x91   :  { %10235 = vmatprep.mubr.bf16.mxu0 %v20697_v2  ;;  %11067 = vmatprep.mubr.bf16.mxu1 %v20990_v12  ;;  %v16347_v2 = vld [vmem:[%s29221_s15 + $0x538] sm:$0xff]  ;;  %v16505_v12 = vld [vmem:[%s29221_s15 + $0xa28] sm:$0xff] }
  0x92   :  { %10401 = vmatpush1.bf16.msra.mxu0 %v19628_v3  ;;  %v19644_v3 = vpack.c.bf16 %v16488_v55, %v16484_v53  ;;  %v19575_v20 = vpack.c.bf16 %v16347_v2, %v16343_v1  ;;  %v19653_v28 = vpack.c.bf16 %v16505_v12, %v16501_v11  ;;  %v16529_v53 = vld [vmem:[%s29221_s15 + $0xae8] sm:$0xff]  ;;  %v16524_v2 = vld [vmem:[%s29221_s15 + $0xac0] sm:$0xff]  ;;  %v16387_v11 = vld [vmem:[%s29221_s15 + $0x678] sm:$0xff] }
  0x93   :  { %10402 = vmatprep.subr.bf16.mxu0 %v19633_v5  ;;  %v19649_v5 = vpack.c.bf16 %v16497_v58, %v16493_v56  ;;  %v16366_v56 = vld [vmem:[%s29221_s15 + $0x5d0] sm:$0xff]  ;;  %v16532_v12 = vld [vmem:[%s29221_s15 + $0xb00] sm:$0xff] }
  0x94   :  { %v16370_v58 = vld [vmem:[%s29221_s15 + $0x5f0] sm:$0xff] }
  0x96   :  { %10403 = vmatpush1.bf16.msra.mxu0 %v19632_v17  ;;  %v16500_v17 = vld [vmem:[%s29221_s15 + $0xa00] sm:$0xff] }
  0x97   :  { %10404 = vmatprep.subr.bf16.mxu0 %v19637_v22  ;;  %v19648_v22 = vpack.c.bf16 %v16496_v8, %v16492_v6  ;;  %v16533_v6 = vld [vmem:[%s29221_s15 + $0xb08] sm:$0xff] }
  0x98   :  { %10236 = vmatmul.mubr.bf16.gmra.mrb[8].mxu0 %v20699_v13  ;;  %11068 = vmatmul.mubr.bf16.vlgmr.msra.gmra.mrb[40].mxu1 %v21363_v41  ;;  %v19567_v41 = vpack.c.bf16 %v16331_v35, %v16327_v33  ;;  %v19570_v13 = vpack.c.bf16 %v16338_v61, %v16334_v60  ;;  %v16363_v35 = vld [vmem:[%s29221_s15 + $0x5b8] sm:$0xff]  ;;  %v19587_v61 = vpack.c.bf16 %v16371_v46, %v16367_v45  ;;  %v16537_v8 = vld [vmem:[%s29221_s15 + $0xb28] sm:$0xff]  ;;  %v16398_v46 = vld [vmem:[%s29221_s15 + $0x6d0] sm:$0xff] }
  0x99   :  { %11249 = vmatpush1.bf16.msra.mxu1 %v19558_v27  ;;  %10245 = vmatprep.mubr.bf16.mxu0 %v20700_v18  ;;  %v16504_v18 = vld [vmem:[%s29221_s15 + $0xa20] sm:$0xff]  ;;  %v16350_v27 = vld [vmem:[%s29221_s15 + $0x550] sm:$0xff]  ;;  %v19583_v49 = vpack.c.bf16 %v16363_v35, %v16359_v31  ;;  %v16549_v35 = vld [vmem:[%s29221_s15 + $0xb88] sm:$0xff] }
  0x9a   :  { %11077 = vmatprep.mubr.bf16.mxu1 %v21401_v57  ;;  %11250 = vmatprep.subr.bf16.mxu1 %v19563_v29  ;;  %v16335_v57 = vld [vmem:[%s29221_s15 + $0x4d8] sm:$0xff]  ;;  %v19579_v29 = vpack.c.bf16 %v16355_v16, %v16351_v14  ;;  %v19652_v33 = vpack.c.bf16 %v16504_v18, %v16500_v17  ;;  %v16541_v17 = vld [vmem:[%s29221_s15 + $0xb48] sm:$0xff]  ;;  %v16382_v18 = vld [vmem:[%s29221_s15 + $0x650] sm:$0xff] }
  0x9b   :  { %10405 = vmatpush1.bf16.msra.mxu0 %v19636_v36  ;;  %v19571_v0 = vpack.c.bf16 %v16339_v51, %v16335_v57  ;;  %v19657_v36 = vpack.c.bf16 %v16513_v25, %v16509_v23  ;;  %v16520_v57 = vld [vmem:[%s29221_s15 + $0xaa0] sm:$0xff]  ;;  %v16525_v51 = vld [vmem:[%s29221_s15 + $0xac8] sm:$0xff]  ;;  %v16391_v23 = vld [vmem:[%s29221_s15 + $0x698] sm:$0xff]  ;;  %v19669_v25 = vpack.c.bf16 %v16537_v8, %v16533_v6 }
  0x9c   :  { %10406 = vmatprep.subr.bf16.mxu0 %v19641_v37  ;;  %v16508_v37 = vld [vmem:[%s29221_s15 + $0xa40] sm:$0xff]  ;;  %v19665_v1 = vpack.c.bf16 %v16529_v53, %v16525_v51  ;;  %v16557_v45 = vld [vmem:[%s29221_s15 + $0xbc8] sm:$0xff]  ;;  %v16414_v6 = vld [vmem:[%s29221_s15 + $0x750] sm:$0xff] }
  0x9d   :  { %11251 = vmatpush1.bf16.msra.mxu1 %v19562_v42  ;;  %v16517_v42 = vld [vmem:[%s29221_s15 + $0xa88] sm:$0xff]  ;;  %v19656_v50 = vpack.c.bf16 %v16512_v39, %v16508_v37  ;;  %v16544_v31 = vld [vmem:[%s29221_s15 + $0xb60] sm:$0xff]  ;;  %v16399_v39 = vld [vmem:[%s29221_s15 + $0x6d8] sm:$0xff] }
  0x9e   :  { %11252 = vmatprep.subr.bf16.mxu1 %v19567_v41  ;;  %v19578_v41 = vpack.c.bf16 %v16354_v30, %v16350_v27  ;;  %v16540_v30 = vld [vmem:[%s29221_s15 + $0xb40] sm:$0xff] }
  0x9f   :  { %10407 = vmatpush1.bf16.msra.mxu0 %v19640_v48  ;;  %v20709_v48 = vld [vmem:[%s29516_s27 + $0x1ec] ss:$40 sps:$4 sm:$0xff]  }
  0xa0   :  { %10246 = vmatmul.mubr.bf16.gmra.mrb[12].mxu0 %v20702_v43  ;;  %11078 = vmatmul.mubr.bf16.gmra.mrb[44].mxu1 %v21425_v4  ;;  %v16346_v4 = vld [vmem:[%s29221_s15 + $0x530] sm:$0xff]  ;;  %v16521_v43 = vld [vmem:[%s29221_s15 + $0xaa8] sm:$0xff] }
  0xa1   :  { %10255 = vmatprep.mubr.bf16.mxu0 %v20703_v47  ;;  %11087 = vmatprep.mubr.bf16.mxu1 %v21455_v15  ;;  %v20705_v15 = vld [vmem:[%s29516_s27 + $0x148] ss:$40 sps:$4 sm:$0xff]   ;;  %v19574_v26 = vpack.c.bf16 %v16346_v4, %v16342_v10  ;;  %v16516_v47 = vld [vmem:[%s29221_s15 + $0xa80] sm:$0xff]  ;;  %v19661_v60 = vpack.c.bf16 %v16521_v43, %v16517_v42  ;;  %v19586_v10 = vpack.c.bf16 %v16370_v58, %v16366_v56  ;;  %v16383_v4 = vld [vmem:[%s29221_s15 + $0x658] sm:$0xff] }
  0xa2   :  { %11253 = vmatpush1.bf16.msra.mxu1 %v19566_v59  ;;  %10408 = vmatprep.subr.bf16.mxu0 %v19645_v63  ;;  %v16375_v59 = vld [vmem:[%s29221_s15 + $0x618] sm:$0xff]  ;;  %v19660_v63 = vpack.c.bf16 %v16520_v57, %v16516_v47  ;;  %v20715_v42 = vld [vmem:[%s29516_s27 + $0x28c] ss:$40 sps:$4 sm:$0xff]   ;;  %v16556_v58 = vld [vmem:[%s29221_s15 + $0xbc0] sm:$0xff] }
  0xa3   :  { %11254 = vmatprep.subr.bf16.mxu1 %v19571_v0  ;;  %10409 = vmatpush1.bf16.msra.mxu0 %v19644_v3  ;;  %v16379_v0 = vld [vmem:[%s29221_s15 + $0x638] sm:$0xff]  ;;  %v16528_v3 = vld [vmem:[%s29221_s15 + $0xae0] sm:$0xff]  ;;  %v16402_v47 = vld [vmem:[%s29221_s15 + $0x6f0] sm:$0xff] }
  0xa4   :  { %10410 = vmatprep.subr.bf16.mxu0 %v19649_v5  ;;  %v16378_v5 = vld [vmem:[%s29221_s15 + $0x630] sm:$0xff]  ;;  %v19591_v14 = vpack.c.bf16 %v16379_v0, %v16375_v59  ;;  %v19664_v16 = vpack.c.bf16 %v16528_v3, %v16524_v2  ;;  %v16561_v57 = vld [vmem:[%s29221_s15 + $0xbe8] sm:$0xff]  ;;  %v16560_v59 = vld [vmem:[%s29221_s15 + $0xbe0] sm:$0xff] }
  0xa5   :  { %v19681_v56 = vpack.c.bf16 %v16561_v57, %v16557_v45  ;;  %v20718_v0 = vld [vmem:[%s29516_s27 + $0x2dc] ss:$40 sps:$4 sm:$0xff]   ;;  %v16565_v2 = vld [vmem:[%s29221_s15 + $0xc08] sm:$0xff] }
  0xa6   :  { %11255 = vmatpush1.bf16.msra.mxu1 %v19570_v13  ;;  %v20712_v13 = vld [vmem:[%s29516_s27 + $0x23c] ss:$40 sps:$4 sm:$0xff]   ;;  %v16569_v3 = vld [vmem:[%s29221_s15 + $0xc28] sm:$0xff] }
  0xa7   :  { %11256 = vmatprep.subr.bf16.mxu1 %v19575_v20  ;;  %10411 = vmatpush1.bf16.msra.mxu0 %v19648_v22  ;;  %v16545_v20 = vld [vmem:[%s29221_s15 + $0xb68] sm:$0xff]  ;;  %v21001_v57 = vld [vmem:[%s29516_s27 + $0x414] ss:$40 sps:$4 sm:$0xff]  }
  0xa8   :  { %10256 = vmatmul.mubr.bf16.gmra.mrb[16].mxu0 %v20705_v15  ;;  %11088 = vmatmul.mubr.bf16.gmra.mrb[48].mxu1 %v21492_v32  ;;  %v16358_v32 = vld [vmem:[%s29221_s15 + $0x590] sm:$0xff]  ;;  %v16536_v15 = vld [vmem:[%s29221_s15 + $0xb20] sm:$0xff] }
  0xa9   :  { %10265 = vmatprep.mubr.bf16.mxu0 %v20706_v19  ;;  %11097 = vmatprep.mubr.bf16.mxu1 %v21521_v44  ;;  %v20708_v44 = vld [vmem:[%s29516_s27 + $0x198] ss:$40 sps:$4 sm:$0xff]   ;;  %v19582_v55 = vpack.c.bf16 %v16362_v40, %v16358_v32  ;;  %v16386_v19 = vld [vmem:[%s29221_s15 + $0x670] sm:$0xff]  ;;  %v19668_v27 = vpack.c.bf16 %v16536_v15, %v16532_v12 }
  0xaa   :  { %11257 = vmatpush1.bf16.msra.mxu1 %v19574_v26  ;;  %10412 = vmatprep.subr.bf16.mxu0 %v19653_v28  ;;  %v19595_v26 = vpack.c.bf16 %v16387_v11, %v16383_v4  ;;  %v16395_v28 = vld [vmem:[%s29221_s15 + $0x6b8] sm:$0xff]  ;;  %v19594_v37 = vpack.c.bf16 %v16386_v19, %v16382_v18  ;;  %v16548_v40 = vld [vmem:[%s29221_s15 + $0xb80] sm:$0xff]  ;;  %v20721_v18 = vld [vmem:[%s29516_s27 + $0x32c] ss:$40 sps:$4 sm:$0xff]  }
  0xab   :  { %11258 = vmatprep.subr.bf16.mxu1 %v19579_v29  ;;  %10413 = vmatpush1.bf16.msra.mxu0 %v19652_v33  ;;  %v19673_v29 = vpack.c.bf16 %v16545_v20, %v16541_v17  ;;  %v16394_v33 = vld [vmem:[%s29221_s15 + $0x6b0] sm:$0xff]  ;;  %v16403_v32 = vld [vmem:[%s29221_s15 + $0x6f8] sm:$0xff]  ;;  %v19599_v43 = vpack.c.bf16 %v16395_v28, %v16391_v23 }
  0xac   :  { %10414 = vmatprep.subr.bf16.mxu0 %v19657_v36  ;;  %v16553_v36 = vld [vmem:[%s29221_s15 + $0xba8] sm:$0xff]  ;;  %v19603_v51 = vpack.c.bf16 %v16403_v32, %v16399_v39  ;;  %v16423_v11 = vld [vmem:[%s29221_s15 + $0x798] sm:$0xff]  ;;  %v16430_v19 = vld [vmem:[%s29221_s15 + $0x7d0] sm:$0xff] }
  0xad   :  { %v16427_v12 = vld [vmem:[%s29221_s15 + $0x7b8] sm:$0xff]  ;;  %v16434_v20 = vld [vmem:[%s29221_s15 + $0x7f0] sm:$0xff]  ;;  %v20996_v32 = vld [vmem:[%s29516_s27 + $0x320] ss:$40 sps:$4 sm:$0xff]  }
  0xae   :  { %11259 = vmatpush1.bf16.msra.mxu1 %v19578_v41  ;;  %v16552_v41 = vld [vmem:[%s29221_s15 + $0xba0] sm:$0xff]  ;;  %v16435_v17 = vld [vmem:[%s29221_s15 + $0x7f8] sm:$0xff]  ;;  %v19618_v28 = vpack.c.bf16 %v16434_v20, %v16430_v19  ;;  %v22422_v45 = vld [vmem:[%s29516_s27 + $0x468] ss:$40 sps:$4 sm:$0xff]  }
  0xaf   :  { %11260 = vmatprep.subr.bf16.mxu1 %v19583_v49  ;;  %10415 = vmatpush1.bf16.msra.mxu0 %v19656_v50  ;;  %v16407_v49 = vld [vmem:[%s29221_s15 + $0x718] sm:$0xff]  ;;  %v19677_v50 = vpack.c.bf16 %v16553_v36, %v16549_v35  ;;  %v19676_v53 = vpack.c.bf16 %v16552_v41, %v16548_v40  ;;  %v22373_v35 = vld [vmem:[%s29516_s27 + $0x3cc] ss:$40 sps:$4 sm:$0xff]  }
  0xb0   :  { %10266 = vmatmul.mubr.bf16.gmra.mrb[20].mxu0 %v20708_v44  ;;  %11098 = vmatmul.mubr.bf16.gmra.mrb[52].mxu1 %v21558_v62  ;;  %v16374_v62 = vld [vmem:[%s29221_s15 + $0x610] sm:$0xff]  ;;  %v19672_v44 = vpack.c.bf16 %v16544_v31, %v16540_v30  ;;  %v20720_v15 = vld [vmem:[%s29516_s27 + $0x2d8] ss:$40 sps:$4 sm:$0xff]   ;;  %v20724_v31 = vld [vmem:[%s29516_s27 + $0x37c] ss:$40 sps:$4 sm:$0xff]  }
  0xb1   :  { %10275 = vmatprep.mubr.bf16.mxu0 %v20709_v48  ;;  %11107 = vmatprep.mubr.bf16.mxu1 %v21581_v9  ;;  %v20711_v9 = vld [vmem:[%s29516_s27 + $0x1e8] ss:$40 sps:$4 sm:$0xff]   ;;  %v19590_v22 = vpack.c.bf16 %v16378_v5, %v16374_v62  ;;  %v16415_v62 = vld [vmem:[%s29221_s15 + $0x758] sm:$0xff]  ;;  %v20999_v41 = vld [vmem:[%s29516_s27 + $0x3c4] ss:$40 sps:$4 sm:$0xff]  }
  0xb2   :  { %11261 = vmatpush1.bf16.msra.mxu1 %v19582_v55  ;;  %10416 = vmatprep.subr.bf16.mxu0 %v19661_v60  ;;  %v16411_v55 = vld [vmem:[%s29221_s15 + $0x738] sm:$0xff]  ;;  %v16410_v60 = vld [vmem:[%s29221_s15 + $0x730] sm:$0xff] }
  0xb3   :  { %11262 = vmatprep.subr.bf16.mxu1 %v19587_v61  ;;  %10417 = vmatpush1.bf16.msra.mxu0 %v19660_v63  ;;  %v20717_v61 = vld [vmem:[%s29516_s27 + $0x288] ss:$40 sps:$4 sm:$0xff]   ;;  %v19602_v63 = vpack.c.bf16 %v16402_v47, %v16398_v46  ;;  %v16419_v5 = vld [vmem:[%s29221_s15 + $0x778] sm:$0xff] }
  0xb4   :  { %10418 = vmatprep.subr.bf16.mxu0 %v19665_v1  ;;  %v19680_v1 = vpack.c.bf16 %v16560_v59, %v16556_v58  ;;  %v19611_v4 = vpack.c.bf16 %v16419_v5, %v16415_v62  ;;  %v16439_v23 = vld [vmem:[%s29221_s15 + $0x818] sm:$0xff]  ;;  %v20723_v30 = vld [vmem:[%s29516_s27 + $0x328] ss:$40 sps:$4 sm:$0xff]  }
  0xb5   :  { %v20994_v36 = vld [vmem:[%s29516_s27 + $0x2d0] ss:$40 sps:$4 sm:$0xff]   ;;  %v22391_v39 = vld [vmem:[%s29516_s27 + $0x41c] ss:$40 sps:$4 sm:$0xff]   ;;  %v21000_v47 = vld [vmem:[%s29516_s27 + $0x3c0] ss:$40 sps:$4 sm:$0xff]  }
  0xb6   :  { %11263 = vmatpush1.bf16.msra.mxu1 %v19586_v10  ;;  %v19685_v10 = vpack.c.bf16 %v16569_v3, %v16565_v2  ;;  %v20997_v40 = vld [vmem:[%s29516_s27 + $0x374] ss:$40 sps:$4 sm:$0xff]   ;;  %v22476_v59 = vld [vmem:[%s29516_s27 + $0x558] ss:$40 sps:$4 sm:$0xff]   ;;  %v16577_v2 = vld [vmem:[%s29221_s15 + $0xc68] sm:$0xff] }
  0xb7   :  { %11264 = vmatprep.subr.bf16.mxu1 %v19591_v14  ;;  %10419 = vmatpush1.bf16.msra.mxu0 %v19664_v16  ;;  %v16422_v14 = vld [vmem:[%s29221_s15 + $0x790] sm:$0xff]  ;;  %v22427_v46 = vld [vmem:[%s29516_s27 + $0x4bc] ss:$40 sps:$4 sm:$0xff]  }
  0xb8   :  { %10276 = vmatmul.mubr.bf16.gmra.mrb[24].mxu0 %v20711_v9  ;;  %11108 = vmatmul.mubr.bf16.gmra.mrb[56].mxu1 %v21615_v24  ;;  %v16390_v24 = vld [vmem:[%s29221_s15 + $0x690] sm:$0xff]  ;;  %v22511_v3 = vld [vmem:[%s29516_s27 + $0x64] ss:$40 sps:$4 sm:$0xff]  }
  0xb9   :  { %10285 = vmatprep.mubr.bf16.mxu0 %v20712_v13  ;;  %11117 = vmatprep.mubr.bf16.mxu1 %v21647_v38  ;;  %v20714_v38 = vld [vmem:[%s29516_s27 + $0x238] ss:$40 sps:$4 sm:$0xff]   ;;  %v19598_v48 = vpack.c.bf16 %v16394_v33, %v16390_v24  ;;  %v16418_v9 = vld [vmem:[%s29221_s15 + $0x770] sm:$0xff] }
  0xba   :  { %11265 = vmatpush1.bf16.msra.mxu1 %v19590_v22  ;;  %10420 = vmatprep.subr.bf16.mxu0 %v19669_v25  ;;  %v19610_v13 = vpack.c.bf16 %v16418_v9, %v16414_v6  ;;  %v16426_v16 = vld [vmem:[%s29221_s15 + $0x7b0] sm:$0xff]  ;;  %v16443_v25 = vld [vmem:[%s29221_s15 + $0x838] sm:$0xff]  ;;  %v16572_v6 = vld [vmem:[%s29221_s15 + $0xc40] sm:$0xff] }
  0xbb   :  { %11266 = vmatprep.subr.bf16.mxu1 %v19595_v26  ;;  %10421 = vmatpush1.bf16.msra.mxu0 %v19668_v27  ;;  %v19614_v22 = vpack.c.bf16 %v16426_v16, %v16422_v14  ;;  %v20991_v27 = vld [vmem:[%s29516_s27 + $0x284] ss:$40 sps:$4 sm:$0xff]   ;;  %v20993_v24 = vld [vmem:[%s29516_s27 + $0x2d4] ss:$40 sps:$4 sm:$0xff]   ;;  %v22368_v33 = vld [vmem:[%s29516_s27 + $0x378] ss:$40 sps:$4 sm:$0xff]  }
  0xbc   :  { %10422 = vmatprep.subr.bf16.mxu0 %v19673_v29  ;;  %v19623_v29 = vpack.c.bf16 %v16443_v25, %v16439_v23  ;;  %v21005_v58 = vld [vmem:[%s29516_s27 + $0x4b4] ss:$40 sps:$4 sm:$0xff]   ;;  %v21008_v9 = vld [vmem:[%s29516_s27 + $0x500] ss:$40 sps:$4 sm:$0xff]  }
  0xbd   :  { %v16584_v14 = vld [vmem:[%s29221_s15 + $0xca0] sm:$0xff]  ;;  %v22559_v20 = vld [vmem:[%s29516_s27 + $0xb4] ss:$40 sps:$4 sm:$0xff]  }
  0xbe   :  { %11267 = vmatpush1.bf16.msra.mxu1 %v19594_v37  ;;  %v22386_v37 = vld [vmem:[%s29516_s27 + $0x3c8] ss:$40 sps:$4 sm:$0xff]  }
  0xbf   :  { %11268 = vmatprep.subr.bf16.mxu1 %v19599_v43  ;;  %10423 = vmatpush1.bf16.msra.mxu0 %v19672_v44  ;;  %v22409_v43 = vld [vmem:[%s29516_s27 + $0x46c] ss:$40 sps:$4 sm:$0xff]   ;;  %v20998_v44 = vld [vmem:[%s29516_s27 + $0x370] ss:$40 sps:$4 sm:$0xff]  }
  0xc0   :  { %10286 = vmatmul.mubr.bf16.gmra.mrb[28].mxu0 %v20714_v38  ;;  %11118 = vmatmul.mubr.bf16.gmra.mrb[60].mxu1 %v21678_v54  ;;  %v16406_v54 = vld [vmem:[%s29221_s15 + $0x710] sm:$0xff]  ;;  %v20995_v38 = vld [vmem:[%s29516_s27 + $0x324] ss:$40 sps:$4 sm:$0xff]  }
  0xc1   :  { %10295 = vmatprep.mubr.bf16.mxu0 %v20715_v42  ;;  %11127 = vmatprep.mubr.bf16.mxu1 %v21713_v7  ;;  %v19607_v7 = vpack.c.bf16 %v16411_v55, %v16407_v49  ;;  %v19606_v8 = vpack.c.bf16 %v16410_v60, %v16406_v54  ;;  %v22404_v42 = vld [vmem:[%s29516_s27 + $0x418] ss:$40 sps:$4 sm:$0xff]   ;;  %v22445_v49 = vld [vmem:[%s29516_s27 + $0x50c] ss:$40 sps:$4 sm:$0xff]   ;;  %v22463_v55 = vld [vmem:[%s29516_s27 + $0x55c] ss:$40 sps:$4 sm:$0xff]  }
  0xc2   :  { %11269 = vmatpush1.bf16.msra.mxu1 %v19598_v48  ;;  %10424 = vmatprep.subr.bf16.mxu0 %v19677_v50  ;;  %v22440_v48 = vld [vmem:[%s29516_s27 + $0x4b8] ss:$40 sps:$4 sm:$0xff]   ;;  %v22481_v54 = vld [vmem:[%s29516_s27 + $0x14] ss:$40 sps:$4 sm:$0xff]  }
  0xc3   :  { %11270 = vmatprep.subr.bf16.mxu1 %v19603_v51  ;;  %10425 = vmatpush1.bf16.msra.mxu0 %v19676_v53  ;;  %v21002_v50 = vld [vmem:[%s29516_s27 + $0x410] ss:$40 sps:$4 sm:$0xff]   ;;  %v21003_v51 = vld [vmem:[%s29516_s27 + $0x464] ss:$40 sps:$4 sm:$0xff]  }
  0xc4   :  { %10426 = vmatprep.subr.bf16.mxu0 %v19681_v56  ;;  %v22458_v53 = vld [vmem:[%s29516_s27 + $0x508] ss:$40 sps:$4 sm:$0xff]  }
  0xc5   :  { %v21004_v56 = vld [vmem:[%s29516_s27 + $0x460] ss:$40 sps:$4 sm:$0xff]   ;;  %v21006_v60 = vld [vmem:[%s29516_s27 + $0x4b0] ss:$40 sps:$4 sm:$0xff]  }
  0xc6   :  { %11271 = vmatpush1.bf16.msra.mxu1 %v19602_v63  ;;  %v16564_v63 = vld [vmem:[%s29221_s15 + $0xc00] sm:$0xff] }
  0xc7   :  { %11272 = vmatprep.subr.bf16.mxu1 %v19607_v7  ;;  %10427 = vmatpush1.bf16.msra.mxu0 %v19680_v1  ;;  %v22500_v7 = vld [vmem:[%s29516_s27 + $0x10] ss:$40 sps:$4 sm:$0xff]   ;;  %v16573_v1 = vld [vmem:[%s29221_s15 + $0xc48] sm:$0xff] }
  0xc8   :  { %10296 = vmatmul.mubr.bf16.gmra.mrb[32].mxu0 %v20717_v61  ;;  %11128 = vmatmul.mubr.bf16.gmra.mrb[64].mxu1 %v21741_v21  ;;  %v19615_v21 = vpack.c.bf16 %v16427_v12, %v16423_v11  ;;  %v21007_v61 = vld [vmem:[%s29516_s27 + $0x504] ss:$40 sps:$4 sm:$0xff]   ;;  %v19689_v5 = vpack.c.bf16 %v16577_v2, %v16573_v1  ;;  %v21009_v11 = vld [vmem:[%s29516_s27 + $0x554] ss:$40 sps:$4 sm:$0xff]  }
  0xc9   :  { %10305 = vmatprep.mubr.bf16.mxu0 %v20718_v0  ;;  %11137 = vmatprep.mubr.bf16.mxu1 %v21767_v34  ;;  %v16431_v34 = vld [vmem:[%s29221_s15 + $0x7d8] sm:$0xff]  ;;  %v16568_v0 = vld [vmem:[%s29221_s15 + $0xc20] sm:$0xff]  ;;  %v16446_v1 = vld [vmem:[%s29221_s15 + $0x850] sm:$0xff] }
  0xca   :  { %11273 = vmatpush1.bf16.msra.mxu1 %v19606_v8  ;;  %10609 = vmatprep.subr.bf16.mxu0 %v19685_v10  ;;  %v19619_v26 = vpack.c.bf16 %v16435_v17, %v16431_v34  ;;  %v19684_v62 = vpack.c.bf16 %v16568_v0, %v16564_v63  ;;  %v16576_v8 = vld [vmem:[%s29221_s15 + $0xc60] sm:$0xff]  ;;  %v16581_v10 = vld [vmem:[%s29221_s15 + $0xc88] sm:$0xff]  ;;  %v16450_v2 = vld [vmem:[%s29221_s15 + $0x870] sm:$0xff] }
  0xcb   :  { %11274 = vmatprep.subr.bf16.mxu1 %v19611_v4  ;;  %v16585_v4 = vld [vmem:[%s29221_s15 + $0xca8] sm:$0xff]  ;;  %v19688_v12 = vpack.c.bf16 %v16576_v8, %v16572_v6 }
  0xcc   :  { %v22546_v34 = vld [vmem:[%s29516_s27 + $0x60] ss:$40 sps:$4 sm:$0xff]  }
  0xcd   :  { %v16589_v17 = vld [vmem:[%s29221_s15 + $0xcc8] sm:$0xff] }
  0xce   :  { %11275 = vmatpush1.bf16.msra.mxu1 %v19610_v13  ;;  %v19693_v13 = vpack.c.bf16 %v16585_v4, %v16581_v10  ;;  %v21012_v8 = vld [vmem:[%s29516_s27 + $0x8] ss:$40 sps:$4 sm:$0xff]   ;;  %v16604_v10 = vld [vmem:[%s29221_s15 + $0xd40] sm:$0xff] }
  0xcf   :  { %11276 = vmatprep.subr.bf16.mxu1 %v19615_v21  ;;  %v16580_v21 = vld [vmem:[%s29221_s15 + $0xc80] sm:$0xff] }
  0xd0   :  { %10306 = vmatmul.mubr.bf16.gmra.mrb[36].mxu0 %v20720_v15  ;;  %11138 = vmatmul.mubr.bf16.gmra.mrb[68].mxu1 %v21804_v52  ;;  %v20992_v52 = vld [vmem:[%s29516_s27 + $0x280] ss:$40 sps:$4 sm:$0xff]   ;;  %v19692_v23 = vpack.c.bf16 %v16584_v14, %v16580_v21  ;;  %v16454_v14 = vld [vmem:[%s29221_s15 + $0x890] sm:$0xff] }
  0xd1   :  { %10315 = vmatprep.mubr.bf16.mxu0 %v20721_v18  ;;  %11147 = vmatprep.mubr.bf16.mxu1 %v20991_v27  ;;  %v16593_v18 = vld [vmem:[%s29221_s15 + $0xce8] sm:$0xff]  ;;  %v16592_v27 = vld [vmem:[%s29221_s15 + $0xce0] sm:$0xff] }
  0xd2   :  { %11277 = vmatpush1.bf16.msra.mxu1 %v19614_v22  ;;  %v19697_v25 = vpack.c.bf16 %v16593_v18, %v16589_v17  ;;  %v16608_v4 = vld [vmem:[%s29221_s15 + $0xd60] sm:$0xff]  ;;  %v16458_v17 = vld [vmem:[%s29221_s15 + $0x8b0] sm:$0xff] }
  0xd3   :  { %11278 = vmatprep.subr.bf16.mxu1 %v19619_v26  ;;  %v16588_v26 = vld [vmem:[%s29221_s15 + $0xcc0] sm:$0xff] }
  0xd6   :  { %11279 = vmatpush1.bf16.msra.mxu1 %v19618_v28  ;;  %v21010_v28 = vld [vmem:[%s29516_s27 + $0x550] ss:$40 sps:$4 sm:$0xff]  }
  0xd7   :  { %11461 = vmatprep.subr.bf16.mxu1 %v19623_v29  ;;  %v16597_v29 = vld [vmem:[%s29221_s15 + $0xd08] sm:$0xff] }
  0xd8   :  { %10316 = vmatmul.mubr.bf16.gmra.mrb[40].mxu0 %v20723_v30  ;;  %11148 = vmatmul.mubr.bf16.gmra.mrb[72].mxu1 %v20992_v52  ;;  %v16601_v30 = vld [vmem:[%s29221_s15 + $0xd28] sm:$0xff]  ;;  %v16438_v52 = vld [vmem:[%s29221_s15 + $0x810] sm:$0xff] }
  0xd9   :  { %10325 = vmatprep.mubr.bf16.mxu0 %v20724_v31  ;;  %11157 = vmatprep.mubr.bf16.mxu1 %v20993_v24  ;;  %v21011_v31 = vld [vmem:[%s29516_s27 + $0xc] ss:$40 sps:$4 sm:$0xff]  }
  0xda   :  { %v16442_v24 = vld [vmem:[%s29221_s15 + $0x830] sm:$0xff] }
  0xe0   :  { %10326 = vmatmul.mubr.bf16.gmra.mrb[44].mxu0 %v22368_v33  ;;  %11158 = vmatmul.mubr.bf16.gmra.mrb[76].mxu1 %v20994_v36  ;;  %v19696_v36 = vpack.c.bf16 %v16592_v27, %v16588_v26  ;;  %v16613_v26 = vld [vmem:[%s29221_s15 + $0xd88] sm:$0xff] }
  0xe1   :  { %10335 = vmatprep.mubr.bf16.mxu0 %v22373_v35  ;;  %11167 = vmatprep.mubr.bf16.mxu1 %v20995_v38  ;;  %v16617_v27 = vld [vmem:[%s29221_s15 + $0xda8] sm:$0xff] }
  0xe8   :  { %10336 = vmatmul.mubr.bf16.gmra.mrb[48].mxu0 %v22386_v37  ;;  %11168 = vmatmul.mubr.bf16.gmra.mrb[80].mxu1 %v20996_v32  ;;  %v16447_v32 = vld [vmem:[%s29221_s15 + $0x858] sm:$0xff] }
  0xe9   :  { %10345 = vmatprep.mubr.bf16.mxu0 %v22391_v39  ;;  %11177 = vmatprep.mubr.bf16.mxu1 %v20997_v40  ;;  %v16451_v40 = vld [vmem:[%s29221_s15 + $0x878] sm:$0xff] }
  0xea   :  { %v19627_v0 = vpack.c.bf16 %v16451_v40, %v16447_v32  ;;  %v16625_v32 = vld [vmem:[%s29221_s15 + $0xde8] sm:$0xff] }
  0xf0   :  { %10346 = vmatmul.mubr.bf16.gmra.mrb[52].mxu0 %v22404_v42  ;;  %11178 = vmatmul.mubr.bf16.gmra.mrb[84].mxu1 %v20998_v44  ;;  %v19701_v44 = vpack.c.bf16 %v16601_v30, %v16597_v29  ;;  %v16467_v29 = vld [vmem:[%s29221_s15 + $0x8f8] sm:$0xff]  ;;  %v16612_v30 = vld [vmem:[%s29221_s15 + $0xd80] sm:$0xff] }
  0xf1   :  { %10355 = vmatprep.mubr.bf16.mxu0 %v22409_v43  ;;  %11187 = vmatprep.mubr.bf16.mxu1 %v20999_v41 }
  0xf8   :  { %10356 = vmatmul.mubr.bf16.gmra.mrb[56].mxu0 %v22422_v45  ;;  %11188 = vmatmul.mubr.bf16.gmra.mrb[88].mxu1 %v21000_v47  ;;  %v22602_v47 = vld [vmem:[%s29516_s27 + $0xb0] ss:$40 sps:$4 sm:$0xff]  }
  0xf9   :  { %10365 = vmatprep.mubr.bf16.mxu0 %v22427_v46  ;;  %11197 = vmatprep.mubr.bf16.mxu1 %v21001_v57  ;;  %v16596_v57 = vld [vmem:[%s29221_s15 + $0xd00] sm:$0xff] }
 0x100   :  { %10366 = vmatmul.mubr.bf16.gmra.mrb[60].mxu0 %v22440_v48  ;;  %11198 = vmatmul.mubr.bf16.gmra.mrb[92].mxu1 %v21002_v50  ;;  %v16600_v50 = vld [vmem:[%s29221_s15 + $0xd20] sm:$0xff] }
 0x101   :  { %10375 = vmatprep.mubr.bf16.mxu0 %v22445_v49  ;;  %11207 = vmatprep.mubr.bf16.mxu1 %v21003_v51  ;;  %v19700_v6 = vpack.c.bf16 %v16600_v50, %v16596_v57  ;;  %v19709_v57 = vpack.c.bf16 %v16617_v27, %v16613_v26  ;;  %v16483_v27 = vld [vmem:[%s29221_s15 + $0x978] sm:$0xff] }
 0x108   :  { %10376 = vmatmul.mubr.bf16.gmra.mrb[64].mxu0 %v22458_v53  ;;  %11208 = vmatmul.mubr.bf16.gmra.mrb[96].mxu1 %v21004_v56  ;;  %v19622_v56 = vpack.c.bf16 %v16442_v24, %v16438_v52  ;;  %v22689_v24 = vld [vmem:[%s29516_s27 + $0x154] ss:$40 sps:$4 sm:$0xff]  }
 0x109   :  { %10385 = vmatprep.mubr.bf16.mxu0 %v22463_v55  ;;  %11217 = vmatprep.mubr.bf16.mxu1 %v21005_v58  ;;  %v22615_v58 = vld [vmem:[%s29516_s27 + $0x104] ss:$40 sps:$4 sm:$0xff]  }
 0x110   :  { %10386 = vmatmul.mubr.bf16.gmra.mrb[68].mxu0 %v22476_v59  ;;  %11218 = vmatmul.mubr.bf16.gmra.mrb[100].mxu1 %v21006_v60  ;;  %v16605_v60 = vld [vmem:[%s29221_s15 + $0xd48] sm:$0xff] }
 0x111   :  { %10428 = vmatprep.mubr.bf16.mxu0 %v22481_v54  ;;  %11227 = vmatprep.mubr.bf16.mxu1 %v21007_v61  ;;  %v16609_v61 = vld [vmem:[%s29221_s15 + $0xd68] sm:$0xff] }
 0x118   :  { %10429 = vmatmul.mubr.bf16.vlgmr.msra.gmra.mrb[0].mxu0 %v22500_v7  ;;  %11228 = vmatmul.mubr.bf16.gmra.mrb[104].mxu1 %v21008_v9  ;;  %v19705_v9 = vpack.c.bf16 %v16609_v61, %v16605_v60  ;;  %v16466_v60 = vld [vmem:[%s29221_s15 + $0x8f0] sm:$0xff]  ;;  %v16471_v61 = vld [vmem:[%s29221_s15 + $0x918] sm:$0xff] }
 0x119   :  { %10438 = vmatprep.mubr.bf16.mxu0 %v22511_v3  ;;  %11237 = vmatprep.mubr.bf16.mxu1 %v21009_v11  ;;  %v19626_v11 = vpack.c.bf16 %v16450_v2, %v16446_v1  ;;  %v21014_v1 = vld [vmem:[%s29516_s27 + $0x58] ss:$40 sps:$4 sm:$0xff]  }
 0x11a   :  { %10610 = vmatpush1.bf16.msra.mxu0 %v19684_v62  ;;  %v16455_v62 = vld [vmem:[%s29221_s15 + $0x898] sm:$0xff] }
 0x11b   :  { %v22533_v15 = vpop.f32.mrb[0].mxu1  ;;  %10611 = vmatprep.subr.bf16.mxu0 %v19689_v5  ;;  %v16459_v5 = vld [vmem:[%s29221_s15 + $0x8b8] sm:$0xff] }
 0x11c   :  { %v22541_v16 = vpop.f32.mrb[1].mxu1  ;;  %v19631_v21 = vpack.c.bf16 %v16459_v5, %v16455_v62  ;;  %v16475_v2 = vld [vmem:[%s29221_s15 + $0x938] sm:$0xff]  ;;  %v16620_v5 = vld [vmem:[%s29221_s15 + $0xdc0] sm:$0xff] }
 0x11d   :  { %v22554_v19 = vpop.f32.mrb[2].mxu1 }
 0x11e   :  { %29517 = vst [vmem:[#allocation5_spill] sm:$0xff] %v22554_v19  ;;  %v22561_v22 = vpop.f32.mrb[3].mxu1  ;;  %10612 = vmatpush1.bf16.msra.mxu0 %v19688_v12  ;;  %v21013_v12 = vld [vmem:[%s29516_s27 + $0x5c] ss:$40 sps:$4 sm:$0xff]  }
 0x11f   :  { %29518 = vst [vmem:[#allocation6_spill] sm:$0xff] %v22561_v22  ;;  %10613 = vmatprep.subr.bf16.mxu0 %v19693_v13  ;;  %v22654_v13 = vld [vmem:[%s29516_s27 + $0x100] ss:$40 sps:$4 sm:$0xff]  }
 0x120   :  { %10439 = vmatmul.mubr.bf16.gmra.mrb[4].mxu0 %v22546_v34  ;;  %11238 = vmatmul.mubr.bf16.gmra.mrb[108].mxu1 %v21010_v28 }
 0x121   :  { %10448 = vmatprep.mubr.bf16.mxu0 %v22559_v20  ;;  %11280 = vmatprep.mubr.bf16.mxu1 %v21011_v31  ;;  %v16616_v31 = vld [vmem:[%s29221_s15 + $0xda0] sm:$0xff] }
 0x122   :  { %10614 = vmatpush1.bf16.msra.mxu0 %v19692_v23  ;;  %v16463_v23 = vld [vmem:[%s29221_s15 + $0x8d8] sm:$0xff] }
 0x123   :  { %v22589_v38 = vpop.f32.mrb[4].mxu1  ;;  %10615 = vmatprep.subr.bf16.mxu0 %v19697_v25  ;;  %v19704_v25 = vpack.c.bf16 %v16608_v4, %v16604_v10  ;;  %v19635_v50 = vpack.c.bf16 %v16467_v29, %v16463_v23  ;;  %v16470_v4 = vld [vmem:[%s29221_s15 + $0x910] sm:$0xff]  ;;  %v16629_v23 = vld [vmem:[%s29221_s15 + $0xe08] sm:$0xff]  ;;  %v16628_v29 = vld [vmem:[%s29221_s15 + $0xe00] sm:$0xff] }
 0x124   :  { %29519 = vst [vmem:[#allocation7_spill] sm:$0xff] %v22589_v38  ;;  %v22597_v41 = vpop.f32.mrb[5].mxu1  ;;  %v16599_v38 = vld [vmem:[%s29221_s15 + $0xd18] sm:$0xff] }
 0x125   :  { %29520 = vst [vmem:[#allocation8_spill] sm:$0xff] %v22597_v41  ;;  %v22610_v51 = vpop.f32.mrb[6].mxu1  ;;  %v16594_v41 = vld [vmem:[%s29221_s15 + $0xcf0] sm:$0xff] }
 0x126   :  { %29521 = vst [vmem:[#allocation9_spill] sm:$0xff] %v22610_v51  ;;  %v22623_v63 = vpop.f32.mrb[7].mxu1  ;;  %10616 = vmatpush1.bf16.msra.mxu0 %v19696_v36  ;;  %v16621_v36 = vld [vmem:[%s29221_s15 + $0xdc8] sm:$0xff] }
 0x127   :  { %29522 = vst [vmem:[#allocation10_spill] sm:$0xff] %v22623_v63  ;;  %10617 = vmatprep.subr.bf16.mxu0 %v19701_v44  ;;  %v19630_v44 = vpack.c.bf16 %v16458_v17, %v16454_v14  ;;  %v19713_v62 = vpack.c.bf16 %v16625_v32, %v16621_v36  ;;  %v16479_v14 = vld [vmem:[%s29221_s15 + $0x958] sm:$0xff]  ;;  %v22763_v36 = vld [vmem:[%s29516_s27 + $0x1a4] ss:$40 sps:$4 sm:$0xff]  }
 0x128   :  { %10449 = vmatmul.mubr.bf16.gmra.mrb[8].mxu0 %v22602_v47  ;;  %11281 = vmatmul.mubr.bf16.vlgmr.msra.gmra.mrb[40].mxu1 %v21012_v8  ;;  %v21015_v8 = vld [vmem:[%s29516_s27 + $0xac] ss:$40 sps:$4 sm:$0xff]  }
 0x129   :  { %11462 = vmatpush1.bf16.msra.mxu1 %v19622_v56  ;;  %10458 = vmatprep.mubr.bf16.mxu0 %v22615_v58  ;;  %v16462_v56 = vld [vmem:[%s29221_s15 + $0x8d0] sm:$0xff]  ;;  %v16637_v32 = vld [vmem:[%s29221_s15 + $0xe48] sm:$0xff] }
 0x12a   :  { %11290 = vmatprep.mubr.bf16.mxu1 %v21013_v12  ;;  %11463 = vmatprep.subr.bf16.mxu1 %v19627_v0  ;;  %v19708_v0 = vpack.c.bf16 %v16616_v31, %v16612_v30  ;;  %v19634_v10 = vpack.c.bf16 %v16466_v60, %v16462_v56  ;;  %v16632_v30 = vld [vmem:[%s29221_s15 + $0xe20] sm:$0xff]  ;;  %v19643_v60 = vpack.c.bf16 %v16483_v27, %v16479_v14  ;;  %v16486_v14 = vld [vmem:[%s29221_s15 + $0x990] sm:$0xff]  ;;  %v16495_v27 = vld [vmem:[%s29221_s15 + $0x9d8] sm:$0xff] }
 0x12b   :  { %v22662_v18 = vpop.f32.mrb[8].mxu1  ;;  %10618 = vmatpush1.bf16.msra.mxu0 %v19700_v6  ;;  %v16624_v6 = vld [vmem:[%s29221_s15 + $0xde0] sm:$0xff] }
 0x12c   :  { %29523 = vst [vmem:[#allocation11_spill] sm:$0xff] %v22662_v18  ;;  %v22673_v28 = vpop.f32.mrb[9].mxu1  ;;  %10619 = vmatprep.subr.bf16.mxu0 %v19705_v9  ;;  %v22728_v9 = vld [vmem:[%s29516_s27 + $0x150] ss:$40 sps:$4 sm:$0xff]   ;;  %v19712_v17 = vpack.c.bf16 %v16624_v6, %v16620_v5 }
 0x12d   :  { %29524 = vst [vmem:[#allocation12_spill] sm:$0xff] %v22673_v28  ;;  %v22684_v52 = vpop.f32.mrb[10].mxu1  ;;  %11464 = vmatpush1.bf16.msra.mxu1 %v19626_v11  ;;  %v16474_v11 = vld [vmem:[%s29221_s15 + $0x930] sm:$0xff]  ;;  %v16491_v5 = vld [vmem:[%s29221_s15 + $0x9b8] sm:$0xff] }
 0x12e   :  { %29525 = vst [vmem:[#allocation13_spill] sm:$0xff] %v22684_v52  ;;  %v22697_v40 = vpop.f32.mrb[11].mxu1  ;;  %11465 = vmatprep.subr.bf16.mxu1 %v19631_v21  ;;  %v19639_v21 = vpack.c.bf16 %v16475_v2, %v16471_v61  ;;  %v16478_v61 = vld [vmem:[%s29221_s15 + $0x950] sm:$0xff]  ;;  %v19716_v2 = vpack.c.bf16 %v16632_v30, %v16628_v29  ;;  %v16645_v30 = vld [vmem:[%s29221_s15 + $0xe88] sm:$0xff]  ;;  %v16587_v18 = vld [vmem:[%s29221_s15 + $0xcb8] sm:$0xff] }
 0x12f   :  { %29526 = vst [vmem:[#allocation14_spill] sm:$0xff] %v22697_v40  ;;  %10620 = vmatpush1.bf16.msra.mxu0 %v19704_v25  ;;  %v16633_v25 = vld [vmem:[%s29221_s15 + $0xe28] sm:$0xff]  ;;  %v16574_v28 = vld [vmem:[%s29221_s15 + $0xc50] sm:$0xff] }
 0x130   :  { %10459 = vmatmul.mubr.bf16.gmra.mrb[12].mxu0 %v22654_v13  ;;  %11291 = vmatmul.mubr.bf16.gmra.mrb[44].mxu1 %v21014_v1  ;;  %v19717_v56 = vpack.c.bf16 %v16633_v25, %v16629_v23  ;;  %v16487_v1 = vld [vmem:[%s29221_s15 + $0x998] sm:$0xff]  ;;  %v16725_v40 = vld [vmem:[%s29221_s15 + $0x1108] sm:$0xff] }
 0x131   :  { %10468 = vmatprep.mubr.bf16.mxu0 %v22689_v24  ;;  %11300 = vmatprep.mubr.bf16.mxu1 %v21015_v8  ;;  %v16636_v8 = vld [vmem:[%s29221_s15 + $0xe40] sm:$0xff]  ;;  %v19647_v25 = vpack.c.bf16 %v16491_v5, %v16487_v1  ;;  %v16653_v1 = vld [vmem:[%s29221_s15 + $0xec8] sm:$0xff] }
 0x132   :  { %11466 = vmatpush1.bf16.msra.mxu1 %v19630_v44  ;;  %10621 = vmatprep.subr.bf16.mxu0 %v19709_v57  ;;  %v16641_v44 = vld [vmem:[%s29221_s15 + $0xe68] sm:$0xff] }
 0x133   :  { %v22736_v12 = vpop.f32.mrb[12].mxu1  ;;  %11467 = vmatprep.subr.bf16.mxu1 %v19635_v50  ;;  %10622 = vmatpush1.bf16.msra.mxu0 %v19708_v0  ;;  %v19638_v50 = vpack.c.bf16 %v16474_v11, %v16470_v4  ;;  %v16482_v0 = vld [vmem:[%s29221_s15 + $0x970] sm:$0xff]  ;;  %v19721_v6 = vpack.c.bf16 %v16641_v44, %v16637_v32  ;;  %v21017_v4 = vld [vmem:[%s29516_s27 + $0xfc] ss:$40 sps:$4 sm:$0xff]   ;;  %v22802_v11 = vld [vmem:[%s29516_s27 + $0x1a0] ss:$40 sps:$4 sm:$0xff]  }
 0x134   :  { %29527 = vst [vmem:[#allocation15_spill] sm:$0xff] %v22736_v12  ;;  %v22747_v26 = vpop.f32.mrb[13].mxu1  ;;  %10623 = vmatprep.subr.bf16.mxu0 %v19713_v62  ;;  %v21016_v62 = vld [vmem:[%s29516_s27 + $0xa8] ss:$40 sps:$4 sm:$0xff]   ;;  %v23361_v52 = vld [vmem:[%s29516_s27 + $0x10c] ss:$40 sps:$4 sm:$0xff]  }
 0x135   :  { %29528 = vst [vmem:[#allocation16_spill] sm:$0xff] %v22747_v26  ;;  %v22758_v31 = vpop.f32.mrb[14].mxu1  ;;  %v16649_v32 = vld [vmem:[%s29221_s15 + $0xea8] sm:$0xff] }
 0x136   :  { %29529 = vst [vmem:[#allocation17_spill] sm:$0xff] %v22758_v31  ;;  %v22771_v57 = vpop.f32.mrb[15].mxu1  ;;  %11468 = vmatpush1.bf16.msra.mxu1 %v19634_v10  ;;  %v16640_v10 = vld [vmem:[%s29221_s15 + $0xe60] sm:$0xff]  ;;  %v16535_v31 = vld [vmem:[%s29221_s15 + $0xb18] sm:$0xff]  ;;  %v23306_v12 = vld [vmem:[%s29516_s27 + $0x68] ss:$40 sps:$4 sm:$0xff]  }
 0x137   :  { %29530 = vst [vmem:[#allocation18_spill] sm:$0xff] %v22771_v57  ;;  %11469 = vmatprep.subr.bf16.mxu1 %v19639_v21  ;;  %10624 = vmatpush1.bf16.msra.mxu0 %v19712_v17  ;;  %v19642_v21 = vpack.c.bf16 %v16482_v0, %v16478_v61  ;;  %v16490_v17 = vld [vmem:[%s29221_s15 + $0x9b0] sm:$0xff]  ;;  %v19720_v29 = vpack.c.bf16 %v16640_v10, %v16636_v8 }
 0x138   :  { %10469 = vmatmul.mubr.bf16.gmra.mrb[16].mxu0 %v22728_v9  ;;  %11301 = vmatmul.mubr.bf16.gmra.mrb[48].mxu1 %v21016_v62  ;;  %v22837_v0 = vld [vmem:[%s29516_s27 + $0x1f4] ss:$40 sps:$4 sm:$0xff]   ;;  %v19646_v5 = vpack.c.bf16 %v16490_v17, %v16486_v14 }
 0x139   :  { %10478 = vmatprep.mubr.bf16.mxu0 %v22763_v36  ;;  %11310 = vmatprep.mubr.bf16.mxu1 %v21017_v4  ;;  %v16494_v10 = vld [vmem:[%s29221_s15 + $0x9d0] sm:$0xff]  ;;  %v16507_v14 = vld [vmem:[%s29221_s15 + $0xa38] sm:$0xff] }
 0x13a   :  { %11470 = vmatpush1.bf16.msra.mxu1 %v19638_v50  ;;  %10625 = vmatprep.subr.bf16.mxu0 %v19717_v56  ;;  %v16499_v50 = vld [vmem:[%s29221_s15 + $0x9f8] sm:$0xff]  ;;  %v16644_v56 = vld [vmem:[%s29221_s15 + $0xe80] sm:$0xff]  ;;  %v16498_v4 = vld [vmem:[%s29221_s15 + $0x9f0] sm:$0xff] }
 0x13b   :  { %v22810_v23 = vpop.f32.mrb[16].mxu1  ;;  %11471 = vmatprep.subr.bf16.mxu1 %v19643_v60  ;;  %10626 = vmatpush1.bf16.msra.mxu0 %v19716_v2  ;;  %v16648_v60 = vld [vmem:[%s29221_s15 + $0xea0] sm:$0xff]  ;;  %v16657_v2 = vld [vmem:[%s29221_s15 + $0xee8] sm:$0xff]  ;;  %v19651_v8 = vpack.c.bf16 %v16499_v50, %v16495_v27  ;;  %v16502_v50 = vld [vmem:[%s29221_s15 + $0xa10] sm:$0xff] }
 0x13c   :  { %29531 = vst [vmem:[#allocation19_spill] sm:$0xff] %v22810_v23  ;;  %v22821_v44 = vpop.f32.mrb[17].mxu1  ;;  %10627 = vmatprep.subr.bf16.mxu0 %v19721_v6  ;;  %v19725_v6 = vpack.c.bf16 %v16649_v32, %v16645_v30  ;;  %v19729_v17 = vpack.c.bf16 %v16657_v2, %v16653_v1  ;;  %v16656_v27 = vld [vmem:[%s29221_s15 + $0xee0] sm:$0xff]  ;;  %v22876_v30 = vld [vmem:[%s29516_s27 + $0x1f0] ss:$40 sps:$4 sm:$0xff]   ;;  %v19650_v32 = vpack.c.bf16 %v16498_v4, %v16494_v10  ;;  %v16661_v10 = vld [vmem:[%s29221_s15 + $0xf08] sm:$0xff] }
 0x13d   :  { %29532 = vst [vmem:[#allocation20_spill] sm:$0xff] %v22821_v44  ;;  %v22832_v61 = vpop.f32.mrb[18].mxu1  ;;  %v19724_v44 = vpack.c.bf16 %v16648_v60, %v16644_v56  ;;  %v16506_v56 = vld [vmem:[%s29221_s15 + $0xa30] sm:$0xff]  ;;  %v16511_v2 = vld [vmem:[%s29221_s15 + $0xa58] sm:$0xff]  ;;  %v16665_v4 = vld [vmem:[%s29221_s15 + $0xf28] sm:$0xff] }
 0x13e   :  { %29533 = vst [vmem:[#allocation21_spill] sm:$0xff] %v22832_v61  ;;  %v22845_v62 = vpop.f32.mrb[19].mxu1  ;;  %11472 = vmatpush1.bf16.msra.mxu1 %v19642_v21  ;;  %v16503_v61 = vld [vmem:[%s29221_s15 + $0xa18] sm:$0xff] }
 0x13f   :  { %29534 = vst [vmem:[#allocation22_spill] sm:$0xff] %v22845_v62  ;;  %11473 = vmatprep.subr.bf16.mxu1 %v19647_v25  ;;  %10628 = vmatpush1.bf16.msra.mxu0 %v19720_v29  ;;  %v21018_v21 = vld [vmem:[%s29516_s27 + $0xf8] ss:$40 sps:$4 sm:$0xff]   ;;  %v21019_v29 = vld [vmem:[%s29516_s27 + $0x14c] ss:$40 sps:$4 sm:$0xff]   ;;  %v19655_v1 = vpack.c.bf16 %v16507_v14, %v16503_v61 }
 0x140   :  { %10479 = vmatmul.mubr.bf16.gmra.mrb[20].mxu0 %v22802_v11  ;;  %11311 = vmatmul.mubr.bf16.gmra.mrb[52].mxu1 %v21018_v21  ;;  %v16652_v25 = vld [vmem:[%s29221_s15 + $0xec0] sm:$0xff]  ;;  %v16515_v61 = vld [vmem:[%s29221_s15 + $0xa78] sm:$0xff]  ;;  %v16514_v62 = vld [vmem:[%s29221_s15 + $0xa70] sm:$0xff] }
 0x141   :  { %10488 = vmatprep.mubr.bf16.mxu0 %v22837_v0  ;;  %11320 = vmatprep.mubr.bf16.mxu1 %v21019_v29  ;;  %v22911_v14 = vld [vmem:[%s29516_s27 + $0x244] ss:$40 sps:$4 sm:$0xff]   ;;  %v19654_v29 = vpack.c.bf16 %v16506_v56, %v16502_v50  ;;  %v16519_v23 = vld [vmem:[%s29221_s15 + $0xa98] sm:$0xff] }
 0x142   :  { %11474 = vmatpush1.bf16.msra.mxu1 %v19646_v5  ;;  %10629 = vmatprep.subr.bf16.mxu0 %v19725_v6  ;;  %v19728_v5 = vpack.c.bf16 %v16656_v27, %v16652_v25  ;;  %v16664_v6 = vld [vmem:[%s29221_s15 + $0xf20] sm:$0xff]  ;;  %v16669_v25 = vld [vmem:[%s29221_s15 + $0xf48] sm:$0xff]  ;;  %v16523_v50 = vld [vmem:[%s29221_s15 + $0xab8] sm:$0xff] }
 0x143   :  { %v22884_v60 = vpop.f32.mrb[20].mxu1  ;;  %11475 = vmatprep.subr.bf16.mxu1 %v19651_v8  ;;  %10630 = vmatpush1.bf16.msra.mxu0 %v19724_v44  ;;  %v16660_v44 = vld [vmem:[%s29221_s15 + $0xf00] sm:$0xff] }
 0x144   :  { %29535 = vst [vmem:[#allocation23_spill] sm:$0xff] %v22884_v60  ;;  %v22895_v21 = vpop.f32.mrb[21].mxu1  ;;  %10631 = vmatprep.subr.bf16.mxu0 %v19729_v17  ;;  %v16673_v17 = vld [vmem:[%s29221_s15 + $0xf68] sm:$0xff]  ;;  %v16510_v60 = vld [vmem:[%s29221_s15 + $0xa50] sm:$0xff]  ;;  %v19732_v57 = vpack.c.bf16 %v16664_v6, %v16660_v44 }
 0x145   :  { %29536 = vst [vmem:[#allocation24_spill] sm:$0xff] %v22895_v21  ;;  %v22906_v8 = vpop.f32.mrb[22].mxu1  ;;  %v19733_v21 = vpack.c.bf16 %v16665_v4, %v16661_v10  ;;  %v19737_v56 = vpack.c.bf16 %v16673_v17, %v16669_v25  ;;  %v22950_v10 = vld [vmem:[%s29516_s27 + $0x240] ss:$40 sps:$4 sm:$0xff]   ;;  %v19658_v4 = vpack.c.bf16 %v16514_v62, %v16510_v60  ;;  %v16522_v44 = vld [vmem:[%s29221_s15 + $0xab0] sm:$0xff]  ;;  %v19663_v25 = vpack.c.bf16 %v16523_v50, %v16519_v23  ;;  %v16527_v17 = vld [vmem:[%s29221_s15 + $0xad8] sm:$0xff] }
 0x146   :  { %29537 = vst [vmem:[#allocation25_spill] sm:$0xff] %v22906_v8  ;;  %v22919_v27 = vpop.f32.mrb[23].mxu1  ;;  %11476 = vmatpush1.bf16.msra.mxu1 %v19650_v32  ;;  %v19659_v8 = vpack.c.bf16 %v16515_v61, %v16511_v2  ;;  %v21020_v32 = vld [vmem:[%s29516_s27 + $0x148] ss:$40 sps:$4 sm:$0xff]   ;;  %v16672_v2 = vld [vmem:[%s29221_s15 + $0xf60] sm:$0xff]  ;;  %v16531_v23 = vld [vmem:[%s29221_s15 + $0xaf8] sm:$0xff] }
 0x147   :  { %29538 = vst [vmem:[#allocation26_spill] sm:$0xff] %v22919_v27  ;;  %11477 = vmatprep.subr.bf16.mxu1 %v19655_v1  ;;  %10632 = vmatpush1.bf16.msra.mxu0 %v19728_v5  ;;  %v16668_v1 = vld [vmem:[%s29221_s15 + $0xf40] sm:$0xff]  ;;  %v16518_v61 = vld [vmem:[%s29221_s15 + $0xa90] sm:$0xff]  ;;  %v16677_v62 = vld [vmem:[%s29221_s15 + $0xf88] sm:$0xff] }
 0x148   :  { %10489 = vmatmul.mubr.bf16.gmra.mrb[24].mxu0 %v22876_v30  ;;  %11321 = vmatmul.mubr.bf16.gmra.mrb[56].mxu1 %v21020_v32  ;;  %v21021_v5 = vld [vmem:[%s29516_s27 + $0x19c] ss:$40 sps:$4 sm:$0xff]   ;;  %v16681_v60 = vld [vmem:[%s29221_s15 + $0xfa8] sm:$0xff]  ;;  %v16530_v27 = vld [vmem:[%s29221_s15 + $0xaf0] sm:$0xff] }
 0x149   :  { %10498 = vmatprep.mubr.bf16.mxu0 %v22911_v14  ;;  %11330 = vmatprep.mubr.bf16.mxu1 %v21021_v5  ;;  %v22985_v50 = vld [vmem:[%s29516_s27 + $0x294] ss:$40 sps:$4 sm:$0xff]   ;;  %v19662_v5 = vpack.c.bf16 %v16522_v44, %v16518_v61 }
 0x14a   :  { %11478 = vmatpush1.bf16.msra.mxu1 %v19654_v29  ;;  %10633 = vmatprep.subr.bf16.mxu0 %v19733_v21  ;;  %v19736_v29 = vpack.c.bf16 %v16672_v2, %v16668_v1  ;;  %v16680_v21 = vld [vmem:[%s29221_s15 + $0xfa0] sm:$0xff]  ;;  %v16685_v1 = vld [vmem:[%s29221_s15 + $0xfc8] sm:$0xff]  ;;  %v16539_v61 = vld [vmem:[%s29221_s15 + $0xb38] sm:$0xff] }
 0x14b   :  { %v22958_v6 = vpop.f32.mrb[24].mxu1  ;;  %11479 = vmatprep.subr.bf16.mxu1 %v19659_v8  ;;  %10634 = vmatpush1.bf16.msra.mxu0 %v19732_v57  ;;  %v16676_v57 = vld [vmem:[%s29221_s15 + $0xf80] sm:$0xff] }
 0x14c   :  { %29539 = vst [vmem:[#allocation27_spill] sm:$0xff] %v22958_v6  ;;  %v22969_v32 = vpop.f32.mrb[25].mxu1  ;;  %10635 = vmatprep.subr.bf16.mxu0 %v19737_v56  ;;  %v16689_v56 = vld [vmem:[%s29221_s15 + $0xfe8] sm:$0xff]  ;;  %v16526_v6 = vld [vmem:[%s29221_s15 + $0xad0] sm:$0xff]  ;;  %v19740_v26 = vpack.c.bf16 %v16680_v21, %v16676_v57  ;;  %v19671_v57 = vpack.c.bf16 %v16539_v61, %v16535_v31 }
 0x14d   :  { %29540 = vst [vmem:[#allocation28_spill] sm:$0xff] %v22969_v32  ;;  %v22980_v8 = vpop.f32.mrb[26].mxu1  ;;  %v19741_v32 = vpack.c.bf16 %v16681_v60, %v16677_v62  ;;  %v19745_v44 = vpack.c.bf16 %v16689_v56, %v16685_v1  ;;  %v19666_v62 = vpack.c.bf16 %v16530_v27, %v16526_v6  ;;  %v16534_v60 = vld [vmem:[%s29221_s15 + $0xb10] sm:$0xff]  ;;  %v16693_v56 = vld [vmem:[%s29221_s15 + $0x1008] sm:$0xff] }
 0x14e   :  { %29541 = vst [vmem:[#allocation29_spill] sm:$0xff] %v22980_v8  ;;  %v22993_v2 = vpop.f32.mrb[27].mxu1  ;;  %11480 = vmatpush1.bf16.msra.mxu1 %v19658_v4  ;;  %v19667_v8 = vpack.c.bf16 %v16531_v23, %v16527_v17  ;;  %v21022_v4 = vld [vmem:[%s29516_s27 + $0x198] ss:$40 sps:$4 sm:$0xff]   ;;  %v16538_v21 = vld [vmem:[%s29221_s15 + $0xb30] sm:$0xff]  ;;  %v16697_v27 = vld [vmem:[%s29221_s15 + $0x1028] sm:$0xff] }
 0x14f   :  { %29542 = vst [vmem:[#allocation30_spill] sm:$0xff] %v22993_v2  ;;  %11481 = vmatprep.subr.bf16.mxu1 %v19663_v25  ;;  %10636 = vmatpush1.bf16.msra.mxu0 %v19736_v29  ;;  %v16684_v25 = vld [vmem:[%s29221_s15 + $0xfc0] sm:$0xff]  ;;  %v21023_v29 = vld [vmem:[%s29516_s27 + $0x1ec] ss:$40 sps:$4 sm:$0xff]   ;;  %v23040_v31 = vld [vmem:[%s29516_s27 + $0x290] ss:$40 sps:$4 sm:$0xff]   ;;  %v19670_v61 = vpack.c.bf16 %v16538_v21, %v16534_v60 }
 0x150   :  { %10499 = vmatmul.mubr.bf16.gmra.mrb[28].mxu0 %v22950_v10  ;;  %11331 = vmatmul.mubr.bf16.gmra.mrb[60].mxu1 %v21022_v4  ;;  %v16688_v17 = vld [vmem:[%s29221_s15 + $0xfe0] sm:$0xff]  ;;  %v16555_v60 = vld [vmem:[%s29221_s15 + $0xbb8] sm:$0xff]  ;;  %v16709_v2 = vld [vmem:[%s29221_s15 + $0x1088] sm:$0xff] }
 0x151   :  { %10508 = vmatprep.mubr.bf16.mxu0 %v22985_v50  ;;  %11340 = vmatprep.mubr.bf16.mxu1 %v21023_v29  ;;  %v19744_v1 = vpack.c.bf16 %v16688_v17, %v16684_v25  ;;  %v19749_v25 = vpack.c.bf16 %v16697_v27, %v16693_v56  ;;  %v16542_v29 = vld [vmem:[%s29221_s15 + $0xb50] sm:$0xff] }
 0x152   :  { %11482 = vmatpush1.bf16.msra.mxu1 %v19662_v5  ;;  %10637 = vmatprep.subr.bf16.mxu0 %v19741_v32  ;;  %v16547_v32 = vld [vmem:[%s29221_s15 + $0xb78] sm:$0xff]  ;;  %v23053_v5 = vld [vmem:[%s29516_s27 + $0x2e4] ss:$40 sps:$4 sm:$0xff]   ;;  %v16550_v27 = vld [vmem:[%s29221_s15 + $0xb90] sm:$0xff] }
 0x153   :  { %v23024_v23 = vpop.f32.mrb[28].mxu1  ;;  %11483 = vmatprep.subr.bf16.mxu1 %v19667_v8  ;;  %10638 = vmatpush1.bf16.msra.mxu0 %v19740_v26  ;;  %v16543_v26 = vld [vmem:[%s29221_s15 + $0xb58] sm:$0xff] }
 0x154   :  { %29543 = vst [vmem:[#allocation31_spill] sm:$0xff] %v23024_v23  ;;  %v23035_v6 = vpop.f32.mrb[29].mxu1  ;;  %10639 = vmatprep.subr.bf16.mxu0 %v19745_v44  ;;  %v19675_v17 = vpack.c.bf16 %v16547_v32, %v16543_v26  ;;  %v16546_v44 = vld [vmem:[%s29221_s15 + $0xb70] sm:$0xff]  ;;  %v16704_v23 = vld [vmem:[%s29221_s15 + $0x1060] sm:$0xff] }
 0x155   :  { %29544 = vst [vmem:[#allocation32_spill] sm:$0xff] %v23035_v6  ;;  %v23048_v8 = vpop.f32.mrb[30].mxu1  ;;  %v19674_v21 = vpack.c.bf16 %v16546_v44, %v16542_v29  ;;  %v16554_v26 = vld [vmem:[%s29221_s15 + $0xbb0] sm:$0xff]  ;;  %v16700_v6 = vld [vmem:[%s29221_s15 + $0x1040] sm:$0xff] }
 0x156   :  { %29545 = vst [vmem:[#allocation33_spill] sm:$0xff] %v23048_v8  ;;  %v23055_v4 = vpop.f32.mrb[31].mxu1  ;;  %11484 = vmatpush1.bf16.msra.mxu1 %v19666_v62  ;;  %v16551_v62 = vld [vmem:[%s29221_s15 + $0xb98] sm:$0xff]  ;;  %v23141_v8 = vld [vmem:[%s29516_s27 + $0x384] ss:$40 sps:$4 sm:$0xff]  }
 0x157   :  { %29546 = vst [vmem:[#allocation34_spill] sm:$0xff] %v23055_v4  ;;  %11485 = vmatprep.subr.bf16.mxu1 %v19671_v57  ;;  %10640 = vmatpush1.bf16.msra.mxu0 %v19744_v1  ;;  %v21024_v4 = vld [vmem:[%s29516_s27 + $0x1e8] ss:$40 sps:$4 sm:$0xff]   ;;  %v21025_v57 = vld [vmem:[%s29516_s27 + $0x23c] ss:$40 sps:$4 sm:$0xff]   ;;  %v19679_v56 = vpack.c.bf16 %v16555_v60, %v16551_v62  ;;  %v19678_v62 = vpack.c.bf16 %v16554_v26, %v16550_v27 }
 0x158   :  { %10509 = vmatmul.mubr.bf16.gmra.mrb[32].mxu0 %v23040_v31  ;;  %11341 = vmatmul.mubr.bf16.gmra.mrb[64].mxu1 %v21024_v4  ;;  %v23090_v4 = vld [vmem:[%s29516_s27 + $0x2e0] ss:$40 sps:$4 sm:$0xff]   ;;  %v23103_v29 = vld [vmem:[%s29516_s27 + $0x334] ss:$40 sps:$4 sm:$0xff]  }
 0x159   :  { %10518 = vmatprep.mubr.bf16.mxu0 %v23053_v5  ;;  %11350 = vmatprep.mubr.bf16.mxu1 %v21025_v57  ;;  %v16558_v57 = vld [vmem:[%s29221_s15 + $0xbd0] sm:$0xff] }
 0x15a   :  { %11486 = vmatpush1.bf16.msra.mxu1 %v19670_v61  ;;  %10822 = vmatprep.subr.bf16.mxu0 %v19749_v25  ;;  %v16559_v61 = vld [vmem:[%s29221_s15 + $0xbd8] sm:$0xff]  ;;  %v21027_v27 = vld [vmem:[%s29516_s27 + $0x28c] ss:$40 sps:$4 sm:$0xff]  }
 0x15b   :  { %v23077_v1 = vpop.f32.mrb[32].mxu1  ;;  %11487 = vmatprep.subr.bf16.mxu1 %v19675_v17  ;;  %v16563_v25 = vld [vmem:[%s29221_s15 + $0xbf8] sm:$0xff] }
 0x15c   :  { %29547 = vst [vmem:[#allocation35_spill] sm:$0xff] %v23077_v1  ;;  %v23085_v32 = vpop.f32.mrb[33].mxu1  ;;  %v19683_v60 = vpack.c.bf16 %v16563_v25, %v16559_v61 }
 0x15d   :  { %29548 = vst [vmem:[#allocation36_spill] sm:$0xff] %v23085_v32  ;;  %v23098_v17 = vpop.f32.mrb[34].mxu1  ;;  %v16562_v32 = vld [vmem:[%s29221_s15 + $0xbf0] sm:$0xff] }
 0x15e   :  { %29549 = vst [vmem:[#allocation37_spill] sm:$0xff] %v23098_v17  ;;  %v23105_v44 = vpop.f32.mrb[35].mxu1  ;;  %11488 = vmatpush1.bf16.msra.mxu1 %v19674_v21  ;;  %v21026_v17 = vld [vmem:[%s29516_s27 + $0x238] ss:$40 sps:$4 sm:$0xff]   ;;  %v19682_v26 = vpack.c.bf16 %v16562_v32, %v16558_v57  ;;  %v21028_v32 = vld [vmem:[%s29516_s27 + $0x288] ss:$40 sps:$4 sm:$0xff]  }
 0x15f   :  { %29550 = vst [vmem:[#allocation38_spill] sm:$0xff] %v23105_v44  ;;  %11489 = vmatprep.subr.bf16.mxu1 %v19679_v56  ;;  %v16567_v21 = vld [vmem:[%s29221_s15 + $0xc18] sm:$0xff]  ;;  %v23156_v57 = vld [vmem:[%s29516_s27 + $0x380] ss:$40 sps:$4 sm:$0xff]  }
 0x160   :  { %10519 = vmatmul.mubr.bf16.gmra.mrb[36].mxu0 %v23090_v4  ;;  %11351 = vmatmul.mubr.bf16.gmra.mrb[68].mxu1 %v21026_v17  ;;  %v16571_v56 = vld [vmem:[%s29221_s15 + $0xc38] sm:$0xff] }
 0x161   :  { %10528 = vmatprep.mubr.bf16.mxu0 %v23103_v29  ;;  %11360 = vmatprep.mubr.bf16.mxu1 %v21027_v27  ;;  %v19687_v25 = vpack.c.bf16 %v16571_v56, %v16567_v21  ;;  %v23134_v44 = vld [vmem:[%s29516_s27 + $0x330] ss:$40 sps:$4 sm:$0xff]   ;;  %v23161_v21 = vld [vmem:[%s29516_s27 + $0x3d4] ss:$40 sps:$4 sm:$0xff]  }
 0x162   :  { %11490 = vmatpush1.bf16.msra.mxu1 %v19678_v62  ;;  %v21030_v56 = vld [vmem:[%s29516_s27 + $0x2d8] ss:$40 sps:$4 sm:$0xff]   ;;  %v21031_v27 = vld [vmem:[%s29516_s27 + $0x32c] ss:$40 sps:$4 sm:$0xff]  }
 0x163   :  { %v23127_v61 = vpop.f32.mrb[36].mxu1  ;;  %11491 = vmatprep.subr.bf16.mxu1 %v19683_v60  ;;  %v21029_v60 = vld [vmem:[%s29516_s27 + $0x2dc] ss:$40 sps:$4 sm:$0xff]  }
 0x164   :  { %29551 = vst [vmem:[#allocation39_spill] sm:$0xff] %v23127_v61  ;;  %v23129_v17 = vpop.f32.mrb[37].mxu1 }
 0x165   :  { %29552 = vst [vmem:[#allocation40_spill] sm:$0xff] %v23129_v17  ;;  %v23136_v1 = vpop.f32.mrb[38].mxu1 }
 0x166   :  { %29553 = vst [vmem:[#allocation41_spill] sm:$0xff] %v23136_v1  ;;  %v23143_v62 = vpop.f32.mrb[39].mxu1  ;;  %11492 = vmatpush1.bf16.msra.mxu1 %v19682_v26  ;;  %v23174_v26 = vld [vmem:[%s29516_s27 + $0x3d0] ss:$40 sps:$4 sm:$0xff]   ;;  %v23279_v1 = vld [vmem:[%s29516_s27 + $0x6c] ss:$40 sps:$4 sm:$0xff]  }
 0x167   :  { %29554 = vst [vmem:[#allocation42_spill] sm:$0xff] %v23143_v62  ;;  %11674 = vmatprep.subr.bf16.mxu1 %v19687_v25  ;;  %v23179_v25 = vld [vmem:[%s29516_s27 + $0x424] ss:$40 sps:$4 sm:$0xff]   ;;  %v23268_v62 = vld [vmem:[%s29516_s27 + $0x18] ss:$40 sps:$4 sm:$0xff]  }
 0x168   :  { %10529 = vmatmul.mubr.bf16.gmra.mrb[40].mxu0 %v23134_v44  ;;  %11361 = vmatmul.mubr.bf16.gmra.mrb[72].mxu1 %v21028_v32  ;;  %v21032_v32 = vld [vmem:[%s29516_s27 + $0x328] ss:$40 sps:$4 sm:$0xff]  }
 0x169   :  { %10538 = vmatprep.mubr.bf16.mxu0 %v23141_v8  ;;  %11370 = vmatprep.mubr.bf16.mxu1 %v21029_v60  ;;  %v21033_v60 = vld [vmem:[%s29516_s27 + $0x37c] ss:$40 sps:$4 sm:$0xff]  }
 0x170   :  { %10539 = vmatmul.mubr.bf16.gmra.mrb[44].mxu0 %v23156_v57  ;;  %11371 = vmatmul.mubr.bf16.gmra.mrb[76].mxu1 %v21030_v56  ;;  %v23192_v56 = vld [vmem:[%s29516_s27 + $0x420] ss:$40 sps:$4 sm:$0xff]  }
 0x171   :  { %10548 = vmatprep.mubr.bf16.mxu0 %v23161_v21  ;;  %11380 = vmatprep.mubr.bf16.mxu1 %v21031_v27  ;;  %v23197_v27 = vld [vmem:[%s29516_s27 + $0x474] ss:$40 sps:$4 sm:$0xff]  }
 0x178   :  { %10549 = vmatmul.mubr.bf16.gmra.mrb[48].mxu0 %v23174_v26  ;;  %11381 = vmatmul.mubr.bf16.gmra.mrb[80].mxu1 %v21032_v32  ;;  %v23206_v32 = vld [vmem:[%s29516_s27 + $0x470] ss:$40 sps:$4 sm:$0xff]  }
 0x179   :  { %10558 = vmatprep.mubr.bf16.mxu0 %v23179_v25  ;;  %11390 = vmatprep.mubr.bf16.mxu1 %v21033_v60  ;;  %v23211_v60 = vld [vmem:[%s29516_s27 + $0x4c4] ss:$40 sps:$4 sm:$0xff]  }
 0x180   :  { %10559 = vmatmul.mubr.bf16.gmra.mrb[52].mxu0 %v23192_v56  ;;  %11391 = vmatmul.mubr.bf16.gmra.mrb[84].mxu1 %v22368_v33  ;;  %v23220_v33 = vld [vmem:[%s29516_s27 + $0x4c0] ss:$40 sps:$4 sm:$0xff]  }
 0x181   :  { %10568 = vmatprep.mubr.bf16.mxu0 %v23197_v27  ;;  %11400 = vmatprep.mubr.bf16.mxu1 %v22373_v35  ;;  %v23225_v35 = vld [vmem:[%s29516_s27 + $0x514] ss:$40 sps:$4 sm:$0xff]  }
 0x188   :  { %10569 = vmatmul.mubr.bf16.gmra.mrb[56].mxu0 %v23206_v32  ;;  %11401 = vmatmul.mubr.bf16.gmra.mrb[88].mxu1 %v22386_v37  ;;  %v23234_v37 = vld [vmem:[%s29516_s27 + $0x510] ss:$40 sps:$4 sm:$0xff]  }
 0x189   :  { %10578 = vmatprep.mubr.bf16.mxu0 %v23211_v60  ;;  %11410 = vmatprep.mubr.bf16.mxu1 %v22391_v39  ;;  %v23239_v39 = vld [vmem:[%s29516_s27 + $0x564] ss:$40 sps:$4 sm:$0xff]  }
 0x190   :  { %10579 = vmatmul.mubr.bf16.gmra.mrb[60].mxu0 %v23220_v33  ;;  %11411 = vmatmul.mubr.bf16.gmra.mrb[92].mxu1 %v22404_v42  ;;  %v23248_v42 = vld [vmem:[%s29516_s27 + $0x560] ss:$40 sps:$4 sm:$0xff]  }
 0x191   :  { %10588 = vmatprep.mubr.bf16.mxu0 %v23225_v35  ;;  %11420 = vmatprep.mubr.bf16.mxu1 %v22409_v43  ;;  %v23253_v43 = vld [vmem:[%s29516_s27 + $0x1c] ss:$40 sps:$4 sm:$0xff]  }
 0x198   :  { %10589 = vmatmul.mubr.bf16.gmra.mrb[64].mxu0 %v23234_v37  ;;  %11421 = vmatmul.mubr.bf16.gmra.mrb[96].mxu1 %v22422_v45  ;;  %v16692_v45 = vld [vmem:[%s29221_s15 + $0x1000] sm:$0xff] }
 0x199   :  { %10598 = vmatprep.mubr.bf16.mxu0 %v23239_v39  ;;  %11430 = vmatprep.mubr.bf16.mxu1 %v22427_v46  ;;  %v16696_v46 = vld [vmem:[%s29221_s15 + $0x1020] sm:$0xff] }
 0x19a   :  { %v19748_v17 = vpack.c.bf16 %v16696_v46, %v16692_v45  ;;  %v16713_v45 = vld [vmem:[%s29221_s15 + $0x10a8] sm:$0xff]  ;;  %v19752_v46 = vpack.c.bf16 %v16704_v23, %v16700_v6  ;;  %v23317_v23 = vld [vmem:[%s29516_s27 + $0xbc] ss:$40 sps:$4 sm:$0xff]  }
 0x1a0   :  { %10599 = vmatmul.mubr.bf16.gmra.mrb[68].mxu0 %v23248_v42  ;;  %11431 = vmatmul.mubr.bf16.gmra.mrb[100].mxu1 %v22440_v48  ;;  %v16701_v48 = vld [vmem:[%s29221_s15 + $0x1048] sm:$0xff] }
 0x1a1   :  { %10641 = vmatprep.mubr.bf16.mxu0 %v23253_v43  ;;  %11440 = vmatprep.mubr.bf16.mxu1 %v22445_v49  ;;  %v16705_v49 = vld [vmem:[%s29221_s15 + $0x1068] sm:$0xff] }
 0x1a2   :  { %v19753_v61 = vpack.c.bf16 %v16705_v49, %v16701_v48  ;;  %v19757_v48 = vpack.c.bf16 %v16713_v45, %v16709_v2  ;;  %v16712_v49 = vld [vmem:[%s29221_s15 + $0x10a0] sm:$0xff]  ;;  %v16721_v2 = vld [vmem:[%s29221_s15 + $0x10e8] sm:$0xff] }
 0x1a3   :  { %v16720_v45 = vld [vmem:[%s29221_s15 + $0x10e0] sm:$0xff] }
 0x1a8   :  { %10642 = vmatmul.mubr.bf16.vlgmr.msra.gmra.mrb[0].mxu0 %v23268_v62  ;;  %11441 = vmatmul.mubr.bf16.gmra.mrb[104].mxu1 %v22458_v53  ;;  %v16708_v53 = vld [vmem:[%s29221_s15 + $0x1080] sm:$0xff] }
 0x1a9   :  { %10651 = vmatprep.mubr.bf16.mxu0 %v23279_v1  ;;  %11450 = vmatprep.mubr.bf16.mxu1 %v22463_v55  ;;  %v16717_v55 = vld [vmem:[%s29221_s15 + $0x10c8] sm:$0xff]  ;;  %v19756_v6 = vpack.c.bf16 %v16712_v49, %v16708_v53  ;;  %v16575_v49 = vld [vmem:[%s29221_s15 + $0xc58] sm:$0xff] }
 0x1aa   :  { %10823 = vmatpush1.bf16.msra.mxu0 %v19748_v17  ;;  %v16716_v17 = vld [vmem:[%s29221_s15 + $0x10c0] sm:$0xff] }
 0x1ab   :  { %10824 = vmatprep.subr.bf16.mxu0 %v19753_v61  ;;  %v19761_v61 = vpack.c.bf16 %v16721_v2, %v16717_v55  ;;  %v19760_v53 = vpack.c.bf16 %v16720_v45, %v16716_v17  ;;  %v16579_v55 = vld [vmem:[%s29221_s15 + $0xc78] sm:$0xff]  ;;  %v16728_v17 = vld [vmem:[%s29221_s15 + $0x1120] sm:$0xff] }
 0x1ac   :  { %v23350_v2 = vld [vmem:[%s29516_s27 + $0xb8] ss:$40 sps:$4 sm:$0xff]  }
 0x1ae   :  { %10825 = vmatpush1.bf16.msra.mxu0 %v19752_v46  ;;  %v16729_v46 = vld [vmem:[%s29221_s15 + $0x1128] sm:$0xff] }
 0x1af   :  { %10826 = vmatprep.subr.bf16.mxu0 %v19757_v48  ;;  %v16566_v48 = vld [vmem:[%s29221_s15 + $0xc10] sm:$0xff] }
 0x1b0   :  { %10652 = vmatmul.mubr.bf16.gmra.mrb[4].mxu0 %v23306_v12  ;;  %11451 = vmatmul.mubr.bf16.gmra.mrb[108].mxu1 %v22476_v59  ;;  %v16570_v59 = vld [vmem:[%s29221_s15 + $0xc30] sm:$0xff] }
 0x1b1   :  { %10661 = vmatprep.mubr.bf16.mxu0 %v23317_v23  ;;  %11493 = vmatprep.mubr.bf16.mxu1 %v22481_v54  ;;  %v19765_v54 = vpack.c.bf16 %v16729_v46, %v16725_v40  ;;  %v19686_v45 = vpack.c.bf16 %v16570_v59, %v16566_v48  ;;  %v16733_v40 = vld [vmem:[%s29221_s15 + $0x1148] sm:$0xff]  ;;  %v19691_v46 = vpack.c.bf16 %v16579_v55, %v16575_v49  ;;  %v16578_v48 = vld [vmem:[%s29221_s15 + $0xc70] sm:$0xff]  ;;  %v16583_v59 = vld [vmem:[%s29221_s15 + $0xc98] sm:$0xff] }
 0x1b2   :  { %10827 = vmatpush1.bf16.msra.mxu0 %v19756_v6  ;;  %v16724_v6 = vld [vmem:[%s29221_s15 + $0x1100] sm:$0xff]  ;;  %v19690_v51 = vpack.c.bf16 %v16578_v48, %v16574_v28  ;;  %v16591_v28 = vld [vmem:[%s29221_s15 + $0xcd8] sm:$0xff]  ;;  %v16749_v48 = vld [vmem:[%s29221_s15 + $0x11c8] sm:$0xff] }
 0x1b3   :  { %10828 = vmatprep.subr.bf16.mxu0 %v19761_v61  ;;  %v16737_v61 = vld [vmem:[%s29221_s15 + $0x1168] sm:$0xff]  ;;  %v19764_v63 = vpack.c.bf16 %v16728_v17, %v16724_v6  ;;  %v16732_v55 = vld [vmem:[%s29221_s15 + $0x1140] sm:$0xff]  ;;  %v16582_v6 = vld [vmem:[%s29221_s15 + $0xc90] sm:$0xff] }
 0x1b4   :  { %v19769_v49 = vpack.c.bf16 %v16737_v61, %v16733_v40  ;;  %v16586_v17 = vld [vmem:[%s29221_s15 + $0xcb0] sm:$0xff]  ;;  %v16595_v40 = vld [vmem:[%s29221_s15 + $0xcf8] sm:$0xff]  ;;  %v16740_v61 = vld [vmem:[%s29221_s15 + $0x1180] sm:$0xff] }
 0x1b6   :  { %10829 = vmatpush1.bf16.msra.mxu0 %v19760_v53  ;;  %v16736_v53 = vld [vmem:[%s29221_s15 + $0x1160] sm:$0xff] }
 0x1b7   :  { %10830 = vmatprep.subr.bf16.mxu0 %v19765_v54  ;;  %v23394_v54 = vld [vmem:[%s29516_s27 + $0x108] ss:$40 sps:$4 sm:$0xff]  }
 0x1b8   :  { %10662 = vmatmul.mubr.bf16.gmra.mrb[8].mxu0 %v23350_v2  ;;  %11494 = vmatmul.mubr.bf16.vlgmr.msra.gmra.mrb[40].mxu1 %v22500_v7  ;;  %v19695_v7 = vpack.c.bf16 %v16587_v18, %v16583_v59  ;;  %v16745_v18 = vld [vmem:[%s29221_s15 + $0x11a8] sm:$0xff] }
 0x1b9   :  { %11675 = vmatpush1.bf16.msra.mxu1 %v19686_v45  ;;  %10671 = vmatprep.mubr.bf16.mxu0 %v23361_v52  ;;  %v16741_v45 = vld [vmem:[%s29221_s15 + $0x1188] sm:$0xff] }
 0x1ba   :  { %11503 = vmatprep.mubr.bf16.mxu1 %v22511_v3  ;;  %11676 = vmatprep.subr.bf16.mxu1 %v19691_v46  ;;  %v19768_v3 = vpack.c.bf16 %v16736_v53, %v16732_v55  ;;  %v23423_v46 = vld [vmem:[%s29516_s27 + $0x15c] ss:$40 sps:$4 sm:$0xff]   ;;  %v16753_v59 = vld [vmem:[%s29221_s15 + $0x11e8] sm:$0xff]  ;;  %v19773_v55 = vpack.c.bf16 %v16745_v18, %v16741_v45  ;;  %v19699_v53 = vpack.c.bf16 %v16595_v40, %v16591_v28  ;;  %v16598_v45 = vld [vmem:[%s29221_s15 + $0xd10] sm:$0xff] }
 0x1bb   :  { %10831 = vmatpush1.bf16.msra.mxu0 %v19764_v63  ;;  %v16744_v63 = vld [vmem:[%s29221_s15 + $0x11a0] sm:$0xff]  ;;  %v16602_v18 = vld [vmem:[%s29221_s15 + $0xd30] sm:$0xff] }
 0x1bc   :  { %10832 = vmatprep.subr.bf16.mxu0 %v19769_v49  ;;  %v19694_v49 = vpack.c.bf16 %v16586_v17, %v16582_v6  ;;  %v19772_v22 = vpack.c.bf16 %v16744_v63, %v16740_v61  ;;  %v19777_v6 = vpack.c.bf16 %v16753_v59, %v16749_v48  ;;  %v16748_v17 = vld [vmem:[%s29221_s15 + $0x11c0] sm:$0xff]  ;;  %v16761_v63 = vld [vmem:[%s29221_s15 + $0x1228] sm:$0xff]  ;;  %v16611_v48 = vld [vmem:[%s29221_s15 + $0xd78] sm:$0xff] }
 0x1bd   :  { %11677 = vmatpush1.bf16.msra.mxu1 %v19690_v51  ;;  %v16590_v51 = vld [vmem:[%s29221_s15 + $0xcd0] sm:$0xff]  ;;  %v16752_v28 = vld [vmem:[%s29221_s15 + $0x11e0] sm:$0xff] }
 0x1be   :  { %11678 = vmatprep.subr.bf16.mxu1 %v19695_v7  ;;  %v16603_v7 = vld [vmem:[%s29221_s15 + $0xd38] sm:$0xff]  ;;  %v19776_v61 = vpack.c.bf16 %v16752_v28, %v16748_v17  ;;  %v23485_v59 = vld [vmem:[%s29516_s27 + $0x1ac] ss:$40 sps:$4 sm:$0xff]  }
 0x1bf   :  { %10833 = vmatpush1.bf16.msra.mxu0 %v19768_v3  ;;  %v19698_v3 = vpack.c.bf16 %v16594_v41, %v16590_v51  ;;  %v19703_v40 = vpack.c.bf16 %v16603_v7, %v16599_v38  ;;  %v16757_v41 = vld [vmem:[%s29221_s15 + $0x1208] sm:$0xff]  ;;  %v16756_v38 = vld [vmem:[%s29221_s15 + $0x1200] sm:$0xff]  ;;  %v16610_v17 = vld [vmem:[%s29221_s15 + $0xd70] sm:$0xff] }
 0x1c0   :  { %10672 = vmatmul.mubr.bf16.gmra.mrb[12].mxu0 %v23394_v54  ;;  %11504 = vmatmul.mubr.bf16.gmra.mrb[44].mxu1 %v22546_v34  ;;  %v23456_v34 = vld [vmem:[%s29516_s27 + $0x158] ss:$40 sps:$4 sm:$0xff]   ;;  %v19781_v51 = vpack.c.bf16 %v16761_v63, %v16757_v41  ;;  %v16618_v41 = vld [vmem:[%s29221_s15 + $0xdb0] sm:$0xff] }
 0x1c1   :  { %10681 = vmatprep.mubr.bf16.mxu0 %v23423_v46  ;;  %11513 = vmatprep.mubr.bf16.mxu1 %v22559_v20  ;;  %v16607_v20 = vld [vmem:[%s29221_s15 + $0xd58] sm:$0xff] }
 0x1c2   :  { %11679 = vmatpush1.bf16.msra.mxu1 %v19694_v49  ;;  %10834 = vmatprep.subr.bf16.mxu0 %v19773_v55  ;;  %v16765_v49 = vld [vmem:[%s29221_s15 + $0x1248] sm:$0xff]  ;;  %v19707_v7 = vpack.c.bf16 %v16611_v48, %v16607_v20  ;;  %v16615_v28 = vld [vmem:[%s29221_s15 + $0xd98] sm:$0xff] }
 0x1c3   :  { %11680 = vmatprep.subr.bf16.mxu1 %v19699_v53  ;;  %10835 = vmatpush1.bf16.msra.mxu0 %v19772_v22  ;;  %v16760_v22 = vld [vmem:[%s29221_s15 + $0x1220] sm:$0xff]  ;;  %v16769_v55 = vld [vmem:[%s29221_s15 + $0x1268] sm:$0xff]  ;;  %v19702_v53 = vpack.c.bf16 %v16602_v18, %v16598_v45 }
 0x1c4   :  { %10836 = vmatprep.subr.bf16.mxu0 %v19777_v6  ;;  %v16606_v6 = vld [vmem:[%s29221_s15 + $0xd50] sm:$0xff]  ;;  %v19780_v19 = vpack.c.bf16 %v16760_v22, %v16756_v38  ;;  %v19785_v45 = vpack.c.bf16 %v16769_v55, %v16765_v49  ;;  %v16764_v18 = vld [vmem:[%s29221_s15 + $0x1240] sm:$0xff]  ;;  %v16773_v38 = vld [vmem:[%s29221_s15 + $0x1288] sm:$0xff] }
 0x1c5   :  { %v19706_v20 = vpack.c.bf16 %v16610_v17, %v16606_v6  ;;  %v16777_v22 = vld [vmem:[%s29221_s15 + $0x12a8] sm:$0xff]  ;;  %v16627_v49 = vld [vmem:[%s29221_s15 + $0xdf8] sm:$0xff]  ;;  %v16772_v55 = vld [vmem:[%s29221_s15 + $0x1280] sm:$0xff] }
 0x1c6   :  { %11681 = vmatpush1.bf16.msra.mxu1 %v19698_v3  ;;  %v16619_v3 = vld [vmem:[%s29221_s15 + $0xdb8] sm:$0xff]  ;;  %v19789_v17 = vpack.c.bf16 %v16777_v22, %v16773_v38  ;;  %v16634_v38 = vld [vmem:[%s29221_s15 + $0xe30] sm:$0xff] }
 0x1c7   :  { %11682 = vmatprep.subr.bf16.mxu1 %v19703_v40  ;;  %10837 = vmatpush1.bf16.msra.mxu0 %v19776_v61  ;;  %v16768_v40 = vld [vmem:[%s29221_s15 + $0x1260] sm:$0xff]  ;;  %v16614_v61 = vld [vmem:[%s29221_s15 + $0xd90] sm:$0xff]  ;;  %v19711_v63 = vpack.c.bf16 %v16619_v3, %v16615_v28 }
 0x1c8   :  { %10682 = vmatmul.mubr.bf16.gmra.mrb[16].mxu0 %v23456_v34  ;;  %11514 = vmatmul.mubr.bf16.gmra.mrb[48].mxu1 %v22602_v47  ;;  %v23518_v47 = vld [vmem:[%s29516_s27 + $0x1a8] ss:$40 sps:$4 sm:$0xff]   ;;  %v19784_v48 = vpack.c.bf16 %v16768_v40, %v16764_v18  ;;  %v19710_v6 = vpack.c.bf16 %v16618_v41, %v16614_v61  ;;  %v16631_v18 = vld [vmem:[%s29221_s15 + $0xe18] sm:$0xff]  ;;  %v16780_v41 = vld [vmem:[%s29221_s15 + $0x12c0] sm:$0xff] }
 0x1c9   :  { %10691 = vmatprep.mubr.bf16.mxu0 %v23485_v59  ;;  %11523 = vmatprep.mubr.bf16.mxu1 %v22615_v58  ;;  %v16623_v58 = vld [vmem:[%s29221_s15 + $0xdd8] sm:$0xff]  ;;  %v16622_v3 = vld [vmem:[%s29221_s15 + $0xdd0] sm:$0xff] }
 0x1ca   :  { %11683 = vmatpush1.bf16.msra.mxu1 %v19702_v53  ;;  %10838 = vmatprep.subr.bf16.mxu0 %v19781_v51  ;;  %v23547_v53 = vld [vmem:[%s29516_s27 + $0x1fc] ss:$40 sps:$4 sm:$0xff]   ;;  %v16781_v51 = vld [vmem:[%s29221_s15 + $0x12c8] sm:$0xff]  ;;  %v19715_v28 = vpack.c.bf16 %v16627_v49, %v16623_v58 }
 0x1cb   :  { %11684 = vmatprep.subr.bf16.mxu1 %v19707_v7  ;;  %10839 = vmatpush1.bf16.msra.mxu0 %v19780_v19  ;;  %v16776_v19 = vld [vmem:[%s29221_s15 + $0x12a0] sm:$0xff]  ;;  %v16785_v7 = vld [vmem:[%s29221_s15 + $0x12e8] sm:$0xff] }
 0x1cc   :  { %10840 = vmatprep.subr.bf16.mxu0 %v19785_v45  ;;  %v16626_v45 = vld [vmem:[%s29221_s15 + $0xdf0] sm:$0xff]  ;;  %v19788_v40 = vpack.c.bf16 %v16776_v19, %v16772_v55  ;;  %v19793_v61 = vpack.c.bf16 %v16785_v7, %v16781_v51  ;;  %v16789_v55 = vld [vmem:[%s29221_s15 + $0x1308] sm:$0xff]  ;;  %v16643_v51 = vld [vmem:[%s29221_s15 + $0xe78] sm:$0xff] }
 0x1cd   :  { %v19714_v58 = vpack.c.bf16 %v16626_v45, %v16622_v3  ;;  %v16793_v19 = vld [vmem:[%s29221_s15 + $0x1328] sm:$0xff]  ;;  %v16788_v7 = vld [vmem:[%s29221_s15 + $0x1300] sm:$0xff] }
 0x1ce   :  { %11685 = vmatpush1.bf16.msra.mxu1 %v19706_v20  ;;  %v16635_v20 = vld [vmem:[%s29221_s15 + $0xe38] sm:$0xff]  ;;  %v16801_v3 = vld [vmem:[%s29221_s15 + $0x1368] sm:$0xff] }
 0x1cf   :  { %11686 = vmatprep.subr.bf16.mxu1 %v19711_v63  ;;  %10841 = vmatpush1.bf16.msra.mxu0 %v19784_v48  ;;  %v16784_v63 = vld [vmem:[%s29221_s15 + $0x12e0] sm:$0xff]  ;;  %v16630_v48 = vld [vmem:[%s29221_s15 + $0xe10] sm:$0xff]  ;;  %v19719_v22 = vpack.c.bf16 %v16635_v20, %v16631_v18  ;;  %v19797_v18 = vpack.c.bf16 %v16793_v19, %v16789_v55 }
 0x1d0   :  { %10692 = vmatmul.mubr.bf16.gmra.mrb[20].mxu0 %v23518_v47  ;;  %11524 = vmatmul.mubr.bf16.gmra.mrb[52].mxu1 %v22654_v13  ;;  %v23580_v13 = vld [vmem:[%s29516_s27 + $0x1f8] ss:$40 sps:$4 sm:$0xff]   ;;  %v19792_v49 = vpack.c.bf16 %v16784_v63, %v16780_v41  ;;  %v19718_v45 = vpack.c.bf16 %v16634_v38, %v16630_v48  ;;  %v16638_v20 = vld [vmem:[%s29221_s15 + $0xe50] sm:$0xff] }
 0x1d1   :  { %10701 = vmatprep.mubr.bf16.mxu0 %v23547_v53  ;;  %11533 = vmatprep.mubr.bf16.mxu1 %v22689_v24  ;;  %v16639_v24 = vld [vmem:[%s29221_s15 + $0xe58] sm:$0xff]  ;;  %v16796_v38 = vld [vmem:[%s29221_s15 + $0x1340] sm:$0xff]  ;;  %v16650_v55 = vld [vmem:[%s29221_s15 + $0xeb0] sm:$0xff] }
 0x1d2   :  { %11687 = vmatpush1.bf16.msra.mxu1 %v19710_v6  ;;  %10842 = vmatprep.subr.bf16.mxu0 %v19789_v17  ;;  %v16792_v6 = vld [vmem:[%s29221_s15 + $0x1320] sm:$0xff]  ;;  %v23609_v17 = vld [vmem:[%s29516_s27 + $0x24c] ss:$40 sps:$4 sm:$0xff]   ;;  %v16647_v41 = vld [vmem:[%s29221_s15 + $0xe98] sm:$0xff] }
 0x1d3   :  { %11688 = vmatprep.subr.bf16.mxu1 %v19715_v28  ;;  %10843 = vmatpush1.bf16.msra.mxu0 %v19788_v40  ;;  %v16797_v28 = vld [vmem:[%s29221_s15 + $0x1348] sm:$0xff]  ;;  %v19723_v40 = vpack.c.bf16 %v16643_v51, %v16639_v24  ;;  %v19796_v63 = vpack.c.bf16 %v16792_v6, %v16788_v7 }
 0x1d4   :  { %10844 = vmatprep.subr.bf16.mxu0 %v19793_v61  ;;  %v16642_v61 = vld [vmem:[%s29221_s15 + $0xe70] sm:$0xff]  ;;  %v19801_v48 = vpack.c.bf16 %v16801_v3, %v16797_v28  ;;  %v16805_v7 = vld [vmem:[%s29221_s15 + $0x1388] sm:$0xff]  ;;  %v16659_v28 = vld [vmem:[%s29221_s15 + $0xef8] sm:$0xff] }
 0x1d5   :  { %v19722_v24 = vpack.c.bf16 %v16642_v61, %v16638_v20  ;;  %v16809_v6 = vld [vmem:[%s29221_s15 + $0x13a8] sm:$0xff]  ;;  %v16804_v3 = vld [vmem:[%s29221_s15 + $0x1380] sm:$0xff] }
 0x1d6   :  { %11689 = vmatpush1.bf16.msra.mxu1 %v19714_v58  ;;  %v16651_v58 = vld [vmem:[%s29221_s15 + $0xeb8] sm:$0xff]  ;;  %v16817_v20 = vld [vmem:[%s29221_s15 + $0x13e8] sm:$0xff] }
 0x1d7   :  { %11690 = vmatprep.subr.bf16.mxu1 %v19719_v22  ;;  %10845 = vmatpush1.bf16.msra.mxu0 %v19792_v49  ;;  %v16800_v22 = vld [vmem:[%s29221_s15 + $0x1360] sm:$0xff]  ;;  %v16646_v49 = vld [vmem:[%s29221_s15 + $0xe90] sm:$0xff]  ;;  %v19727_v19 = vpack.c.bf16 %v16651_v58, %v16647_v41  ;;  %v19805_v41 = vpack.c.bf16 %v16809_v6, %v16805_v7 }
 0x1d8   :  { %10702 = vmatmul.mubr.bf16.gmra.mrb[24].mxu0 %v23580_v13  ;;  %11534 = vmatmul.mubr.bf16.gmra.mrb[56].mxu1 %v22728_v9  ;;  %v23642_v9 = vld [vmem:[%s29516_s27 + $0x248] ss:$40 sps:$4 sm:$0xff]   ;;  %v19800_v51 = vpack.c.bf16 %v16800_v22, %v16796_v38  ;;  %v19726_v61 = vpack.c.bf16 %v16650_v55, %v16646_v49  ;;  %v16663_v38 = vld [vmem:[%s29221_s15 + $0xf18] sm:$0xff]  ;;  %v16812_v55 = vld [vmem:[%s29221_s15 + $0x13c0] sm:$0xff] }
 0x1d9   :  { %10711 = vmatprep.mubr.bf16.mxu0 %v23609_v17  ;;  %11543 = vmatprep.mubr.bf16.mxu1 %v22763_v36  ;;  %v16655_v36 = vld [vmem:[%s29221_s15 + $0xed8] sm:$0xff]  ;;  %v16654_v58 = vld [vmem:[%s29221_s15 + $0xed0] sm:$0xff] }
 0x1da   :  { %11691 = vmatpush1.bf16.msra.mxu1 %v19718_v45  ;;  %10846 = vmatprep.subr.bf16.mxu0 %v19797_v18  ;;  %v16808_v45 = vld [vmem:[%s29221_s15 + $0x13a0] sm:$0xff]  ;;  %v16666_v7 = vld [vmem:[%s29221_s15 + $0xf30] sm:$0xff] }
 0x1db   :  { %11692 = vmatprep.subr.bf16.mxu1 %v19723_v40  ;;  %10847 = vmatpush1.bf16.msra.mxu0 %v19796_v63  ;;  %v23671_v18 = vld [vmem:[%s29516_s27 + $0x29c] ss:$40 sps:$4 sm:$0xff]   ;;  %v16813_v40 = vld [vmem:[%s29221_s15 + $0x13c8] sm:$0xff]  ;;  %v19731_v63 = vpack.c.bf16 %v16659_v28, %v16655_v36  ;;  %v19804_v22 = vpack.c.bf16 %v16808_v45, %v16804_v3  ;;  %v23710_v28 = vld [vmem:[%s29516_s27 + $0x298] ss:$40 sps:$4 sm:$0xff]  }
 0x1dc   :  { %10848 = vmatprep.subr.bf16.mxu0 %v19801_v48  ;;  %v16658_v48 = vld [vmem:[%s29221_s15 + $0xef0] sm:$0xff]  ;;  %v19809_v49 = vpack.c.bf16 %v16817_v20, %v16813_v40  ;;  %v16675_v3 = vld [vmem:[%s29221_s15 + $0xf78] sm:$0xff] }
 0x1dd   :  { %v19730_v36 = vpack.c.bf16 %v16658_v48, %v16654_v58  ;;  %v23721_v45 = vld [vmem:[%s29516_s27 + $0x2ec] ss:$40 sps:$4 sm:$0xff]   ;;  %v16683_v58 = vld [vmem:[%s29221_s15 + $0xfb8] sm:$0xff] }
 0x1de   :  { %11693 = vmatpush1.bf16.msra.mxu1 %v19722_v24  ;;  %v16667_v24 = vld [vmem:[%s29221_s15 + $0xf38] sm:$0xff] }
 0x1df   :  { %11694 = vmatprep.subr.bf16.mxu1 %v19727_v19  ;;  %10849 = vmatpush1.bf16.msra.mxu0 %v19800_v51  ;;  %v16816_v19 = vld [vmem:[%s29221_s15 + $0x13e0] sm:$0xff]  ;;  %v16662_v51 = vld [vmem:[%s29221_s15 + $0xf10] sm:$0xff] }
 0x1e0   :  { %10712 = vmatmul.mubr.bf16.gmra.mrb[28].mxu0 %v23642_v9  ;;  %11544 = vmatmul.mubr.bf16.gmra.mrb[60].mxu1 %v22802_v11  ;;  %v19735_v11 = vpack.c.bf16 %v16667_v24, %v16663_v38  ;;  %v19808_v6 = vpack.c.bf16 %v16816_v19, %v16812_v55  ;;  %v19734_v40 = vpack.c.bf16 %v16666_v7, %v16662_v51  ;;  %v23748_v24 = vld [vmem:[%s29516_s27 + $0x2e8] ss:$40 sps:$4 sm:$0xff]   ;;  %v23759_v55 = vld [vmem:[%s29516_s27 + $0x33c] ss:$40 sps:$4 sm:$0xff]  }
 0x1e1   :  { %10721 = vmatprep.mubr.bf16.mxu0 %v23671_v18  ;;  %11553 = vmatprep.mubr.bf16.mxu1 %v22837_v0  ;;  %v16671_v0 = vld [vmem:[%s29221_s15 + $0xf58] sm:$0xff]  ;;  %v16690_v51 = vld [vmem:[%s29221_s15 + $0xff0] sm:$0xff] }
 0x1e2   :  { %11695 = vmatpush1.bf16.msra.mxu1 %v19726_v61  ;;  %10850 = vmatprep.subr.bf16.mxu0 %v19805_v41  ;;  %v19739_v20 = vpack.c.bf16 %v16675_v3, %v16671_v0  ;;  %v16670_v61 = vld [vmem:[%s29221_s15 + $0xf50] sm:$0xff]  ;;  %v16695_v7 = vld [vmem:[%s29221_s15 + $0x1018] sm:$0xff] }
 0x1e3   :  { %11696 = vmatprep.subr.bf16.mxu1 %v19731_v63  ;;  %10851 = vmatpush1.bf16.msra.mxu0 %v19804_v22  ;;  %v16674_v41 = vld [vmem:[%s29221_s15 + $0xf70] sm:$0xff]  ;;  %v16679_v63 = vld [vmem:[%s29221_s15 + $0xf98] sm:$0xff] }
 0x1e4   :  { %10852 = vmatprep.subr.bf16.mxu0 %v19809_v49  ;;  %v19738_v48 = vpack.c.bf16 %v16674_v41, %v16670_v61  ;;  %v19743_v38 = vpack.c.bf16 %v16683_v58, %v16679_v63  ;;  %v16682_v22 = vld [vmem:[%s29221_s15 + $0xfb0] sm:$0xff]  ;;  %v16691_v49 = vld [vmem:[%s29221_s15 + $0xff8] sm:$0xff] }
 0x1e5   :  { %v16703_v61 = vld [vmem:[%s29221_s15 + $0x1058] sm:$0xff] }
 0x1e6   :  { %11697 = vmatpush1.bf16.msra.mxu1 %v19730_v36  ;;  %v23937_v63 = vld [vmem:[%s29516_s27 + $0x114] ss:$40 sps:$4 sm:$0xff]  }
 0x1e7   :  { %11698 = vmatprep.subr.bf16.mxu1 %v19735_v11  ;;  %10853 = vmatpush1.bf16.msra.mxu0 %v19808_v6  ;;  %v16686_v11 = vld [vmem:[%s29221_s15 + $0xfd0] sm:$0xff]  ;;  %v16699_v6 = vld [vmem:[%s29221_s15 + $0x1038] sm:$0xff] }
 0x1e8   :  { %10722 = vmatmul.mubr.bf16.gmra.mrb[32].mxu0 %v23710_v28  ;;  %11554 = vmatmul.mubr.bf16.gmra.mrb[64].mxu1 %v22876_v30  ;;  %v16678_v30 = vld [vmem:[%s29221_s15 + $0xf90] sm:$0xff]  ;;  %v19746_v0 = vpack.c.bf16 %v16690_v51, %v16686_v11  ;;  %v19751_v3 = vpack.c.bf16 %v16699_v6, %v16695_v7  ;;  %v16719_v11 = vld [vmem:[%s29221_s15 + $0x10d8] sm:$0xff]  ;;  %v23975_v51 = vld [vmem:[%s29516_s27 + $0x164] ss:$40 sps:$4 sm:$0xff]  }
 0x1e9   :  { %10731 = vmatprep.mubr.bf16.mxu0 %v23721_v45  ;;  %11563 = vmatprep.mubr.bf16.mxu1 %v22911_v14  ;;  %v16687_v14 = vld [vmem:[%s29221_s15 + $0xfd8] sm:$0xff]  ;;  %v19742_v19 = vpack.c.bf16 %v16682_v22, %v16678_v30 }
 0x1ea   :  { %11699 = vmatpush1.bf16.msra.mxu1 %v19734_v40  ;;  %v19747_v36 = vpack.c.bf16 %v16691_v49, %v16687_v14  ;;  %v23785_v40 = vld [vmem:[%s29516_s27 + $0x38c] ss:$40 sps:$4 sm:$0xff]   ;;  %v16711_v30 = vld [vmem:[%s29221_s15 + $0x1098] sm:$0xff] }
 0x1eb   :  { %11700 = vmatprep.subr.bf16.mxu1 %v19739_v20  ;;  %v23799_v20 = vld [vmem:[%s29516_s27 + $0x3dc] ss:$40 sps:$4 sm:$0xff]  }
 0x1ec   :  { %v16715_v22 = vld [vmem:[%s29221_s15 + $0x10b8] sm:$0xff] }
 0x1ed   :  { %v19759_v49 = vpack.c.bf16 %v16715_v22, %v16711_v30 }
 0x1ee   :  { %11701 = vmatpush1.bf16.msra.mxu1 %v19738_v48  ;;  %v16702_v48 = vld [vmem:[%s29221_s15 + $0x1050] sm:$0xff] }
 0x1ef   :  { %11702 = vmatprep.subr.bf16.mxu1 %v19743_v38  ;;  %v16706_v38 = vld [vmem:[%s29221_s15 + $0x1070] sm:$0xff] }
 0x1f0   :  { %10732 = vmatmul.mubr.bf16.gmra.mrb[36].mxu0 %v23748_v24  ;;  %11564 = vmatmul.mubr.bf16.gmra.mrb[68].mxu1 %v22950_v10  ;;  %v23780_v10 = vld [vmem:[%s29516_s27 + $0x338] ss:$40 sps:$4 sm:$0xff]   ;;  %v19754_v14 = vpack.c.bf16 %v16706_v38, %v16702_v48  ;;  %v24013_v38 = vld [vmem:[%s29516_s27 + $0x1b4] ss:$40 sps:$4 sm:$0xff]  }
 0x1f1   :  { %10741 = vmatprep.mubr.bf16.mxu0 %v23759_v55  ;;  %11573 = vmatprep.mubr.bf16.mxu1 %v22985_v50  ;;  %v23794_v50 = vld [vmem:[%s29516_s27 + $0x388] ss:$40 sps:$4 sm:$0xff]   ;;  %v16739_v48 = vld [vmem:[%s29221_s15 + $0x1178] sm:$0xff] }
 0x1f2   :  { %11703 = vmatpush1.bf16.msra.mxu1 %v19742_v19  ;;  %v16710_v19 = vld [vmem:[%s29221_s15 + $0x1090] sm:$0xff] }
 0x1f3   :  { %11704 = vmatprep.subr.bf16.mxu1 %v19747_v36  ;;  %v16714_v36 = vld [vmem:[%s29221_s15 + $0x10b0] sm:$0xff] }
 0x1f4   :  { %v19758_v7 = vpack.c.bf16 %v16714_v36, %v16710_v19  ;;  %v16743_v19 = vld [vmem:[%s29221_s15 + $0x1198] sm:$0xff] }
 0x1f5   :  { %v16747_v36 = vld [vmem:[%s29221_s15 + $0x11b8] sm:$0xff] }
 0x1f6   :  { %11705 = vmatpush1.bf16.msra.mxu1 %v19746_v0  ;;  %v16718_v0 = vld [vmem:[%s29221_s15 + $0x10d0] sm:$0xff] }
 0x1f7   :  { %11887 = vmatprep.subr.bf16.mxu1 %v19751_v3  ;;  %v16722_v3 = vld [vmem:[%s29221_s15 + $0x10f0] sm:$0xff] }
 0x1f8   :  { %10742 = vmatmul.mubr.bf16.gmra.mrb[40].mxu0 %v23780_v10  ;;  %11574 = vmatmul.mubr.bf16.gmra.mrb[72].mxu1 %v23040_v31  ;;  %v23808_v31 = vld [vmem:[%s29516_s27 + $0x3d8] ss:$40 sps:$4 sm:$0xff]  }
 0x1f9   :  { %10751 = vmatprep.mubr.bf16.mxu0 %v23785_v40  ;;  %11583 = vmatprep.mubr.bf16.mxu1 %v23053_v5  ;;  %v23813_v5 = vld [vmem:[%s29516_s27 + $0x42c] ss:$40 sps:$4 sm:$0xff]  }
 0x200   :  { %10752 = vmatmul.mubr.bf16.gmra.mrb[44].mxu0 %v23794_v50  ;;  %11584 = vmatmul.mubr.bf16.gmra.mrb[76].mxu1 %v23090_v4  ;;  %v23822_v4 = vld [vmem:[%s29516_s27 + $0x428] ss:$40 sps:$4 sm:$0xff]  }
 0x201   :  { %10761 = vmatprep.mubr.bf16.mxu0 %v23799_v20  ;;  %11593 = vmatprep.mubr.bf16.mxu1 %v23103_v29  ;;  %v23827_v29 = vld [vmem:[%s29516_s27 + $0x47c] ss:$40 sps:$4 sm:$0xff]  }
 0x208   :  { %10762 = vmatmul.mubr.bf16.gmra.mrb[48].mxu0 %v23808_v31  ;;  %11594 = vmatmul.mubr.bf16.gmra.mrb[80].mxu1 %v23134_v44  ;;  %v23841_v44 = vld [vmem:[%s29516_s27 + $0x4cc] ss:$40 sps:$4 sm:$0xff]  }
 0x209   :  { %10771 = vmatprep.mubr.bf16.mxu0 %v23813_v5  ;;  %11603 = vmatprep.mubr.bf16.mxu1 %v23141_v8  ;;  %v23836_v8 = vld [vmem:[%s29516_s27 + $0x478] ss:$40 sps:$4 sm:$0xff]  }
 0x210   :  { %10772 = vmatmul.mubr.bf16.gmra.mrb[52].mxu0 %v23822_v4  ;;  %11604 = vmatmul.mubr.bf16.gmra.mrb[84].mxu1 %v23156_v57  ;;  %v23850_v57 = vld [vmem:[%s29516_s27 + $0x4c8] ss:$40 sps:$4 sm:$0xff]  }
 0x211   :  { %10781 = vmatprep.mubr.bf16.mxu0 %v23827_v29  ;;  %11613 = vmatprep.mubr.bf16.mxu1 %v23161_v21  ;;  %v23855_v21 = vld [vmem:[%s29516_s27 + $0x51c] ss:$40 sps:$4 sm:$0xff]  }
 0x218   :  { %10782 = vmatmul.mubr.bf16.gmra.mrb[56].mxu0 %v23836_v8  ;;  %11614 = vmatmul.mubr.bf16.gmra.mrb[88].mxu1 %v23174_v26  ;;  %v23864_v26 = vld [vmem:[%s29516_s27 + $0x518] ss:$40 sps:$4 sm:$0xff]  }
 0x219   :  { %10791 = vmatprep.mubr.bf16.mxu0 %v23841_v44  ;;  %11623 = vmatprep.mubr.bf16.mxu1 %v23179_v25  ;;  %v23869_v25 = vld [vmem:[%s29516_s27 + $0x56c] ss:$40 sps:$4 sm:$0xff]  }
 0x220   :  { %10792 = vmatmul.mubr.bf16.gmra.mrb[60].mxu0 %v23850_v57  ;;  %11624 = vmatmul.mubr.bf16.gmra.mrb[92].mxu1 %v23192_v56  ;;  %v23878_v56 = vld [vmem:[%s29516_s27 + $0x568] ss:$40 sps:$4 sm:$0xff]  }
 0x221   :  { %10801 = vmatprep.mubr.bf16.mxu0 %v23855_v21  ;;  %11633 = vmatprep.mubr.bf16.mxu1 %v23197_v27  ;;  %v23883_v27 = vld [vmem:[%s29516_s27 + $0x24] ss:$40 sps:$4 sm:$0xff]  }
 0x228   :  { %10802 = vmatmul.mubr.bf16.gmra.mrb[64].mxu0 %v23864_v26  ;;  %11634 = vmatmul.mubr.bf16.gmra.mrb[96].mxu1 %v23206_v32  ;;  %v23892_v32 = vld [vmem:[%s29516_s27 + $0x20] ss:$40 sps:$4 sm:$0xff]  }
 0x229   :  { %10811 = vmatprep.mubr.bf16.mxu0 %v23869_v25  ;;  %11643 = vmatprep.mubr.bf16.mxu1 %v23211_v60  ;;  %v23897_v60 = vld [vmem:[%s29516_s27 + $0x74] ss:$40 sps:$4 sm:$0xff]  }
 0x230   :  { %10812 = vmatmul.mubr.bf16.gmra.mrb[68].mxu0 %v23878_v56  ;;  %11644 = vmatmul.mubr.bf16.gmra.mrb[100].mxu1 %v23220_v33  ;;  %v23906_v33 = vld [vmem:[%s29516_s27 + $0x70] ss:$40 sps:$4 sm:$0xff]  }
 0x231   :  { %10854 = vmatprep.mubr.bf16.mxu0 %v23883_v27  ;;  %11653 = vmatprep.mubr.bf16.mxu1 %v23225_v35  ;;  %v23911_v35 = vld [vmem:[%s29516_s27 + $0xc4] ss:$40 sps:$4 sm:$0xff]  }
 0x238   :  { %10855 = vmatmul.mubr.bf16.vlgmr.msra.gmra.mrb[0].mxu0 %v23892_v32  ;;  %11654 = vmatmul.mubr.bf16.gmra.mrb[104].mxu1 %v23234_v37  ;;  %v16694_v37 = vld [vmem:[%s29221_s15 + $0x1010] sm:$0xff] }
 0x239   :  { %10864 = vmatprep.mubr.bf16.mxu0 %v23897_v60  ;;  %11663 = vmatprep.mubr.bf16.mxu1 %v23239_v39  ;;  %v16698_v39 = vld [vmem:[%s29221_s15 + $0x1030] sm:$0xff] }
 0x23a   :  { %v19750_v41 = vpack.c.bf16 %v16698_v39, %v16694_v37  ;;  %v16727_v37 = vld [vmem:[%s29221_s15 + $0x1118] sm:$0xff] }
 0x23b   :  { %v16731_v39 = vld [vmem:[%s29221_s15 + $0x1138] sm:$0xff] }
 0x240   :  { %10865 = vmatmul.mubr.bf16.gmra.mrb[4].mxu0 %v23906_v33  ;;  %11664 = vmatmul.mubr.bf16.gmra.mrb[108].mxu1 %v23248_v42  ;;  %v16707_v42 = vld [vmem:[%s29221_s15 + $0x1078] sm:$0xff] }
 0x241   :  { %10874 = vmatprep.mubr.bf16.mxu0 %v23911_v35  ;;  %11706 = vmatprep.mubr.bf16.mxu1 %v23253_v43  ;;  %v23932_v43 = vld [vmem:[%s29516_s27 + $0xc0] ss:$40 sps:$4 sm:$0xff]   ;;  %v19755_v58 = vpack.c.bf16 %v16707_v42, %v16703_v61  ;;  %v19762_v61 = vpack.c.bf16 %v16722_v3, %v16718_v0  ;;  %v19767_v42 = vpack.c.bf16 %v16731_v39, %v16727_v37  ;;  %v16755_v0 = vld [vmem:[%s29221_s15 + $0x11f8] sm:$0xff]  ;;  %v24051_v3 = vld [vmem:[%s29516_s27 + $0x204] ss:$40 sps:$4 sm:$0xff]  }
 0x248   :  { %10875 = vmatmul.mubr.bf16.gmra.mrb[8].mxu0 %v23932_v43  ;;  %11707 = vmatmul.mubr.bf16.vlgmr.msra.gmra.mrb[40].mxu1 %v23268_v62  ;;  %v23964_v62 = vld [vmem:[%s29516_s27 + $0x110] ss:$40 sps:$4 sm:$0xff]  }
 0x249   :  { %11888 = vmatpush1.bf16.msra.mxu1 %v19750_v41  ;;  %10884 = vmatprep.mubr.bf16.mxu0 %v23937_v63  ;;  %v16730_v41 = vld [vmem:[%s29221_s15 + $0x1130] sm:$0xff] }
 0x24a   :  { %11716 = vmatprep.mubr.bf16.mxu1 %v23279_v1  ;;  %11889 = vmatprep.subr.bf16.mxu1 %v19755_v58  ;;  %v16723_v1 = vld [vmem:[%s29221_s15 + $0x10f8] sm:$0xff]  ;;  %v24002_v58 = vld [vmem:[%s29516_s27 + $0x160] ss:$40 sps:$4 sm:$0xff]  }
 0x24b   :  { %v19763_v6 = vpack.c.bf16 %v16723_v1, %v16719_v11  ;;  %v19775_v1 = vpack.c.bf16 %v16747_v36, %v16743_v19 }
 0x24d   :  { %11890 = vmatpush1.bf16.msra.mxu1 %v19754_v14  ;;  %v16734_v14 = vld [vmem:[%s29221_s15 + $0x1150] sm:$0xff] }
 0x24e   :  { %11891 = vmatprep.subr.bf16.mxu1 %v19759_v49  ;;  %v16738_v49 = vld [vmem:[%s29221_s15 + $0x1170] sm:$0xff] }
 0x24f   :  { %v19770_v11 = vpack.c.bf16 %v16738_v49, %v16734_v14  ;;  %v16771_v14 = vld [vmem:[%s29221_s15 + $0x1278] sm:$0xff] }
 0x250   :  { %10885 = vmatmul.mubr.bf16.gmra.mrb[12].mxu0 %v23964_v62  ;;  %11717 = vmatmul.mubr.bf16.gmra.mrb[44].mxu1 %v23306_v12  ;;  %v16726_v12 = vld [vmem:[%s29221_s15 + $0x1110] sm:$0xff] }
 0x251   :  { %10894 = vmatprep.mubr.bf16.mxu0 %v23975_v51  ;;  %11726 = vmatprep.mubr.bf16.mxu1 %v23317_v23  ;;  %v16735_v23 = vld [vmem:[%s29221_s15 + $0x1158] sm:$0xff]  ;;  %v19766_v30 = vpack.c.bf16 %v16730_v41, %v16726_v12 }
 0x252   :  { %11892 = vmatpush1.bf16.msra.mxu1 %v19758_v7  ;;  %v19771_v22 = vpack.c.bf16 %v16739_v48, %v16735_v23  ;;  %v16746_v7 = vld [vmem:[%s29221_s15 + $0x11b0] sm:$0xff]  ;;  %v16759_v12 = vld [vmem:[%s29221_s15 + $0x1218] sm:$0xff] }
 0x253   :  { %11893 = vmatprep.subr.bf16.mxu1 %v19763_v6  ;;  %v24040_v6 = vld [vmem:[%s29516_s27 + $0x1b0] ss:$40 sps:$4 sm:$0xff]   ;;  %v24089_v49 = vld [vmem:[%s29516_s27 + $0x254] ss:$40 sps:$4 sm:$0xff]  }
 0x254   :  { %v16763_v41 = vld [vmem:[%s29221_s15 + $0x1238] sm:$0xff] }
 0x255   :  { %v19783_v48 = vpack.c.bf16 %v16763_v41, %v16759_v12 }
 0x256   :  { %11894 = vmatpush1.bf16.msra.mxu1 %v19762_v61  ;;  %v16750_v61 = vld [vmem:[%s29221_s15 + $0x11d0] sm:$0xff] }
 0x257   :  { %11895 = vmatprep.subr.bf16.mxu1 %v19767_v42  ;;  %v16754_v42 = vld [vmem:[%s29221_s15 + $0x11f0] sm:$0xff] }
 0x258   :  { %10895 = vmatmul.mubr.bf16.gmra.mrb[16].mxu0 %v24002_v58  ;;  %11727 = vmatmul.mubr.bf16.gmra.mrb[48].mxu1 %v23350_v2  ;;  %v16742_v2 = vld [vmem:[%s29221_s15 + $0x1190] sm:$0xff]  ;;  %v19778_v23 = vpack.c.bf16 %v16754_v42, %v16750_v61  ;;  %v16787_v61 = vld [vmem:[%s29221_s15 + $0x12f8] sm:$0xff]  ;;  %v24127_v42 = vld [vmem:[%s29516_s27 + $0x2a4] ss:$40 sps:$4 sm:$0xff]  }
 0x259   :  { %10904 = vmatprep.mubr.bf16.mxu0 %v24013_v38  ;;  %11736 = vmatprep.mubr.bf16.mxu1 %v23361_v52  ;;  %v16751_v52 = vld [vmem:[%s29221_s15 + $0x11d8] sm:$0xff]  ;;  %v19774_v37 = vpack.c.bf16 %v16746_v7, %v16742_v2 }
 0x25a   :  { %11896 = vmatpush1.bf16.msra.mxu1 %v19766_v30  ;;  %v19779_v39 = vpack.c.bf16 %v16755_v0, %v16751_v52  ;;  %v16762_v30 = vld [vmem:[%s29221_s15 + $0x1230] sm:$0xff]  ;;  %v16775_v2 = vld [vmem:[%s29221_s15 + $0x1298] sm:$0xff] }
 0x25b   :  { %11897 = vmatprep.subr.bf16.mxu1 %v19771_v22  ;;  %v24078_v22 = vld [vmem:[%s29516_s27 + $0x200] ss:$40 sps:$4 sm:$0xff]   ;;  %v16779_v7 = vld [vmem:[%s29221_s15 + $0x12b8] sm:$0xff] }
 0x25c   :  { %v19791_v0 = vpack.c.bf16 %v16779_v7, %v16775_v2 }
 0x25e   :  { %11898 = vmatpush1.bf16.msra.mxu1 %v19770_v11  ;;  %v16766_v11 = vld [vmem:[%s29221_s15 + $0x1250] sm:$0xff] }
 0x25f   :  { %11899 = vmatprep.subr.bf16.mxu1 %v19775_v1  ;;  %v16770_v1 = vld [vmem:[%s29221_s15 + $0x1270] sm:$0xff] }
 0x260   :  { %10905 = vmatmul.mubr.bf16.gmra.mrb[20].mxu0 %v24040_v6  ;;  %11737 = vmatmul.mubr.bf16.gmra.mrb[52].mxu1 %v23394_v54  ;;  %v16758_v54 = vld [vmem:[%s29221_s15 + $0x1210] sm:$0xff]  ;;  %v19786_v52 = vpack.c.bf16 %v16770_v1, %v16766_v11  ;;  %v16803_v11 = vld [vmem:[%s29221_s15 + $0x1378] sm:$0xff] }
 0x261   :  { %10914 = vmatprep.mubr.bf16.mxu0 %v24051_v3  ;;  %11746 = vmatprep.mubr.bf16.mxu1 %v23423_v46  ;;  %v16767_v46 = vld [vmem:[%s29221_s15 + $0x1258] sm:$0xff]  ;;  %v19782_v19 = vpack.c.bf16 %v16762_v30, %v16758_v54 }
 0x262   :  { %11900 = vmatpush1.bf16.msra.mxu1 %v19774_v37  ;;  %v19787_v36 = vpack.c.bf16 %v16771_v14, %v16767_v46  ;;  %v16778_v37 = vld [vmem:[%s29221_s15 + $0x12b0] sm:$0xff]  ;;  %v16791_v54 = vld [vmem:[%s29221_s15 + $0x1318] sm:$0xff] }
 0x263   :  { %11901 = vmatprep.subr.bf16.mxu1 %v19779_v39  ;;  %v24116_v39 = vld [vmem:[%s29516_s27 + $0x250] ss:$40 sps:$4 sm:$0xff]   ;;  %v24165_v1 = vld [vmem:[%s29516_s27 + $0x2f4] ss:$40 sps:$4 sm:$0xff]  }
 0x264   :  { %v16795_v30 = vld [vmem:[%s29221_s15 + $0x1338] sm:$0xff] }
 0x265   :  { %v19799_v14 = vpack.c.bf16 %v16795_v30, %v16791_v54 }
 0x266   :  { %11902 = vmatpush1.bf16.msra.mxu1 %v19778_v23  ;;  %v16782_v23 = vld [vmem:[%s29221_s15 + $0x12d0] sm:$0xff] }
 0x267   :  { %11903 = vmatprep.subr.bf16.mxu1 %v19783_v48  ;;  %v16786_v48 = vld [vmem:[%s29221_s15 + $0x12f0] sm:$0xff] }
 0x268   :  { %10915 = vmatmul.mubr.bf16.gmra.mrb[24].mxu0 %v24078_v22  ;;  %11747 = vmatmul.mubr.bf16.gmra.mrb[56].mxu1 %v23456_v34  ;;  %v16774_v34 = vld [vmem:[%s29221_s15 + $0x1290] sm:$0xff]  ;;  %v19794_v46 = vpack.c.bf16 %v16786_v48, %v16782_v23  ;;  %v16819_v23 = vld [vmem:[%s29221_s15 + $0x13f8] sm:$0xff]  ;;  %v24203_v48 = vld [vmem:[%s29516_s27 + $0x344] ss:$40 sps:$4 sm:$0xff]  }
 0x269   :  { %10924 = vmatprep.mubr.bf16.mxu0 %v24089_v49  ;;  %11756 = vmatprep.mubr.bf16.mxu1 %v23485_v59  ;;  %v16783_v59 = vld [vmem:[%s29221_s15 + $0x12d8] sm:$0xff]  ;;  %v19790_v12 = vpack.c.bf16 %v16778_v37, %v16774_v34 }
 0x26a   :  { %11904 = vmatpush1.bf16.msra.mxu1 %v19782_v19  ;;  %v19795_v41 = vpack.c.bf16 %v16787_v61, %v16783_v59  ;;  %v16794_v19 = vld [vmem:[%s29221_s15 + $0x1330] sm:$0xff]  ;;  %v16807_v34 = vld [vmem:[%s29221_s15 + $0x1398] sm:$0xff] }
 0x26b   :  { %11905 = vmatprep.subr.bf16.mxu1 %v19787_v36  ;;  %v24154_v36 = vld [vmem:[%s29516_s27 + $0x2a0] ss:$40 sps:$4 sm:$0xff]   ;;  %v16811_v37 = vld [vmem:[%s29221_s15 + $0x13b8] sm:$0xff] }
 0x26c   :  { %v19807_v61 = vpack.c.bf16 %v16811_v37, %v16807_v34 }
 0x26e   :  { %11906 = vmatpush1.bf16.msra.mxu1 %v19786_v52  ;;  %v16798_v52 = vld [vmem:[%s29221_s15 + $0x1350] sm:$0xff] }
 0x26f   :  { %11907 = vmatprep.subr.bf16.mxu1 %v19791_v0  ;;  %v16802_v0 = vld [vmem:[%s29221_s15 + $0x1370] sm:$0xff] }
 0x270   :  { %10925 = vmatmul.mubr.bf16.gmra.mrb[28].mxu0 %v24116_v39  ;;  %11757 = vmatmul.mubr.bf16.gmra.mrb[60].mxu1 %v23518_v47  ;;  %v16790_v47 = vld [vmem:[%s29221_s15 + $0x1310] sm:$0xff]  ;;  %v19802_v59 = vpack.c.bf16 %v16802_v0, %v16798_v52 }
 0x271   :  { %10934 = vmatprep.mubr.bf16.mxu0 %v24127_v42  ;;  %11766 = vmatprep.mubr.bf16.mxu1 %v23547_v53  ;;  %v16799_v53 = vld [vmem:[%s29221_s15 + $0x1358] sm:$0xff]  ;;  %v19798_v2 = vpack.c.bf16 %v16794_v19, %v16790_v47  ;;  %v24218_v19 = vld [vmem:[%s29516_s27 + $0x340] ss:$40 sps:$4 sm:$0xff]  }
 0x272   :  { %11908 = vmatpush1.bf16.msra.mxu1 %v19790_v12  ;;  %v19803_v7 = vpack.c.bf16 %v16803_v11, %v16799_v53  ;;  %v16810_v12 = vld [vmem:[%s29221_s15 + $0x13b0] sm:$0xff] }
 0x273   :  { %11909 = vmatprep.subr.bf16.mxu1 %v19795_v41  ;;  %v24192_v41 = vld [vmem:[%s29516_s27 + $0x2f0] ss:$40 sps:$4 sm:$0xff]   ;;  %v24223_v53 = vld [vmem:[%s29516_s27 + $0x394] ss:$40 sps:$4 sm:$0xff]  }
 0x276   :  { %11910 = vmatpush1.bf16.msra.mxu1 %v19794_v46  ;;  %v16814_v46 = vld [vmem:[%s29221_s15 + $0x13d0] sm:$0xff] }
 0x277   :  { %11911 = vmatprep.subr.bf16.mxu1 %v19799_v14  ;;  %v16818_v14 = vld [vmem:[%s29221_s15 + $0x13f0] sm:$0xff] }
 0x278   :  { %10935 = vmatmul.mubr.bf16.gmra.mrb[32].mxu0 %v24154_v36  ;;  %11767 = vmatmul.mubr.bf16.gmra.mrb[64].mxu1 %v23580_v13  ;;  %v16806_v13 = vld [vmem:[%s29221_s15 + $0x1390] sm:$0xff]  ;;  %v19810_v47 = vpack.c.bf16 %v16818_v14, %v16814_v46 }
 0x279   :  { %10944 = vmatprep.mubr.bf16.mxu0 %v24165_v1  ;;  %11776 = vmatprep.mubr.bf16.mxu1 %v23609_v17  ;;  %v16815_v17 = vld [vmem:[%s29221_s15 + $0x13d8] sm:$0xff]  ;;  %v19806_v54 = vpack.c.bf16 %v16810_v12, %v16806_v13 }
 0x27a   :  { %11912 = vmatpush1.bf16.msra.mxu1 %v19798_v2  ;;  %v19811_v30 = vpack.c.bf16 %v16819_v23, %v16815_v17 }
 0x27b   :  { %11913 = vmatprep.subr.bf16.mxu1 %v19803_v7 }
 0x27e   :  { %11914 = vmatpush1.bf16.msra.mxu1 %v19802_v59 }
 0x27f   :  { %11915 = vmatprep.subr.bf16.mxu1 %v19807_v61 }
 0x280   :  { %10945 = vmatmul.mubr.bf16.gmra.mrb[36].mxu0 %v24192_v41  ;;  %11777 = vmatmul.mubr.bf16.gmra.mrb[68].mxu1 %v23642_v9  ;;  %v24232_v9 = vld [vmem:[%s29516_s27 + $0x390] ss:$40 sps:$4 sm:$0xff]  }
 0x281   :  { %10954 = vmatprep.mubr.bf16.mxu0 %v24203_v48  ;;  %11786 = vmatprep.mubr.bf16.mxu1 %v23671_v18  ;;  %v24237_v18 = vld [vmem:[%s29516_s27 + $0x3e4] ss:$40 sps:$4 sm:$0xff]  }
 0x282   :  { %11916 = vmatpush1.bf16.msra.mxu1 %v19806_v54 }
 0x283   :  { %11917 = vmatprep.subr.bf16.mxu1 %v19811_v30 }
 0x286   :  { %11918 = vmatpush1.bf16.msra.mxu1 %v19810_v47 }
 0x288   :  { %10955 = vmatmul.mubr.bf16.gmra.mrb[40].mxu0 %v24218_v19  ;;  %11787 = vmatmul.mubr.bf16.gmra.mrb[72].mxu1 %v23710_v28  ;;  %v24246_v28 = vld [vmem:[%s29516_s27 + $0x3e0] ss:$40 sps:$4 sm:$0xff]  }
 0x289   :  { %10964 = vmatprep.mubr.bf16.mxu0 %v24223_v53  ;;  %11796 = vmatprep.mubr.bf16.mxu1 %v23721_v45  ;;  %v24251_v45 = vld [vmem:[%s29516_s27 + $0x434] ss:$40 sps:$4 sm:$0xff]  }
 0x290   :  { %10965 = vmatmul.mubr.bf16.gmra.mrb[44].mxu0 %v24232_v9  ;;  %11797 = vmatmul.mubr.bf16.gmra.mrb[76].mxu1 %v23748_v24  ;;  %v24260_v24 = vld [vmem:[%s29516_s27 + $0x430] ss:$40 sps:$4 sm:$0xff]  }
 0x291   :  { %10974 = vmatprep.mubr.bf16.mxu0 %v24237_v18  ;;  %11806 = vmatprep.mubr.bf16.mxu1 %v23759_v55  ;;  %v24265_v55 = vld [vmem:[%s29516_s27 + $0x484] ss:$40 sps:$4 sm:$0xff]  }
 0x298   :  { %10975 = vmatmul.mubr.bf16.gmra.mrb[48].mxu0 %v24246_v28  ;;  %11807 = vmatmul.mubr.bf16.gmra.mrb[80].mxu1 %v23780_v10  ;;  %v24274_v10 = vld [vmem:[%s29516_s27 + $0x480] ss:$40 sps:$4 sm:$0xff]  }
 0x299   :  { %10984 = vmatprep.mubr.bf16.mxu0 %v24251_v45  ;;  %11816 = vmatprep.mubr.bf16.mxu1 %v23785_v40  ;;  %v24279_v40 = vld [vmem:[%s29516_s27 + $0x4d4] ss:$40 sps:$4 sm:$0xff]  }
 0x2a0   :  { %10985 = vmatmul.mubr.bf16.gmra.mrb[52].mxu0 %v24260_v24  ;;  %11817 = vmatmul.mubr.bf16.gmra.mrb[84].mxu1 %v23794_v50  ;;  %v24288_v50 = vld [vmem:[%s29516_s27 + $0x4d0] ss:$40 sps:$4 sm:$0xff]  }
 0x2a1   :  { %10994 = vmatprep.mubr.bf16.mxu0 %v24265_v55  ;;  %11826 = vmatprep.mubr.bf16.mxu1 %v23799_v20  ;;  %v24293_v20 = vld [vmem:[%s29516_s27 + $0x524] ss:$40 sps:$4 sm:$0xff]  }
 0x2a8   :  { %10995 = vmatmul.mubr.bf16.gmra.mrb[56].mxu0 %v24274_v10  ;;  %11827 = vmatmul.mubr.bf16.gmra.mrb[88].mxu1 %v23808_v31  ;;  %v24302_v31 = vld [vmem:[%s29516_s27 + $0x520] ss:$40 sps:$4 sm:$0xff]  }
 0x2a9   :  { %11004 = vmatprep.mubr.bf16.mxu0 %v24279_v40  ;;  %11836 = vmatprep.mubr.bf16.mxu1 %v23813_v5  ;;  %v24307_v5 = vld [vmem:[%s29516_s27 + $0x574] ss:$40 sps:$4 sm:$0xff]  }
 0x2b0   :  { %11005 = vmatmul.mubr.bf16.gmra.mrb[60].mxu0 %v24288_v50  ;;  %11837 = vmatmul.mubr.bf16.gmra.mrb[92].mxu1 %v23822_v4  ;;  %v24316_v4 = vld [vmem:[%s29516_s27 + $0x570] ss:$40 sps:$4 sm:$0xff]  }
 0x2b1   :  { %11014 = vmatprep.mubr.bf16.mxu0 %v24293_v20  ;;  %11846 = vmatprep.mubr.bf16.mxu1 %v23827_v29 }
 0x2b8   :  { %11015 = vmatmul.mubr.bf16.gmra.mrb[64].mxu0 %v24302_v31  ;;  %11847 = vmatmul.mubr.bf16.gmra.mrb[96].mxu1 %v23836_v8 }
 0x2b9   :  { %11024 = vmatprep.mubr.bf16.mxu0 %v24307_v5  ;;  %11856 = vmatprep.mubr.bf16.mxu1 %v23841_v44 }
 0x2c0   :  { %11025 = vmatmul.mubr.bf16.gmra.mrb[68].mxu0 %v24316_v4  ;;  %11857 = vmatmul.mubr.bf16.gmra.mrb[100].mxu1 %v23850_v57 }
 0x2c1   :  { %11866 = vmatprep.mubr.bf16.mxu1 %v23855_v21 }
 0x2c8   :  { %11867 = vmatmul.mubr.bf16.gmra.mrb[104].mxu1 %v23864_v26 }
 0x2c9   :  { %11876 = vmatprep.mubr.bf16.mxu1 %v23869_v25 }
 0x2d0   :  { %11877 = vmatmul.mubr.bf16.gmra.mrb[108].mxu1 %v23878_v56 }
 0x2d1   :  { %11919 = vmatprep.mubr.bf16.mxu1 %v23883_v27 }
 0x2d8   :  { %11920 = vmatmul.mubr.bf16.vlgmr.msra.gmra.mrb[40].mxu1 %v23892_v32 }
 0x2d9   :  { %11929 = vmatprep.mubr.bf16.mxu1 %v23897_v60 }
 0x2e0   :  { %11930 = vmatmul.mubr.bf16.gmra.mrb[44].mxu1 %v23906_v33 }
 0x2e1   :  { %11939 = vmatprep.mubr.bf16.mxu1 %v23911_v35 }
 0x2e8   :  { %11940 = vmatmul.mubr.bf16.gmra.mrb[48].mxu1 %v23932_v43 }
 0x2e9   :  { %11949 = vmatprep.mubr.bf16.mxu1 %v23937_v63 }
 0x2f0   :  { %11950 = vmatmul.mubr.bf16.gmra.mrb[52].mxu1 %v23964_v62 }
 0x2f1   :  { %11959 = vmatprep.mubr.bf16.mxu1 %v23975_v51 }
 0x2f8   :  { %11960 = vmatmul.mubr.bf16.gmra.mrb[56].mxu1 %v24002_v58 }
 0x2f9   :  { %11969 = vmatprep.mubr.bf16.mxu1 %v24013_v38 }
 0x300   :  { %11970 = vmatmul.mubr.bf16.gmra.mrb[60].mxu1 %v24040_v6 }
 0x301   :  { %11979 = vmatprep.mubr.bf16.mxu1 %v24051_v3 }
 0x308   :  { %11980 = vmatmul.mubr.bf16.gmra.mrb[64].mxu1 %v24078_v22 }
 0x309   :  { %11989 = vmatprep.mubr.bf16.mxu1 %v24089_v49 }
 0x30b   :  { %v24339_v29 = vpop.f32.mrb[0].mxu0 }
 0x30c   :  { %v24341_v8 = vpop.f32.mrb[1].mxu0 }
 0x30d   :  { %v24343_v44 = vpop.f32.mrb[2].mxu0 }
 0x30e   :  { %v12102_v57 = vadd.f32 %v24343_v44, %v24339_v29  ;;  %v24347_v21 = vpop.f32.mrb[3].mxu0 }
 0x30f   :  { %v12143_v26 = vadd.f32 %v24347_v21, %v24341_v8 }
 0x310   :  { %11990 = vmatmul.mubr.bf16.gmra.mrb[68].mxu1 %v24116_v39 }
 0x311   :  { %11999 = vmatprep.mubr.bf16.mxu1 %v24127_v42 }
 0x313   :  { %v24353_v25 = vpop.f32.mrb[4].mxu0 }
 0x314   :  { %v12103_v56 = vadd.f32 %v12102_v57, %v24353_v25  ;;  %v24356_v27 = vpop.f32.mrb[5].mxu0 }
 0x315   :  { %v12144_v32 = vadd.f32 %v12143_v26, %v24356_v27  ;;  %v24359_v60 = vpop.f32.mrb[6].mxu0 }
 0x316   :  { %v12104_v33 = vadd.f32 %v12103_v56, %v24359_v60  ;;  %v24362_v35 = vpop.f32.mrb[7].mxu0 }
 0x317   :  { %v12145_v43 = vadd.f32 %v12144_v32, %v24362_v35 }
 0x318   :  { %12000 = vmatmul.mubr.bf16.gmra.mrb[72].mxu1 %v24154_v36 }
 0x319   :  { %12009 = vmatprep.mubr.bf16.mxu1 %v24165_v1 }
 0x31b   :  { %v24367_v63 = vpop.f32.mrb[8].mxu0 }
 0x31c   :  { %v12105_v62 = vadd.f32 %v12104_v33, %v24367_v63  ;;  %v24370_v51 = vpop.f32.mrb[9].mxu0 }
 0x31d   :  { %v12146_v58 = vadd.f32 %v12145_v43, %v24370_v51  ;;  %v24373_v38 = vpop.f32.mrb[10].mxu0 }
 0x31e   :  { %v12106_v6 = vadd.f32 %v12105_v62, %v24373_v38  ;;  %v24376_v3 = vpop.f32.mrb[11].mxu0 }
 0x31f   :  { %v12147_v22 = vadd.f32 %v12146_v58, %v24376_v3 }
 0x320   :  { %12010 = vmatmul.mubr.bf16.gmra.mrb[76].mxu1 %v24192_v41 }
 0x321   :  { %12019 = vmatprep.mubr.bf16.mxu1 %v24203_v48 }
 0x323   :  { %v24381_v49 = vpop.f32.mrb[12].mxu0 }
 0x324   :  { %v12107_v39 = vadd.f32 %v12106_v6, %v24381_v49  ;;  %v24384_v42 = vpop.f32.mrb[13].mxu0 }
 0x325   :  { %v12148_v36 = vadd.f32 %v12147_v22, %v24384_v42  ;;  %v24387_v11 = vpop.f32.mrb[14].mxu0 }
 0x326   :  { %v12108_v1 = vadd.f32 %v12107_v39, %v24387_v11  ;;  %v24390_v2 = vpop.f32.mrb[15].mxu0 }
 0x327   :  { %v12149_v7 = vadd.f32 %v12148_v36, %v24390_v2 }
 0x328   :  { %12020 = vmatmul.mubr.bf16.gmra.mrb[80].mxu1 %v24218_v19 }
 0x329   :  { %12029 = vmatprep.mubr.bf16.mxu1 %v24223_v53 }
 0x32b   :  { %v24395_v52 = vpop.f32.mrb[16].mxu0 }
 0x32c   :  { %v12109_v0 = vadd.f32 %v12108_v1, %v24395_v52  ;;  %v24398_v34 = vpop.f32.mrb[17].mxu0  ;;  %v29557_v1 = vld [vmem:[#allocation5_spill] sm:$0xff] }
 0x32d   :  { %v12150_v37 = vadd.f32 %v12149_v7, %v24398_v34  ;;  %v24401_v59 = vpop.f32.mrb[18].mxu0 }
 0x32e   :  { %v12110_v61 = vadd.f32 %v12109_v0, %v24401_v59  ;;  %v24404_v13 = vpop.f32.mrb[19].mxu0 }
 0x32f   :  { %v12151_v12 = vadd.f32 %v12150_v37, %v24404_v13  ;;  %v29559_v37 = vld [vmem:[#allocation6_spill] sm:$0xff] }
 0x330   :  { %12030 = vmatmul.mubr.bf16.gmra.mrb[84].mxu1 %v24232_v9 }
 0x331   :  { %12039 = vmatprep.mubr.bf16.mxu1 %v24237_v18 }
 0x333   :  { %v24409_v41 = vpop.f32.mrb[20].mxu0 }
 0x334   :  { %v12111_v17 = vadd.f32 %v12110_v61, %v24409_v41  ;;  %v24412_v23 = vpop.f32.mrb[21].mxu0 }
 0x335   :  { %v12152_v48 = vadd.f32 %v12151_v12, %v24412_v23  ;;  %v24415_v54 = vpop.f32.mrb[22].mxu0 }
 0x336   :  { %v12112_v30 = vadd.f32 %v12111_v17, %v24415_v54  ;;  %v24418_v46 = vpop.f32.mrb[23].mxu0  ;;  %v29563_v17 = vld [vmem:[#allocation8_spill] sm:$0xff] }
 0x337   :  { %v12153_v14 = vadd.f32 %v12152_v48, %v24418_v46 }
 0x338   :  { %12040 = vmatmul.mubr.bf16.gmra.mrb[88].mxu1 %v24246_v28 }
 0x339   :  { %12049 = vmatprep.mubr.bf16.mxu1 %v24251_v45 }
 0x33b   :  { %v24423_v47 = vpop.f32.mrb[24].mxu0 }
 0x33c   :  { %v12113_v19 = vadd.f32 %v12112_v30, %v24423_v47  ;;  %v24426_v53 = vpop.f32.mrb[25].mxu0 }
 0x33d   :  { %v12154_v9 = vadd.f32 %v12153_v14, %v24426_v53  ;;  %v24429_v18 = vpop.f32.mrb[26].mxu0  ;;  %v29565_v14 = vld [vmem:[#allocation9_spill] sm:$0xff] }
 0x33e   :  { %v12114_v57 = vadd.f32 %v12113_v19, %v24429_v18  ;;  %v24432_v26 = vpop.f32.mrb[27].mxu0 }
 0x33f   :  { %v12155_v56 = vadd.f32 %v12154_v9, %v24432_v26 }
 0x340   :  { %12050 = vmatmul.mubr.bf16.gmra.mrb[92].mxu1 %v24260_v24 }
 0x341   :  { %12059 = vmatprep.mubr.bf16.mxu1 %v24265_v55 }
 0x343   :  { %v24437_v28 = vpop.f32.mrb[28].mxu0 }
 0x344   :  { %v12115_v45 = vadd.f32 %v12114_v57, %v24437_v28  ;;  %v24440_v32 = vpop.f32.mrb[29].mxu0  ;;  %v29567_v57 = vld [vmem:[#allocation10_spill] sm:$0xff] }
 0x345   :  { %v12156_v33 = vadd.f32 %v12155_v56, %v24440_v32  ;;  %v24443_v43 = vpop.f32.mrb[30].mxu0 }
 0x346   :  { %v12116_v62 = vadd.f32 %v12115_v45, %v24443_v43  ;;  %v24446_v58 = vpop.f32.mrb[31].mxu0 }
 0x347   :  { %v12157_v6 = vadd.f32 %v12156_v33, %v24446_v58  ;;  %v29569_v33 = vld [vmem:[#allocation11_spill] sm:$0xff] }
 0x348   :  { %12060 = vmatmul.mubr.bf16.gmra.mrb[96].mxu1 %v24274_v10 }
 0x349   :  { %12069 = vmatprep.mubr.bf16.mxu1 %v24279_v40  ;;  %v29561_v40 = vld [vmem:[#allocation7_spill] sm:$0xff] }
 0x34b   :  { %v10936_v24 = vpop.f32.mrb[32].mxu0 }
 0x34c   :  { %v24452_v55 = vadd.f32 %v10936_v24, %v22533_v15  ;;  %v10938_v22 = vpop.f32.mrb[33].mxu0 }
 0x34d   :  { %v24455_v39 = vadd.f32 %v10938_v22, %v22541_v16  ;;  %v10940_v36 = vpop.f32.mrb[34].mxu0 }
 0x34e   :  { %29555 = vst [vmem:[#allocation43_spill] sm:$0xff] %v24452_v55  ;;  %v24458_v7 = vadd.f32 %v10940_v36, %v29557_v1  ;;  %v10942_v0 = vpop.f32.mrb[35].mxu0  ;;  %v12117_v30 = vadd.f32 %v24452_v55, %v12116_v62  ;;  %v29571_v36 = vld [vmem:[#allocation12_spill] sm:$0xff]  ;;  %v16828_v55 = vld [vmem:[%s29222_s16 + $0x48] sm:$0xff] }
 0x34f   :  { %29556 = vst [vmem:[#allocation44_spill] sm:$0xff] %v24455_v39  ;;  %v24461_v61 = vadd.f32 %v10942_v0, %v29559_v37  ;;  %v12158_v22 = vadd.f32 %v24455_v39, %v12157_v6  ;;  %v29573_v37 = vld [vmem:[#allocation13_spill] sm:$0xff]  ;;  %v29604_v39 = vld [vmem:[#allocation32_spill] sm:$0xff] }
 0x350   :  { %29558 = vst [vmem:[#allocation5_spill] sm:$0xff] %v24458_v7  ;;  %12070 = vmatmul.mubr.bf16.gmra.mrb[100].mxu1 %v24288_v50  ;;  %v12118_v50 = vadd.f32 %v24458_v7, %v12117_v30 }
 0x351   :  { %29560 = vst [vmem:[#allocation6_spill] sm:$0xff] %v24461_v61  ;;  %12079 = vmatprep.mubr.bf16.mxu1 %v24293_v20 }
 0x353   :  { %v10946_v10 = vpop.f32.mrb[36].mxu0 }
 0x354   :  { %v24466_v15 = vadd.f32 %v10946_v10, %v29561_v40  ;;  %v10948_v12 = vpop.f32.mrb[37].mxu0 }
 0x355   :  { %v24469_v16 = vadd.f32 %v10948_v12, %v29563_v17  ;;  %v10950_v48 = vpop.f32.mrb[38].mxu0  ;;  %v12159_v17 = vadd.f32 %v24461_v61, %v12158_v22  ;;  %v29600_v61 = vld [vmem:[#allocation29_spill] sm:$0xff] }
 0x356   :  { %29562 = vst [vmem:[#allocation7_spill] sm:$0xff] %v24466_v15  ;;  %v24473_v19 = vadd.f32 %v10950_v48, %v29565_v14  ;;  %v10952_v9 = vpop.f32.mrb[39].mxu0  ;;  %v12119_v45 = vadd.f32 %v24466_v15, %v12118_v50  ;;  %v29577_v14 = vld [vmem:[#allocation15_spill] sm:$0xff]  ;;  %v29579_v50 = vld [vmem:[#allocation16_spill] sm:$0xff] }
 0x357   :  { %29564 = vst [vmem:[#allocation8_spill] sm:$0xff] %v24469_v16  ;;  %v24476_v56 = vadd.f32 %v10952_v9, %v29567_v57  ;;  %v12160_v6 = vadd.f32 %v24469_v16, %v12159_v17 }
 0x358   :  { %29566 = vst [vmem:[#allocation9_spill] sm:$0xff] %v24473_v19  ;;  %12080 = vmatmul.mubr.bf16.gmra.mrb[104].mxu1 %v24302_v31  ;;  %v12120_v12 = vadd.f32 %v24473_v19, %v12119_v45  ;;  %v29581_v45 = vld [vmem:[#allocation17_spill] sm:$0xff] }
 0x359   :  { %29568 = vst [vmem:[#allocation10_spill] sm:$0xff] %v24476_v56  ;;  %12089 = vmatprep.mubr.bf16.mxu1 %v24307_v5  ;;  %v29575_v5 = vld [vmem:[#allocation14_spill] sm:$0xff]  ;;  %v12161_v22 = vadd.f32 %v24476_v56, %v12160_v6  ;;  %v29592_v56 = vld [vmem:[#allocation24_spill] sm:$0xff] }
 0x35b   :  { %v10956_v20 = vpop.f32.mrb[40].mxu0 }
 0x35c   :  { %v24483_v24 = vadd.f32 %v10956_v20, %v29569_v33  ;;  %v10958_v62 = vpop.f32.mrb[41].mxu0 }
 0x35d   :  { %v24487_v1 = vadd.f32 %v10958_v62, %v29571_v36  ;;  %v10960_v0 = vpop.f32.mrb[42].mxu0 }
 0x35e   :  { %29570 = vst [vmem:[#allocation11_spill] sm:$0xff] %v24483_v24  ;;  %v24490_v10 = vadd.f32 %v10960_v0, %v29573_v37  ;;  %v10962_v31 = vpop.f32.mrb[43].mxu0  ;;  %v12121_v48 = vadd.f32 %v24483_v24, %v12120_v12  ;;  %v29583_v0 = vld [vmem:[#allocation18_spill] sm:$0xff]  ;;  %v5819_v24 = vld [vmem:[%s29222_s16] sm:$0xff] }
 0x35f   :  { %29572 = vst [vmem:[#allocation12_spill] sm:$0xff] %v24487_v1  ;;  %v24493_v40 = vadd.f32 %v10962_v31, %v29575_v5  ;;  %v12162_v5 = vadd.f32 %v24487_v1, %v12161_v22  ;;  %v29589_v1 = vld [vmem:[#allocation22_spill] sm:$0xff] }
 0x360   :  { %29574 = vst [vmem:[#allocation13_spill] sm:$0xff] %v24490_v10  ;;  %12090 = vmatmul.mubr.bf16.gmra.mrb[108].mxu1 %v24316_v4  ;;  %v12122_v62 = vadd.f32 %v24490_v10, %v12121_v48 }
 0x361   :  { %29576 = vst [vmem:[#allocation14_spill] sm:$0xff] %v24493_v40 }
 0x363   :  { %v10966_v30 = vpop.f32.mrb[44].mxu0 }
 0x364   :  { %v24501_v9 = vadd.f32 %v10966_v30, %v29577_v14  ;;  %v10968_v57 = vpop.f32.mrb[45].mxu0  ;;  %v29585_v30 = vld [vmem:[#allocation19_spill] sm:$0xff] }
 0x365   :  { %v24504_v20 = vadd.f32 %v10968_v57, %v29579_v50  ;;  %v10970_v33 = vpop.f32.mrb[46].mxu0  ;;  %v12163_v57 = vadd.f32 %v24493_v40, %v12162_v5  ;;  %v29586_v50 = vld [vmem:[#allocation20_spill] sm:$0xff]  ;;  %v29591_v40 = vld [vmem:[#allocation23_spill] sm:$0xff] }
 0x366   :  { %29578 = vst [vmem:[#allocation15_spill] sm:$0xff] %v24501_v9  ;;  %v24508_v36 = vadd.f32 %v10970_v33, %v29581_v45  ;;  %v10972_v4 = vpop.f32.mrb[47].mxu0  ;;  %v12123_v31 = vadd.f32 %v24501_v9, %v12122_v62 }
 0x367   :  { %29580 = vst [vmem:[#allocation16_spill] sm:$0xff] %v24504_v20  ;;  %v24512_v37 = vadd.f32 %v10972_v4, %v29583_v0  ;;  %v29588_v4 = vld [vmem:[#allocation21_spill] sm:$0xff]  ;;  %v12164_v22 = vadd.f32 %v24504_v20, %v12163_v57 }
 0x368   :  { %29582 = vst [vmem:[#allocation17_spill] sm:$0xff] %v24508_v36  ;;  %v12124_v17 = vadd.f32 %v24508_v36, %v12123_v31  ;;  %v29594_v20 = vld [vmem:[#allocation25_spill] sm:$0xff]  ;;  %v29610_v36 = vld [vmem:[#allocation38_spill] sm:$0xff] }
 0x369   :  { %29584 = vst [vmem:[#allocation18_spill] sm:$0xff] %v24512_v37 }
 0x36b   :  { %v10976_v12 = vpop.f32.mrb[48].mxu0 }
 0x36c   :  { %v24518_v14 = vadd.f32 %v10976_v12, %v29585_v30  ;;  %v10978_v48 = vpop.f32.mrb[49].mxu0  ;;  %v12165_v30 = vadd.f32 %v24512_v37, %v12164_v22  ;;  %v29598_v37 = vld [vmem:[#allocation28_spill] sm:$0xff] }
 0x36d   :  { %v24522_v33 = vadd.f32 %v10978_v48, %v29586_v50  ;;  %v10980_v6 = vpop.f32.mrb[50].mxu0 }
 0x36e   :  { %v12125_v45 = vadd.f32 %v24518_v14, %v12124_v17  ;;  %v24526_v0 = vadd.f32 %v10980_v6, %v29588_v4  ;;  %v10982_v62 = vpop.f32.mrb[51].mxu0 }
 0x36f   :  { %29587 = vst [vmem:[#allocation19_spill] sm:$0xff] %v24522_v33  ;;  %v24530_v31 = vadd.f32 %v10982_v62, %v29589_v1  ;;  %v12166_v17 = vadd.f32 %v24522_v33, %v12165_v30  ;;  %v29597_v33 = vld [vmem:[#allocation27_spill] sm:$0xff] }
 0x370   :  { %v12126_v12 = vadd.f32 %v24526_v0, %v12125_v45  ;;  %v29595_v45 = vld [vmem:[#allocation26_spill] sm:$0xff] }
 0x371   :  { %29590 = vst [vmem:[#allocation20_spill] sm:$0xff] %v24530_v31 }
 0x373   :  { %v10986_v5 = vpop.f32.mrb[52].mxu0 }
 0x374   :  { %v24535_v48 = vadd.f32 %v10986_v5, %v29591_v40  ;;  %v10988_v50 = vpop.f32.mrb[53].mxu0  ;;  %v12167_v40 = vadd.f32 %v24530_v31, %v12166_v17  ;;  %v29601_v17 = vld [vmem:[#allocation30_spill] sm:$0xff] }
 0x375   :  { %v24539_v6 = vadd.f32 %v10988_v50, %v29592_v56  ;;  %v10990_v4 = vpop.f32.mrb[54].mxu0 }
 0x376   :  { %v12127_v57 = vadd.f32 %v24535_v48, %v12126_v12  ;;  %v24543_v1 = vadd.f32 %v10990_v4, %v29594_v20  ;;  %v10992_v62 = vpop.f32.mrb[55].mxu0 }
 0x377   :  { %29593 = vst [vmem:[#allocation21_spill] sm:$0xff] %v24539_v6  ;;  %v24546_v16 = vadd.f32 %v10992_v62, %v29595_v45  ;;  %v12168_v5 = vadd.f32 %v24539_v6, %v12167_v40  ;;  %v29603_v6 = vld [vmem:[#allocation31_spill] sm:$0xff] }
 0x378   :  { %v12128_v22 = vadd.f32 %v24543_v1, %v12127_v57 }
 0x379   :  { %29596 = vst [vmem:[#allocation22_spill] sm:$0xff] %v24546_v16  ;;  %v12169_v57 = vadd.f32 %v24546_v16, %v12168_v5  ;;  %v29605_v16 = vld [vmem:[#allocation33_spill] sm:$0xff] }
 0x37b   :  { %v10996_v30 = vpop.f32.mrb[56].mxu0 }
 0x37c   :  { %v24552_v56 = vadd.f32 %v10996_v30, %v29597_v33  ;;  %v10998_v50 = vpop.f32.mrb[57].mxu0 }
 0x37d   :  { %v24555_v12 = vadd.f32 %v10998_v50, %v29598_v37  ;;  %v11000_v20 = vpop.f32.mrb[58].mxu0 }
 0x37e   :  { %v12129_v4 = vadd.f32 %v24552_v56, %v12128_v22  ;;  %v24559_v62 = vadd.f32 %v11000_v20, %v29600_v61  ;;  %v11002_v45 = vpop.f32.mrb[59].mxu0 }
 0x37f   :  { %29599 = vst [vmem:[#allocation23_spill] sm:$0xff] %v24555_v12  ;;  %v24563_v31 = vadd.f32 %v11002_v45, %v29601_v17  ;;  %v12170_v33 = vadd.f32 %v24555_v12, %v12169_v57  ;;  %v29606_v57 = vld [vmem:[#allocation34_spill] sm:$0xff] }
 0x380   :  { %v12130_v40 = vadd.f32 %v24559_v62, %v12129_v4 }
 0x381   :  { %29602 = vst [vmem:[#allocation24_spill] sm:$0xff] %v24563_v31  ;;  %v12171_v22 = vadd.f32 %v24563_v31, %v12170_v33  ;;  %v29607_v31 = vld [vmem:[#allocation35_spill] sm:$0xff] }
 0x383   :  { %v11006_v30 = vpop.f32.mrb[60].mxu0 }
 0x384   :  { %v24568_v37 = vadd.f32 %v11006_v30, %v29603_v6  ;;  %v11008_v50 = vpop.f32.mrb[61].mxu0 }
 0x385   :  { %v24572_v61 = vadd.f32 %v11008_v50, %v29604_v39  ;;  %v11010_v20 = vpop.f32.mrb[62].mxu0 }
 0x386   :  { %v12131_v5 = vadd.f32 %v24568_v37, %v12130_v40  ;;  %v24576_v45 = vadd.f32 %v11010_v20, %v29605_v16  ;;  %v11012_v17 = vpop.f32.mrb[63].mxu0  ;;  %v16820_v16 = vld [vmem:[%s29222_s16 + $0x8] sm:$0xff]  ;;  %v16822_v40 = vld [vmem:[%s29222_s16 + $0x18] sm:$0xff] }
 0x387   :  { %v12172_v4 = vadd.f32 %v24572_v61, %v12171_v22  ;;  %v24580_v12 = vadd.f32 %v11012_v17, %v29606_v57  ;;  %v29608_v22 = vld [vmem:[#allocation36_spill] sm:$0xff]  ;;  %v19813_v10 = vpack.c.bf16 %v16822_v40, %v16820_v16 }
 0x388   :  { %v12132_v6 = vadd.f32 %v24576_v45, %v12131_v5 }
 0x389   :  { %v12173_v30 = vadd.f32 %v24580_v12, %v12172_v4  ;;  %v29609_v4 = vld [vmem:[#allocation37_spill] sm:$0xff]  ;;  %13809 = vmatprep.subr.bf16.mxu0 %v19813_v10  ;;  %v29611_v10 = vld [vmem:[#allocation39_spill] sm:$0xff] }
 0x38b   :  { %v11016_v33 = vpop.f32.mrb[64].mxu0 }
 0x38c   :  { %v24585_v39 = vadd.f32 %v11016_v33, %v29607_v31  ;;  %v11018_v50 = vpop.f32.mrb[65].mxu0 }
 0x38d   :  { %v24594_v20 = vadd.f32 %v11018_v50, %v29608_v22  ;;  %v11020_v17 = vpop.f32.mrb[66].mxu0  ;;  %v16821_v50 = vld [vmem:[%s29222_s16 + $0x10] sm:$0xff] }
 0x38e   :  { %v12133_v5 = vadd.f32 %v24585_v39, %v12132_v6  ;;  %v24598_v57 = vadd.f32 %v11020_v17, %v29609_v4  ;;  %v11022_v31 = vpop.f32.mrb[67].mxu0  ;;  %v19812_v22 = vpack.c.bf16 %v16821_v50, %v5819_v24  ;;  %v16823_v4 = vld [vmem:[%s29222_s16 + $0x20] sm:$0xff]  ;;  %v16825_v24 = vld [vmem:[%s29222_s16 + $0x30] sm:$0xff] }
 0x38f   :  { %v12174_v33 = vadd.f32 %v24594_v20, %v12173_v30  ;;  %v24602_v9 = vadd.f32 %v11022_v31, %v29610_v36  ;;  %v16824_v36 = vld [vmem:[%s29222_s16 + $0x28] sm:$0xff]  ;;  %v16826_v30 = vld [vmem:[%s29222_s16 + $0x38] sm:$0xff] }
 0x390   :  { %v12134_v6 = vadd.f32 %v24598_v57, %v12133_v5  ;;  %13810 = vmatpush1.bf16.msra.mxu0 %v19812_v22  ;;  %v19815_v40 = vpack.c.bf16 %v16826_v30, %v16824_v36  ;;  %v29612_v50 = vld [vmem:[#allocation40_spill] sm:$0xff]  ;;  %v29613_v30 = vld [vmem:[#allocation41_spill] sm:$0xff] }
 0x391   :  { %v12175_v17 = vadd.f32 %v24602_v9, %v12174_v33  ;;  %v19814_v33 = vpack.c.bf16 %v16825_v24, %v16823_v4  ;;  %v29614_v24 = vld [vmem:[#allocation42_spill] sm:$0xff] }
 0x392   :  { %13811 = vmatprep.subr.bf16.mxu0 %v19815_v40 }
 0x393   :  { %v11026_v16 = vpop.f32.mrb[68].mxu0 }
 0x394   :  { %v24625_v5 = vadd.f32 %v11026_v16, %v29611_v10  ;;  %v11028_v31 = vpop.f32.mrb[69].mxu0  ;;  %13812 = vmatpush1.bf16.msra.mxu0 %v19814_v33  ;;  %v16830_v16 = vld [vmem:[%s29222_s16 + $0x58] sm:$0xff] }
 0x395   :  { %v24628_v22 = vadd.f32 %v11028_v31, %v29612_v50  ;;  %v11030_v19 = vpop.f32.mrb[70].mxu0  ;;  %v19817_v40 = vpack.c.bf16 %v16830_v16, %v16828_v55  ;;  %v16832_v55 = vld [vmem:[%s29222_s16 + $0x68] sm:$0xff] }
 0x396   :  { %v12135_v36 = vadd.f32 %v24625_v5, %v12134_v6  ;;  %v24632_v15 = vadd.f32 %v11030_v19, %v29613_v30  ;;  %v11032_v7 = vpop.f32.mrb[71].mxu0  ;;  %v16827_v19 = vld [vmem:[%s29222_s16 + $0x40] sm:$0xff]  ;;  %v16829_v6 = vld [vmem:[%s29222_s16 + $0x50] sm:$0xff] }
 0x397   :  { %v12176_v4 = vadd.f32 %v24628_v22, %v12175_v17  ;;  %v24642_v10 = vadd.f32 %v11032_v7, %v29614_v24  ;;  %v19816_v33 = vpack.c.bf16 %v16829_v6, %v16827_v19  ;;  %13813 = vmatprep.subr.bf16.mxu0 %v19817_v40  ;;  %v16834_v7 = vld [vmem:[%s29222_s16 + $0x78] sm:$0xff]  ;;  %v16836_v6 = vld [vmem:[%s29222_s16 + $0x88] sm:$0xff] }
 0x398   :  { %v12136_v31 = vadd.f32 %v24632_v15, %v12135_v36  ;;  %v19819_v16 = vpack.c.bf16 %v16834_v7, %v16832_v55  ;;  %v16831_v36 = vld [vmem:[%s29222_s16 + $0x60] sm:$0xff] }
 0x399   :  { %29615 = vst [vmem:[#allocation25_spill] sm:$0xff] %v24642_v10  ;;  %v12177_v50 = vadd.f32 %v24642_v10, %v12176_v4  ;;  %13814 = vmatpush1.bf16.msra.mxu0 %v19816_v33  ;;  %v16833_v4 = vld [vmem:[%s29222_s16 + $0x70] sm:$0xff]  ;;  %v16838_v33 = vld [vmem:[%s29222_s16 + $0x98] sm:$0xff]  ;;  %v16835_v10 = vld [vmem:[%s29222_s16 + $0x80] sm:$0xff] }
 0x39a   :  { %v12137_v30 = vrot.slane %v12136_v31, 4  ;;  %v19818_v40 = vpack.c.bf16 %v16833_v4, %v16831_v36  ;;  %13815 = vmatprep.subr.bf16.mxu0 %v19819_v16  ;;  %v19821_v7 = vpack.c.bf16 %v16838_v33, %v16836_v6  ;;  %v16840_v4 = vld [vmem:[%s29222_s16 + $0xa8] sm:$0xff]  ;;  %v16839_v6 = vld [vmem:[%s29222_s16 + $0xa0] sm:$0xff] }
 0x39b   :  { %v12178_v17 = vrot.slane %v12177_v50, 4 }
 0x39c   :  { %v12138_v24 = vadd.f32 %v12137_v30, %v12136_v31  ;;  %v16837_v31 = vld [vmem:[%s29222_s16 + $0x90] sm:$0xff] }
 0x39d   :  { %13816 = vmatpush1.bf16.msra.mxu0 %v19818_v40  ;;  %v12179_v55 = vadd.f32 %v12178_v17, %v12177_v50  ;;  %v19820_v16 = vpack.c.bf16 %v16837_v31, %v16835_v10  ;;  %v16842_v50 = vld [vmem:[%s29222_s16 + $0xb8] sm:$0xff]  ;;  %v16841_v10 = vld [vmem:[%s29222_s16 + $0xb0] sm:$0xff] }
 0x39e   :  { %v12139_v19 = vrot.slane %v12138_v24, 2  ;;  %13817 = vmatprep.subr.bf16.mxu0 %v19821_v7  ;;  %v19823_v40 = vpack.c.bf16 %v16842_v50, %v16840_v4  ;;  %v16844_v7 = vld [vmem:[%s29222_s16 + $0xc8] sm:$0xff]  ;;  %v16846_v31 = vld [vmem:[%s29222_s16 + $0xd8] sm:$0xff] }
 0x39f   :  { %v12180_v17 = vrot.slane %v12179_v55, 2  ;;  %v19825_v4 = vpack.c.bf16 %v16846_v31, %v16844_v7 }
 0x3a0   :  { %v12140_v30 = vadd.f32 %v12139_v19, %v12138_v24  ;;  %v19822_v19 = vpack.c.bf16 %v16841_v10, %v16839_v6 }
 0x3a1   :  { %13818 = vmatpush1.bf16.msra.mxu0 %v19820_v16  ;;  %v12181_v16 = vadd.f32 %v12180_v17, %v12179_v55 }
 0x3a2   :  { %v12141_v36 = vrot.slane %v12140_v30, 1  ;;  %13819 = vmatprep.subr.bf16.mxu0 %v19823_v40 }
 0x3a3   :  { %v12182_v6 = vrot.slane %v12181_v16, 1 }
 0x3a4   :  { %v12142_v24 = vadd.f32 %v12141_v36, %v12140_v30 }
 0x3a5   :  { %13820 = vmatpush1.bf16.msra.mxu0 %v19822_v19  ;;  %v12183_v7 = vadd.f32 %v12182_v6, %v12181_v16 }
 0x3a6   :  { %v24688_v33 = vmul.f32 0.0034722222, %v12142_v24  ;;  %13821 = vmatprep.subr.bf16.mxu0 %v19825_v4 }
 0x3a8   :  { %v24698_v50 = vsub.f32 %v24339_v29, %v24688_v33  ;;  %v24702_v30 = vsub.f32 %v24343_v44, %v24688_v33  ;;  %v24706_v36 = vsub.f32 %v24353_v25, %v24688_v33  ;;  %v24710_v40 = vsub.f32 %v24359_v60, %v24688_v33 }
 0x3a9   :  { %v24714_v55 = vsub.f32 %v24367_v63, %v24688_v33  ;;  %v24718_v29 = vsub.f32 %v24373_v38, %v24688_v33  ;;  %v24722_v44 = vsub.f32 %v24381_v49, %v24688_v33  ;;  %v24726_v25 = vsub.f32 %v24387_v11, %v24688_v33 }
 0x3aa   :  { %29616 = vst [vmem:[#allocation26_spill] sm:$0xff] %v24698_v50  ;;  %29617 = vst [vmem:[#allocation27_spill] sm:$0xff] %v24702_v30  ;;  %v24730_v60 = vsub.f32 %v24395_v52, %v24688_v33  ;;  %v24734_v63 = vsub.f32 %v24401_v59, %v24688_v33  ;;  %v24738_v38 = vsub.f32 %v24409_v41, %v24688_v33 }
 0x3ab   :  { %29618 = vst [vmem:[#allocation28_spill] sm:$0xff] %v24706_v36  ;;  %29619 = vst [vmem:[#allocation29_spill] sm:$0xff] %v24710_v40  ;;  %v24742_v49 = vsub.f32 %v24415_v54, %v24688_v33  ;;  %v24746_v11 = vsub.f32 %v24423_v47, %v24688_v33  ;;  %v24750_v52 = vsub.f32 %v24429_v18, %v24688_v33  ;;  %v24760_v17 = vpop.f32.mrb[40].mxu1 }
 0x3ac   :  { %29620 = vst [vmem:[#allocation30_spill] sm:$0xff] %v24714_v55  ;;  %29621 = vst [vmem:[#allocation31_spill] sm:$0xff] %v24718_v29  ;;  %v24754_v59 = vsub.f32 %v24437_v28, %v24688_v33  ;;  %v24758_v41 = vsub.f32 %v24443_v43, %v24688_v33  ;;  %v24762_v54 = vpop.f32.mrb[41].mxu1  ;;  %v24768_v47 = vsub.f32 %v24518_v14, %v24688_v33 }
 0x3ad   :  { %29622 = vst [vmem:[#allocation32_spill] sm:$0xff] %v24722_v44  ;;  %29623 = vst [vmem:[#allocation33_spill] sm:$0xff] %v24726_v25  ;;  %v24764_v10 = vpop.f32.mrb[42].mxu1  ;;  %v24772_v18 = vsub.f32 %v24526_v0, %v24688_v33  ;;  %v24776_v28 = vsub.f32 %v24535_v48, %v24688_v33  ;;  %v24780_v43 = vsub.f32 %v24543_v1, %v24688_v33 }
 0x3ae   :  { %29624 = vst [vmem:[#allocation34_spill] sm:$0xff] %v24730_v60  ;;  %29625 = vst [vmem:[#allocation35_spill] sm:$0xff] %v24734_v63  ;;  %v24782_v24 = vpop.f32.mrb[43].mxu1  ;;  %v24786_v19 = vsub.f32 %v24552_v56, %v24688_v33  ;;  %v24790_v14 = vsub.f32 %v24559_v62, %v24688_v33  ;;  %v24794_v0 = vsub.f32 %v24568_v37, %v24688_v33 }
 0x3af   :  { %29626 = vst [vmem:[#allocation36_spill] sm:$0xff] %v24738_v38  ;;  %29627 = vst [vmem:[#allocation37_spill] sm:$0xff] %v24742_v49  ;;  %v24798_v48 = vsub.f32 %v24576_v45, %v24688_v33  ;;  %v24802_v1 = vsub.f32 %v24585_v39, %v24688_v33  ;;  %v24806_v56 = vsub.f32 %v24598_v57, %v24688_v33 }
 0x3b0   :  { %29628 = vst [vmem:[#allocation38_spill] sm:$0xff] %v24746_v11  ;;  %29629 = vst [vmem:[#allocation39_spill] sm:$0xff] %v24750_v52  ;;  %v24810_v62 = vsub.f32 %v24625_v5, %v24688_v33  ;;  %v24814_v37 = vsub.f32 %v24632_v15, %v24688_v33  ;;  %v12415_v39 = vmul.f32 %v24698_v50, %v24698_v50 }
 0x3b1   :  { %29630 = vst [vmem:[#allocation40_spill] sm:$0xff] %v24754_v59  ;;  %29631 = vst [vmem:[#allocation41_spill] sm:$0xff] %v24760_v17  ;;  %v12419_v57 = vmul.f32 %v24702_v30, %v24702_v30  ;;  %v12423_v15 = vmul.f32 %v24706_v36, %v24706_v36  ;;  %v12427_v16 = vmul.f32 %v24710_v40, %v24710_v40 }
 0x3b2   :  { %29632 = vst [vmem:[#allocation42_spill] sm:$0xff] %v24762_v54  ;;  %29633 = vst [vmem:[#allocation45_spill] sm:$0xff] %v24764_v10 }
 0x3b3   :  { %29634 = vst [vmem:[#allocation46_spill] sm:$0xff] %v24782_v24  ;;  %29635 = vst [vmem:[#allocation47_spill] sm:$0xff] %v24798_v48  ;;  %v24816_v31 = vpop.f32.mrb[44].mxu1  ;;  %v12559_v6 = vadd.f32 %v12419_v57, %v12415_v39 }
 0x3b4   :  { %29636 = vst [vmem:[#allocation48_spill] sm:$0xff] %v24802_v1  ;;  %29637 = vst [vmem:[#allocation49_spill] sm:$0xff] %v24806_v56  ;;  %v24818_v45 = vpop.f32.mrb[45].mxu1  ;;  %v24826_v56 = vmul.f32 0.0034722222, %v12183_v7  ;;  %v12439_v1 = vmul.f32 %v24722_v44, %v24722_v44 }
 0x3b5   :  { %29638 = vst [vmem:[#allocation50_spill] sm:$0xff] %v24810_v62  ;;  %29639 = vst [vmem:[#allocation51_spill] sm:$0xff] %v24814_v37  ;;  %v24820_v4 = vpop.f32.mrb[46].mxu1 }
 0x3b6   :  { %29640 = vst [vmem:[#allocation52_spill] sm:$0xff] %v24816_v31  ;;  %29641 = vst [vmem:[#allocation53_spill] sm:$0xff] %v24818_v45  ;;  %v24828_v5 = vpop.f32.mrb[47].mxu1  ;;  %v24836_v37 = vsub.f32 %v24341_v8, %v24826_v56  ;;  %v24840_v50 = vsub.f32 %v24347_v21, %v24826_v56  ;;  %v24844_v7 = vsub.f32 %v24356_v27, %v24826_v56 }
 0x3b7   :  { %29642 = vst [vmem:[#allocation54_spill] sm:$0xff] %v24820_v4  ;;  %29643 = vst [vmem:[#allocation55_spill] sm:$0xff] %v24828_v5  ;;  %v24848_v30 = vsub.f32 %v24362_v35, %v24826_v56  ;;  %v24852_v40 = vsub.f32 %v24370_v51, %v24826_v56  ;;  %v24856_v8 = vsub.f32 %v24376_v3, %v24826_v56 }
 0x3b8   :  { %29644 = vst [vmem:[#allocation56_spill] sm:$0xff] %v24836_v37  ;;  %29645 = vst [vmem:[#allocation57_spill] sm:$0xff] %v24840_v50  ;;  %v24860_v21 = vsub.f32 %v24384_v42, %v24826_v56  ;;  %v12560_v27 = vadd.f32 %v12559_v6, %v12423_v15  ;;  %v24866_v57 = vsub.f32 %v24390_v2, %v24826_v56 }
 0x3b9   :  { %29646 = vst [vmem:[#allocation58_spill] sm:$0xff] %v24844_v7  ;;  %29647 = vst [vmem:[#allocation59_spill] sm:$0xff] %v24848_v30  ;;  %v24870_v35 = vsub.f32 %v24398_v34, %v24826_v56  ;;  %v24874_v51 = vsub.f32 %v24404_v13, %v24826_v56  ;;  %v24880_v42 = vsub.f32 %v24412_v23, %v24826_v56 }
 0x3ba   :  { %29648 = vst [vmem:[#allocation60_spill] sm:$0xff] %v24852_v40  ;;  %v24884_v15 = vsub.f32 %v24418_v46, %v24826_v56  ;;  %v24888_v2 = vsub.f32 %v24426_v53, %v24826_v56  ;;  %v24892_v34 = vsub.f32 %v24432_v26, %v24826_v56  ;;  %v12431_v6 = vmul.f32 %v24714_v55, %v24714_v55 }
 0x3bb   :  { %v24862_v39 = vpop.f32.mrb[48].mxu1  ;;  %v12561_v36 = vadd.f32 %v12560_v27, %v12427_v16  ;;  %v24900_v23 = vsub.f32 %v24440_v32, %v24826_v56  ;;  %v24904_v46 = vsub.f32 %v24446_v58, %v24826_v56  ;;  %v12435_v26 = vmul.f32 %v24718_v29, %v24718_v29 }
 0x3bc   :  { %29649 = vst [vmem:[#allocation61_spill] sm:$0xff] %v24862_v39  ;;  %v24876_v3 = vpop.f32.mrb[49].mxu1  ;;  %29651 = vst [vmem:[#allocation63_spill] sm:$0xff] %v24884_v15  ;;  %v24914_v16 = vsub.f32 %v24572_v61, %v24826_v56  ;;  %v24918_v32 = vsub.f32 %v24580_v12, %v24826_v56  ;;  %v24922_v58 = vsub.f32 %v24594_v20, %v24826_v56  ;;  %v29664_v12 = vld [vmem:[#allocation25_spill] sm:$0xff] }
 0x3bd   :  { %29650 = vst [vmem:[#allocation62_spill] sm:$0xff] %v24876_v3  ;;  %29652 = vst [vmem:[#allocation64_spill] sm:$0xff] %v24888_v2  ;;  %v24894_v13 = vpop.f32.mrb[50].mxu1  ;;  %v12562_v62 = vadd.f32 %v12561_v36, %v12431_v6  ;;  %v24926_v27 = vsub.f32 %v24602_v9, %v24826_v56  ;;  %v24930_v36 = vsub.f32 %v24628_v22, %v24826_v56 }
 0x3be   :  { %29653 = vst [vmem:[#allocation65_spill] sm:$0xff] %v24892_v34  ;;  %29654 = vst [vmem:[#allocation66_spill] sm:$0xff] %v24894_v13  ;;  %v24906_v53 = vpop.f32.mrb[51].mxu1  ;;  %v12443_v61 = vmul.f32 %v24726_v25, %v24726_v25  ;;  %v12447_v9 = vmul.f32 %v24730_v60, %v24730_v60  ;;  %v12451_v55 = vmul.f32 %v24734_v63, %v24734_v63 }
 0x3bf   :  { %29655 = vst [vmem:[#allocation67_spill] sm:$0xff] %v24900_v23  ;;  %29656 = vst [vmem:[#allocation68_spill] sm:$0xff] %v24904_v46  ;;  %v12563_v48 = vadd.f32 %v12562_v62, %v12435_v26  ;;  %v24938_v26 = vsub.f32 %v29664_v12, %v24826_v56  ;;  %v12416_v12 = vmul.f32 %v24836_v37, %v24836_v37 }
 0x3c0   :  { %29657 = vst [vmem:[#allocation69_spill] sm:$0xff] %v24906_v53  ;;  %29658 = vst [vmem:[#allocation70_spill] sm:$0xff] %v24914_v16  ;;  %v12420_v25 = vmul.f32 %v24840_v50, %v24840_v50  ;;  %v12424_v37 = vmul.f32 %v24844_v7, %v24844_v7  ;;  %v12467_v63 = vmul.f32 %v24750_v52, %v24750_v52 }
 0x3c1   :  { %29659 = vst [vmem:[#allocation71_spill] sm:$0xff] %v24918_v32  ;;  %29660 = vst [vmem:[#allocation72_spill] sm:$0xff] %v24922_v58  ;;  %v12564_v6 = vadd.f32 %v12563_v48, %v12439_v1  ;;  %v12455_v48 = vmul.f32 %v24738_v38, %v24738_v38  ;;  %v12184_v58 = vadd.f32 %v24764_v10, %v24760_v17 }
 0x3c2   :  { %29661 = vst [vmem:[#allocation73_spill] sm:$0xff] %v24926_v27  ;;  %29662 = vst [vmem:[#allocation74_spill] sm:$0xff] %v24930_v36  ;;  %v12428_v27 = vmul.f32 %v24848_v30, %v24848_v30  ;;  %v12225_v32 = vadd.f32 %v24782_v24, %v24762_v54  ;;  %v16852_v30 = vld [vmem:[%s29222_s16 + $0x108] sm:$0xff]  ;;  %v16854_v24 = vld [vmem:[%s29222_s16 + $0x118] sm:$0xff]  ;;  %v12471_v17 = vmul.f32 %v24754_v59, %v24754_v59 }
 0x3c3   :  { %v24932_v62 = vpop.f32.mrb[52].mxu1  ;;  %29665 = vst [vmem:[#allocation25_spill] sm:$0xff] %v24938_v26  ;;  %v12565_v29 = vadd.f32 %v12564_v6, %v12443_v61  ;;  %v12459_v61 = vmul.f32 %v24742_v49, %v24742_v49  ;;  %v12600_v49 = vadd.f32 %v12420_v25, %v12416_v12  ;;  %v16849_v25 = vld [vmem:[%s29222_s16 + $0xf0] sm:$0xff] }
 0x3c4   :  { %29663 = vst [vmem:[#allocation75_spill] sm:$0xff] %v24932_v62  ;;  %v24940_v20 = vpop.f32.mrb[53].mxu1  ;;  %v29673_v54 = vld [vmem:[#allocation43_spill] sm:$0xff] }
 0x3c5   :  { %29666 = vst [vmem:[#allocation76_spill] sm:$0xff] %v24940_v20  ;;  %v24942_v44 = vpop.f32.mrb[54].mxu1  ;;  %v12566_v36 = vadd.f32 %v12565_v29, %v12447_v9  ;;  %v16843_v29 = vld [vmem:[%s29222_s16 + $0xc0] sm:$0xff]  ;;  %v25004_v10 = vsub.f32 %v29673_v54, %v24688_v33  ;;  %v12475_v54 = vmul.f32 %v24758_v41, %v24758_v41 }
 0x3c6   :  { %29667 = vst [vmem:[#allocation77_spill] sm:$0xff] %v24942_v44  ;;  %v24946_v22 = vpop.f32.mrb[55].mxu1 }
 0x3c7   :  { %29668 = vst [vmem:[#allocation78_spill] sm:$0xff] %v24946_v22  ;;  %v12567_v1 = vadd.f32 %v12566_v36, %v12451_v55  ;;  %v16845_v55 = vld [vmem:[%s29222_s16 + $0xd0] sm:$0xff]  ;;  %v16848_v36 = vld [vmem:[%s29222_s16 + $0xe8] sm:$0xff] }
 0x3c8   :  { %v19824_v7 = vpack.c.bf16 %v16845_v55, %v16843_v29  ;;  %v12226_v55 = vadd.f32 %v12225_v32, %v24818_v45 }
 0x3c9   :  { %v12568_v6 = vadd.f32 %v12567_v1, %v12455_v48  ;;  %v16850_v48 = vld [vmem:[%s29222_s16 + $0xf8] sm:$0xff]  ;;  %v12463_v1 = vmul.f32 %v24746_v11, %v24746_v11 }
 0x3ca   :  { %v19827_v52 = vpack.c.bf16 %v16850_v48, %v16848_v36  ;;  %13822 = vmatpush1.bf16.msra.mxu0 %v19824_v7  ;;  %v29674_v48 = vld [vmem:[#allocation5_spill] sm:$0xff]  ;;  %v16853_v7 = vld [vmem:[%s29222_s16 + $0x110] sm:$0xff] }
 0x3cb   :  { %v24956_v26 = vpop.f32.mrb[56].mxu1  ;;  %v12569_v50 = vadd.f32 %v12568_v6, %v12459_v61  ;;  %v16847_v61 = vld [vmem:[%s29222_s16 + $0xe0] sm:$0xff]  ;;  %v12601_v6 = vadd.f32 %v12600_v49, %v12424_v37  ;;  %v12185_v49 = vadd.f32 %v12184_v58, %v24816_v31  ;;  %v12436_v58 = vmul.f32 %v24856_v8, %v24856_v8 }
 0x3cc   :  { %29669 = vst [vmem:[#allocation79_spill] sm:$0xff] %v24956_v26  ;;  %v24960_v60 = vpop.f32.mrb[57].mxu1  ;;  %v19826_v36 = vpack.c.bf16 %v16849_v25, %v16847_v61  ;;  %13823 = vmatprep.subr.bf16.mxu0 %v19827_v52  ;;  %v12227_v61 = vadd.f32 %v12226_v55, %v24828_v5  ;;  %v16858_v52 = vld [vmem:[%s29222_s16 + $0x138] sm:$0xff] }
 0x3cd   :  { %29670 = vst [vmem:[#allocation80_spill] sm:$0xff] %v24960_v60  ;;  %v24965_v9 = vpop.f32.mrb[58].mxu1  ;;  %v12570_v12 = vadd.f32 %v12569_v50, %v12463_v1  ;;  %v12432_v50 = vmul.f32 %v24852_v40, %v24852_v40  ;;  %v12602_v29 = vadd.f32 %v12601_v6, %v12428_v27  ;;  %v25014_v1 = vsub.f32 %v29674_v48, %v24688_v33 }
 0x3ce   :  { %29671 = vst [vmem:[#allocation81_spill] sm:$0xff] %v24965_v9  ;;  %v24980_v38 = vpop.f32.mrb[59].mxu1  ;;  %v12186_v59 = vadd.f32 %v12185_v49, %v24820_v4  ;;  %v19829_v40 = vpack.c.bf16 %v16854_v24, %v16852_v30  ;;  %v16856_v30 = vld [vmem:[%s29222_s16 + $0x128] sm:$0xff]  ;;  %v29677_v24 = vld [vmem:[#allocation7_spill] sm:$0xff]  ;;  %v12440_v6 = vmul.f32 %v24860_v21, %v24860_v21  ;;  %v12228_v55 = vadd.f32 %v12227_v61, %v24876_v3 }
 0x3cf   :  { %29672 = vst [vmem:[#allocation82_spill] sm:$0xff] %v24980_v38  ;;  %v12571_v37 = vadd.f32 %v12570_v12, %v12467_v63  ;;  %v16851_v63 = vld [vmem:[%s29222_s16 + $0x100] sm:$0xff]  ;;  %v12603_v27 = vadd.f32 %v12602_v29, %v12432_v50  ;;  %v25040_v12 = vsub.f32 %v29677_v24, %v24688_v33  ;;  %13824 = vmatpush1.bf16.msra.mxu0 %v19826_v36  ;;  %v16857_v36 = vld [vmem:[%s29222_s16 + $0x130] sm:$0xff] }
 0x3d0   :  { %v12187_v50 = vadd.f32 %v12186_v59, %v24862_v39  ;;  %v19828_v5 = vpack.c.bf16 %v16853_v7, %v16851_v63  ;;  %v29680_v24 = vld [vmem:[#allocation9_spill] sm:$0xff]  ;;  %v12483_v4 = vmul.f32 %v25014_v1, %v25014_v1  ;;  %13825 = vmatprep.subr.bf16.mxu0 %v19829_v40  ;;  %v19831_v59 = vpack.c.bf16 %v16858_v52, %v16856_v30  ;;  %v29681_v61 = vld [vmem:[#allocation11_spill] sm:$0xff] }
 0x3d1   :  { %v12572_v32 = vadd.f32 %v12571_v37, %v12471_v17  ;;  %v12479_v17 = vmul.f32 %v25004_v10, %v25004_v10  ;;  %v12604_v29 = vadd.f32 %v12603_v27, %v12436_v58  ;;  %v25054_v45 = vsub.f32 %v29680_v24, %v24688_v33  ;;  %v16860_v40 = vld [vmem:[%s29222_s16 + $0x148] sm:$0xff]  ;;  %v16862_v27 = vld [vmem:[%s29222_s16 + $0x158] sm:$0xff] }
 0x3d2   :  { %v12188_v31 = vadd.f32 %v12187_v50, %v24894_v13  ;;  %v12444_v7 = vmul.f32 %v24866_v57, %v24866_v57  ;;  %v12229_v58 = vadd.f32 %v12228_v55, %v24906_v53  ;;  %v25076_v30 = vsub.f32 %v29681_v61, %v24688_v33  ;;  %v29682_v24 = vld [vmem:[#allocation13_spill] sm:$0xff] }
 0x3d3   :  { %v25019_v11 = vpop.f32.mrb[60].mxu1  ;;  %v12573_v37 = vadd.f32 %v12572_v32, %v12475_v54  ;;  %v16855_v54 = vld [vmem:[%s29222_s16 + $0x120] sm:$0xff]  ;;  %v12605_v32 = vadd.f32 %v12604_v29, %v12440_v6  ;;  %v12487_v52 = vmul.f32 %v25040_v12, %v25040_v12  ;;  %13826 = vmatpush1.bf16.msra.mxu0 %v19828_v5  ;;  %v25086_v53 = vsub.f32 %v29682_v24, %v24688_v33 }
 0x3d4   :  { %29675 = vst [vmem:[#allocation43_spill] sm:$0xff] %v25019_v11  ;;  %v25030_v25 = vpop.f32.mrb[61].mxu1  ;;  %v12189_v6 = vadd.f32 %v12188_v31, %v24932_v62  ;;  %v12230_v29 = vadd.f32 %v12229_v58, %v24940_v20  ;;  %v19830_v55 = vpack.c.bf16 %v16857_v36, %v16855_v54  ;;  %v12491_v61 = vmul.f32 %v25054_v45, %v25054_v45  ;;  %v16859_v31 = vld [vmem:[%s29222_s16 + $0x140] sm:$0xff]  ;;  %v29685_v58 = vld [vmem:[#allocation15_spill] sm:$0xff] }
 0x3d5   :  { %29676 = vst [vmem:[#allocation5_spill] sm:$0xff] %v25030_v25  ;;  %v25047_v49 = vpop.f32.mrb[62].mxu1  ;;  %v12574_v63 = vadd.f32 %v12573_v37, %v12479_v17  ;;  %v12448_v17 = vmul.f32 %v24870_v35, %v24870_v35  ;;  %v12606_v37 = vadd.f32 %v12605_v32, %v12444_v7  ;;  %13827 = vmatprep.subr.bf16.mxu0 %v19831_v59  ;;  %v16864_v59 = vld [vmem:[%s29222_s16 + $0x168] sm:$0xff]  ;;  %v16866_v32 = vld [vmem:[%s29222_s16 + $0x178] sm:$0xff] }
 0x3d6   :  { %29678 = vst [vmem:[#allocation7_spill] sm:$0xff] %v25047_v49  ;;  %v25050_v48 = vpop.f32.mrb[63].mxu1  ;;  %v12190_v3 = vadd.f32 %v12189_v6, %v24942_v44  ;;  %v19833_v39 = vpack.c.bf16 %v16862_v27, %v16860_v40  ;;  %v12452_v54 = vmul.f32 %v24874_v51, %v24874_v51  ;;  %v25112_v40 = vsub.f32 %v29685_v58, %v24688_v33  ;;  %v29688_v58 = vld [vmem:[#allocation17_spill] sm:$0xff] }
 0x3d7   :  { %29679 = vst [vmem:[#allocation83_spill] sm:$0xff] %v25050_v48  ;;  %v12575_v50 = vadd.f32 %v12574_v63, %v12483_v4  ;;  %v16861_v4 = vld [vmem:[%s29222_s16 + $0x150] sm:$0xff]  ;;  %v12607_v36 = vadd.f32 %v12606_v37, %v12448_v17  ;;  %v12231_v63 = vadd.f32 %v12230_v29, %v24946_v22  ;;  %v12495_v27 = vmul.f32 %v25076_v30, %v25076_v30 }
 0x3d8   :  { %v12191_v17 = vadd.f32 %v12190_v3, %v24956_v26  ;;  %13828 = vmatpush1.bf16.msra.mxu0 %v19830_v55  ;;  %v19832_v22 = vpack.c.bf16 %v16861_v4, %v16859_v31  ;;  %v25126_v20 = vsub.f32 %v29688_v58, %v24688_v33  ;;  %v12499_v44 = vmul.f32 %v25086_v53, %v25086_v53  ;;  %v16865_v55 = vld [vmem:[%s29222_s16 + $0x170] sm:$0xff] }
 0x3d9   :  { %v12576_v5 = vadd.f32 %v12575_v50, %v12487_v52  ;;  %v12456_v52 = vmul.f32 %v24880_v42, %v24880_v42  ;;  %v12608_v37 = vadd.f32 %v12607_v36, %v12452_v54  ;;  %v12232_v29 = vadd.f32 %v12231_v63, %v24960_v60  ;;  %13829 = vmatprep.subr.bf16.mxu0 %v19833_v39  ;;  %v16868_v39 = vld [vmem:[%s29222_s16 + $0x188] sm:$0xff]  ;;  %v16870_v54 = vld [vmem:[%s29222_s16 + $0x198] sm:$0xff] }
 0x3da   :  { %v12192_v62 = vadd.f32 %v12191_v17, %v24965_v9  ;;  %v19835_v3 = vpack.c.bf16 %v16866_v32, %v16864_v59  ;;  %v12460_v33 = vmul.f32 %v24884_v15, %v24884_v15  ;;  %v12503_v36 = vmul.f32 %v25112_v40, %v25112_v40 }
 0x3db   :  { %v25091_v13 = vpop.f32.mrb[64].mxu1  ;;  %v12577_v50 = vadd.f32 %v12576_v5, %v12491_v61  ;;  %v16863_v61 = vld [vmem:[%s29222_s16 + $0x160] sm:$0xff]  ;;  %v12609_v4 = vadd.f32 %v12608_v37, %v12456_v52  ;;  %v12233_v5 = vadd.f32 %v12232_v29, %v24980_v38  ;;  %v12464_v63 = vmul.f32 %v24888_v2, %v24888_v2 }
 0x3dc   :  { %29683 = vst [vmem:[#allocation9_spill] sm:$0xff] %v25091_v13  ;;  %v25102_v7 = vpop.f32.mrb[65].mxu1  ;;  %v12193_v59 = vadd.f32 %v12192_v62, %v25019_v11  ;;  %13830 = vmatpush1.bf16.msra.mxu0 %v19832_v22  ;;  %v19834_v17 = vpack.c.bf16 %v16865_v55, %v16863_v61  ;;  %v19837_v58 = vpack.c.bf16 %v16870_v54, %v16868_v39  ;;  %v16867_v38 = vld [vmem:[%s29222_s16 + $0x180] sm:$0xff] }
 0x3dd   :  { %29684 = vst [vmem:[#allocation11_spill] sm:$0xff] %v25102_v7  ;;  %v25119_v6 = vpop.f32.mrb[66].mxu1  ;;  %v12578_v31 = vadd.f32 %v12577_v50, %v12495_v27  ;;  %v12610_v27 = vadd.f32 %v12609_v4, %v12460_v33  ;;  %v12234_v52 = vadd.f32 %v12233_v5, %v25030_v25  ;;  %v12507_v50 = vmul.f32 %v25126_v20, %v25126_v20  ;;  %v16874_v33 = vld [vmem:[%s29222_s16 + $0x1b8] sm:$0xff] }
 0x3de   :  { %29686 = vst [vmem:[#allocation13_spill] sm:$0xff] %v25119_v6  ;;  %v25122_v24 = vpop.f32.mrb[67].mxu1  ;;  %v12194_v37 = vadd.f32 %v12193_v59, %v25047_v49  ;;  %13831 = vmatprep.subr.bf16.mxu0 %v19835_v3  ;;  %v12468_v22 = vmul.f32 %v24892_v34, %v24892_v34  ;;  %v16872_v3 = vld [vmem:[%s29222_s16 + $0x1a8] sm:$0xff]  ;;  %v12511_v4 = vmul.f32 %v24768_v47, %v24768_v47  ;;  %v29691_v5 = vld [vmem:[#allocation44_spill] sm:$0xff] }
 0x3df   :  { %29687 = vst [vmem:[#allocation15_spill] sm:$0xff] %v25122_v24  ;;  %v12579_v32 = vadd.f32 %v12578_v31, %v12499_v44  ;;  %v16869_v44 = vld [vmem:[%s29222_s16 + $0x190] sm:$0xff]  ;;  %v12611_v61 = vadd.f32 %v12610_v27, %v12464_v63  ;;  %v12235_v55 = vadd.f32 %v12234_v52, %v25050_v48  ;;  %v25178_v39 = vsub.f32 %v29691_v5, %v24826_v56 }
 0x3e0   :  { %v12472_v54 = vmul.f32 %v24900_v23, %v24900_v23  ;;  %13832 = vmatpush1.bf16.msra.mxu0 %v19834_v17  ;;  %v19836_v48 = vpack.c.bf16 %v16869_v44, %v16867_v38  ;;  %v12515_v25 = vmul.f32 %v24772_v18, %v24772_v18  ;;  %v29695_v5 = vld [vmem:[#allocation6_spill] sm:$0xff]  ;;  %v12476_v44 = vmul.f32 %v24904_v46, %v24904_v46 }
 0x3e1   :  { %v12580_v62 = vadd.f32 %v12579_v32, %v12503_v36  ;;  %29692 = vst [vmem:[#allocation44_spill] sm:$0xff] %v25178_v39  ;;  %v12195_v36 = vadd.f32 %v12194_v37, %v25091_v13  ;;  %v12612_v32 = vadd.f32 %v12611_v61, %v12468_v22  ;;  %v12236_v27 = vadd.f32 %v12235_v55, %v25102_v7  ;;  %v16873_v17 = vld [vmem:[%s29222_s16 + $0x1b0] sm:$0xff]  ;;  %v16878_v61 = vld [vmem:[%s29222_s16 + $0x1d8] sm:$0xff] }
 0x3e2   :  { %v25192_v60 = vsub.f32 %v29695_v5, %v24826_v56  ;;  %13833 = vmatprep.subr.bf16.mxu0 %v19837_v58  ;;  %v19839_v37 = vpack.c.bf16 %v16874_v33, %v16872_v3  ;;  %v16876_v58 = vld [vmem:[%s29222_s16 + $0x1c8] sm:$0xff]  ;;  %v12519_v55 = vmul.f32 %v24776_v28, %v24776_v28  ;;  %v29697_v3 = vld [vmem:[#allocation8_spill] sm:$0xff]  ;;  %v12523_v5 = vmul.f32 %v24780_v43, %v24780_v43 }
 0x3e3   :  { %v25155_v29 = vpop.f32.mrb[68].mxu1  ;;  %v12581_v59 = vadd.f32 %v12580_v62, %v12507_v50  ;;  %v12196_v49 = vadd.f32 %v12195_v36, %v25119_v6  ;;  %v16871_v50 = vld [vmem:[%s29222_s16 + $0x1a0] sm:$0xff]  ;;  %v12613_v62 = vadd.f32 %v12612_v32, %v12472_v54  ;;  %v12237_v22 = vadd.f32 %v12236_v27, %v25122_v24  ;;  %v29698_v24 = vld [vmem:[#allocation10_spill] sm:$0xff] }
 0x3e4   :  { %29689 = vst [vmem:[#allocation17_spill] sm:$0xff] %v25155_v29  ;;  %v25166_v31 = vpop.f32.mrb[69].mxu1  ;;  %29696 = vst [vmem:[#allocation6_spill] sm:$0xff] %v25192_v60  ;;  %v25214_v33 = vsub.f32 %v29697_v3, %v24826_v56  ;;  %13834 = vmatpush1.bf16.msra.mxu0 %v19836_v48  ;;  %v19838_v27 = vpack.c.bf16 %v16873_v17, %v16871_v50  ;;  %v25224_v7 = vsub.f32 %v29698_v24, %v24826_v56 }
 0x3e5   :  { %29690 = vst [vmem:[#allocation84_spill] sm:$0xff] %v25166_v31  ;;  %v25183_v63 = vpop.f32.mrb[70].mxu1  ;;  %v12582_v38 = vadd.f32 %v12581_v59, %v12511_v4  ;;  %v12480_v4 = vmul.f32 %v25178_v39, %v25178_v39  ;;  %v12197_v54 = vadd.f32 %v12196_v49, %v25155_v29  ;;  %v12614_v59 = vadd.f32 %v12613_v62, %v12476_v44  ;;  %v16877_v49 = vld [vmem:[%s29222_s16 + $0x1d0] sm:$0xff]  ;;  %v16882_v44 = vld [vmem:[%s29222_s16 + $0x1f8] sm:$0xff] }
 0x3e6   :  { %29693 = vst [vmem:[#allocation85_spill] sm:$0xff] %v25183_v63  ;;  %v25186_v52 = vpop.f32.mrb[71].mxu1  ;;  %v12238_v32 = vadd.f32 %v12237_v22, %v25166_v31  ;;  %13835 = vmatprep.subr.bf16.mxu0 %v19839_v37  ;;  %v19841_v13 = vpack.c.bf16 %v16878_v61, %v16876_v58  ;;  %v12484_v50 = vmul.f32 %v25192_v60, %v25192_v60  ;;  %v16880_v37 = vld [vmem:[%s29222_s16 + $0x1e8] sm:$0xff]  ;;  %v29701_v22 = vld [vmem:[#allocation12_spill] sm:$0xff] }
 0x3e7   :  { %29694 = vst [vmem:[#allocation86_spill] sm:$0xff] %v25186_v52  ;;  %v12583_v36 = vadd.f32 %v12582_v38, %v12515_v25  ;;  %v12198_v3 = vadd.f32 %v12197_v54, %v25183_v63  ;;  %v16875_v25 = vld [vmem:[%s29222_s16 + $0x1c0] sm:$0xff]  ;;  %v12615_v24 = vadd.f32 %v12614_v59, %v12480_v4  ;;  %v12527_v62 = vmul.f32 %v24786_v19, %v24786_v19 }
 0x3e8   :  { %v12239_v17 = vadd.f32 %v12238_v32, %v25186_v52  ;;  %v25250_v58 = vsub.f32 %v29701_v22, %v24826_v56  ;;  %v12488_v61 = vmul.f32 %v25214_v33, %v25214_v33  ;;  %13836 = vmatpush1.bf16.msra.mxu0 %v19838_v27  ;;  %v19840_v52 = vpack.c.bf16 %v16877_v49, %v16875_v25  ;;  %v29705_v22 = vld [vmem:[#allocation14_spill] sm:$0xff] }
 0x3e9   :  { %v12584_v48 = vadd.f32 %v12583_v36, %v12519_v55  ;;  %v12616_v36 = vadd.f32 %v12615_v24, %v12484_v50  ;;  %v12531_v31 = vmul.f32 %v24790_v14, %v24790_v14  ;;  %v25264_v63 = vsub.f32 %v29705_v22, %v24826_v56  ;;  %13837 = vmatprep.subr.bf16.mxu0 %v19841_v13  ;;  %v16881_v27 = vld [vmem:[%s29222_s16 + $0x1f0] sm:$0xff]  ;;  %v16884_v13 = vld [vmem:[%s29222_s16 + $0x208] sm:$0xff]  ;;  %v16886_v24 = vld [vmem:[%s29222_s16 + $0x218] sm:$0xff] }
 0x3ea   :  { %29702 = vst [vmem:[#allocation12_spill] sm:$0xff] %v25250_v58  ;;  %v12492_v49 = vmul.f32 %v25224_v7, %v25224_v7  ;;  %v29710_v22 = vld [vmem:[#allocation18_spill] sm:$0xff] }
 0x3eb   :  { %v25227_v6 = vpop.f32.mrb[72].mxu1  ;;  %v12585_v54 = vadd.f32 %v12584_v48, %v12523_v5  ;;  %29706 = vst [vmem:[#allocation14_spill] sm:$0xff] %v25264_v63  ;;  %v16879_v5 = vld [vmem:[%s29222_s16 + $0x1e0] sm:$0xff]  ;;  %v12617_v48 = vadd.f32 %v12616_v36, %v12488_v61  ;;  %v12496_v61 = vmul.f32 %v25250_v58, %v25250_v58  ;;  %v29709_v36 = vld [vmem:[#allocation47_spill] sm:$0xff] }
 0x3ec   :  { %29699 = vst [vmem:[#allocation8_spill] sm:$0xff] %v25227_v6  ;;  %v25238_v38 = vpop.f32.mrb[73].mxu1  ;;  %v12199_v55 = vadd.f32 %v12198_v3, %v25227_v6  ;;  %v19843_v3 = vpack.c.bf16 %v16882_v44, %v16880_v37  ;;  %v29707_v37 = vld [vmem:[#allocation16_spill] sm:$0xff]  ;;  %13838 = vmatpush1.bf16.msra.mxu0 %v19840_v52 }
 0x3ed   :  { %29700 = vst [vmem:[#allocation10_spill] sm:$0xff] %v25238_v38  ;;  %v25255_v4 = vpop.f32.mrb[74].mxu1  ;;  %v12240_v59 = vadd.f32 %v12239_v17, %v25238_v38  ;;  %v12586_v25 = vadd.f32 %v12585_v54, %v12527_v62  ;;  %v12535_v17 = vmul.f32 %v24794_v0, %v24794_v0  ;;  %v25286_v44 = vsub.f32 %v29707_v37, %v24826_v56 }
 0x3ee   :  { %29703 = vst [vmem:[#allocation87_spill] sm:$0xff] %v25255_v4  ;;  %v25258_v32 = vpop.f32.mrb[75].mxu1  ;;  %v12200_v29 = vadd.f32 %v12199_v55, %v25255_v4  ;;  %v12618_v55 = vadd.f32 %v12617_v48, %v12492_v49  ;;  %v19842_v54 = vpack.c.bf16 %v16881_v27, %v16879_v5  ;;  %13839 = vmatprep.subr.bf16.mxu0 %v19843_v3  ;;  %v29714_v5 = vld [vmem:[#allocation48_spill] sm:$0xff]  ;;  %v29715_v48 = vld [vmem:[#allocation19_spill] sm:$0xff] }
 0x3ef   :  { %29704 = vst [vmem:[#allocation88_spill] sm:$0xff] %v25258_v32  ;;  %v12241_v50 = vadd.f32 %v12240_v59, %v25258_v32  ;;  %29708 = vst [vmem:[#allocation16_spill] sm:$0xff] %v25286_v44  ;;  %v12587_v62 = vadd.f32 %v12586_v25, %v12531_v31  ;;  %v12539_v59 = vmul.f32 %v29709_v36, %v29709_v36 }
 0x3f0   :  { %v25294_v32 = vsub.f32 %v29710_v22, %v24826_v56  ;;  %v19845_v4 = vpack.c.bf16 %v16886_v24, %v16884_v13  ;;  %v12500_v31 = vmul.f32 %v25264_v63, %v25264_v63  ;;  %v12619_v25 = vadd.f32 %v12618_v55, %v12496_v61  ;;  %13840 = vmatpush1.bf16.msra.mxu0 %v19842_v54  ;;  %v29719_v61 = vld [vmem:[#allocation49_spill] sm:$0xff] }
 0x3f1   :  { %v12588_v37 = vadd.f32 %v12587_v62, %v12535_v17  ;;  %v12543_v27 = vmul.f32 %v29714_v5, %v29714_v5  ;;  %v25307_v22 = vsub.f32 %v29715_v48, %v24826_v56  ;;  %v12504_v24 = vmul.f32 %v25286_v44, %v25286_v44  ;;  %v29723_v54 = vld [vmem:[#allocation21_spill] sm:$0xff] }
 0x3f2   :  { %29711 = vst [vmem:[#allocation47_spill] sm:$0xff] %v25294_v32  ;;  %v12620_v17 = vadd.f32 %v12619_v25, %v12500_v31  ;;  %v12547_v55 = vmul.f32 %v29719_v61, %v29719_v61  ;;  %14022 = vmatprep.subr.bf16.mxu0 %v19845_v4  ;;  %v29722_v31 = vld [vmem:[#allocation50_spill] sm:$0xff] }
 0x3f3   :  { %v25296_v38 = vpop.f32.mrb[76].mxu1  ;;  %29716 = vst [vmem:[#allocation48_spill] sm:$0xff] %v25307_v22  ;;  %v12589_v13 = vadd.f32 %v12588_v37, %v12539_v59  ;;  %v12508_v59 = vmul.f32 %v25294_v32, %v25294_v32  ;;  %v12551_v25 = vmul.f32 %v29722_v31, %v29722_v31 }
 0x3f4   :  { %29712 = vst [vmem:[#allocation18_spill] sm:$0xff] %v25296_v38  ;;  %v12201_v49 = vadd.f32 %v12200_v29, %v25296_v38  ;;  %v25301_v52 = vpop.f32.mrb[77].mxu1  ;;  %v12621_v37 = vadd.f32 %v12620_v17, %v12504_v24 }
 0x3f5   :  { %29713 = vst [vmem:[#allocation89_spill] sm:$0xff] %v25301_v52  ;;  %v12242_v6 = vadd.f32 %v12241_v50, %v25301_v52  ;;  %v25310_v3 = vpop.f32.mrb[78].mxu1  ;;  %v12590_v38 = vadd.f32 %v12589_v13, %v12543_v27  ;;  %v29720_v50 = vld [vmem:[#allocation20_spill] sm:$0xff]  ;;  %v29725_v27 = vld [vmem:[#allocation51_spill] sm:$0xff] }
 0x3f6   :  { %29717 = vst [vmem:[#allocation19_spill] sm:$0xff] %v25310_v3  ;;  %v12202_v29 = vadd.f32 %v12201_v49, %v25310_v3  ;;  %v25315_v62 = vpop.f32.mrb[79].mxu1  ;;  %v25322_v52 = vsub.f32 %v29720_v50, %v24826_v56  ;;  %v25330_v3 = vsub.f32 %v29723_v54, %v24826_v56  ;;  %v12622_v4 = vadd.f32 %v12621_v37, %v12508_v59  ;;  %v29726_v50 = vld [vmem:[#allocation22_spill] sm:$0xff]  ;;  %v29730_v59 = vld [vmem:[#allocation23_spill] sm:$0xff] }
 0x3f7   :  { %29718 = vst [vmem:[#allocation90_spill] sm:$0xff] %v25315_v62  ;;  %v12243_v48 = vadd.f32 %v12242_v6, %v25315_v62  ;;  %v12591_v49 = vadd.f32 %v12590_v38, %v12547_v55  ;;  %v12512_v6 = vmul.f32 %v25307_v22, %v25307_v22  ;;  %v12555_v13 = vmul.f32 %v29725_v27, %v29725_v27 }
 0x3f8   :  { %29721 = vst [vmem:[#allocation49_spill] sm:$0xff] %v25322_v52  ;;  %29724 = vst [vmem:[#allocation20_spill] sm:$0xff] %v25330_v3  ;;  %v25338_v62 = vsub.f32 %v29726_v50, %v24826_v56  ;;  %v12516_v38 = vmul.f32 %v25322_v52, %v25322_v52  ;;  %v25349_v37 = vsub.f32 %v29730_v59, %v24826_v56 }
 0x3f9   :  { %v12592_v17 = vadd.f32 %v12591_v49, %v12551_v25  ;;  %v12623_v55 = vadd.f32 %v12622_v4, %v12512_v6  ;;  %v12520_v25 = vmul.f32 %v25330_v3, %v25330_v3 }
 0x3fa   :  { %29727 = vst [vmem:[#allocation50_spill] sm:$0xff] %v25338_v62  ;;  %29731 = vst [vmem:[#allocation22_spill] sm:$0xff] %v25349_v37 }
 0x3fb   :  { %v25340_v24 = vpop.f32.mrb[80].mxu1  ;;  %v12593_v50 = vadd.f32 %v12592_v17, %v12555_v13  ;;  %v12624_v49 = vadd.f32 %v12623_v55, %v12516_v38  ;;  %v12528_v17 = vmul.f32 %v25349_v37, %v25349_v37 }
 0x3fc   :  { %29728 = vst [vmem:[#allocation21_spill] sm:$0xff] %v25340_v24  ;;  %v12203_v54 = vadd.f32 %v12202_v29, %v25340_v24  ;;  %v25345_v11 = vpop.f32.mrb[81].mxu1  ;;  %v29734_v24 = vld [vmem:[#allocation24_spill] sm:$0xff] }
 0x3fd   :  { %29729 = vst [vmem:[#allocation51_spill] sm:$0xff] %v25345_v11  ;;  %v12244_v9 = vadd.f32 %v12243_v48, %v25345_v11  ;;  %v25352_v26 = vpop.f32.mrb[82].mxu1  ;;  %v12594_v4 = vrot.slane %v12593_v50, 4  ;;  %v25362_v59 = vsub.f32 %v29734_v24, %v24826_v56  ;;  %v12524_v48 = vmul.f32 %v25338_v62, %v25338_v62  ;;  %v29770_v62 = vld [vmem:[#allocation30_spill] sm:$0xff] }
 0x3fe   :  { %29732 = vst [vmem:[#allocation23_spill] sm:$0xff] %v25352_v26  ;;  %v12204_v60 = vadd.f32 %v12203_v54, %v25352_v26  ;;  %v25357_v6 = vpop.f32.mrb[83].mxu1  ;;  %v12625_v11 = vadd.f32 %v12624_v49, %v12520_v25  ;;  %v12536_v25 = vmul.f32 %v24914_v16, %v24914_v16 }
 0x3ff   :  { %29733 = vst [vmem:[#allocation91_spill] sm:$0xff] %v25357_v6  ;;  %v12245_v29 = vadd.f32 %v12244_v9, %v25357_v6  ;;  %29735 = vst [vmem:[#allocation24_spill] sm:$0xff] %v25362_v59  ;;  %v12595_v13 = vadd.f32 %v12594_v4, %v12593_v50  ;;  %v12532_v9 = vmul.f32 %v25362_v59, %v25362_v59 }
 0x400   :  { %v12626_v38 = vadd.f32 %v12625_v11, %v12524_v48 }
 0x401   :  { %v12596_v54 = vrot.slane %v12595_v13, 2 }
 0x402   :  { %v12627_v6 = vadd.f32 %v12626_v38, %v12528_v17  ;;  %v29740_v38 = vld [vmem:[#allocation71_spill] sm:$0xff] }
 0x403   :  { %v25368_v55 = vpop.f32.mrb[84].mxu1  ;;  %v12597_v50 = vadd.f32 %v12596_v54, %v12595_v13 }
 0x404   :  { %29736 = vst [vmem:[#allocation92_spill] sm:$0xff] %v25368_v55  ;;  %v12205_v26 = vadd.f32 %v12204_v60, %v25368_v55  ;;  %v25373_v56 = vpop.f32.mrb[85].mxu1  ;;  %v12628_v11 = vadd.f32 %v12627_v6, %v12532_v9  ;;  %v12540_v60 = vmul.f32 %v29740_v38, %v29740_v38  ;;  %v29743_v6 = vld [vmem:[#allocation73_spill] sm:$0xff] }
 0x405   :  { %29737 = vst [vmem:[#allocation93_spill] sm:$0xff] %v25373_v56  ;;  %v12246_v24 = vadd.f32 %v12245_v29, %v25373_v56  ;;  %v25376_v39 = vpop.f32.mrb[86].mxu1  ;;  %v12598_v17 = vrot.slane %v12597_v50, 1  ;;  %v29741_v29 = vld [vmem:[#allocation72_spill] sm:$0xff] }
 0x406   :  { %29738 = vst [vmem:[#allocation94_spill] sm:$0xff] %v25376_v39  ;;  %v12206_v49 = vadd.f32 %v12205_v26, %v25376_v39  ;;  %v25381_v4 = vpop.f32.mrb[87].mxu1  ;;  %v12629_v55 = vadd.f32 %v12628_v11, %v12536_v25  ;;  %v12544_v56 = vmul.f32 %v29741_v29, %v29741_v29  ;;  %v12548_v26 = vmul.f32 %v29743_v6, %v29743_v6  ;;  %v29746_v11 = vld [vmem:[#allocation74_spill] sm:$0xff] }
 0x407   :  { %29739 = vst [vmem:[#allocation95_spill] sm:$0xff] %v25381_v4  ;;  %v12247_v48 = vadd.f32 %v12246_v24, %v25381_v4  ;;  %v12599_v46 = vadd.f32 %v12598_v17, %v12597_v50  ;;  %v12880_v4 = vlaneseq }
 0x408   :  { %v12630_v13 = vadd.f32 %v12629_v55, %v12540_v60  ;;  %v12552_v55 = vmul.f32 %v29746_v11, %v29746_v11  ;;  %v29765_v11 = vld [vmem:[#allocation26_spill] sm:$0xff] }
 0x409   :  { %v12723_v23 = vmul.f32 0.0034722222, %v12599_v46  ;;  %v25406_v2 = vshrl.u32 %v12880_v4, 7  ;;  %v12100_v4 = vld [vmem:[%s29754_s24] sm:$0xf] }
 0x40a   :  { %v12631_v9 = vadd.f32 %v12630_v13, %v12544_v56 }
 0x40b   :  { %v25388_v54 = vpop.f32.mrb[88].mxu1  ;;  %v12727_v50 = vadd.f32 1e-05, %v12723_v23 }
 0x40c   :  { %29742 = vst [vmem:[#allocation96_spill] sm:$0xff] %v25388_v54  ;;  %v12207_v39 = vadd.f32 %v12206_v49, %v25388_v54  ;;  %v25393_v24 = vpop.f32.mrb[89].mxu1  ;;  %v12632_v17 = vadd.f32 %v12631_v9, %v12548_v26  ;;  %v29748_v49 = vld [vmem:[#allocation25_spill] sm:$0xff] }
 0x40d   :  { %29744 = vst [vmem:[#allocation97_spill] sm:$0xff] %v25393_v24  ;;  %v12248_v34 = vadd.f32 %v12247_v48, %v25393_v24  ;;  %v25396_v25 = vpop.f32.mrb[90].mxu1  ;;  %20970 = vrsqrt.f32 %v12727_v50  ;;  %v12556_v13 = vmul.f32 %v29748_v49, %v29748_v49  ;;  %29749 = vst [vmem:[#allocation25_spill] sm:$0xff] %v25406_v2 }
 0x40e   :  { %29745 = vst [vmem:[#allocation98_spill] sm:$0xff] %v25396_v25  ;;  %v12208_v46 = vadd.f32 %v12207_v39, %v25396_v25  ;;  %v25401_v60 = vpop.f32.mrb[91].mxu1  ;;  %v12633_v54 = vadd.f32 %v12632_v17, %v12552_v55  ;;  %v25414_v39 = vsub.s32 0, %v25406_v2 }
 0x40f   :  { %29747 = vst [vmem:[#allocation99_spill] sm:$0xff] %v25401_v60  ;;  %v12249_v56 = vadd.f32 %v12248_v34, %v25401_v60 }
 0x410   :  { %v12634_v48 = vadd.f32 %v12633_v54, %v12556_v13  ;;  %29752 = vst [vmem:[#allocation102_spill] sm:$0xff] %v25414_v39 }
 0x412   :  { %v12635_v23 = vrot.slane %v12634_v48, 4 }
 0x413   :  { %v25408_v24 = vpop.f32.mrb[92].mxu1 }
 0x414   :  { %29750 = vst [vmem:[#allocation100_spill] sm:$0xff] %v25408_v24  ;;  %v12209_v15 = vadd.f32 %v12208_v46, %v25408_v24  ;;  %v25411_v26 = vpop.f32.mrb[93].mxu1  ;;  %v12636_v55 = vadd.f32 %v12635_v23, %v12634_v48  ;;  %v25431_v46 = vrot.slane %v12100_v4, %v25414_v39 }
 0x415   :  { %29751 = vst [vmem:[#allocation101_spill] sm:$0xff] %v25411_v26  ;;  %v12250_v34 = vadd.f32 %v12249_v56, %v25411_v26  ;;  %v25417_v9 = vpop.f32.mrb[94].mxu1  ;;  %v25436_v56 = vsub.s32 1, %v25406_v2  ;;  %v12101_v26 = vld [vmem:[%s29757_s26] sm:$0xf]  ;;  %v25455_v2 = vld [vmem:[%s29222_s16 + $0x210] sm:$0xff] }
 0x416   :  { %29753 = vst [vmem:[#allocation103_spill] sm:$0xff] %v25417_v9  ;;  %v25423_v54 = vadd.f32 %v12209_v15, %v25417_v9  ;;  %v25425_v50 = vpop.f32.mrb[95].mxu1  ;;  %v12637_v60 = vrot.slane %v12636_v55, 2  ;;  %29761 = vst [vmem:[#allocation109_spill] sm:$0xff] %v25455_v2 }
 0x417   :  { %29755 = vst [vmem:[#allocation104_spill] sm:$0xff] %v25425_v50  ;;  %v25428_v17 = vadd.f32 %v12250_v34, %v25425_v50  ;;  %v25433_v13 = vpop.eup %20970  ;;  %29756 = vst [vmem:[#allocation105_spill] sm:$0xff] %v25436_v56  ;;  %v25450_v34 = vld [vmem:[%s29222_s16 + $0x200] sm:$0xff]  ;;  %v25466_v24 = vrot.slane %v12100_v4, %v25436_v56  ;;  %v25473_v38 = vrot.slane %v12101_v26, %v25436_v56 }
 0x418   :  { %v12875_v15 = vmul.f32 %v25433_v13, %v29725_v27  ;;  %29760 = vst [vmem:[#allocation108_spill] sm:$0xff] %v25450_v34  ;;  %v25463_v27 = vrot.slane %v12101_v26, %v25414_v39  ;;  %v12735_v6 = vmul.f32 %v25433_v13, %v29765_v11  ;;  %v12638_v29 = vadd.f32 %v12637_v60, %v12636_v55  ;;  %v29768_v39 = vld [vmem:[#allocation28_spill] sm:$0xff]  ;;  %v29769_v4 = vld [vmem:[#allocation29_spill] sm:$0xff]  ;;  %v29771_v11 = vld [vmem:[#allocation31_spill] sm:$0xff] }
 0x419   :  { %29766 = vst [vmem:[#allocation26_spill] sm:$0xff] %v25473_v38  ;;  %v12743_v59 = vmul.f32 %v25433_v13, %v29768_v39  ;;  %v12747_v37 = vmul.f32 %v25433_v13, %v29769_v4  ;;  %v12751_v3 = vmul.f32 %v25433_v13, %v29770_v62  ;;  %v12755_v60 = vmul.f32 %v25433_v13, %v29771_v11  ;;  %v29772_v26 = vld [vmem:[#allocation32_spill] sm:$0xff]  ;;  %v29775_v34 = vld [vmem:[#allocation35_spill] sm:$0xff] }
 0x41a   :  { %v25458_v50 = vmul.f32 %v25431_v46, %v12875_v15  ;;  %v25489_v55 = vmul.f32 %v25433_v13, %v29772_v26  ;;  %v29773_v15 = vld [vmem:[#allocation33_spill] sm:$0xff]  ;;  %v25501_v4 = vmul.f32 %v25433_v13, %v29775_v34  ;;  %v12799_v62 = vmul.f32 %v25433_v13, %v25004_v10 }
 0x41b   :  { %v25443_v48 = vpop.f32.mrb[96].mxu1  ;;  %v25493_v56 = vmul.f32 %v25433_v13, %v29773_v15  ;;  %v12803_v11 = vmul.f32 %v25433_v13, %v25014_v1  ;;  %v12807_v26 = vmul.f32 %v25433_v13, %v25040_v12  ;;  %v12811_v15 = vmul.f32 %v25433_v13, %v25054_v45 }
 0x41c   :  { %29758 = vst [vmem:[#allocation106_spill] sm:$0xff] %v25443_v48  ;;  %v25445_v23 = vpop.f32.mrb[97].mxu1  ;;  %29762 = vst [vmem:[#allocation110_spill] sm:$0xff] %v25458_v50  ;;  %v29767_v50 = vld [vmem:[#allocation27_spill] sm:$0xff]  ;;  %v12819_v2 = vmul.f32 %v25433_v13, %v25086_v53  ;;  %v12823_v34 = vmul.f32 %v25433_v13, %v25112_v40  ;;  %v12827_v10 = vmul.f32 %v25433_v13, %v25126_v20  ;;  %v12639_v12 = vrot.slane %v12638_v29, 1 }
 0x41d   :  { %29759 = vst [vmem:[#allocation107_spill] sm:$0xff] %v25445_v23  ;;  %v25460_v9 = vpop.f32.mrb[98].mxu1  ;;  %v12739_v16 = vmul.f32 %v25433_v13, %v29767_v50  ;;  %v29774_v50 = vld [vmem:[#allocation34_spill] sm:$0xff]  ;;  %v12831_v1 = vmul.f32 %v25433_v13, %v24768_v47  ;;  %v12835_v45 = vmul.f32 %v25433_v13, %v24772_v18  ;;  %v12839_v53 = vmul.f32 %v25433_v13, %v24776_v28 }
 0x41e   :  { %29763 = vst [vmem:[#allocation111_spill] sm:$0xff] %v25460_v9  ;;  %v25468_v25 = vpop.f32.mrb[99].mxu1  ;;  %v25497_v39 = vmul.f32 %v25433_v13, %v29774_v50  ;;  %v12815_v50 = vmul.f32 %v25433_v13, %v25076_v30  ;;  %v12843_v30 = vmul.f32 %v25433_v13, %v24780_v43  ;;  %v12847_v40 = vmul.f32 %v25433_v13, %v24786_v19 }
 0x41f   :  { %29764 = vst [vmem:[#allocation112_spill] sm:$0xff] %v25468_v25  ;;  %v12851_v20 = vmul.f32 %v25433_v13, %v24790_v14  ;;  %v12855_v47 = vmul.f32 %v25433_v13, %v24794_v0  ;;  %v12859_v18 = vmul.f32 %v25433_v13, %v29709_v36  ;;  %v12863_v28 = vmul.f32 %v25433_v13, %v29714_v5 }
 0x420   :  { %v12640_v32 = vadd.f32 %v12639_v12, %v12638_v29  ;;  %v12867_v43 = vmul.f32 %v25433_v13, %v29719_v61  ;;  %v12871_v19 = vmul.f32 %v25433_v13, %v29722_v31  ;;  %v12900_v14 = vmul.f32 %v25431_v46, %v12735_v6 }
 0x421   :  { %v12904_v63 = vmul.f32 %v25431_v46, %v12739_v16  ;;  %v12908_v58 = vmul.f32 %v25431_v46, %v12743_v59  ;;  %v12912_v36 = vmul.f32 %v25431_v46, %v12747_v37  ;;  %v12916_v5 = vmul.f32 %v25431_v46, %v12751_v3 }
 0x422   :  { %v12724_v0 = vmul.f32 0.0034722222, %v12640_v32  ;;  %v25555_v29 = vmul.f32 %v25431_v46, %v12799_v62  ;;  %v25558_v12 = vmul.f32 %v25431_v46, %v12803_v11  ;;  %v25561_v61 = vmul.f32 %v25431_v46, %v12807_v26 }
 0x423   :  { %v25517_v38 = vpop.f32.mrb[100].mxu1  ;;  %v25564_v31 = vmul.f32 %v25431_v46, %v12811_v15  ;;  %v25567_v32 = vmul.f32 %v25431_v46, %v12815_v50  ;;  %v25570_v37 = vmul.f32 %v25431_v46, %v12819_v2  ;;  %v25573_v3 = vmul.f32 %v25431_v46, %v12823_v34 }
 0x424   :  { %29776 = vst [vmem:[#allocation27_spill] sm:$0xff] %v25517_v38  ;;  %v25525_v52 = vpop.f32.mrb[101].mxu1  ;;  %29780 = vst [vmem:[#allocation31_spill] sm:$0xff] %v25561_v61  ;;  %v12728_v16 = vadd.f32 1e-05, %v12724_v0  ;;  %v25576_v59 = vmul.f32 %v25431_v46, %v12827_v10  ;;  %v25579_v6 = vmul.f32 %v25431_v46, %v12831_v1  ;;  %v25582_v62 = vmul.f32 %v25431_v46, %v12835_v45  ;;  %v29821_v61 = vld [vmem:[#allocation50_spill] sm:$0xff] }
 0x425   :  { %29777 = vst [vmem:[#allocation28_spill] sm:$0xff] %v25525_v52  ;;  %v25535_v22 = vpop.f32.mrb[102].mxu1  ;;  %29781 = vst [vmem:[#allocation32_spill] sm:$0xff] %v25564_v31  ;;  %v25585_v11 = vmul.f32 %v25431_v46, %v12839_v53  ;;  %v25590_v2 = vmul.f32 %v25431_v46, %v12843_v30  ;;  %v25593_v15 = vmul.f32 %v25431_v46, %v12847_v40  ;;  %v29797_v40 = vld [vmem:[#allocation36_spill] sm:$0xff]  ;;  %v29817_v31 = vld [vmem:[#allocation47_spill] sm:$0xff] }
 0x426   :  { %29778 = vst [vmem:[#allocation29_spill] sm:$0xff] %v25535_v22  ;;  %v25543_v44 = vpop.f32.mrb[103].mxu1  ;;  %29782 = vst [vmem:[#allocation33_spill] sm:$0xff] %v25567_v32  ;;  %20972 = vrsqrt.f32 %v12728_v16  ;;  %v25596_v50 = vmul.f32 %v25431_v46, %v12851_v20  ;;  %v25601_v10 = vmul.f32 %v25431_v46, %v12855_v47  ;;  %v25604_v1 = vmul.f32 %v25431_v46, %v12859_v18 }
 0x427   :  { %29779 = vst [vmem:[#allocation30_spill] sm:$0xff] %v25543_v44  ;;  %29783 = vst [vmem:[#allocation34_spill] sm:$0xff] %v25570_v37  ;;  %v25607_v45 = vmul.f32 %v25431_v46, %v12863_v28  ;;  %v25610_v53 = vmul.f32 %v25431_v46, %v12867_v43  ;;  %v12775_v20 = vmul.f32 %v25433_v13, %v29797_v40  ;;  %v29799_v28 = vld [vmem:[#allocation37_spill] sm:$0xff]  ;;  %v29800_v43 = vld [vmem:[#allocation38_spill] sm:$0xff] }
 0x428   :  { %29784 = vst [vmem:[#allocation35_spill] sm:$0xff] %v25573_v3  ;;  %29785 = vst [vmem:[#allocation113_spill] sm:$0xff] %v25576_v59  ;;  %v12920_v0 = vmul.f32 %v25431_v46, %v12755_v60  ;;  %v25618_v16 = vmul.f32 %v25431_v46, %v12871_v19  ;;  %v12211_v47 = vadd.f32 %v25423_v54, %v25443_v48  ;;  %v29802_v40 = vld [vmem:[#allocation40_spill] sm:$0xff]  ;;  %v29812_v37 = vld [vmem:[#allocation59_spill] sm:$0xff] }
 0x429   :  { %29786 = vst [vmem:[#allocation114_spill] sm:$0xff] %v25579_v6  ;;  %29787 = vst [vmem:[#allocation115_spill] sm:$0xff] %v25582_v62  ;;  %v12252_v60 = vadd.f32 %v25428_v17, %v25445_v23  ;;  %v12791_v19 = vmul.f32 %v25433_v13, %v29802_v40  ;;  %v13069_v54 = vadd.f32 %v25463_v27, %v12904_v63  ;;  %v29820_v23 = vld [vmem:[#allocation20_spill] sm:$0xff]  ;;  %v29828_v48 = vld [vmem:[#allocation74_spill] sm:$0xff] }
 0x42a   :  { %29788 = vst [vmem:[#allocation116_spill] sm:$0xff] %v25585_v11  ;;  %29790 = vst [vmem:[#allocation118_spill] sm:$0xff] %v25590_v2  ;;  %v12924_v17 = vmul.f32 %v25431_v46, %v25489_v55  ;;  %v12928_v40 = vmul.f32 %v25431_v46, %v25493_v56  ;;  %v13085_v63 = vadd.f32 %v25463_v27, %v12920_v0 }
 0x42b   :  { %v25587_v26 = vpop.f32.mrb[104].mxu1  ;;  %29791 = vst [vmem:[#allocation119_spill] sm:$0xff] %v25593_v15  ;;  %29792 = vst [vmem:[#allocation120_spill] sm:$0xff] %v25596_v50  ;;  %v12212_v50 = vadd.f32 %v12211_v47, %v25460_v9  ;;  %v13073_v15 = vadd.f32 %v25463_v27, %v12908_v58  ;;  %v12795_v47 = vmul.f32 %v25433_v13, %v24758_v41  ;;  %v13213_v2 = vmax.f32 %v13069_v54, 0.0  ;;  %v25661_v41 = vld [vmem:[%s29222_s16 + $0x228] sm:$0xff]  ;;  %v25676_v54 = vld [vmem:[%s29222_s16 + $0x220] sm:$0xff] }
 0x42c   :  { %29789 = vst [vmem:[#allocation117_spill] sm:$0xff] %v25587_v26  ;;  %v25598_v34 = vpop.f32.mrb[105].mxu1  ;;  %29793 = vst [vmem:[#allocation121_spill] sm:$0xff] %v25601_v10  ;;  %v12932_v58 = vmul.f32 %v25431_v46, %v25497_v39  ;;  %v12940_v55 = vmul.f32 %v25431_v46, %v12775_v20  ;;  %v29827_v9 = vld [vmem:[#allocation73_spill] sm:$0xff] }
 0x42d   :  { %29794 = vst [vmem:[#allocation122_spill] sm:$0xff] %v25604_v1  ;;  %29795 = vst [vmem:[#allocation123_spill] sm:$0xff] %v25607_v45  ;;  %v25612_v30 = vpop.f32.mrb[106].mxu1  ;;  %v12779_v45 = vmul.f32 %v25433_v13, %v29799_v28  ;;  %v29801_v1 = vld [vmem:[#allocation39_spill] sm:$0xff]  ;;  %v12253_v28 = vadd.f32 %v12252_v60, %v25468_v25  ;;  %v29819_v25 = vld [vmem:[#allocation49_spill] sm:$0xff] }
 0x42e   :  { %29796 = vst [vmem:[#allocation124_spill] sm:$0xff] %v25610_v53  ;;  %29798 = vst [vmem:[#allocation36_spill] sm:$0xff] %v25618_v16  ;;  %v25622_v18 = vpop.f32.mrb[107].mxu1  ;;  %v12783_v53 = vmul.f32 %v25433_v13, %v29800_v43  ;;  %v12787_v10 = vmul.f32 %v25433_v13, %v29801_v1  ;;  %v13065_v16 = vadd.f32 %v25463_v27, %v12900_v14  ;;  %v25666_v13 = vld [vmem:[%s29222_s16 + $0x238] sm:$0xff] }
 0x42f   :  { %v13077_v43 = vadd.f32 %v25463_v27, %v12912_v36  ;;  %v13081_v1 = vadd.f32 %v25463_v27, %v12916_v5  ;;  %v12213_v14 = vadd.f32 %v12212_v50, %v25517_v38  ;;  %v12936_v36 = vmul.f32 %v25431_v46, %v25501_v4  ;;  %v29826_v38 = vld [vmem:[#allocation72_spill] sm:$0xff] }
 0x430   :  { %v12254_v5 = vadd.f32 %v12253_v28, %v25525_v52  ;;  %v13209_v56 = vmax.f32 %v13065_v16, 0.0  ;;  %v13217_v4 = vmax.f32 %v13073_v15, 0.0  ;;  %v25681_v28 = vld [vmem:[%s29222_s16 + $0x230] sm:$0xff]  ;;  %v25685_v11 = vpop.eup %20972  ;;  %v13229_v15 = vmax.f32 %v13085_v63, 0.0 }
 0x431   :  { %v12214_v50 = vadd.f32 %v12213_v14, %v25535_v22  ;;  %v13221_v0 = vmax.f32 %v13077_v43, 0.0  ;;  %v13225_v16 = vmax.f32 %v13081_v1, 0.0  ;;  %v25691_v1 = vadd.f32 %v25463_v27, %v12924_v17  ;;  %v29825_v22 = vld [vmem:[#allocation71_spill] sm:$0xff] }
 0x432   :  { %v25671_v20 = vadd.f32 %v12254_v5, %v25543_v44  ;;  %v25694_v5 = vadd.f32 %v25463_v27, %v12928_v40  ;;  %v12876_v6 = vmul.f32 %v25685_v11, %v29748_v49  ;;  %v12944_v59 = vmul.f32 %v25431_v46, %v12779_v45  ;;  %v29815_v40 = vld [vmem:[#allocation14_spill] sm:$0xff] }
 0x433   :  { %v25654_v60 = vpop.f32.mrb[108].mxu1  ;;  %v25688_v43 = vadd.f32 %v12214_v50, %v25587_v26  ;;  %v25702_v3 = vadd.f32 %v25463_v27, %v12932_v58  ;;  %v25705_v63 = vadd.f32 %v25463_v27, %v12936_v36  ;;  %v12948_v50 = vmul.f32 %v25431_v46, %v12783_v53  ;;  %v29824_v26 = vld [vmem:[#allocation70_spill] sm:$0xff] }
 0x434   :  { %v25668_v39 = vpop.f32.mrb[109].mxu1  ;;  %v25709_v17 = vmul.f32 %v25431_v46, %v12787_v10  ;;  %v25716_v49 = vmul.f32 %v25466_v24, %v12876_v6  ;;  %v25719_v45 = vmul.f32 %v25431_v46, %v12791_v19  ;;  %v25722_v58 = vmul.f32 %v25431_v46, %v12795_v47 }
 0x435   :  { %v25683_v14 = vpop.f32.mrb[110].mxu1  ;;  %29804 = vst [vmem:[#allocation38_spill] sm:$0xff] %v25702_v3  ;;  %29805 = vst [vmem:[#allocation39_spill] sm:$0xff] %v25705_v63  ;;  %v25724_v36 = vpack.c.bf16 %v13213_v2, %v13209_v56  ;;  %v25726_v53 = vpack.c.bf16 %v13221_v0, %v13217_v4  ;;  %v25728_v10 = vpack.c.bf16 %v13229_v15, %v13225_v16  ;;  %v29809_v2 = vld [vmem:[#allocation56_spill] sm:$0xff]  ;;  %v29810_v56 = vld [vmem:[#allocation57_spill] sm:$0xff] }
 0x436   :  { %v25696_v62 = vpop.f32.mrb[111].mxu1  ;;  %29806 = vst [vmem:[#allocation40_spill] sm:$0xff] %v25716_v49  ;;  %29807 = vst [vmem:[#allocation125_spill] sm:$0xff] %v25722_v58  ;;  %v25735_v19 = vadd.f32 %v25463_v27, %v12940_v55  ;;  %v25738_v46 = vadd.f32 %v25463_v27, %v12944_v59  ;;  %v12736_v47 = vmul.f32 %v25685_v11, %v29809_v2  ;;  %v29811_v0 = vld [vmem:[#allocation58_spill] sm:$0xff]  ;;  %v29813_v55 = vld [vmem:[#allocation60_spill] sm:$0xff] }
 0x437   :  { %29803 = vst [vmem:[#allocation37_spill] sm:$0xff] %v25696_v62  ;;  %29808 = vst [vmem:[#allocation126_spill] sm:$0xff] %v25728_v10  ;;  %v12740_v4 = vmul.f32 %v25685_v11, %v29810_v56  ;;  %v12744_v16 = vmul.f32 %v25685_v11, %v29811_v0  ;;  %v25747_v15 = vadd.f32 %v25463_v27, %v12948_v50  ;;  %v29816_v49 = vld [vmem:[#allocation16_spill] sm:$0xff]  ;;  %v29822_v63 = vld [vmem:[#allocation22_spill] sm:$0xff] }
 0x438   :  { %v12748_v6 = vmul.f32 %v25685_v11, %v29812_v37  ;;  %v12752_v32 = vmul.f32 %v25685_v11, %v29813_v55  ;;  %v12756_v59 = vmul.f32 %v25685_v11, %v24856_v8  ;;  %v12760_v2 = vmul.f32 %v25685_v11, %v24860_v21  ;;  %v29814_v55 = vld [vmem:[#allocation12_spill] sm:$0xff] }
 0x439   :  { %v12764_v56 = vmul.f32 %v25685_v11, %v24866_v57  ;;  %v25761_v0 = vmul.f32 %v25685_v11, %v24870_v35  ;;  %v25765_v50 = vmul.f32 %v25685_v11, %v24874_v51  ;;  %v25769_v37 = vmul.f32 %v25685_v11, %v24880_v42  ;;  %v29818_v42 = vld [vmem:[#allocation48_spill] sm:$0xff] }
 0x43a   :  { %v12808_v8 = vmul.f32 %v25685_v11, %v25214_v33  ;;  %v12812_v21 = vmul.f32 %v25685_v11, %v25224_v7  ;;  %v12816_v57 = vmul.f32 %v25685_v11, %v29814_v55  ;;  %v12820_v35 = vmul.f32 %v25685_v11, %v29815_v40  ;;  %v29823_v3 = vld [vmem:[#allocation24_spill] sm:$0xff] }
 0x43b   :  { %v12824_v51 = vmul.f32 %v25685_v11, %v29816_v49  ;;  %v12828_v44 = vmul.f32 %v25685_v11, %v29817_v31  ;;  %v12832_v52 = vmul.f32 %v25685_v11, %v29818_v42  ;;  %v12836_v33 = vmul.f32 %v25685_v11, %v29819_v25 }
 0x43c   :  { %v12840_v7 = vmul.f32 %v25685_v11, %v29820_v23  ;;  %v12844_v55 = vmul.f32 %v25685_v11, %v29821_v61  ;;  %v12848_v40 = vmul.f32 %v25685_v11, %v29822_v63  ;;  %v12852_v49 = vmul.f32 %v25685_v11, %v29823_v3 }
 0x43d   :  { %v12856_v31 = vmul.f32 %v25685_v11, %v29824_v26  ;;  %v12860_v42 = vmul.f32 %v25685_v11, %v29825_v22  ;;  %v12864_v25 = vmul.f32 %v25685_v11, %v29826_v38  ;;  %v12868_v23 = vmul.f32 %v25685_v11, %v29827_v9 }
 0x43e   :  { %v12872_v61 = vmul.f32 %v25685_v11, %v29828_v48  ;;  %v12901_v63 = vmul.f32 %v25466_v24, %v12736_v47  ;;  %v12905_v10 = vmul.f32 %v25466_v24, %v12740_v4  ;;  %v12909_v3 = vmul.f32 %v25466_v24, %v12744_v16 }
 0x43f   :  { %v12913_v26 = vmul.f32 %v25466_v24, %v12748_v6  ;;  %v12917_v58 = vmul.f32 %v25466_v24, %v12752_v32  ;;  %v12921_v22 = vmul.f32 %v25466_v24, %v12756_v59  ;;  %v25812_v38 = vmul.f32 %v25466_v24, %v12808_v8 }
 0x440   :  { %v25815_v9 = vmul.f32 %v25466_v24, %v12812_v21  ;;  %v25818_v48 = vmul.f32 %v25466_v24, %v12816_v57  ;;  %v25821_v47 = vmul.f32 %v25466_v24, %v12820_v35  ;;  %v25824_v4 = vmul.f32 %v25466_v24, %v12824_v51 }
 0x441   :  { %v25827_v6 = vmul.f32 %v25466_v24, %v12828_v44  ;;  %v25830_v32 = vmul.f32 %v25466_v24, %v12832_v52  ;;  %v25833_v16 = vmul.f32 %v25466_v24, %v12836_v33  ;;  %v25836_v59 = vmul.f32 %v25466_v24, %v12840_v7  ;;  %v29844_v7 = vld [vmem:[#allocation26_spill] sm:$0xff] }
 0x442   :  { %29829 = vst [vmem:[#allocation56_spill] sm:$0xff] %v25818_v48  ;;  %29830 = vst [vmem:[#allocation57_spill] sm:$0xff] %v25821_v47  ;;  %v25839_v8 = vmul.f32 %v25466_v24, %v12844_v55  ;;  %v25842_v21 = vmul.f32 %v25466_v24, %v12848_v40  ;;  %v25845_v57 = vmul.f32 %v25466_v24, %v12852_v49 }
 0x443   :  { %29831 = vst [vmem:[#allocation58_spill] sm:$0xff] %v25824_v4  ;;  %29832 = vst [vmem:[#allocation59_spill] sm:$0xff] %v25827_v6  ;;  %v25848_v44 = vmul.f32 %v25466_v24, %v12856_v31  ;;  %v25851_v52 = vmul.f32 %v25466_v24, %v12860_v42  ;;  %v25854_v35 = vmul.f32 %v25466_v24, %v12864_v25 }
 0x444   :  { %29833 = vst [vmem:[#allocation60_spill] sm:$0xff] %v25830_v32  ;;  %29834 = vst [vmem:[#allocation12_spill] sm:$0xff] %v25833_v16  ;;  %v25857_v51 = vmul.f32 %v25466_v24, %v12868_v23  ;;  %v25860_v33 = vmul.f32 %v25466_v24, %v12872_v61  ;;  %v13066_v55 = vadd.f32 %v29844_v7, %v12901_v63 }
 0x445   :  { %29835 = vst [vmem:[#allocation14_spill] sm:$0xff] %v25836_v59  ;;  %29836 = vst [vmem:[#allocation16_spill] sm:$0xff] %v25839_v8  ;;  %v13070_v40 = vadd.f32 %v29844_v7, %v12905_v10  ;;  %v13074_v49 = vadd.f32 %v29844_v7, %v12909_v3  ;;  %v13078_v31 = vadd.f32 %v29844_v7, %v12913_v26  ;;  %v29848_v3 = vld [vmem:[#allocation67_spill] sm:$0xff] }
 0x446   :  { %29837 = vst [vmem:[#allocation47_spill] sm:$0xff] %v25842_v21  ;;  %29838 = vst [vmem:[#allocation48_spill] sm:$0xff] %v25845_v57  ;;  %v12925_v23 = vmul.f32 %v25466_v24, %v12760_v2  ;;  %v13210_v61 = vmax.f32 %v13066_v55, 0.0  ;;  %v29847_v57 = vld [vmem:[#allocation65_spill] sm:$0xff]  ;;  %v12792_v26 = vmul.f32 %v25685_v11, %v29848_v3  ;;  %v29849_v21 = vld [vmem:[#allocation68_spill] sm:$0xff]  ;;  %v13082_v8 = vadd.f32 %v29844_v7, %v12917_v58 }
 0x447   :  { %29839 = vst [vmem:[#allocation49_spill] sm:$0xff] %v25848_v44  ;;  %29840 = vst [vmem:[#allocation20_spill] sm:$0xff] %v25851_v52  ;;  %v29845_v44 = vld [vmem:[#allocation63_spill] sm:$0xff]  ;;  %v29846_v52 = vld [vmem:[#allocation64_spill] sm:$0xff]  ;;  %v13222_v63 = vmax.f32 %v13078_v31, 0.0  ;;  %v12788_v10 = vmul.f32 %v25685_v11, %v29847_v57  ;;  %v13086_v2 = vadd.f32 %v29844_v7, %v12921_v22  ;;  %v12216_v55 = vadd.f32 %v25688_v43, %v25612_v30 }
 0x448   :  { %29841 = vst [vmem:[#allocation50_spill] sm:$0xff] %v25854_v35  ;;  %29842 = vst [vmem:[#allocation22_spill] sm:$0xff] %v25857_v51  ;;  %v12780_v42 = vmul.f32 %v25685_v11, %v29845_v44  ;;  %v12784_v25 = vmul.f32 %v25685_v11, %v29846_v52  ;;  %v12929_v51 = vmul.f32 %v25466_v24, %v12764_v56  ;;  %v13218_v35 = vmax.f32 %v13074_v49, 0.0  ;;  %v29851_v43 = vld [vmem:[#allocation6_spill] sm:$0xff] }
 0x449   :  { %29843 = vst [vmem:[#allocation24_spill] sm:$0xff] %v25860_v33  ;;  %v13214_v33 = vmax.f32 %v13070_v40, 0.0  ;;  %v12796_v44 = vmul.f32 %v25685_v11, %v29849_v21  ;;  %v12256_v56 = vadd.f32 %v25671_v20, %v25598_v34  ;;  %v29850_v40 = vld [vmem:[#allocation44_spill] sm:$0xff]  ;;  %v12933_v49 = vmul.f32 %v25466_v24, %v25761_v0 }
 0x44a   :  { %v12800_v57 = vmul.f32 %v25685_v11, %v29850_v40  ;;  %v13090_v31 = vadd.f32 %v29844_v7, %v12925_v23  ;;  %v13094_v21 = vadd.f32 %v29844_v7, %v12929_v51  ;;  %v12937_v58 = vmul.f32 %v25466_v24, %v25765_v50  ;;  %v16891_v40 = vld [vmem:[%s29222_s16 + $0x240] sm:$0xff] }
 0x44b   :  { %v13418_v52 = vpack.c.bf16 %v13214_v33, %v13210_v61  ;;  %v13422_v22 = vpack.c.bf16 %v13222_v63, %v13218_v35  ;;  %v12257_v20 = vadd.f32 %v12256_v56, %v25622_v18  ;;  %v12217_v33 = vadd.f32 %v12216_v55, %v25654_v60  ;;  %v29852_v35 = vld [vmem:[#allocation109_spill] sm:$0xff]  ;;  %v29853_v63 = vld [vmem:[#allocation108_spill] sm:$0xff] }
 0x44c   :  { %v12804_v61 = vmul.f32 %v25685_v11, %v29851_v43  ;;  %v12941_v3 = vmul.f32 %v25466_v24, %v25769_v37  ;;  %v12945_v0 = vmul.f32 %v25466_v24, %v12780_v42  ;;  %v12949_v23 = vmul.f32 %v25466_v24, %v12784_v25  ;;  %v16892_v37 = vld [vmem:[%s29222_s16 + $0x248] sm:$0xff]  ;;  %v16894_v42 = vld [vmem:[%s29222_s16 + $0x258] sm:$0xff] }
 0x44d   :  { %13841 = vmatprep.mubr.bf16.mxu0 %v13418_v52  ;;  %v13226_v50 = vmax.f32 %v13082_v8, 0.0  ;;  %v13230_v51 = vmax.f32 %v13086_v2, 0.0  ;;  %v29854_v52 = vpack.c.bf16 %v29852_v35, %v29853_v63  ;;  %v12258_v56 = vadd.f32 %v12257_v20, %v25668_v39 }
 0x44e   :  { %13842 = vmatmul.mubr.bf16.vlgmr.msra.gmra.mrb[72].mxu0 %v25724_v36  ;;  %v12218_v11 = vadd.f32 %v12217_v33, %v25683_v14  ;;  %v12953_v36 = vmul.f32 %v25466_v24, %v12788_v10  ;;  %v13234_v8 = vmax.f32 %v13090_v31, 0.0  ;;  %v13238_v25 = vmax.f32 %v13094_v21, 0.0 }
 0x44f   :  { %13851 = vmatprep.mubr.bf16.mxu0 %v13422_v22  ;;  %14023 = vmatpush1.bf16.msra.mxu0 %v29854_v52  ;;  %v29855_v2 = vpack.c.bf16 %v25666_v13, %v25661_v41  ;;  %v19849_v55 = vpack.c.bf16 %v16894_v42, %v16892_v37  ;;  %v16893_v22 = vld [vmem:[%s29222_s16 + $0x250] sm:$0xff]  ;;  %v13098_v20 = vadd.f32 %v29844_v7, %v12933_v49 }
 0x450   :  { %v13102_v33 = vadd.f32 %v29844_v7, %v12937_v58  ;;  %v12219_v10 = vrot.slane %v12218_v11, 4  ;;  %v12259_v31 = vadd.f32 %v12258_v56, %v25696_v62  ;;  %v12957_v21 = vmul.f32 %v25466_v24, %v12792_v26  ;;  %v16896_v26 = vld [vmem:[%s29222_s16 + $0x268] sm:$0xff] }
 0x451   :  { %14024 = vmatprep.subr.bf16.mxu0 %v29855_v2  ;;  %v12961_v41 = vmul.f32 %v25466_v24, %v12796_v44  ;;  %v25928_v13 = vmul.f32 %v25466_v24, %v12800_v57  ;;  %v25931_v43 = vmul.f32 %v25466_v24, %v12804_v61  ;;  %v13426_v35 = vpack.c.bf16 %v13230_v51, %v13226_v50  ;;  %v16898_v44 = vld [vmem:[%s29222_s16 + $0x278] sm:$0xff]  ;;  %v16897_v50 = vld [vmem:[%s29222_s16 + $0x270] sm:$0xff] }
 0x452   :  { %v29856_v63 = vpack.c.bf16 %v25681_v28, %v25676_v54  ;;  %v12220_v49 = vadd.f32 %v12219_v10, %v12218_v11  ;;  %v12260_v58 = vrot.slane %v12259_v31, 4  ;;  %v19848_v52 = vpack.c.bf16 %v16893_v22, %v16891_v40  ;;  %v16895_v28 = vld [vmem:[%s29222_s16 + $0x260] sm:$0xff] }
 0x453   :  { %v13430_v57 = vpack.c.bf16 %v13238_v25, %v13234_v8  ;;  %v25943_v24 = vadd.f32 %v29844_v7, %v12941_v3  ;;  %v25946_v61 = vadd.f32 %v29844_v7, %v12945_v0  ;;  %v19851_v54 = vpack.c.bf16 %v16898_v44, %v16896_v26 }
 0x454   :  { %14025 = vmatpush1.bf16.msra.mxu0 %v29856_v63  ;;  %v13242_v51 = vmax.f32 %v13098_v20, 0.0  ;;  %v13246_v56 = vmax.f32 %v13102_v33, 0.0  ;;  %v12221_v11 = vrot.slane %v12220_v49, 2  ;;  %v25955_v37 = vadd.f32 %v29844_v7, %v12949_v23  ;;  %v16901_v63 = vld [vmem:[%s29222_s16 + $0x290] sm:$0xff] }
 0x455   :  { %14026 = vmatprep.subr.bf16.mxu0 %v19849_v55  ;;  %v29857_v3 = vmax.f32 %v25691_v1, 0.0  ;;  %v29858_v0 = vmax.f32 %v25694_v5, 0.0  ;;  %v12261_v8 = vadd.f32 %v12260_v58, %v12259_v31  ;;  %v25965_v25 = vadd.f32 %v29844_v7, %v12953_v36  ;;  %v16900_v5 = vld [vmem:[%s29222_s16 + $0x288] sm:$0xff]  ;;  %v16902_v36 = vld [vmem:[%s29222_s16 + $0x298] sm:$0xff] }
 0x456   :  { %13852 = vmatmul.mubr.bf16.gmra.mrb[76].mxu0 %v25726_v53  ;;  %v25969_v2 = vadd.f32 %v25463_v27, %v25709_v17  ;;  %v12222_v55 = vadd.f32 %v12221_v11, %v12220_v49  ;;  %v19850_v53 = vpack.c.bf16 %v16897_v50, %v16895_v28  ;;  %v25973_v1 = vadd.f32 %v29844_v7, %v12957_v21  ;;  %v16905_v11 = vld [vmem:[%s29222_s16 + $0x2b0] sm:$0xff]  ;;  %v29888_v31 = vld [vmem:[#allocation13_spill] sm:$0xff] }
 0x457   :  { %v25962_v42 = vpack.c.bf16 %v29858_v0, %v29857_v3  ;;  %13861 = vmatprep.mubr.bf16.mxu0 %v13426_v35  ;;  %v19853_v20 = vpack.c.bf16 %v16902_v36, %v16900_v5  ;;  %v25984_v33 = vpack.c.bf16 %v13246_v56, %v13242_v51  ;;  %v16899_v35 = vld [vmem:[%s29222_s16 + $0x280] sm:$0xff]  ;;  %v12262_v49 = vrot.slane %v12261_v8, 2  ;;  %v16904_v51 = vld [vmem:[%s29222_s16 + $0x2a8] sm:$0xff] }
 0x458   :  { %14027 = vmatpush1.bf16.msra.mxu0 %v19848_v52  ;;  %v12223_v10 = vrot.slane %v12222_v55, 1  ;;  %v13129_v52 = vadd.f32 %v25463_v27, %v25555_v29  ;;  %v13133_v26 = vadd.f32 %v25463_v27, %v25558_v12  ;;  %v26001_v28 = vadd.f32 %v29844_v7, %v12961_v41  ;;  %v16906_v29 = vld [vmem:[%s29222_s16 + $0x2b8] sm:$0xff]  ;;  %v16903_v41 = vld [vmem:[%s29222_s16 + $0x2a0] sm:$0xff] }
 0x459   :  { %14028 = vmatprep.subr.bf16.mxu0 %v19851_v54  ;;  %v19852_v56 = vpack.c.bf16 %v16901_v63, %v16899_v35  ;;  %v26012_v12 = vadd.f32 %v25463_v27, %v25719_v45  ;;  %v26026_v36 = vadd.f32 %v29844_v7, %v25928_v13  ;;  %v19855_v45 = vpack.c.bf16 %v16906_v29, %v16904_v51  ;;  %v29866_v13 = vld [vmem:[#allocation52_spill] sm:$0xff]  ;;  %v29868_v51 = vld [vmem:[#allocation54_spill] sm:$0xff] }
 0x45a   :  { %v12224_v44 = vadd.f32 %v12223_v10, %v12222_v55  ;;  %v13273_v3 = vmax.f32 %v13129_v52, 0.0  ;;  %v13277_v0 = vmax.f32 %v13133_v26, 0.0  ;;  %v12263_v10 = vadd.f32 %v12262_v49, %v12261_v8  ;;  %v29862_v26 = vld [vmem:[#allocation41_spill] sm:$0xff] }
 0x45b   :  { %v26031_v35 = vadd.f32 %v29844_v7, %v25931_v43  ;;  %v19854_v63 = vpack.c.bf16 %v16905_v11, %v16903_v41  ;;  %v29870_v8 = vld [vmem:[#allocation61_spill] sm:$0xff]  ;;  %v29872_v43 = vld [vmem:[#allocation66_spill] sm:$0xff]  ;;  %v29874_v11 = vld [vmem:[#allocation75_spill] sm:$0xff] }
 0x45c   :  { %14029 = vmatpush1.bf16.msra.mxu0 %v19850_v53  ;;  %v12269_v55 = vmul.f32 0.0034722222, %v12224_v44  ;;  %v29859_v53 = vld [vmem:[#allocation125_spill] sm:$0xff]  ;;  %v26033_v52 = vpack.c.bf16 %v13277_v0, %v13273_v3 }
 0x45d   :  { %14030 = vmatprep.subr.bf16.mxu0 %v19853_v20  ;;  %v26022_v5 = vadd.f32 %v25463_v27, %v29859_v53  ;;  %v29860_v20 = vld [vmem:[#allocation126_spill] sm:$0xff]  ;;  %v29864_v53 = vld [vmem:[#allocation45_spill] sm:$0xff] }
 0x45e   :  { %13862 = vmatmul.mubr.bf16.gmra.mrb[80].mxu0 %v29860_v20  ;;  %29861 = vst [vmem:[#allocation70_spill] sm:$0xff] %v26033_v52  ;;  %v26036_v44 = vsub.f32 %v29862_v26, %v12269_v55  ;;  %v26039_v50 = vsub.f32 %v29864_v53, %v12269_v55  ;;  %v26042_v54 = vsub.f32 %v29866_v13, %v12269_v55  ;;  %v29876_v3 = vld [vmem:[#allocation77_spill] sm:$0xff]  ;;  %v29878_v20 = vld [vmem:[#allocation79_spill] sm:$0xff] }
 0x45f   :  { %13871 = vmatprep.mubr.bf16.mxu0 %v13430_v57  ;;  %v26045_v29 = vsub.f32 %v29868_v51, %v12269_v55  ;;  %v26048_v49 = vsub.f32 %v29870_v8, %v12269_v55  ;;  %v26051_v41 = vsub.f32 %v29872_v43, %v12269_v55  ;;  %v26054_v57 = vsub.f32 %v29874_v11, %v12269_v55  ;;  %v29880_v53 = vld [vmem:[#allocation81_spill] sm:$0xff]  ;;  %v29882_v51 = vld [vmem:[#allocation43_spill] sm:$0xff] }
 0x460   :  { %29863 = vst [vmem:[#allocation71_spill] sm:$0xff] %v26036_v44  ;;  %29865 = vst [vmem:[#allocation72_spill] sm:$0xff] %v26039_v50  ;;  %v26057_v0 = vsub.f32 %v29876_v3, %v12269_v55  ;;  %14031 = vmatpush1.bf16.msra.mxu0 %v19852_v56  ;;  %v26060_v26 = vsub.f32 %v29878_v20, %v12269_v55  ;;  %v26063_v13 = vsub.f32 %v29880_v53, %v12269_v55  ;;  %v29884_v8 = vld [vmem:[#allocation7_spill] sm:$0xff]  ;;  %v29886_v43 = vld [vmem:[#allocation9_spill] sm:$0xff] }
 0x461   :  { %29867 = vst [vmem:[#allocation73_spill] sm:$0xff] %v26042_v54  ;;  %29869 = vst [vmem:[#allocation74_spill] sm:$0xff] %v26045_v29  ;;  %v26066_v21 = vsub.f32 %v29882_v51, %v12269_v55  ;;  %v26069_v58 = vsub.f32 %v29884_v8, %v12269_v55  ;;  %14032 = vmatprep.subr.bf16.mxu0 %v19855_v45  ;;  %v26072_v11 = vsub.f32 %v29886_v43, %v12269_v55  ;;  %v29890_v56 = vld [vmem:[#allocation17_spill] sm:$0xff]  ;;  %v29894_v53 = vld [vmem:[#allocation8_spill] sm:$0xff] }
 0x462   :  { %29871 = vst [vmem:[#allocation26_spill] sm:$0xff] %v26048_v49  ;;  %29873 = vst [vmem:[#allocation63_spill] sm:$0xff] %v26051_v41  ;;  %v26075_v3 = vsub.f32 %v29888_v31, %v12269_v55  ;;  %v26078_v22 = vsub.f32 %v29890_v56, %v12269_v55  ;;  %v29892_v20 = vld [vmem:[#allocation85_spill] sm:$0xff]  ;;  %v26084_v40 = vsub.f32 %v29894_v53, %v12269_v55  ;;  %v29896_v51 = vld [vmem:[#allocation87_spill] sm:$0xff] }
 0x463   :  { %29875 = vst [vmem:[#allocation64_spill] sm:$0xff] %v26054_v57  ;;  %29877 = vst [vmem:[#allocation65_spill] sm:$0xff] %v26057_v0  ;;  %v26081_v23 = vsub.f32 %v29892_v20, %v12269_v55  ;;  %v26087_v17 = vsub.f32 %v29896_v51, %v12269_v55  ;;  %v29898_v8 = vld [vmem:[#allocation18_spill] sm:$0xff]  ;;  %v29900_v43 = vld [vmem:[#allocation19_spill] sm:$0xff] }
 0x464   :  { %29879 = vst [vmem:[#allocation67_spill] sm:$0xff] %v26060_v26  ;;  %29881 = vst [vmem:[#allocation68_spill] sm:$0xff] %v26063_v13  ;;  %v26090_v45 = vsub.f32 %v29898_v8, %v12269_v55  ;;  %v26093_v59 = vsub.f32 %v29900_v43, %v12269_v55  ;;  %v29902_v31 = vld [vmem:[#allocation21_spill] sm:$0xff]  ;;  %v29904_v56 = vld [vmem:[#allocation23_spill] sm:$0xff]  ;;  %14033 = vmatpush1.bf16.msra.mxu0 %v19854_v63 }
 0x465   :  { %29883 = vst [vmem:[#allocation44_spill] sm:$0xff] %v26066_v21  ;;  %29885 = vst [vmem:[#allocation6_spill] sm:$0xff] %v26069_v58  ;;  %v26096_v16 = vsub.f32 %v29902_v31, %v12269_v55  ;;  %v26099_v32 = vsub.f32 %v29904_v56, %v12269_v55  ;;  %v29906_v20 = vld [vmem:[#allocation92_spill] sm:$0xff]  ;;  %v29908_v53 = vld [vmem:[#allocation94_spill] sm:$0xff] }
 0x466   :  { %29887 = vst [vmem:[#allocation109_spill] sm:$0xff] %v26072_v11  ;;  %29889 = vst [vmem:[#allocation108_spill] sm:$0xff] %v26075_v3  ;;  %v26102_v52 = vsub.f32 %v29906_v20, %v12269_v55  ;;  %v26105_v6 = vsub.f32 %v29908_v53, %v12269_v55  ;;  %v29910_v51 = vld [vmem:[#allocation96_spill] sm:$0xff]  ;;  %v29912_v8 = vld [vmem:[#allocation98_spill] sm:$0xff]  ;;  %13872 = vmatmul.mubr.bf16.gmra.mrb[84].mxu0 %v25962_v42  ;;  %v26140_v42 = vsub.f32 %v25654_v60, %v12269_v55 }
 0x467   :  { %29891 = vst [vmem:[#allocation125_spill] sm:$0xff] %v26078_v22  ;;  %29893 = vst [vmem:[#allocation126_spill] sm:$0xff] %v26081_v23  ;;  %v26108_v4 = vsub.f32 %v29910_v51, %v12269_v55  ;;  %v26111_v47 = vsub.f32 %v29912_v8, %v12269_v55  ;;  %v29914_v43 = vld [vmem:[#allocation100_spill] sm:$0xff]  ;;  %v29916_v31 = vld [vmem:[#allocation103_spill] sm:$0xff]  ;;  %13881 = vmatprep.mubr.bf16.mxu0 %v25984_v33  ;;  %v13274_v33 = vmax.f32 %v26026_v36, 0.0  ;;  %v29938_v36 = vmax.f32 %v25738_v46, 0.0 }
 0x468   :  { %29895 = vst [vmem:[#allocation41_spill] sm:$0xff] %v26084_v40  ;;  %29897 = vst [vmem:[#allocation45_spill] sm:$0xff] %v26087_v17  ;;  %v26114_v48 = vsub.f32 %v29914_v43, %v12269_v55  ;;  %v26117_v62 = vsub.f32 %v29916_v31, %v12269_v55  ;;  %v29918_v56 = vld [vmem:[#allocation106_spill] sm:$0xff]  ;;  %v29920_v53 = vld [vmem:[#allocation111_spill] sm:$0xff]  ;;  %v26137_v31 = vsub.f32 %v25612_v30, %v12269_v55 }
 0x469   :  { %29899 = vst [vmem:[#allocation52_spill] sm:$0xff] %v26090_v45  ;;  %29901 = vst [vmem:[#allocation54_spill] sm:$0xff] %v26093_v59  ;;  %v26121_v20 = vsub.f32 %v29918_v56, %v12269_v55  ;;  %v29922_v63 = vld [vmem:[#allocation27_spill] sm:$0xff]  ;;  %v29926_v43 = vld [vmem:[#allocation117_spill] sm:$0xff]  ;;  %v26143_v56 = vsub.f32 %v25683_v14, %v12269_v55  ;;  %v26152_v30 = vadd.f32 %v29844_v7, %v25812_v38  ;;  %v29940_v38 = vmax.f32 %v25965_v25, 0.0 }
 0x46a   :  { %29903 = vst [vmem:[#allocation61_spill] sm:$0xff] %v26096_v16  ;;  %29905 = vst [vmem:[#allocation66_spill] sm:$0xff] %v26099_v32  ;;  %v26127_v51 = vsub.f32 %v29922_v63, %v12269_v55  ;;  %v13270_v63 = vmax.f32 %v26001_v28, 0.0  ;;  %v29931_v60 = vld [vmem:[#allocation38_spill] sm:$0xff]  ;;  %v29936_v28 = vmax.f32 %v25946_v61, 0.0  ;;  %v29943_v61 = vmax.f32 %v25973_v1, 0.0 }
 0x46b   :  { %29907 = vst [vmem:[#allocation75_spill] sm:$0xff] %v26102_v52  ;;  %29909 = vst [vmem:[#allocation77_spill] sm:$0xff] %v26105_v6  ;;  %v26124_v6 = vsub.f32 %v29920_v53, %v12269_v55  ;;  %v12264_v53 = vrot.slane %v12263_v10, 1  ;;  %v26184_v46 = vadd.f32 %v29844_v7, %v25815_v9  ;;  %v12425_v1 = vmul.f32 %v26042_v54, %v26042_v54 }
 0x46c   :  { %29911 = vst [vmem:[#allocation79_spill] sm:$0xff] %v26108_v4  ;;  %29913 = vst [vmem:[#allocation81_spill] sm:$0xff] %v26111_v47  ;;  %v29924_v4 = vld [vmem:[#allocation29_spill] sm:$0xff]  ;;  %v12433_v9 = vmul.f32 %v26048_v49, %v26048_v49 }
 0x46d   :  { %29915 = vst [vmem:[#allocation43_spill] sm:$0xff] %v26114_v48  ;;  %29917 = vst [vmem:[#allocation7_spill] sm:$0xff] %v26117_v62  ;;  %v26130_v8 = vsub.f32 %v29924_v4, %v12269_v55  ;;  %v26134_v48 = vsub.f32 %v29926_v43, %v12269_v55  ;;  %v13265_v4 = vmax.f32 %v26012_v12, 0.0  ;;  %v13278_v43 = vmax.f32 %v26031_v35, 0.0 }
 0x46e   :  { %29919 = vst [vmem:[#allocation9_spill] sm:$0xff] %v26121_v20  ;;  %29921 = vst [vmem:[#allocation13_spill] sm:$0xff] %v26124_v6  ;;  %v29939_v35 = vmax.f32 %v25955_v37, 0.0  ;;  %v12417_v37 = vmul.f32 %v26036_v44, %v26036_v44 }
 0x46f   :  { %29923 = vst [vmem:[#allocation17_spill] sm:$0xff] %v26127_v51  ;;  %29925 = vst [vmem:[#allocation85_spill] sm:$0xff] %v26130_v8  ;;  %v13269_v8 = vmax.f32 %v26022_v5, 0.0  ;;  %v29937_v5 = vmax.f32 %v25735_v19, 0.0  ;;  %v26190_v25 = vpack.c.bf16 %v13278_v43, %v13274_v33  ;;  %v12445_v33 = vmul.f32 %v26057_v0, %v26057_v0 }
 0x470   :  { %29927 = vst [vmem:[#allocation8_spill] sm:$0xff] %v26134_v48  ;;  %29928 = vst [vmem:[#allocation87_spill] sm:$0xff] %v26137_v31  ;;  %v29933_v31 = vld [vmem:[#allocation39_spill] sm:$0xff]  ;;  %v13442_v51 = vpack.c.bf16 %v29940_v38, %v29939_v35  ;;  %v26211_v43 = vmul.f32 %v26060_v26, %v26060_v26  ;;  %v29961_v26 = vld [vmem:[#allocation69_spill] sm:$0xff] }
 0x471   :  { %29929 = vst [vmem:[#allocation18_spill] sm:$0xff] %v26140_v42  ;;  %29930 = vst [vmem:[#allocation19_spill] sm:$0xff] %v26143_v56  ;;  %v29932_v42 = vmax.f32 %v29931_v60, 0.0  ;;  %v29934_v14 = vmax.f32 %v29933_v31, 0.0  ;;  %v29935_v56 = vmax.f32 %v25943_v24, 0.0  ;;  %v13437_v48 = vpack.c.bf16 %v29938_v36, %v29937_v5 }
 0x472   :  { %v29941_v60 = vmax.f32 %v25747_v15, 0.0  ;;  %v29942_v31 = vmax.f32 %v25969_v2, 0.0  ;;  %v12265_v24 = vadd.f32 %v12264_v53, %v12263_v10  ;;  %v26180_v19 = vpack.c.bf16 %v13269_v8, %v13265_v4  ;;  %v29944_v8 = vld [vmem:[#allocation31_spill] sm:$0xff] }
 0x473   :  { %v13433_v55 = vpack.c.bf16 %v29934_v14, %v29932_v42  ;;  %v13438_v12 = vpack.c.bf16 %v29936_v28, %v29935_v56  ;;  %v26178_v56 = vpack.c.bf16 %v13270_v63, %v29943_v61  ;;  %v12421_v15 = vmul.f32 %v26039_v50, %v26039_v50 }
 0x474   :  { %v26174_v42 = vpack.c.bf16 %v29942_v31, %v29941_v60  ;;  %v12429_v10 = vmul.f32 %v26045_v29, %v26045_v29  ;;  %v26201_v53 = vadd.f32 %v25463_v27, %v29944_v8  ;;  %v12437_v63 = vmul.f32 %v26051_v41, %v26051_v41 }
 0x475   :  { %13882 = vmatmul.mubr.bf16.gmra.mrb[88].mxu0 %v13433_v55  ;;  %v12441_v4 = vmul.f32 %v26054_v57, %v26054_v57  ;;  %v26215_v14 = vmul.f32 %v26063_v13, %v26063_v13  ;;  %v26219_v55 = vmul.f32 %v26066_v21, %v26066_v21  ;;  %v26223_v28 = vmul.f32 %v26069_v58, %v26069_v58  ;;  %v29959_v21 = vld [vmem:[#allocation62_spill] sm:$0xff]  ;;  %v29963_v57 = vld [vmem:[#allocation76_spill] sm:$0xff] }
 0x476   :  { %13891 = vmatprep.mubr.bf16.mxu0 %v13438_v12  ;;  %v26227_v5 = vmul.f32 %v26072_v11, %v26072_v11  ;;  %v26231_v36 = vmul.f32 %v26075_v3, %v26075_v3  ;;  %v26235_v12 = vmul.f32 %v26078_v22, %v26078_v22  ;;  %v12641_v35 = vadd.f32 %v12421_v15, %v12417_v37  ;;  %v29951_v22 = vld [vmem:[#allocation42_spill] sm:$0xff]  ;;  %v29957_v11 = vld [vmem:[#allocation55_spill] sm:$0xff] }
 0x477   :  { %v12270_v38 = vmul.f32 0.0034722222, %v12265_v24  ;;  %v26239_v60 = vmul.f32 %v26081_v23, %v26081_v23  ;;  %v26243_v31 = vmul.f32 %v26084_v40, %v26084_v40  ;;  %v26247_v61 = vmul.f32 %v26087_v17, %v26087_v17  ;;  %v29953_v24 = vld [vmem:[#allocation46_spill] sm:$0xff]  ;;  %v29955_v23 = vld [vmem:[#allocation53_spill] sm:$0xff] }
 0x478   :  { %29945 = vst [vmem:[#allocation21_spill] sm:$0xff] %v26231_v36  ;;  %29946 = vst [vmem:[#allocation23_spill] sm:$0xff] %v26235_v12  ;;  %v26251_v8 = vmul.f32 %v26090_v45, %v26090_v45  ;;  %v12642_v2 = vadd.f32 %v12641_v35, %v12425_v1  ;;  %v29965_v35 = vld [vmem:[#allocation78_spill] sm:$0xff] }
 0x479   :  { %29947 = vst [vmem:[#allocation92_spill] sm:$0xff] %v26239_v60  ;;  %29948 = vst [vmem:[#allocation94_spill] sm:$0xff] %v26243_v31  ;;  %v26254_v37 = vsub.f32 %v29951_v22, %v12270_v38  ;;  %v26257_v15 = vsub.f32 %v29953_v24, %v12270_v38  ;;  %v26260_v3 = vsub.f32 %v29955_v23, %v12270_v38  ;;  %v29967_v24 = vld [vmem:[#allocation80_spill] sm:$0xff]  ;;  %v29969_v23 = vld [vmem:[#allocation82_spill] sm:$0xff] }
 0x47a   :  { %29949 = vst [vmem:[#allocation96_spill] sm:$0xff] %v26247_v61  ;;  %29950 = vst [vmem:[#allocation98_spill] sm:$0xff] %v26251_v8  ;;  %v26263_v58 = vsub.f32 %v29957_v11, %v12270_v38  ;;  %v26266_v13 = vsub.f32 %v29959_v21, %v12270_v38  ;;  %v26269_v0 = vsub.f32 %v29961_v26, %v12270_v38  ;;  %v29971_v11 = vld [vmem:[#allocation5_spill] sm:$0xff]  ;;  %v29973_v21 = vld [vmem:[#allocation83_spill] sm:$0xff] }
 0x47b   :  { %29952 = vst [vmem:[#allocation100_spill] sm:$0xff] %v26254_v37  ;;  %29954 = vst [vmem:[#allocation103_spill] sm:$0xff] %v26257_v15  ;;  %v26272_v1 = vsub.f32 %v29963_v57, %v12270_v38  ;;  %v12643_v22 = vadd.f32 %v12642_v2, %v12429_v10  ;;  %v26275_v41 = vsub.f32 %v29965_v35, %v12270_v38  ;;  %v29975_v26 = vld [vmem:[#allocation11_spill] sm:$0xff]  ;;  %v29979_v35 = vld [vmem:[#allocation84_spill] sm:$0xff] }
 0x47c   :  { %29956 = vst [vmem:[#allocation106_spill] sm:$0xff] %v26260_v3  ;;  %29958 = vst [vmem:[#allocation111_spill] sm:$0xff] %v26263_v58  ;;  %v26278_v49 = vsub.f32 %v29967_v24, %v12270_v38  ;;  %v26281_v29 = vsub.f32 %v29969_v23, %v12270_v38  ;;  %v26284_v54 = vsub.f32 %v29971_v11, %v12270_v38  ;;  %v29977_v57 = vld [vmem:[#allocation15_spill] sm:$0xff]  ;;  %v29981_v45 = vld [vmem:[#allocation86_spill] sm:$0xff] }
 0x47d   :  { %29960 = vst [vmem:[#allocation27_spill] sm:$0xff] %v26266_v13  ;;  %29962 = vst [vmem:[#allocation29_spill] sm:$0xff] %v26269_v0  ;;  %v26287_v50 = vsub.f32 %v29973_v21, %v12270_v38  ;;  %v26290_v44 = vsub.f32 %v29975_v26, %v12270_v38  ;;  %v26293_v2 = vsub.f32 %v29977_v57, %v12270_v38  ;;  %13892 = vmatmul.mubr.bf16.gmra.mrb[92].mxu0 %v13437_v48  ;;  %v29983_v17 = vld [vmem:[#allocation10_spill] sm:$0xff]  ;;  %v29985_v21 = vld [vmem:[#allocation88_spill] sm:$0xff] }
 0x47e   :  { %29964 = vst [vmem:[#allocation117_spill] sm:$0xff] %v26272_v1  ;;  %29966 = vst [vmem:[#allocation38_spill] sm:$0xff] %v26275_v41  ;;  %v12644_v10 = vadd.f32 %v12643_v22, %v12433_v9  ;;  %v26296_v24 = vsub.f32 %v29979_v35, %v12270_v38  ;;  %v26299_v23 = vsub.f32 %v29981_v45, %v12270_v38  ;;  %13901 = vmatprep.mubr.bf16.mxu0 %v13442_v51  ;;  %v29987_v26 = vld [vmem:[#allocation89_spill] sm:$0xff]  ;;  %v29989_v57 = vld [vmem:[#allocation90_spill] sm:$0xff] }
 0x47f   :  { %29968 = vst [vmem:[#allocation39_spill] sm:$0xff] %v26278_v49  ;;  %29970 = vst [vmem:[#allocation31_spill] sm:$0xff] %v26281_v29  ;;  %v26302_v11 = vsub.f32 %v29983_v17, %v12270_v38  ;;  %v26305_v40 = vsub.f32 %v29985_v21, %v12270_v38  ;;  %v26308_v8 = vsub.f32 %v29987_v26, %v12270_v38  ;;  %v29991_v48 = vld [vmem:[#allocation51_spill] sm:$0xff]  ;;  %v29994_v31 = vld [vmem:[#allocation93_spill] sm:$0xff] }
 0x480   :  { %29972 = vst [vmem:[#allocation42_spill] sm:$0xff] %v26284_v54  ;;  %29974 = vst [vmem:[#allocation46_spill] sm:$0xff] %v26287_v50  ;;  %v26311_v61 = vsub.f32 %v29989_v57, %v12270_v38  ;;  %v26314_v9 = vsub.f32 %v29991_v48, %v12270_v38  ;;  %v12645_v22 = vadd.f32 %v12644_v10, %v12437_v63  ;;  %v29992_v35 = vld [vmem:[#allocation91_spill] sm:$0xff]  ;;  %v29998_v21 = vld [vmem:[#allocation97_spill] sm:$0xff] }
 0x481   :  { %29976 = vst [vmem:[#allocation53_spill] sm:$0xff] %v26290_v44  ;;  %29978 = vst [vmem:[#allocation55_spill] sm:$0xff] %v26293_v2  ;;  %v26317_v45 = vsub.f32 %v29992_v35, %v12270_v38  ;;  %v26320_v17 = vsub.f32 %v29994_v31, %v12270_v38  ;;  %v29996_v51 = vld [vmem:[#allocation95_spill] sm:$0xff]  ;;  %v26326_v12 = vsub.f32 %v29998_v21, %v12270_v38  ;;  %v30001_v57 = vld [vmem:[#allocation101_spill] sm:$0xff] }
 0x482   :  { %29980 = vst [vmem:[#allocation62_spill] sm:$0xff] %v26296_v24  ;;  %29982 = vst [vmem:[#allocation69_spill] sm:$0xff] %v26299_v23  ;;  %v26323_v60 = vsub.f32 %v29996_v51, %v12270_v38  ;;  %v30000_v26 = vld [vmem:[#allocation99_spill] sm:$0xff]  ;;  %v30002_v48 = vld [vmem:[#allocation104_spill] sm:$0xff]  ;;  %v12646_v10 = vadd.f32 %v12645_v22, %v12441_v4  ;;  %v26356_v4 = vsub.f32 %v25668_v39, %v12270_v38 }
 0x483   :  { %29984 = vst [vmem:[#allocation76_spill] sm:$0xff] %v26302_v11  ;;  %29986 = vst [vmem:[#allocation78_spill] sm:$0xff] %v26305_v40  ;;  %v26329_v36 = vsub.f32 %v30000_v26, %v12270_v38  ;;  %v26335_v63 = vsub.f32 %v30002_v48, %v12270_v38  ;;  %v30003_v35 = vld [vmem:[#allocation107_spill] sm:$0xff]  ;;  %v30005_v31 = vld [vmem:[#allocation112_spill] sm:$0xff]  ;;  %v26350_v26 = vsub.f32 %v25598_v34, %v12270_v38 }
 0x484   :  { %29988 = vst [vmem:[#allocation80_spill] sm:$0xff] %v26308_v8  ;;  %29990 = vst [vmem:[#allocation82_spill] sm:$0xff] %v26311_v61  ;;  %v26332_v61 = vsub.f32 %v30001_v57, %v12270_v38  ;;  %v30007_v51 = vld [vmem:[#allocation28_spill] sm:$0xff]  ;;  %v30009_v21 = vld [vmem:[#allocation30_spill] sm:$0xff]  ;;  %v26353_v57 = vsub.f32 %v25622_v18, %v12270_v38  ;;  %v26360_v22 = vmul.f32 %v26093_v59, %v26093_v59 }
 0x485   :  { %29993 = vst [vmem:[#allocation5_spill] sm:$0xff] %v26317_v45  ;;  %29995 = vst [vmem:[#allocation83_spill] sm:$0xff] %v26320_v17  ;;  %v26338_v45 = vsub.f32 %v30003_v35, %v12270_v38  ;;  %v26341_v17 = vsub.f32 %v30005_v31, %v12270_v38  ;;  %v26364_v48 = vmul.f32 %v26096_v16, %v26096_v16  ;;  %v30014_v31 = vld [vmem:[#allocation37_spill] sm:$0xff]  ;;  %v30017_v59 = vld [vmem:[#allocation79_spill] sm:$0xff]  ;;  %13902 = vmatmul.mubr.bf16.gmra.mrb[96].mxu0 %v26174_v42 }
 0x486   :  { %29997 = vst [vmem:[#allocation11_spill] sm:$0xff] %v26323_v60  ;;  %29999 = vst [vmem:[#allocation15_spill] sm:$0xff] %v26326_v12  ;;  %v26344_v60 = vsub.f32 %v30007_v51, %v12270_v38  ;;  %v26347_v12 = vsub.f32 %v30009_v21, %v12270_v38  ;;  %v12647_v35 = vadd.f32 %v12646_v10, %v12445_v33  ;;  %v30016_v39 = vld [vmem:[#allocation77_spill] sm:$0xff]  ;;  %13911 = vmatprep.mubr.bf16.mxu0 %v26178_v56 }
 0x487   :  { %30004 = vst [vmem:[#allocation84_spill] sm:$0xff] %v26338_v45  ;;  %30006 = vst [vmem:[#allocation86_spill] sm:$0xff] %v26341_v17  ;;  %v26367_v51 = vsub.f32 %v30014_v31, %v12270_v38  ;;  %v26371_v34 = vmul.f32 %v26099_v32, %v26099_v32  ;;  %v26375_v18 = vmul.f32 %v26102_v52, %v26102_v52  ;;  %v30018_v38 = vld [vmem:[#allocation43_spill] sm:$0xff]  ;;  %v13281_v32 = vmax.f32 %v26201_v53, 0.0 }
 0x488   :  { %30008 = vst [vmem:[#allocation10_spill] sm:$0xff] %v26344_v60  ;;  %30010 = vst [vmem:[#allocation88_spill] sm:$0xff] %v26347_v12  ;;  %v26379_v21 = vmul.f32 %v30016_v39, %v30016_v39  ;;  %v26383_v16 = vmul.f32 %v30017_v59, %v30017_v59  ;;  %v26388_v33 = vmul.f32 %v26111_v47, %v26111_v47  ;;  %v13286_v47 = vmax.f32 %v26184_v46, 0.0  ;;  %v16916_v60 = vld [vmem:[%s29222_s16 + $0x308] sm:$0xff]  ;;  %v16918_v17 = vld [vmem:[%s29222_s16 + $0x318] sm:$0xff] }
 0x489   :  { %30011 = vst [vmem:[#allocation89_spill] sm:$0xff] %v26350_v26  ;;  %30012 = vst [vmem:[#allocation90_spill] sm:$0xff] %v26353_v57  ;;  %v26392_v10 = vmul.f32 %v30018_v38, %v30018_v38  ;;  %v26396_v31 = vmul.f32 %v26117_v62, %v26117_v62  ;;  %v12648_v39 = vadd.f32 %v12647_v35, %v26211_v43  ;;  %v30019_v38 = vld [vmem:[#allocation32_spill] sm:$0xff]  ;;  %v30021_v35 = vld [vmem:[#allocation57_spill] sm:$0xff] }
 0x48a   :  { %30013 = vst [vmem:[#allocation51_spill] sm:$0xff] %v26356_v4  ;;  %30015 = vst [vmem:[#allocation91_spill] sm:$0xff] %v26367_v51  ;;  %v26402_v59 = vmul.f32 %v26121_v20, %v26121_v20  ;;  %v26406_v42 = vmul.f32 %v26124_v6, %v26124_v6  ;;  %v13141_v52 = vadd.f32 %v25463_v27, %v30019_v38  ;;  %v30020_v43 = vld [vmem:[#allocation56_spill] sm:$0xff]  ;;  %v30022_v38 = vld [vmem:[#allocation33_spill] sm:$0xff] }
 0x48b   :  { %v12649_v62 = vadd.f32 %v12648_v39, %v26215_v14  ;;  %v13146_v56 = vadd.f32 %v29844_v7, %v30020_v43  ;;  %v13150_v20 = vadd.f32 %v29844_v7, %v30021_v35  ;;  %v12418_v51 = vmul.f32 %v26254_v37, %v26254_v37 }
 0x48c   :  { %v12422_v6 = vmul.f32 %v26257_v15, %v26257_v15  ;;  %v12426_v46 = vmul.f32 %v26260_v3, %v26260_v3  ;;  %v26425_v14 = vadd.f32 %v25463_v27, %v30022_v38  ;;  %v12430_v39 = vmul.f32 %v26263_v58, %v26263_v58  ;;  %v16912_v3 = vld [vmem:[%s29222_s16 + $0x2e8] sm:$0xff] }
 0x48d   :  { %v12650_v53 = vadd.f32 %v12649_v62, %v26219_v55  ;;  %v12434_v43 = vmul.f32 %v26266_v13, %v26266_v13  ;;  %v26434_v35 = vmul.f32 %v26269_v0, %v26269_v0  ;;  %v26438_v15 = vmul.f32 %v26272_v1, %v26272_v1  ;;  %v16908_v0 = vld [vmem:[%s29222_s16 + $0x2c8] sm:$0xff]  ;;  %13912 = vmatmul.mubr.bf16.gmra.mrb[100].mxu0 %v26180_v19  ;;  %v16914_v19 = vld [vmem:[%s29222_s16 + $0x2f8] sm:$0xff] }
 0x48e   :  { %v26442_v38 = vmul.f32 %v26275_v41, %v26275_v41  ;;  %v26446_v62 = vmul.f32 %v26278_v49, %v26278_v49  ;;  %v26450_v55 = vmul.f32 %v26281_v29, %v26281_v29  ;;  %v26458_v1 = vmul.f32 %v26284_v54, %v26284_v54  ;;  %v16910_v29 = vld [vmem:[%s29222_s16 + $0x2d8] sm:$0xff]  ;;  %13921 = vmatprep.mubr.bf16.mxu0 %v26190_v25 }
 0x48f   :  { %v12651_v13 = vadd.f32 %v12650_v53, %v26223_v28  ;;  %v26462_v41 = vmul.f32 %v26287_v50, %v26287_v50  ;;  %v26466_v49 = vmul.f32 %v26290_v44, %v26290_v44  ;;  %v16907_v28 = vld [vmem:[%s29222_s16 + $0x2c0] sm:$0xff]  ;;  %v16909_v53 = vld [vmem:[%s29222_s16 + $0x2d0] sm:$0xff]  ;;  %v26479_v50 = vmul.f32 %v26293_v2, %v26293_v2 }
 0x490   :  { %v26483_v44 = vmul.f32 %v26296_v24, %v26296_v24  ;;  %v26487_v54 = vmul.f32 %v26299_v23, %v26299_v23  ;;  %v26491_v58 = vmul.f32 %v26302_v11, %v26302_v11  ;;  %v26500_v24 = vmul.f32 %v26305_v40, %v26305_v40  ;;  %v16911_v11 = vld [vmem:[%s29222_s16 + $0x2e0] sm:$0xff] }
 0x491   :  { %v12652_v2 = vadd.f32 %v12651_v13, %v26227_v5  ;;  %v26504_v23 = vmul.f32 %v26308_v8, %v26308_v8  ;;  %v12682_v37 = vadd.f32 %v12422_v6, %v12418_v51  ;;  %v16913_v13 = vld [vmem:[%s29222_s16 + $0x2f0] sm:$0xff]  ;;  %v30023_v5 = vmax.f32 %v26152_v30, 0.0  ;;  %v30024_v51 = vld [vmem:[#allocation21_spill] sm:$0xff] }
 0x492   :  { %v19857_v8 = vpack.c.bf16 %v16910_v29, %v16908_v0  ;;  %v19856_v4 = vpack.c.bf16 %v16909_v53, %v16907_v28  ;;  %v13285_v6 = vmax.f32 %v13141_v52, 0.0  ;;  %v13290_v26 = vmax.f32 %v13146_v56, 0.0  ;;  %v30025_v0 = vld [vmem:[#allocation34_spill] sm:$0xff]  ;;  %v30028_v28 = vld [vmem:[#allocation59_spill] sm:$0xff] }
 0x493   :  { %v13454_v40 = vpack.c.bf16 %v13286_v47, %v30023_v5  ;;  %v12653_v25 = vadd.f32 %v12652_v2, %v30024_v51  ;;  %v12683_v57 = vadd.f32 %v12682_v37, %v12426_v46  ;;  %v13294_v12 = vmax.f32 %v13150_v20, 0.0  ;;  %v16915_v20 = vld [vmem:[%s29222_s16 + $0x300] sm:$0xff]  ;;  %v16917_v30 = vld [vmem:[%s29222_s16 + $0x310] sm:$0xff] }
 0x494   :  { %14034 = vmatprep.subr.bf16.mxu0 %v19857_v8  ;;  %v26525_v45 = vpack.c.bf16 %v13285_v6, %v13281_v32  ;;  %v19859_v47 = vpack.c.bf16 %v16914_v19, %v16912_v3  ;;  %v19858_v29 = vpack.c.bf16 %v16913_v13, %v16911_v11  ;;  %v13149_v52 = vadd.f32 %v25463_v27, %v30025_v0  ;;  %v30026_v37 = vld [vmem:[#allocation23_spill] sm:$0xff]  ;;  %v30027_v11 = vld [vmem:[#allocation58_spill] sm:$0xff]  ;;  %v30029_v13 = vld [vmem:[#allocation92_spill] sm:$0xff] }
 0x495   :  { %v12654_v2 = vadd.f32 %v12653_v25, %v30026_v37  ;;  %v12684_v56 = vadd.f32 %v12683_v57, %v12430_v39  ;;  %14035 = vmatpush1.bf16.msra.mxu0 %v19856_v4  ;;  %v26536_v8 = vpack.c.bf16 %v13294_v12, %v13290_v26  ;;  %v13289_v32 = vmax.f32 %v26425_v14, 0.0  ;;  %v30030_v25 = vld [vmem:[#allocation35_spill] sm:$0xff]  ;;  %v16920_v12 = vld [vmem:[%s29222_s16 + $0x328] sm:$0xff] }
 0x496   :  { %14036 = vmatprep.subr.bf16.mxu0 %v19859_v47  ;;  %v13293_v3 = vmax.f32 %v13149_v52, 0.0  ;;  %v13154_v46 = vadd.f32 %v29844_v7, %v30027_v11  ;;  %v13158_v53 = vadd.f32 %v29844_v7, %v30028_v28  ;;  %v19861_v19 = vpack.c.bf16 %v16918_v17, %v16916_v60  ;;  %v16922_v26 = vld [vmem:[%s29222_s16 + $0x338] sm:$0xff]  ;;  %v30031_v4 = vld [vmem:[#allocation70_spill] sm:$0xff]  ;;  %v30032_v39 = vld [vmem:[#allocation113_spill] sm:$0xff] }
 0x497   :  { %v12655_v5 = vadd.f32 %v12654_v2, %v30029_v13  ;;  %v12685_v6 = vadd.f32 %v12684_v56, %v12434_v43  ;;  %v19860_v51 = vpack.c.bf16 %v16917_v30, %v16915_v20  ;;  %v13153_v57 = vadd.f32 %v25463_v27, %v30030_v25  ;;  %13922 = vmatmul.mubr.bf16.gmra.mrb[104].mxu0 %v30031_v4  ;;  %v30033_v47 = vld [vmem:[#allocation94_spill] sm:$0xff]  ;;  %v30034_v30 = vld [vmem:[#allocation60_spill] sm:$0xff] }
 0x498   :  { %v26553_v14 = vpack.c.bf16 %v13293_v3, %v13289_v32  ;;  %v13298_v60 = vmax.f32 %v13154_v46, 0.0  ;;  %v13302_v17 = vmax.f32 %v13158_v53, 0.0  ;;  %v13157_v43 = vadd.f32 %v25463_v27, %v30032_v39  ;;  %13931 = vmatprep.mubr.bf16.mxu0 %v13454_v40  ;;  %v16919_v2 = vld [vmem:[%s29222_s16 + $0x320] sm:$0xff]  ;;  %v16921_v56 = vld [vmem:[%s29222_s16 + $0x330] sm:$0xff] }
 0x499   :  { %v12656_v0 = vadd.f32 %v12655_v5, %v30033_v47  ;;  %v12686_v52 = vadd.f32 %v12685_v6, %v26434_v35  ;;  %14037 = vmatpush1.bf16.msra.mxu0 %v19858_v29  ;;  %v13297_v20 = vmax.f32 %v13153_v57, 0.0  ;;  %v13162_v37 = vadd.f32 %v29844_v7, %v30034_v30  ;;  %v30035_v11 = vld [vmem:[#allocation12_spill] sm:$0xff]  ;;  %v30037_v13 = vld [vmem:[#allocation114_spill] sm:$0xff]  ;;  %v30038_v57 = vld [vmem:[#allocation115_spill] sm:$0xff] }
 0x49a   :  { %v26567_v32 = vpack.c.bf16 %v13302_v17, %v13298_v60  ;;  %14038 = vmatprep.subr.bf16.mxu0 %v19861_v19  ;;  %v13301_v3 = vmax.f32 %v13157_v43, 0.0  ;;  %v13166_v40 = vadd.f32 %v29844_v7, %v30035_v11  ;;  %v19863_v35 = vpack.c.bf16 %v16922_v26, %v16920_v12  ;;  %v30036_v29 = vld [vmem:[#allocation96_spill] sm:$0xff]  ;;  %v30039_v60 = vld [vmem:[#allocation98_spill] sm:$0xff] }
 0x49b   :  { %v12657_v46 = vadd.f32 %v12656_v0, %v30036_v29  ;;  %v12687_v28 = vadd.f32 %v12686_v52, %v26438_v15  ;;  %v13306_v53 = vmax.f32 %v13162_v37, 0.0  ;;  %v13161_v5 = vadd.f32 %v25463_v27, %v30037_v13  ;;  %v30040_v26 = vld [vmem:[#allocation14_spill] sm:$0xff]  ;;  %v16926_v47 = vld [vmem:[%s29222_s16 + $0x358] sm:$0xff] }
 0x49c   :  { %v26575_v6 = vpack.c.bf16 %v13301_v3, %v13297_v20  ;;  %v13310_v25 = vmax.f32 %v13166_v40, 0.0  ;;  %v13165_v4 = vadd.f32 %v25463_v27, %v30038_v57  ;;  %v19862_v19 = vpack.c.bf16 %v16921_v56, %v16919_v2  ;;  %v16924_v43 = vld [vmem:[%s29222_s16 + $0x348] sm:$0xff]  ;;  %v30041_v20 = vld [vmem:[#allocation16_spill] sm:$0xff] }
 0x49d   :  { %v12658_v17 = vadd.f32 %v12657_v46, %v30039_v60  ;;  %v12688_v39 = vadd.f32 %v12687_v28, %v26442_v38  ;;  %14039 = vmatpush1.bf16.msra.mxu0 %v19860_v51  ;;  %v13305_v12 = vmax.f32 %v13161_v5, 0.0  ;;  %v13170_v15 = vadd.f32 %v29844_v7, %v30040_v26  ;;  %v30042_v51 = vld [vmem:[#allocation116_spill] sm:$0xff]  ;;  %v30043_v3 = vld [vmem:[#allocation118_spill] sm:$0xff]  ;;  %v30044_v5 = vld [vmem:[#allocation47_spill] sm:$0xff] }
 0x49e   :  { %v26589_v0 = vpack.c.bf16 %v13310_v25, %v13306_v53  ;;  %14040 = vmatprep.subr.bf16.mxu0 %v19863_v35  ;;  %v13309_v52 = vmax.f32 %v13165_v4, 0.0  ;;  %v13174_v38 = vadd.f32 %v29844_v7, %v30041_v20  ;;  %v13169_v30 = vadd.f32 %v25463_v27, %v30042_v51  ;;  %v16923_v40 = vld [vmem:[%s29222_s16 + $0x340] sm:$0xff]  ;;  %v16925_v35 = vld [vmem:[%s29222_s16 + $0x350] sm:$0xff] }
 0x49f   :  { %v12659_v37 = vadd.f32 %v12658_v17, %v26360_v22  ;;  %v12689_v2 = vadd.f32 %v12688_v39, %v26446_v62  ;;  %v13314_v56 = vmax.f32 %v13170_v15, 0.0  ;;  %v13173_v11 = vadd.f32 %v25463_v27, %v30043_v3  ;;  %13932 = vmatmul.mubr.bf16.gmra.mrb[108].mxu0 %v26525_v45  ;;  %v30045_v45 = vld [vmem:[#allocation48_spill] sm:$0xff]  ;;  %v30046_v17 = vld [vmem:[#allocation119_spill] sm:$0xff]  ;;  %v30048_v51 = vld [vmem:[#allocation49_spill] sm:$0xff] }
 0x4a0   :  { %v26606_v29 = vpack.c.bf16 %v13309_v52, %v13305_v12  ;;  %v13318_v46 = vmax.f32 %v13174_v38, 0.0  ;;  %v13313_v22 = vmax.f32 %v13169_v30, 0.0  ;;  %v19865_v28 = vpack.c.bf16 %v16926_v47, %v16924_v43  ;;  %13941 = vmatprep.mubr.bf16.mxu0 %v26536_v8  ;;  %v16927_v15 = vld [vmem:[%s29222_s16 + $0x360] sm:$0xff]  ;;  %v16929_v43 = vld [vmem:[%s29222_s16 + $0x370] sm:$0xff] }
 0x4a1   :  { %v12660_v62 = vadd.f32 %v12659_v37, %v26364_v48  ;;  %v12690_v53 = vadd.f32 %v12689_v2, %v26450_v55  ;;  %14041 = vmatpush1.bf16.msra.mxu0 %v19862_v19  ;;  %v13317_v13 = vmax.f32 %v13173_v11, 0.0  ;;  %v13178_v25 = vadd.f32 %v29844_v7, %v30044_v5  ;;  %v16928_v48 = vld [vmem:[%s29222_s16 + $0x368] sm:$0xff]  ;;  %v16930_v55 = vld [vmem:[%s29222_s16 + $0x378] sm:$0xff] }
 0x4a2   :  { %v26613_v57 = vpack.c.bf16 %v13318_v46, %v13314_v56  ;;  %14042 = vmatprep.subr.bf16.mxu0 %v19865_v28  ;;  %v13182_v4 = vadd.f32 %v29844_v7, %v30045_v45  ;;  %v19864_v60 = vpack.c.bf16 %v16925_v35, %v16923_v40  ;;  %v13177_v39 = vadd.f32 %v25463_v27, %v30046_v17  ;;  %v30047_v52 = vld [vmem:[#allocation120_spill] sm:$0xff]  ;;  %v30052_v5 = vld [vmem:[#allocation50_spill] sm:$0xff] }
 0x4a3   :  { %v12661_v8 = vadd.f32 %v12660_v62, %v26371_v34  ;;  %v12691_v19 = vadd.f32 %v12690_v53, %v26458_v1  ;;  %v26627_v12 = vpack.c.bf16 %v13317_v13, %v13313_v22  ;;  %v13322_v26 = vmax.f32 %v13178_v25, 0.0  ;;  %v30049_v37 = vld [vmem:[#allocation20_spill] sm:$0xff]  ;;  %v30050_v62 = vld [vmem:[#allocation121_spill] sm:$0xff]  ;;  %v30053_v45 = vld [vmem:[#allocation22_spill] sm:$0xff] }
 0x4a4   :  { %v13326_v47 = vmax.f32 %v13182_v4, 0.0  ;;  %v13181_v20 = vadd.f32 %v25463_v27, %v30047_v52  ;;  %v13321_v38 = vmax.f32 %v13177_v39, 0.0  ;;  %v13186_v34 = vadd.f32 %v29844_v7, %v30048_v51  ;;  %v16934_v53 = vld [vmem:[%s29222_s16 + $0x398] sm:$0xff]  ;;  %v16933_v17 = vld [vmem:[%s29222_s16 + $0x390] sm:$0xff] }
 0x4a5   :  { %v12662_v1 = vadd.f32 %v12661_v8, %v26375_v18  ;;  %v12692_v30 = vadd.f32 %v12691_v19, %v26462_v41  ;;  %14043 = vmatpush1.bf16.msra.mxu0 %v19864_v60  ;;  %v13190_v2 = vadd.f32 %v29844_v7, %v30049_v37  ;;  %v19867_v56 = vpack.c.bf16 %v16930_v55, %v16928_v48  ;;  %v16932_v41 = vld [vmem:[%s29222_s16 + $0x388] sm:$0xff]  ;;  %v16931_v60 = vld [vmem:[%s29222_s16 + $0x380] sm:$0xff]  ;;  %v16937_v51 = vld [vmem:[%s29222_s16 + $0x3b0] sm:$0xff] }
 0x4a6   :  { %v26643_v3 = vpack.c.bf16 %v13326_v47, %v13322_v26  ;;  %v13325_v11 = vmax.f32 %v13181_v20, 0.0  ;;  %v13330_v40 = vmax.f32 %v13186_v34, 0.0  ;;  %v19866_v35 = vpack.c.bf16 %v16929_v43, %v16927_v15  ;;  %v16936_v43 = vld [vmem:[%s29222_s16 + $0x3a8] sm:$0xff]  ;;  %v16938_v20 = vld [vmem:[%s29222_s16 + $0x3b8] sm:$0xff] }
 0x4a7   :  { %v12663_v46 = vadd.f32 %v12662_v1, %v26379_v21  ;;  %v12693_v22 = vadd.f32 %v12692_v30, %v26466_v49  ;;  %v13334_v28 = vmax.f32 %v13190_v2, 0.0  ;;  %14044 = vmatprep.subr.bf16.mxu0 %v19867_v56  ;;  %v13185_v18 = vadd.f32 %v25463_v27, %v30050_v62  ;;  %13942 = vmatmul.mubr.bf16.gmra.mrb[112].mxu0 %v26553_v14  ;;  %v30051_v21 = vld [vmem:[#allocation122_spill] sm:$0xff]  ;;  %v30056_v30 = vld [vmem:[#allocation24_spill] sm:$0xff] }
 0x4a8   :  { %v26656_v13 = vpack.c.bf16 %v13325_v11, %v13321_v38  ;;  %v13189_v49 = vadd.f32 %v25463_v27, %v30051_v21  ;;  %v13194_v25 = vadd.f32 %v29844_v7, %v30052_v5  ;;  %v13198_v4 = vadd.f32 %v29844_v7, %v30053_v45  ;;  %13951 = vmatprep.mubr.bf16.mxu0 %v26567_v32  ;;  %v16935_v38 = vld [vmem:[%s29222_s16 + $0x3a0] sm:$0xff]  ;;  %v16941_v5 = vld [vmem:[%s29222_s16 + $0x3d0] sm:$0xff]  ;;  %v16946_v45 = vld [vmem:[%s29222_s16 + $0x3f8] sm:$0xff] }
 0x4a9   :  { %v12664_v14 = vadd.f32 %v12663_v46, %v26383_v16  ;;  %v12694_v39 = vadd.f32 %v12693_v22, %v26479_v50  ;;  %v26673_v48 = vpack.c.bf16 %v13334_v28, %v13330_v40  ;;  %14045 = vmatpush1.bf16.msra.mxu0 %v19866_v35  ;;  %v13329_v55 = vmax.f32 %v13185_v18, 0.0  ;;  %v30054_v50 = vld [vmem:[#allocation123_spill] sm:$0xff]  ;;  %v30057_v40 = vld [vmem:[#allocation40_spill] sm:$0xff]  ;;  %v16940_v46 = vld [vmem:[%s29222_s16 + $0x3c8] sm:$0xff] }
 0x4aa   :  { %v13333_v8 = vmax.f32 %v13189_v49, 0.0  ;;  %v13338_v19 = vmax.f32 %v13194_v25, 0.0  ;;  %v13342_v26 = vmax.f32 %v13198_v4, 0.0  ;;  %v19869_v15 = vpack.c.bf16 %v16934_v53, %v16932_v41  ;;  %v16942_v22 = vld [vmem:[%s29222_s16 + $0x3d8] sm:$0xff]  ;;  %v16944_v25 = vld [vmem:[%s29222_s16 + $0x3e8] sm:$0xff] }
 0x4ab   :  { %v12665_v47 = vadd.f32 %v12664_v14, %v26388_v33  ;;  %v12695_v16 = vadd.f32 %v12694_v39, %v26483_v44  ;;  %v19868_v52 = vpack.c.bf16 %v16933_v17, %v16931_v60  ;;  %v13193_v32 = vadd.f32 %v25463_v27, %v30054_v50  ;;  %v30055_v44 = vld [vmem:[#allocation124_spill] sm:$0xff] }
 0x4ac   :  { %v26691_v34 = vpack.c.bf16 %v13333_v8, %v13329_v55  ;;  %v26693_v33 = vpack.c.bf16 %v13342_v26, %v13338_v19  ;;  %14046 = vmatprep.subr.bf16.mxu0 %v19869_v15  ;;  %v13197_v1 = vadd.f32 %v25463_v27, %v30055_v44  ;;  %v13202_v37 = vadd.f32 %v29844_v7, %v30056_v30  ;;  %v30058_v21 = vld [vmem:[#allocation36_spill] sm:$0xff]  ;;  %v30061_v15 = vld [vmem:[#allocation82_spill] sm:$0xff]  ;;  %v30064_v30 = vld [vmem:[#allocation5_spill] sm:$0xff] }
 0x4ad   :  { %v12666_v2 = vadd.f32 %v12665_v47, %v26392_v10  ;;  %v12696_v56 = vadd.f32 %v12695_v16, %v26487_v54  ;;  %14047 = vmatpush1.bf16.msra.mxu0 %v19868_v52  ;;  %v13337_v11 = vmax.f32 %v13193_v32, 0.0  ;;  %v13206_v35 = vadd.f32 %v29844_v7, %v30057_v40  ;;  %v16939_v54 = vld [vmem:[%s29222_s16 + $0x3c0] sm:$0xff]  ;;  %v30066_v40 = vld [vmem:[#allocation83_spill] sm:$0xff] }
 0x4ae   :  { %v13341_v28 = vmax.f32 %v13197_v1, 0.0  ;;  %v13346_v62 = vmax.f32 %v13202_v37, 0.0  ;;  %v19871_v18 = vpack.c.bf16 %v16938_v20, %v16936_v43  ;;  %v19870_v41 = vpack.c.bf16 %v16937_v51, %v16935_v38  ;;  %v16943_v26 = vld [vmem:[%s29222_s16 + $0x3e0] sm:$0xff] }
 0x4af   :  { %v12667_v10 = vadd.f32 %v12666_v2, %v26396_v31  ;;  %v12697_v7 = vadd.f32 %v12696_v56, %v26491_v58  ;;  %v13350_v53 = vmax.f32 %v13206_v35, 0.0  ;;  %v13201_v49 = vadd.f32 %v25463_v27, %v30058_v21  ;;  %13952 = vmatmul.mubr.bf16.gmra.mrb[116].mxu0 %v26575_v6  ;;  %v30059_v58 = vld [vmem:[#allocation110_spill] sm:$0xff]  ;;  %v30062_v16 = vld [vmem:[#allocation85_spill] sm:$0xff]  ;;  %v30063_v44 = vld [vmem:[#allocation8_spill] sm:$0xff] }
 0x4b0   :  { %v26726_v31 = vpack.c.bf16 %v13341_v28, %v13337_v11  ;;  %14048 = vmatprep.subr.bf16.mxu0 %v19871_v18  ;;  %v13205_v4 = vadd.f32 %v25463_v27, %v30059_v58  ;;  %v19873_v60 = vpack.c.bf16 %v16942_v22, %v16940_v46  ;;  %13961 = vmatprep.mubr.bf16.mxu0 %v26589_v0  ;;  %v16945_v27 = vld [vmem:[%s29222_s16 + $0x3f0] sm:$0xff]  ;;  %s21039_s16 = smov 64  }
 0x4b1   :  { %v12668_v17 = vadd.f32 %v12667_v10, %v26402_v59  ;;  %v12698_v14 = vadd.f32 %v12697_v7, %v26500_v24  ;;  %v26733_v39 = vpack.c.bf16 %v13350_v53, %v13346_v62  ;;  %14049 = vmatpush1.bf16.msra.mxu0 %v19870_v41  ;;  %v13345_v55 = vmax.f32 %v13201_v49, 0.0  ;;  %v30060_v59 = vld [vmem:[#allocation17_spill] sm:$0xff]  ;;  %v30065_v2 = vld [vmem:[#allocation87_spill] sm:$0xff]  ;;  %v30067_v22 = vld [vmem:[#allocation18_spill] sm:$0xff] }
 0x4b2   :  { %v13349_v8 = vmax.f32 %v13205_v4, 0.0  ;;  %14050 = vmatprep.subr.bf16.mxu0 %v19873_v60  ;;  %v19872_v6 = vpack.c.bf16 %v16941_v5, %v16939_v54  ;;  %v19875_v19 = vpack.c.bf16 %v16946_v45, %v16944_v25  ;;  %v12537_v24 = vmul.f32 %v30060_v59, %v30060_v59  ;;  %v30068_v18 = vld [vmem:[#allocation11_spill] sm:$0xff] }
 0x4b3   :  { %v12669_v0 = vadd.f32 %v12668_v17, %v26406_v42  ;;  %v12494_v43 = vmul.f32 %v30061_v15, %v30061_v15  ;;  %v12699_v47 = vadd.f32 %v12698_v14, %v26504_v23  ;;  %v12541_v52 = vmul.f32 %v30062_v16, %v30062_v16  ;;  %v30069_v10 = vld [vmem:[#allocation19_spill] sm:$0xff] }
 0x4b4   :  { %v26749_v50 = vpack.c.bf16 %v13349_v8, %v13345_v55  ;;  %v12498_v20 = vmul.f32 %v26314_v9, %v26314_v9  ;;  %v19874_v51 = vpack.c.bf16 %v16945_v27, %v16943_v26  ;;  %v12545_v42 = vmul.f32 %v30063_v44, %v30063_v44  ;;  %v30070_v53 = vld [vmem:[#allocation15_spill] sm:$0xff]  ;;  %v30071_v8 = vld [vmem:[#allocation84_spill] sm:$0xff]  ;;  %v30072_v27 = vld [vmem:[#allocation86_spill] sm:$0xff] }
 0x4b5   :  { %v12670_v32 = vadd.f32 %v12669_v0, %v12537_v24  ;;  %v12700_v38 = vadd.f32 %v12699_v47, %v12494_v43  ;;  %14051 = vmatpush1.bf16.msra.mxu0 %v19872_v6  ;;  %v12502_v23 = vmul.f32 %v30064_v30, %v30064_v30  ;;  %v12549_v56 = vmul.f32 %v30065_v2, %v30065_v2  ;;  %v30073_v43 = vld [vmem:[#allocation10_spill] sm:$0xff] }
 0x4b6   :  { %14052 = vmatprep.subr.bf16.mxu0 %v19875_v19  ;;  %v12506_v35 = vmul.f32 %v30066_v40, %v30066_v40  ;;  %v12553_v28 = vmul.f32 %v30067_v22, %v30067_v22  ;;  %v12510_v41 = vmul.f32 %v30068_v18, %v30068_v18  ;;  %v12557_v7 = vmul.f32 %v30069_v10, %v30069_v10 }
 0x4b7   :  { %v12671_v1 = vadd.f32 %v12670_v32, %v12541_v52  ;;  %v12701_v37 = vadd.f32 %v12700_v38, %v12498_v20  ;;  %13962 = vmatmul.mubr.bf16.gmra.mrb[120].mxu0 %v26606_v29  ;;  %v12514_v21 = vmul.f32 %v30070_v53, %v30070_v53  ;;  %v12522_v58 = vmul.f32 %v26332_v61, %v26332_v61  ;;  %v30074_v32 = vld [vmem:[#allocation88_spill] sm:$0xff] }
 0x4b8   :  { %13971 = vmatprep.mubr.bf16.mxu0 %v26613_v57  ;;  %v12518_v57 = vmul.f32 %v26329_v36, %v26329_v36  ;;  %v12526_v17 = vmul.f32 %v26335_v63, %v26335_v63  ;;  %v12530_v6 = vmul.f32 %v30071_v8, %v30071_v8  ;;  %v12542_v20 = vmul.f32 %v30074_v32, %v30074_v32 }
 0x4b9   :  { %v12672_v11 = vadd.f32 %v12671_v1, %v12545_v42  ;;  %v12702_v46 = vadd.f32 %v12701_v37, %v12502_v23  ;;  %14053 = vmatpush1.bf16.msra.mxu0 %v19874_v51  ;;  %v30075_v42 = vld [vmem:[#allocation89_spill] sm:$0xff] }
 0x4ba   :  { %v12546_v1 = vmul.f32 %v30075_v42, %v30075_v42 }
 0x4bb   :  { %v12673_v62 = vadd.f32 %v12672_v11, %v12549_v56  ;;  %v12703_v54 = vadd.f32 %v12702_v46, %v12506_v35  ;;  %v30076_v56 = vld [vmem:[#allocation90_spill] sm:$0xff]  ;;  %v30077_v35 = vld [vmem:[#allocation51_spill] sm:$0xff] }
 0x4bd   :  { %v12674_v29 = vadd.f32 %v12673_v62, %v12553_v28  ;;  %v12704_v49 = vadd.f32 %v12703_v54, %v12510_v41  ;;  %v30078_v28 = vld [vmem:[#allocation91_spill] sm:$0xff] }
 0x4be   :  { %v12558_v62 = vmul.f32 %v30078_v28, %v30078_v28 }
 0x4bf   :  { %v12675_v5 = vadd.f32 %v12674_v29, %v12557_v7  ;;  %v12705_v25 = vadd.f32 %v12704_v49, %v12514_v21  ;;  %13972 = vmatmul.mubr.bf16.gmra.mrb[124].mxu0 %v26627_v12  ;;  %v12534_v12 = vmul.f32 %v30072_v27, %v30072_v27  ;;  %v30079_v7 = vld [vmem:[#allocation25_spill] sm:$0xff] }
 0x4c0   :  { %13981 = vmatprep.mubr.bf16.mxu0 %v26643_v3  ;;  %v12538_v3 = vmul.f32 %v30073_v43, %v30073_v43  ;;  %v12890_v29 = vsub.s32 2, %v30079_v7 }
 0x4c1   :  { %v12676_v45 = vrot.slane %v12675_v5, 4  ;;  %v12706_v4 = vadd.f32 %v12705_v25, %v12518_v57  ;;  %v30083_v25 = vld [vmem:[#allocation41_spill] sm:$0xff] }
 0x4c3   :  { %v12677_v60 = vadd.f32 %v12676_v45, %v12675_v5  ;;  %v12707_v14 = vadd.f32 %v12706_v4, %v12522_v58  ;;  %v30084_v58 = vld [vmem:[#allocation45_spill] sm:$0xff] }
 0x4c5   :  { %v12678_v55 = vrot.slane %v12677_v60, 2  ;;  %v12708_v19 = vadd.f32 %v12707_v14, %v12526_v17  ;;  %v30086_v14 = vld [vmem:[#allocation54_spill] sm:$0xff] }
 0x4c7   :  { %v12679_v26 = vadd.f32 %v12678_v55, %v12677_v60  ;;  %v12709_v24 = vadd.f32 %v12708_v19, %v12530_v6  ;;  %13982 = vmatmul.mubr.bf16.gmra.mrb[128].mxu0 %v26656_v13  ;;  %v12550_v13 = vmul.f32 %v30076_v56, %v30076_v56  ;;  %v30085_v60 = vld [vmem:[#allocation52_spill] sm:$0xff] }
 0x4c8   :  { %13991 = vmatprep.mubr.bf16.mxu0 %v26673_v48  ;;  %v12554_v48 = vmul.f32 %v30077_v35, %v30077_v35 }
 0x4c9   :  { %v12680_v0 = vrot.slane %v12679_v26, 1  ;;  %v12710_v47 = vadd.f32 %v12709_v24, %v12534_v12  ;;  %v30089_v12 = vld [vmem:[#allocation75_spill] sm:$0xff] }
 0x4cb   :  { %v12681_v52 = vadd.f32 %v12680_v0, %v12679_v26  ;;  %v12711_v38 = vadd.f32 %v12710_v47, %v12538_v3  ;;  %v30088_v26 = vld [vmem:[#allocation66_spill] sm:$0xff]  ;;  %v30090_v0 = vld [vmem:[#allocation77_spill] sm:$0xff]  ;;  %v30091_v47 = vld [vmem:[#allocation79_spill] sm:$0xff] }
 0x4cd   :  { %v12725_v51 = vmul.f32 0.0034722222, %v12681_v52  ;;  %v12712_v23 = vadd.f32 %v12711_v38, %v12542_v20  ;;  %v30092_v20 = vld [vmem:[#allocation81_spill] sm:$0xff] }
 0x4cf   :  { %v12729_v37 = vadd.f32 1e-05, %v12725_v51  ;;  %v12713_v11 = vadd.f32 %v12712_v23, %v12546_v1  ;;  %13992 = vmatmul.mubr.bf16.gmra.mrb[132].mxu0 %v26691_v34  ;;  %v26805_v34 = vld [vmem:[%s29754_s24] sm:$0xf]  ;;  %v30093_v51 = vld [vmem:[#allocation43_spill] sm:$0xff]  ;;  %s21043_s24 = smov 112  }
 0x4d0   :  { %14001 = vmatprep.mubr.bf16.mxu0 %v26693_v33  ;;  %v26810_v33 = vrot.slane %v26805_v34, %v12890_v29  ;;  %v30094_v23 = vld [vmem:[#allocation7_spill] sm:$0xff] }
 0x4d1   :  { %20974 = vrsqrt.f32 %v12729_v37  ;;  %v12714_v46 = vadd.f32 %v12713_v11, %v12550_v13  ;;  %v30095_v11 = vld [vmem:[#allocation9_spill] sm:$0xff] }
 0x4d2   :  { %30080 = vst [vmem:[#allocation93_spill] sm:$0xff] %v26810_v33 }
 0x4d3   :  { %v12715_v41 = vadd.f32 %v12714_v46, %v12554_v48  ;;  %v30096_v46 = vld [vmem:[#allocation13_spill] sm:$0xff] }
 0x4d5   :  { %v12716_v54 = vadd.f32 %v12715_v41, %v12558_v62 }
 0x4d7   :  { %14002 = vmatmul.mubr.bf16.gmra.mrb[136].mxu0 %v26726_v31  ;;  %v12717_v21 = vrot.slane %v12716_v54, 4 }
 0x4d8   :  { %14011 = vmatprep.mubr.bf16.mxu0 %v26733_v39 }
 0x4d9   :  { %v12718_v57 = vadd.f32 %v12717_v21, %v12716_v54 }
 0x4db   :  { %v26812_v49 = vpop.eup %20974  ;;  %v12719_v39 = vrot.slane %v12718_v57, 2 }
 0x4dc   :  { %30081 = vst [vmem:[#allocation95_spill] sm:$0xff] %v26812_v49  ;;  %v12877_v5 = vmul.f32 %v26812_v49, %v30069_v10  ;;  %v12801_v45 = vmul.f32 %v26812_v49, %v30083_v25  ;;  %v12805_v4 = vmul.f32 %v26812_v49, %v30084_v58  ;;  %v12809_v17 = vmul.f32 %v26812_v49, %v30085_v60  ;;  %v30087_v10 = vld [vmem:[#allocation61_spill] sm:$0xff] }
 0x4dd   :  { %v12813_v55 = vmul.f32 %v26812_v49, %v30086_v14  ;;  %v12817_v6 = vmul.f32 %v26812_v49, %v30087_v10  ;;  %v12720_v19 = vadd.f32 %v12719_v39, %v12718_v57  ;;  %v12825_v24 = vmul.f32 %v26812_v49, %v30089_v12 }
 0x4de   :  { %v26817_v31 = vmul.f32 %v26810_v33, %v12877_v5  ;;  %v12829_v3 = vmul.f32 %v26812_v49, %v30090_v0  ;;  %v12833_v52 = vmul.f32 %v26812_v49, %v30091_v47  ;;  %v12837_v38 = vmul.f32 %v26812_v49, %v30092_v20 }
 0x4df   :  { %14012 = vmatmul.mubr.bf16.gmra.mrb[140].mxu0 %v26749_v50  ;;  %v12821_v50 = vmul.f32 %v26812_v49, %v30088_v26  ;;  %v12841_v1 = vmul.f32 %v26812_v49, %v30093_v51  ;;  %v12845_v37 = vmul.f32 %v26812_v49, %v30094_v23  ;;  %v12721_v13 = vrot.slane %v12720_v19, 1  ;;  %v30105_v51 = vld [vmem:[#allocation73_spill] sm:$0xff]  ;;  %v30106_v23 = vld [vmem:[#allocation74_spill] sm:$0xff] }
 0x4e0   :  { %30082 = vst [vmem:[#allocation97_spill] sm:$0xff] %v26817_v31  ;;  %v12849_v48 = vmul.f32 %v26812_v49, %v30095_v11  ;;  %v12853_v62 = vmul.f32 %v26812_v49, %v30096_v46  ;;  %v12857_v41 = vmul.f32 %v26812_v49, %v30060_v59  ;;  %v12861_v54 = vmul.f32 %v26812_v49, %v30062_v16 }
 0x4e1   :  { %v12865_v21 = vmul.f32 %v26812_v49, %v30063_v44  ;;  %v12869_v5 = vmul.f32 %v26812_v49, %v30065_v2  ;;  %v12873_v57 = vmul.f32 %v26812_v49, %v30067_v22  ;;  %v12722_v39 = vadd.f32 %v12721_v13, %v12720_v19  ;;  %v30107_v13 = vld [vmem:[#allocation26_spill] sm:$0xff] }
 0x4e2   :  { %v12966_v25 = vmul.f32 %v26810_v33, %v12801_v45  ;;  %v12970_v58 = vmul.f32 %v26810_v33, %v12805_v4  ;;  %v12974_v60 = vmul.f32 %v26810_v33, %v12809_v17  ;;  %v26862_v59 = vmul.f32 %v26810_v33, %v12813_v55 }
 0x4e3   :  { %v12726_v16 = vmul.f32 0.0034722222, %v12722_v39  ;;  %v26865_v14 = vmul.f32 %v26810_v33, %v12817_v6  ;;  %v26868_v44 = vmul.f32 %v26810_v33, %v12821_v50  ;;  %v26871_v2 = vmul.f32 %v26810_v33, %v12825_v24 }
 0x4e4   :  { %v26874_v22 = vmul.f32 %v26810_v33, %v12829_v3  ;;  %v26877_v45 = vmul.f32 %v26810_v33, %v12833_v52  ;;  %v26880_v4 = vmul.f32 %v26810_v33, %v12837_v38  ;;  %v26883_v17 = vmul.f32 %v26810_v33, %v12841_v1  ;;  %v30103_v3 = vld [vmem:[#allocation71_spill] sm:$0xff]  ;;  %v30104_v52 = vld [vmem:[#allocation72_spill] sm:$0xff] }
 0x4e5   :  { %v12730_v55 = vadd.f32 1e-05, %v12726_v16  ;;  %v26886_v10 = vmul.f32 %v26810_v33, %v12845_v37  ;;  %v26889_v6 = vmul.f32 %v26810_v33, %v12849_v48  ;;  %v26892_v19 = vmul.f32 %v26810_v33, %v12853_v62  ;;  %v21035_v48 = vld [vmem:[%s29757_s26] sm:$0xf]  ;;  %v30108_v62 = vld [vmem:[#allocation63_spill] sm:$0xff] }
 0x4e6   :  { %v26895_v26 = vmul.f32 %v26810_v33, %v12857_v41  ;;  %v26898_v50 = vmul.f32 %v26810_v33, %v12861_v54  ;;  %v26901_v12 = vmul.f32 %v26810_v33, %v12865_v21  ;;  %v26904_v24 = vmul.f32 %v26810_v33, %v12869_v5  ;;  %v30109_v54 = vld [vmem:[#allocation64_spill] sm:$0xff]  ;;  %v30110_v5 = vld [vmem:[#allocation65_spill] sm:$0xff] }
 0x4e7   :  { %30097 = vst [vmem:[#allocation99_spill] sm:$0xff] %v26892_v19  ;;  %20976 = vrsqrt.f32 %v12730_v55  ;;  %v26907_v0 = vmul.f32 %v26810_v33, %v12873_v57  ;;  %v12737_v47 = vmul.f32 %v26812_v49, %v30103_v3  ;;  %v12741_v20 = vmul.f32 %v26812_v49, %v30104_v52  ;;  %v30111_v52 = vld [vmem:[#allocation67_spill] sm:$0xff] }
 0x4e8   :  { %30098 = vst [vmem:[#allocation101_spill] sm:$0xff] %v26895_v26  ;;  %30099 = vst [vmem:[#allocation104_spill] sm:$0xff] %v26898_v50  ;;  %v12894_v38 = vsub.s32 3, %v30079_v7  ;;  %v12745_v1 = vmul.f32 %v26812_v49, %v30105_v51  ;;  %v12749_v37 = vmul.f32 %v26812_v49, %v30106_v23  ;;  %v12753_v11 = vmul.f32 %v26812_v49, %v30107_v13  ;;  %v30112_v23 = vld [vmem:[#allocation68_spill] sm:$0xff] }
 0x4e9   :  { %30100 = vst [vmem:[#allocation107_spill] sm:$0xff] %v26901_v12  ;;  %30101 = vst [vmem:[#allocation112_spill] sm:$0xff] %v26904_v24  ;;  %v26925_v46 = vrot.slane %v21035_v48, %v12890_v29  ;;  %v12757_v41 = vmul.f32 %v26812_v49, %v30108_v62  ;;  %v12761_v21 = vmul.f32 %v26812_v49, %v30109_v54  ;;  %v30113_v62 = vld [vmem:[#allocation44_spill] sm:$0xff]  ;;  %v30127_v24 = vld [vmem:[#allocation31_spill] sm:$0xff] }
 0x4ea   :  { %30102 = vst [vmem:[#allocation28_spill] sm:$0xff] %v26907_v0  ;;  %v12765_v57 = vmul.f32 %v26812_v49, %v30110_v5  ;;  %v12902_v39 = vmul.f32 %v26810_v33, %v12737_v47  ;;  %v12906_v16 = vmul.f32 %v26810_v33, %v12741_v20  ;;  %v26936_v55 = vrot.slane %v26805_v34, %v12894_v38  ;;  %v30114_v34 = vld [vmem:[#allocation6_spill] sm:$0xff]  ;;  %v30128_v12 = vld [vmem:[#allocation80_spill] sm:$0xff] }
 0x4eb   :  { %v12910_v7 = vmul.f32 %v26810_v33, %v12745_v1  ;;  %v12914_v29 = vmul.f32 %v26810_v33, %v12749_v37  ;;  %v12918_v3 = vmul.f32 %v26810_v33, %v12753_v11  ;;  %v12769_v51 = vmul.f32 %v26812_v49, %v30111_v52  ;;  %v30125_v0 = vld [vmem:[#allocation38_spill] sm:$0xff] }
 0x4ec   :  { %v12773_v13 = vmul.f32 %v26812_v49, %v30112_v23  ;;  %v12777_v47 = vmul.f32 %v26812_v49, %v30113_v62  ;;  %v26948_v20 = vadd.f32 %v26925_v46, %v12966_v25  ;;  %v12781_v54 = vmul.f32 %v26812_v49, %v30114_v34  ;;  %v30123_v49 = vld [vmem:[#allocation29_spill] sm:$0xff] }
 0x4ed   :  { %v12922_v1 = vmul.f32 %v26810_v33, %v12757_v41  ;;  %v12926_v37 = vmul.f32 %v26810_v33, %v12761_v21  ;;  %v26955_v11 = vadd.f32 %v26925_v46, %v12970_v58  ;;  %v12930_v52 = vmul.f32 %v26810_v33, %v12765_v57 }
 0x4ee   :  { %v26961_v23 = vadd.f32 %v26925_v46, %v12902_v39  ;;  %v26964_v25 = vadd.f32 %v26925_v46, %v12906_v16  ;;  %v26967_v62 = vadd.f32 %v26925_v46, %v12974_v60  ;;  %v26972_v21 = vadd.f32 %v26925_v46, %v12910_v7 }
 0x4ef   :  { %v26975_v58 = vadd.f32 %v26925_v46, %v12914_v29  ;;  %v26978_v57 = vadd.f32 %v26925_v46, %v12918_v3  ;;  %v26981_v39 = vmul.f32 %v26810_v33, %v12769_v51  ;;  %v26983_v16 = vrot.slane %v21035_v48, %v12894_v38  ;;  %v30122_v48 = vld [vmem:[#allocation27_spill] sm:$0xff] }
 0x4f0   :  { %v26989_v34 = vmul.f32 %v26810_v33, %v12773_v13  ;;  %v26995_v7 = vmul.f32 %v26810_v33, %v12781_v54  ;;  %v27000_v51 = vadd.f32 %v26925_v46, %v12922_v1  ;;  %v27003_v38 = vadd.f32 %v26925_v46, %v12926_v37  ;;  %v30118_v54 = vld [vmem:[#allocation100_spill] sm:$0xff]  ;;  %v30120_v1 = vld [vmem:[#allocation106_spill] sm:$0xff]  ;;  %v30121_v37 = vld [vmem:[#allocation111_spill] sm:$0xff] }
 0x4f1   :  { %v26957_v5 = vpop.eup %20976 }
 0x4f2   :  { %v12878_v41 = vmul.f32 %v26957_v5, %v30078_v28  ;;  %v26992_v28 = vmul.f32 %v26810_v33, %v12777_v47  ;;  %30117 = vst [vmem:[#allocation32_spill] sm:$0xff] %v26995_v7  ;;  %v12738_v29 = vmul.f32 %v26957_v5, %v30118_v54  ;;  %v30119_v33 = vld [vmem:[#allocation103_spill] sm:$0xff]  ;;  %v12746_v7 = vmul.f32 %v26957_v5, %v30120_v1 }
 0x4f3   :  { %v12742_v3 = vmul.f32 %v26957_v5, %v30119_v33  ;;  %v12754_v13 = vmul.f32 %v26957_v5, %v30122_v48  ;;  %v12758_v47 = vmul.f32 %v26957_v5, %v30123_v49  ;;  %v12766_v54 = vmul.f32 %v26957_v5, %v30125_v0 }
 0x4f4   :  { %v26986_v60 = vmul.f32 %v26936_v55, %v12878_v41  ;;  %30116 = vst [vmem:[#allocation37_spill] sm:$0xff] %v26992_v28  ;;  %v27009_v41 = vadd.f32 %v26925_v46, %v12930_v52  ;;  %v12750_v28 = vmul.f32 %v26957_v5, %v30121_v37  ;;  %v30124_v52 = vld [vmem:[#allocation117_spill] sm:$0xff]  ;;  %v12774_v1 = vmul.f32 %v26957_v5, %v30127_v24 }
 0x4f5   :  { %v12762_v31 = vmul.f32 %v26957_v5, %v30124_v52  ;;  %v12810_v37 = vmul.f32 %v26957_v5, %v30128_v12  ;;  %v12814_v48 = vmul.f32 %v26957_v5, %v30061_v15  ;;  %v12818_v49 = vmul.f32 %v26957_v5, %v26314_v9 }
 0x4f6   :  { %30115 = vst [vmem:[#allocation30_spill] sm:$0xff] %v26986_v60  ;;  %v30126_v60 = vld [vmem:[#allocation39_spill] sm:$0xff]  ;;  %v12822_v52 = vmul.f32 %v26957_v5, %v30064_v30  ;;  %v12826_v0 = vmul.f32 %v26957_v5, %v30066_v40  ;;  %v12834_v24 = vmul.f32 %v26957_v5, %v30070_v53  ;;  %v12838_v12 = vmul.f32 %v26957_v5, %v26329_v36 }
 0x4f7   :  { %v12770_v33 = vmul.f32 %v26957_v5, %v30126_v60  ;;  %v12830_v60 = vmul.f32 %v26957_v5, %v30068_v18  ;;  %v12842_v15 = vmul.f32 %v26957_v5, %v26332_v61  ;;  %v12846_v9 = vmul.f32 %v26957_v5, %v26335_v63 }
 0x4f8   :  { %v12850_v30 = vmul.f32 %v26957_v5, %v30071_v8  ;;  %v12854_v40 = vmul.f32 %v26957_v5, %v30072_v27  ;;  %v12858_v18 = vmul.f32 %v26957_v5, %v30073_v43  ;;  %v12862_v53 = vmul.f32 %v26957_v5, %v30074_v32 }
 0x4f9   :  { %v12866_v36 = vmul.f32 %v26957_v5, %v30075_v42  ;;  %v12870_v61 = vmul.f32 %v26957_v5, %v30076_v56  ;;  %v12874_v63 = vmul.f32 %v26957_v5, %v30077_v35  ;;  %v12903_v8 = vmul.f32 %v26936_v55, %v12738_v29 }
 0x4fa   :  { %v12907_v50 = vmul.f32 %v26936_v55, %v12742_v3  ;;  %v12911_v27 = vmul.f32 %v26936_v55, %v12746_v7  ;;  %v12915_v43 = vmul.f32 %v26936_v55, %v12750_v28  ;;  %v12919_v26 = vmul.f32 %v26936_v55, %v12754_v13 }
 0x4fb   :  { %v12923_v32 = vmul.f32 %v26936_v55, %v12758_v47  ;;  %v12927_v42 = vmul.f32 %v26936_v55, %v12762_v31  ;;  %v12931_v19 = vmul.f32 %v26936_v55, %v12766_v54  ;;  %v27074_v56 = vmul.f32 %v26936_v55, %v12810_v37 }
 0x4fc   :  { %v27077_v35 = vmul.f32 %v26936_v55, %v12814_v48  ;;  %v27080_v29 = vmul.f32 %v26936_v55, %v12818_v49  ;;  %v27083_v7 = vmul.f32 %v26936_v55, %v12822_v52  ;;  %v27086_v28 = vmul.f32 %v26936_v55, %v12826_v0 }
 0x4fd   :  { %v27089_v3 = vmul.f32 %v26936_v55, %v12830_v60  ;;  %v27092_v31 = vmul.f32 %v26936_v55, %v12834_v24  ;;  %v27095_v13 = vmul.f32 %v26936_v55, %v12838_v12  ;;  %v27098_v47 = vmul.f32 %v26936_v55, %v12842_v15 }
 0x4fe   :  { %v27101_v54 = vmul.f32 %v26936_v55, %v12846_v9  ;;  %v27104_v37 = vmul.f32 %v26936_v55, %v12850_v30  ;;  %v27107_v48 = vmul.f32 %v26936_v55, %v12854_v40  ;;  %v27110_v49 = vmul.f32 %v26936_v55, %v12858_v18 }
 0x4ff   :  { %v27113_v52 = vmul.f32 %v26936_v55, %v12862_v53  ;;  %v27116_v0 = vmul.f32 %v26936_v55, %v12866_v36  ;;  %v27119_v60 = vmul.f32 %v26936_v55, %v12870_v61  ;;  %v27122_v24 = vmul.f32 %v26936_v55, %v12874_v63 }
 0x500   :  { %v13068_v12 = vadd.f32 %v26983_v16, %v12903_v8  ;;  %v13072_v15 = vadd.f32 %v26983_v16, %v12907_v50  ;;  %v13076_v9 = vadd.f32 %v26983_v16, %v12911_v27  ;;  %v13080_v30 = vadd.f32 %v26983_v16, %v12915_v43 }
 0x501   :  { %30129 = vst [vmem:[#allocation56_spill] sm:$0xff] %v27113_v52  ;;  %30130 = vst [vmem:[#allocation57_spill] sm:$0xff] %v27116_v0  ;;  %v12935_v40 = vmul.f32 %v26936_v55, %v12770_v33  ;;  %v12939_v18 = vmul.f32 %v26936_v55, %v12774_v1  ;;  %v13084_v53 = vadd.f32 %v26983_v16, %v12919_v26  ;;  %v13231_v8 = vmax.f32 %v27000_v51, 0.0  ;;  %v30133_v0 = vld [vmem:[#allocation42_spill] sm:$0xff] }
 0x502   :  { %30131 = vst [vmem:[#allocation33_spill] sm:$0xff] %v27119_v60  ;;  %30132 = vst [vmem:[#allocation21_spill] sm:$0xff] %v27122_v24  ;;  %v13088_v36 = vadd.f32 %v26983_v16, %v12923_v32  ;;  %v13212_v61 = vmax.f32 %v13068_v12, 0.0  ;;  %v13216_v60 = vmax.f32 %v13072_v15, 0.0  ;;  %v13220_v63 = vmax.f32 %v13076_v9, 0.0  ;;  %v30134_v1 = vld [vmem:[#allocation46_spill] sm:$0xff] }
 0x503   :  { %v13224_v24 = vmax.f32 %v13080_v30, 0.0  ;;  %v13092_v50 = vadd.f32 %v26983_v16, %v12927_v42  ;;  %v13096_v27 = vadd.f32 %v26983_v16, %v12931_v19  ;;  %v13235_v43 = vmax.f32 %v27003_v38, 0.0 }
 0x504   :  { %v12778_v33 = vmul.f32 %v26957_v5, %v30133_v0  ;;  %v12782_v26 = vmul.f32 %v26957_v5, %v30134_v1  ;;  %v13420_v52 = vpack.c.bf16 %v13216_v60, %v13212_v61  ;;  %v13239_v32 = vmax.f32 %v27009_v41, 0.0 }
 0x505   :  { %v30135_v12 = vmax.f32 %v26961_v23, 0.0  ;;  %v30136_v15 = vmax.f32 %v26964_v25, 0.0  ;;  %v13228_v9 = vmax.f32 %v13084_v53, 0.0  ;;  %v27147_v19 = vadd.f32 %v26925_v46, %v26981_v39 }
 0x506   :  { %v27151_v38 = vadd.f32 %v26925_v46, %v26989_v34  ;;  %14054 = vmatprep.mubr.bf16.mxu0 %v13420_v52  ;;  %v13424_v42 = vpack.c.bf16 %v13224_v24, %v13220_v63  ;;  %v13232_v0 = vmax.f32 %v13088_v36, 0.0  ;;  %v13100_v60 = vadd.f32 %v26983_v16, %v12935_v40  ;;  %v30140_v36 = vld [vmem:[#allocation53_spill] sm:$0xff] }
 0x507   :  { %v13419_v51 = vpack.c.bf16 %v30136_v15, %v30135_v12  ;;  %v13104_v41 = vadd.f32 %v26983_v16, %v12939_v18  ;;  %v30137_v23 = vmax.f32 %v26972_v21, 0.0  ;;  %v30138_v25 = vmax.f32 %v26975_v58, 0.0  ;;  %v30141_v58 = vld [vmem:[#allocation55_spill] sm:$0xff] }
 0x508   :  { %v30139_v39 = vmax.f32 %v26978_v57, 0.0  ;;  %v13236_v61 = vmax.f32 %v13092_v50, 0.0  ;;  %v13240_v34 = vmax.f32 %v13096_v27, 0.0  ;;  %v12943_v52 = vmul.f32 %v26936_v55, %v12778_v33 }
 0x509   :  { %14055 = vmatmul.mubr.bf16.vlgmr.msra.gmra.mrb[72].mxu0 %v13419_v51  ;;  %v13423_v30 = vpack.c.bf16 %v30138_v25, %v30137_v23  ;;  %v12947_v24 = vmul.f32 %v26936_v55, %v12782_v26  ;;  %v27165_v40 = vpack.c.bf16 %v13239_v32, %v13235_v43  ;;  %v13275_v18 = vmax.f32 %v26948_v20, 0.0 }
 0x50a   :  { %v27161_v53 = vpack.c.bf16 %v13231_v8, %v30139_v39  ;;  %14064 = vmatprep.mubr.bf16.mxu0 %v13424_v42  ;;  %v27170_v21 = vmul.f32 %v26957_v5, %v30140_v36  ;;  %v27174_v57 = vmul.f32 %v26957_v5, %v30141_v58  ;;  %v13243_v63 = vmax.f32 %v27147_v19, 0.0  ;;  %v30161_v19 = vld [vmem:[#allocation93_spill] sm:$0xff] }
 0x50b   :  { %v13247_v8 = vmax.f32 %v27151_v38, 0.0  ;;  %v13428_v50 = vpack.c.bf16 %v13232_v0, %v13228_v9  ;;  %v13244_v27 = vmax.f32 %v13100_v60, 0.0  ;;  %v13248_v33 = vmax.f32 %v13104_v41, 0.0 }
 0x50c   :  { %v13279_v43 = vmax.f32 %v26955_v11, 0.0  ;;  %v13432_v1 = vpack.c.bf16 %v13240_v34, %v13236_v61  ;;  %v13140_v20 = vadd.f32 %v26983_v16, %v27074_v56  ;;  %v13144_v26 = vadd.f32 %v26983_v16, %v27077_v35 }
 0x50d   :  { %v13143_v32 = vadd.f32 %v26925_v46, %v26862_v59  ;;  %v27186_v12 = vadd.f32 %v26983_v16, %v12943_v52  ;;  %v27189_v15 = vadd.f32 %v26983_v16, %v12947_v24  ;;  %v13283_v11 = vmax.f32 %v26967_v62, 0.0 }
 0x50e   :  { %v27191_v51 = vpack.c.bf16 %v13279_v43, %v13275_v18  ;;  %v13284_v9 = vmax.f32 %v13140_v20, 0.0  ;;  %v13288_v42 = vmax.f32 %v13144_v26, 0.0  ;;  %v13148_v56 = vadd.f32 %v26983_v16, %v27080_v29 }
 0x50f   :  { %v13287_v0 = vmax.f32 %v13143_v32, 0.0  ;;  %v27196_v35 = vpack.c.bf16 %v13248_v33, %v13244_v27  ;;  %v13152_v59 = vadd.f32 %v26983_v16, %v27083_v7  ;;  %v13147_v60 = vadd.f32 %v26925_v46, %v26865_v14 }
 0x510   :  { %v13151_v41 = vadd.f32 %v26925_v46, %v26868_v44  ;;  %v27204_v23 = vpack.c.bf16 %v13288_v42, %v13284_v9  ;;  %v13292_v25 = vmax.f32 %v13148_v56, 0.0  ;;  %v13156_v29 = vadd.f32 %v26983_v16, %v27086_v28 }
 0x511   :  { %14065 = vmatmul.mubr.bf16.gmra.mrb[76].mxu0 %v13423_v30  ;;  %v27206_v62 = vpack.c.bf16 %v13287_v0, %v13283_v11  ;;  %v13296_v39 = vmax.f32 %v13152_v59, 0.0  ;;  %v13291_v61 = vmax.f32 %v13147_v60, 0.0  ;;  %v13160_v7 = vadd.f32 %v26983_v16, %v27089_v3  ;;  %v30142_v59 = vld [vmem:[#allocation99_spill] sm:$0xff] }
 0x512   :  { %14074 = vmatprep.mubr.bf16.mxu0 %v13428_v50  ;;  %v13295_v34 = vmax.f32 %v13151_v41, 0.0  ;;  %v13300_v14 = vmax.f32 %v13156_v29, 0.0  ;;  %v13155_v44 = vadd.f32 %v26925_v46, %v26871_v2  ;;  %v13159_v30 = vadd.f32 %v26925_v46, %v26874_v22  ;;  %v30143_v29 = vld [vmem:[#allocation56_spill] sm:$0xff] }
 0x513   :  { %v13164_v52 = vadd.f32 %v26983_v16, %v27092_v31  ;;  %v27218_v24 = vpack.c.bf16 %v13296_v39, %v13292_v25  ;;  %v13304_v18 = vmax.f32 %v13160_v7, 0.0  ;;  %v13168_v36 = vadd.f32 %v26983_v16, %v27095_v13 }
 0x514   :  { %v27220_v28 = vpack.c.bf16 %v13295_v34, %v13291_v61  ;;  %v13299_v58 = vmax.f32 %v13155_v44, 0.0  ;;  %v13303_v3 = vmax.f32 %v13159_v30, 0.0  ;;  %v13163_v2 = vadd.f32 %v26925_v46, %v26877_v45  ;;  %v30144_v34 = vld [vmem:[#allocation101_spill] sm:$0xff] }
 0x515   :  { %v13308_v50 = vmax.f32 %v13164_v52, 0.0  ;;  %v27226_v27 = vpack.c.bf16 %v13304_v18, %v13300_v14  ;;  %v13312_v22 = vmax.f32 %v13168_v36, 0.0  ;;  %v13167_v31 = vadd.f32 %v26925_v46, %v26880_v4  ;;  %v30145_v14 = vld [vmem:[#allocation104_spill] sm:$0xff]  ;;  %v30147_v36 = vld [vmem:[#allocation33_spill] sm:$0xff] }
 0x516   :  { %v13172_v33 = vadd.f32 %v26983_v16, %v27098_v47  ;;  %v27232_v43 = vpack.c.bf16 %v13303_v3, %v13299_v58  ;;  %v13307_v20 = vmax.f32 %v13163_v2, 0.0  ;;  %v13176_v13 = vadd.f32 %v26983_v16, %v27101_v54  ;;  %v30148_v2 = vld [vmem:[#allocation107_spill] sm:$0xff] }
 0x517   :  { %v13171_v26 = vadd.f32 %v26925_v46, %v26883_v17  ;;  %v27238_v32 = vpack.c.bf16 %v13312_v22, %v13308_v50  ;;  %v13311_v45 = vmax.f32 %v13167_v31, 0.0  ;;  %v13175_v9 = vadd.f32 %v26925_v46, %v26886_v10  ;;  %v30149_v31 = vld [vmem:[#allocation112_spill] sm:$0xff] }
 0x518   :  { %v13316_v11 = vmax.f32 %v13172_v33, 0.0  ;;  %v13320_v4 = vmax.f32 %v13176_v13, 0.0  ;;  %v13180_v42 = vadd.f32 %v26983_v16, %v27104_v37  ;;  %v13184_v54 = vadd.f32 %v26983_v16, %v27107_v48 }
 0x519   :  { %14075 = vmatmul.mubr.bf16.gmra.mrb[80].mxu0 %v27161_v53  ;;  %v13315_v47 = vmax.f32 %v13171_v26, 0.0  ;;  %v27247_v0 = vpack.c.bf16 %v13311_v45, %v13307_v20  ;;  %v13319_v17 = vmax.f32 %v13175_v9, 0.0  ;;  %v13179_v56 = vadd.f32 %v26925_v46, %v26889_v6  ;;  %v30150_v45 = vld [vmem:[#allocation21_spill] sm:$0xff] }
 0x51a   :  { %14084 = vmatprep.mubr.bf16.mxu0 %v13432_v1  ;;  %v13183_v10 = vadd.f32 %v26925_v46, %v30142_v59  ;;  %v27253_v60 = vpack.c.bf16 %v13320_v4, %v13316_v11  ;;  %v13324_v53 = vmax.f32 %v13180_v42, 0.0  ;;  %v13328_v41 = vmax.f32 %v13184_v54, 0.0  ;;  %v30151_v42 = vld [vmem:[#allocation30_spill] sm:$0xff]  ;;  %v30152_v59 = vld [vmem:[#allocation28_spill] sm:$0xff] }
 0x51b   :  { %v13188_v37 = vadd.f32 %v26983_v16, %v27110_v49  ;;  %v27257_v25 = vpack.c.bf16 %v13319_v17, %v13315_v47  ;;  %v13323_v48 = vmax.f32 %v13179_v56, 0.0  ;;  %v13192_v39 = vadd.f32 %v26983_v16, %v30143_v29  ;;  %v30146_v49 = vld [vmem:[#allocation57_spill] sm:$0xff] }
 0x51c   :  { %v13327_v1 = vmax.f32 %v13183_v10, 0.0  ;;  %v27261_v61 = vpack.c.bf16 %v13328_v41, %v13324_v53  ;;  %v13187_v7 = vadd.f32 %v26925_v46, %v30144_v34  ;;  %v13191_v44 = vadd.f32 %v26925_v46, %v30145_v14  ;;  %v30153_v53 = vld [vmem:[#allocation97_spill] sm:$0xff]  ;;  %v30155_v14 = vld [vmem:[#allocation95_spill] sm:$0xff] }
 0x51d   :  { %v13332_v6 = vmax.f32 %v13188_v37, 0.0  ;;  %v13336_v52 = vmax.f32 %v13192_v39, 0.0  ;;  %v13196_v18 = vadd.f32 %v26983_v16, %v30146_v49  ;;  %v13200_v58 = vadd.f32 %v26983_v16, %v30147_v36 }
 0x51e   :  { %v27267_v30 = vpack.c.bf16 %v13327_v1, %v13323_v48  ;;  %v13331_v3 = vmax.f32 %v13187_v7, 0.0  ;;  %v13335_v50 = vmax.f32 %v13191_v44, 0.0  ;;  %v13195_v22 = vadd.f32 %v26925_v46, %v30148_v2  ;;  %v30154_v7 = vld [vmem:[#allocation109_spill] sm:$0xff] }
 0x51f   :  { %v13199_v33 = vadd.f32 %v26925_v46, %v30149_v31  ;;  %v27277_v20 = vpack.c.bf16 %v13336_v52, %v13332_v6  ;;  %v13340_v13 = vmax.f32 %v13196_v18, 0.0  ;;  %v13344_v26 = vmax.f32 %v13200_v58, 0.0  ;;  %v30156_v52 = vld [vmem:[#allocation108_spill] sm:$0xff] }
 0x520   :  { %v13204_v11 = vadd.f32 %v26983_v16, %v30150_v45  ;;  %v27282_v9 = vpack.c.bf16 %v13335_v50, %v13331_v3  ;;  %v13339_v4 = vmax.f32 %v13195_v22, 0.0  ;;  %v13208_v54 = vadd.f32 %v26983_v16, %v30151_v42  ;;  %v30159_v58 = vld [vmem:[#allocation32_spill] sm:$0xff]  ;;  %v30160_v50 = vld [vmem:[#allocation69_spill] sm:$0xff] }
 0x521   :  { %14085 = vmatmul.mubr.bf16.gmra.mrb[84].mxu0 %v27165_v40  ;;  %v13343_v47 = vmax.f32 %v13199_v33, 0.0  ;;  %v27287_v17 = vpack.c.bf16 %v13344_v26, %v13340_v13  ;;  %v13203_v10 = vadd.f32 %v26925_v46, %v30152_v59  ;;  %v13207_v41 = vadd.f32 %v26925_v46, %v30153_v53  ;;  %v30164_v59 = vld [vmem:[#allocation76_spill] sm:$0xff] }
 0x522   :  { %14094 = vmatprep.mubr.bf16.mxu0 %v27196_v35  ;;  %v13348_v56 = vmax.f32 %v13204_v11, 0.0  ;;  %v12951_v40 = vmul.f32 %v26936_v55, %v27170_v21  ;;  %v12955_v37 = vmul.f32 %v26936_v55, %v27174_v57  ;;  %v13352_v1 = vmax.f32 %v13208_v54, 0.0  ;;  %v30157_v57 = vld [vmem:[#allocation62_spill] sm:$0xff] }
 0x523   :  { %v27297_v48 = vpack.c.bf16 %v13343_v47, %v13339_v4  ;;  %v13252_v35 = vmax.f32 %v27186_v12, 0.0  ;;  %v13256_v29 = vmax.f32 %v27189_v15, 0.0  ;;  %v13347_v39 = vmax.f32 %v13203_v10, 0.0  ;;  %v30158_v15 = vld [vmem:[#allocation37_spill] sm:$0xff]  ;;  %v30163_v54 = vld [vmem:[#allocation126_spill] sm:$0xff] }
 0x524   :  { %v13351_v6 = vmax.f32 %v13207_v41, 0.0  ;;  %v27301_v34 = vpack.c.bf16 %v13352_v1, %v13348_v56  ;;  %v12785_v44 = vmul.f32 %v30155_v14, %v30154_v7  ;;  %v12789_v21 = vmul.f32 %v30155_v14, %v30156_v52  ;;  %v30162_v47 = vld [vmem:[#allocation125_spill] sm:$0xff] }
 0x525   :  { %v12794_v18 = vmul.f32 %v26957_v5, %v30157_v57  ;;  %v13435_v12 = vpack.c.bf16 %v13247_v8, %v13243_v63  ;;  %v13107_v36 = vadd.f32 %v26925_v46, %v30158_v15  ;;  %v13111_v3 = vadd.f32 %v26925_v46, %v30159_v58 }
 0x526   :  { %v27307_v49 = vpack.c.bf16 %v13351_v6, %v13347_v39  ;;  %v12798_v2 = vmul.f32 %v26957_v5, %v30160_v50  ;;  %v13440_v22 = vpack.c.bf16 %v13256_v29, %v13252_v35  ;;  %v13116_v31 = vadd.f32 %v26983_v16, %v12951_v40 }
 0x527   :  { %v13120_v33 = vadd.f32 %v26983_v16, %v12955_v37  ;;  %v12950_v13 = vmul.f32 %v30161_v19, %v12785_v44  ;;  %v12954_v38 = vmul.f32 %v30161_v19, %v12789_v21  ;;  %v13251_v63 = vmax.f32 %v13107_v36, 0.0  ;;  %v30165_v37 = vld [vmem:[#allocation78_spill] sm:$0xff] }
 0x528   :  { %v13255_v8 = vmax.f32 %v13111_v3, 0.0  ;;  %v12959_v26 = vmul.f32 %v26936_v55, %v12794_v18  ;;  %v12963_v45 = vmul.f32 %v26936_v55, %v12798_v2  ;;  %v13260_v11 = vmax.f32 %v13116_v31, 0.0 }
 0x529   :  { %14095 = vmatmul.mubr.bf16.gmra.mrb[88].mxu0 %v13435_v12  ;;  %v13264_v4 = vmax.f32 %v13120_v33, 0.0  ;;  %v12793_v42 = vmul.f32 %v30155_v14, %v30162_v47  ;;  %v12797_v56 = vmul.f32 %v30155_v14, %v30163_v54  ;;  %v12802_v10 = vmul.f32 %v26957_v5, %v30164_v59 }
 0x52a   :  { %14104 = vmatprep.mubr.bf16.mxu0 %v13440_v22  ;;  %v13439_v53 = vpack.c.bf16 %v13255_v8, %v13251_v63  ;;  %v13115_v41 = vadd.f32 %v26925_v46, %v12950_v13  ;;  %v13119_v40 = vadd.f32 %v26925_v46, %v12954_v38  ;;  %v12806_v1 = vmul.f32 %v26957_v5, %v30165_v37 }
 0x52b   :  { %v13444_v35 = vpack.c.bf16 %v13264_v4, %v13260_v11  ;;  %v13124_v29 = vadd.f32 %v26983_v16, %v12959_v26  ;;  %v13128_v39 = vadd.f32 %v26983_v16, %v12963_v45  ;;  %v12958_v6 = vmul.f32 %v30161_v19, %v12793_v42 }
 0x52c   :  { %v12962_v7 = vmul.f32 %v30161_v19, %v12797_v56  ;;  %v13259_v14 = vmax.f32 %v13115_v41, 0.0  ;;  %v13263_v44 = vmax.f32 %v13119_v40, 0.0  ;;  %v12967_v52 = vmul.f32 %v26936_v55, %v12802_v10 }
 0x52d   :  { %v12971_v21 = vmul.f32 %v26936_v55, %v12806_v1  ;;  %v13268_v57 = vmax.f32 %v13124_v29, 0.0  ;;  %v13272_v18 = vmax.f32 %v13128_v39, 0.0  ;;  %v13123_v12 = vadd.f32 %v26925_v46, %v12958_v6 }
 0x52e   :  { %v13443_v5 = vpack.c.bf16 %v13263_v44, %v13259_v14  ;;  %v13127_v15 = vadd.f32 %v26925_v46, %v12962_v7  ;;  %v13132_v58 = vadd.f32 %v26983_v16, %v12967_v52  ;;  %v20907_v46 = vld [vmem:[%s29211_s5] sm:$0xff]  }
 0x52f   :  { %v13448_v36 = vpack.c.bf16 %v13272_v18, %v13268_v57  ;;  %v13136_v3 = vadd.f32 %v26983_v16, %v12971_v21  ;;  %v13267_v50 = vmax.f32 %v13123_v12, 0.0  ;;  %v29448_v16 = vmov 0  }
 0x530   :  { %v13271_v2 = vmax.f32 %v13127_v15, 0.0  ;;  %v13276_v22 = vmax.f32 %v13132_v58, 0.0  ;;  %19947 = vmatprep.subr.bf16.mxu1 %v29448_v16  ;;  %15027 = vmatprep.subr.bf16.mxu0 %v29448_v16 }
 0x531   :  { %14105 = vmatmul.mubr.bf16.gmra.mrb[92].mxu0 %v13439_v53  ;;  %v13280_v31 = vmax.f32 %v13136_v3, 0.0  ;;  %19963 = vmatpush1.bf16.msra.mxu1 %v20907_v46 }
 0x532   :  { %14114 = vmatprep.mubr.bf16.mxu0 %v13444_v35  ;;  %v13447_v33 = vpack.c.bf16 %v13271_v2, %v13267_v50  ;;  %15028 = vmatpush1.bf16.msra.mxu0 %v20907_v46 }
 0x533   :  { %v13452_v55 = vpack.c.bf16 %v13280_v31, %v13276_v22  ;;  %19948 = vmatprep.subr.bf16.mxu1 %v29448_v16  ;;  %15029 = vmatprep.subr.bf16.mxu0 %v29448_v16 }
 0x539   :  { %14115 = vmatmul.mubr.bf16.gmra.mrb[96].mxu0 %v13443_v5 }
 0x53a   :  { %14124 = vmatprep.mubr.bf16.mxu0 %v13448_v36 }
 0x541   :  { %14125 = vmatmul.mubr.bf16.gmra.mrb[100].mxu0 %v13447_v33 }
 0x542   :  { %14134 = vmatprep.mubr.bf16.mxu0 %v13452_v55 }
 0x549   :  { %14135 = vmatmul.mubr.bf16.gmra.mrb[104].mxu0 %v27191_v51 }
 0x54a   :  { %14144 = vmatprep.mubr.bf16.mxu0 %v27204_v23 }
 0x551   :  { %14145 = vmatmul.mubr.bf16.gmra.mrb[108].mxu0 %v27206_v62 }
 0x552   :  { %14154 = vmatprep.mubr.bf16.mxu0 %v27218_v24 }
 0x559   :  { %14155 = vmatmul.mubr.bf16.gmra.mrb[112].mxu0 %v27220_v28 }
 0x55a   :  { %14164 = vmatprep.mubr.bf16.mxu0 %v27226_v27 }
 0x561   :  { %14165 = vmatmul.mubr.bf16.gmra.mrb[116].mxu0 %v27232_v43  ;;  %v20908_v43 = vld [vmem:[%s29211_s5 + $0x8] sm:$0xff]  }
 0x562   :  { %14174 = vmatprep.mubr.bf16.mxu0 %v27238_v32  ;;  %19964 = vmatpush1.bf16.msra.mxu1 %v20908_v43 }
 0x563   :  { %15030 = vmatpush1.bf16.msra.mxu0 %v20908_v43  ;;  %19949 = vmatprep.subr.bf16.mxu1 %v29448_v16 }
 0x564   :  { %15031 = vmatprep.subr.bf16.mxu0 %v29448_v16 }
 0x569   :  { %14175 = vmatmul.mubr.bf16.gmra.mrb[120].mxu0 %v27247_v0 }
 0x56a   :  { %14184 = vmatprep.mubr.bf16.mxu0 %v27253_v60 }
 0x571   :  { %14185 = vmatmul.mubr.bf16.gmra.mrb[124].mxu0 %v27257_v25 }
 0x572   :  { %14194 = vmatprep.mubr.bf16.mxu0 %v27261_v61 }
 0x579   :  { %14195 = vmatmul.mubr.bf16.gmra.mrb[128].mxu0 %v27267_v30 }
 0x57a   :  { %14204 = vmatprep.mubr.bf16.mxu0 %v27277_v20 }
 0x581   :  { %14205 = vmatmul.mubr.bf16.gmra.mrb[132].mxu0 %v27282_v9 }
 0x582   :  { %14214 = vmatprep.mubr.bf16.mxu0 %v27287_v17 }
 0x589   :  { %14215 = vmatmul.mubr.bf16.gmra.mrb[136].mxu0 %v27297_v48 }
 0x58a   :  { %14224 = vmatprep.mubr.bf16.mxu0 %v27301_v34 }
 0x591   :  { %14225 = vmatmul.mubr.bf16.gmra.mrb[140].mxu0 %v27307_v49 }
 0x5dc   :  { %v27373_v51 = vpop.f32.mrb[72].mxu0 }
 0x5dd   :  { %v27375_v23 = vpop.f32.mrb[73].mxu0 }
 0x5de   :  { %v27377_v62 = vpop.f32.mrb[74].mxu0 }
 0x5df   :  { %v14237_v24 = vadd.f32 %v27377_v62, %v27373_v51  ;;  %v27381_v28 = vpop.f32.mrb[75].mxu0 }
 0x5e0   :  { %v14278_v27 = vadd.f32 %v27381_v28, %v27375_v23 }
 0x5e4   :  { %v27390_v32 = vpop.f32.mrb[76].mxu0 }
 0x5e5   :  { %v14238_v0 = vadd.f32 %v14237_v24, %v27390_v32  ;;  %v27393_v60 = vpop.f32.mrb[77].mxu0 }
 0x5e6   :  { %v14279_v25 = vadd.f32 %v14278_v27, %v27393_v60  ;;  %v27396_v61 = vpop.f32.mrb[78].mxu0 }
 0x5e7   :  { %v14239_v30 = vadd.f32 %v14238_v0, %v27396_v61  ;;  %v27399_v20 = vpop.f32.mrb[79].mxu0 }
 0x5e8   :  { %v14280_v9 = vadd.f32 %v14279_v25, %v27399_v20 }
 0x5ec   :  { %v27402_v17 = vpop.f32.mrb[80].mxu0 }
 0x5ed   :  { %v14240_v48 = vadd.f32 %v14239_v30, %v27402_v17  ;;  %v27405_v34 = vpop.f32.mrb[81].mxu0 }
 0x5ee   :  { %v14281_v49 = vadd.f32 %v14280_v9, %v27405_v34  ;;  %v27408_v19 = vpop.f32.mrb[82].mxu0 }
 0x5ef   :  { %v14241_v13 = vadd.f32 %v14240_v48, %v27408_v19  ;;  %v27411_v38 = vpop.f32.mrb[83].mxu0 }
 0x5f0   :  { %v14282_v63 = vadd.f32 %v14281_v49, %v27411_v38 }
 0x5f4   :  { %v27414_v8 = vpop.f32.mrb[84].mxu0 }
 0x5f5   :  { %v14242_v26 = vadd.f32 %v14241_v13, %v27414_v8  ;;  %v27417_v45 = vpop.f32.mrb[85].mxu0 }
 0x5f6   :  { %v14283_v11 = vadd.f32 %v14282_v63, %v27417_v45  ;;  %v27420_v4 = vpop.f32.mrb[86].mxu0 }
 0x5f7   :  { %v14243_v47 = vadd.f32 %v14242_v26, %v27420_v4  ;;  %v27423_v42 = vpop.f32.mrb[87].mxu0 }
 0x5f8   :  { %v14284_v54 = vadd.f32 %v14283_v11, %v27423_v42 }
 0x5fc   :  { %v27426_v56 = vpop.f32.mrb[88].mxu0 }
 0x5fd   :  { %v14244_v59 = vadd.f32 %v14243_v47, %v27426_v56  ;;  %v27429_v10 = vpop.f32.mrb[89].mxu0 }
 0x5fe   :  { %v14285_v53 = vadd.f32 %v14284_v54, %v27429_v10  ;;  %v27432_v41 = vpop.f32.mrb[90].mxu0 }
 0x5ff   :  { %v14245_v40 = vadd.f32 %v14244_v59, %v27432_v41  ;;  %v27435_v37 = vpop.f32.mrb[91].mxu0 }
 0x600   :  { %v14286_v1 = vadd.f32 %v14285_v53, %v27435_v37 }
 0x604   :  { %v27438_v35 = vpop.f32.mrb[92].mxu0 }
 0x605   :  { %v14246_v29 = vadd.f32 %v14245_v40, %v27438_v35  ;;  %v27441_v39 = vpop.f32.mrb[93].mxu0 }
 0x606   :  { %v14287_v6 = vadd.f32 %v14286_v1, %v27441_v39  ;;  %v27444_v7 = vpop.f32.mrb[94].mxu0 }
 0x607   :  { %v14247_v14 = vadd.f32 %v14246_v29, %v27444_v7  ;;  %v27447_v44 = vpop.f32.mrb[95].mxu0 }
 0x608   :  { %30166 = vst [vmem:[#allocation34_spill] sm:$0xff] %v27447_v44  ;;  %v14288_v52 = vadd.f32 %v14287_v6, %v27447_v44  ;;  %v30190_v44 = vmov 0  }
 0x60c   :  { %v27450_v21 = vpop.f32.mrb[96].mxu0 }
 0x60d   :  { %v14248_v57 = vadd.f32 %v14247_v14, %v27450_v21  ;;  %v27453_v18 = vpop.f32.mrb[97].mxu0 }
 0x60e   :  { %30167 = vst [vmem:[#allocation23_spill] sm:$0xff] %v27453_v18  ;;  %v14289_v5 = vadd.f32 %v14288_v52, %v27453_v18  ;;  %v27456_v12 = vpop.f32.mrb[98].mxu0 }
 0x60f   :  { %v14249_v15 = vadd.f32 %v14248_v57, %v27456_v12  ;;  %v27459_v36 = vpop.f32.mrb[99].mxu0 }
 0x610   :  { %30168 = vst [vmem:[#allocation58_spill] sm:$0xff] %v27459_v36  ;;  %v14290_v58 = vadd.f32 %v14289_v5, %v27459_v36 }
 0x614   :  { %v27462_v3 = vpop.f32.mrb[100].mxu0 }
 0x615   :  { %v14250_v50 = vadd.f32 %v14249_v15, %v27462_v3  ;;  %v27465_v2 = vpop.f32.mrb[101].mxu0 }
 0x616   :  { %30169 = vst [vmem:[#allocation59_spill] sm:$0xff] %v27465_v2  ;;  %v14291_v22 = vadd.f32 %v14290_v58, %v27465_v2  ;;  %v27468_v31 = vpop.f32.mrb[102].mxu0 }
 0x617   :  { %v14251_v33 = vadd.f32 %v14250_v50, %v27468_v31  ;;  %v27471_v55 = vpop.f32.mrb[103].mxu0 }
 0x618   :  { %30170 = vst [vmem:[#allocation92_spill] sm:$0xff] %v27471_v55  ;;  %v14292_v46 = vadd.f32 %v14291_v22, %v27471_v55 }
 0x61c   :  { %v27474_v24 = vpop.f32.mrb[104].mxu0 }
 0x61d   :  { %v14252_v27 = vadd.f32 %v14251_v33, %v27474_v24  ;;  %v27477_v43 = vpop.f32.mrb[105].mxu0 }
 0x61e   :  { %30171 = vst [vmem:[#allocation35_spill] sm:$0xff] %v27477_v43  ;;  %v14293_v0 = vadd.f32 %v14292_v46, %v27477_v43  ;;  %v27480_v25 = vpop.f32.mrb[106].mxu0 }
 0x61f   :  { %v14253_v30 = vadd.f32 %v14252_v27, %v27480_v25  ;;  %v27483_v9 = vpop.f32.mrb[107].mxu0 }
 0x620   :  { %30172 = vst [vmem:[#allocation70_spill] sm:$0xff] %v27483_v9  ;;  %v14294_v48 = vadd.f32 %v14293_v0, %v27483_v9 }
 0x624   :  { %v27486_v49 = vpop.f32.mrb[108].mxu0 }
 0x625   :  { %v14254_v13 = vadd.f32 %v14253_v30, %v27486_v49  ;;  %v27489_v63 = vpop.f32.mrb[109].mxu0 }
 0x626   :  { %30173 = vst [vmem:[#allocation113_spill] sm:$0xff] %v27489_v63  ;;  %v14295_v26 = vadd.f32 %v14294_v48, %v27489_v63  ;;  %v27492_v11 = vpop.f32.mrb[110].mxu0 }
 0x627   :  { %v14255_v47 = vadd.f32 %v14254_v13, %v27492_v11  ;;  %v27495_v54 = vpop.f32.mrb[111].mxu0 }
 0x628   :  { %30174 = vst [vmem:[#allocation94_spill] sm:$0xff] %v27495_v54  ;;  %v14296_v59 = vadd.f32 %v14295_v26, %v27495_v54 }
 0x62c   :  { %v27498_v53 = vpop.f32.mrb[112].mxu0 }
 0x62d   :  { %v14256_v40 = vadd.f32 %v14255_v47, %v27498_v53  ;;  %v27501_v1 = vpop.f32.mrb[113].mxu0 }
 0x62e   :  { %30175 = vst [vmem:[#allocation60_spill] sm:$0xff] %v27501_v1  ;;  %v14297_v29 = vadd.f32 %v14296_v59, %v27501_v1  ;;  %v27504_v6 = vpop.f32.mrb[114].mxu0 }
 0x62f   :  { %v14257_v14 = vadd.f32 %v14256_v40, %v27504_v6  ;;  %v27507_v52 = vpop.f32.mrb[115].mxu0 }
 0x630   :  { %30176 = vst [vmem:[#allocation12_spill] sm:$0xff] %v27507_v52  ;;  %v14298_v57 = vadd.f32 %v14297_v29, %v27507_v52 }
 0x634   :  { %v27510_v5 = vpop.f32.mrb[116].mxu0 }
 0x635   :  { %v14258_v15 = vadd.f32 %v14257_v14, %v27510_v5  ;;  %v27513_v58 = vpop.f32.mrb[117].mxu0 }
 0x636   :  { %30177 = vst [vmem:[#allocation96_spill] sm:$0xff] %v27513_v58  ;;  %v14299_v50 = vadd.f32 %v14298_v57, %v27513_v58  ;;  %v27516_v22 = vpop.f32.mrb[118].mxu0 }
 0x637   :  { %v14259_v33 = vadd.f32 %v14258_v15, %v27516_v22  ;;  %v27519_v46 = vpop.f32.mrb[119].mxu0 }
 0x638   :  { %30178 = vst [vmem:[#allocation114_spill] sm:$0xff] %v27519_v46  ;;  %v14300_v27 = vadd.f32 %v14299_v50, %v27519_v46 }
 0x63c   :  { %v27522_v0 = vpop.f32.mrb[120].mxu0 }
 0x63d   :  { %v14260_v30 = vadd.f32 %v14259_v33, %v27522_v0  ;;  %v27525_v48 = vpop.f32.mrb[121].mxu0 }
 0x63e   :  { %30179 = vst [vmem:[#allocation115_spill] sm:$0xff] %v27525_v48  ;;  %v14301_v13 = vadd.f32 %v14300_v27, %v27525_v48  ;;  %v27528_v26 = vpop.f32.mrb[122].mxu0 }
 0x63f   :  { %v14261_v47 = vadd.f32 %v14260_v30, %v27528_v26  ;;  %v27531_v59 = vpop.f32.mrb[123].mxu0 }
 0x640   :  { %30180 = vst [vmem:[#allocation98_spill] sm:$0xff] %v27531_v59  ;;  %v14302_v40 = vadd.f32 %v14301_v13, %v27531_v59 }
 0x644   :  { %v27534_v29 = vpop.f32.mrb[124].mxu0 }
 0x645   :  { %v14262_v14 = vadd.f32 %v14261_v47, %v27534_v29  ;;  %v27537_v57 = vpop.f32.mrb[125].mxu0 }
 0x646   :  { %30181 = vst [vmem:[#allocation14_spill] sm:$0xff] %v27537_v57  ;;  %v14303_v15 = vadd.f32 %v14302_v40, %v27537_v57  ;;  %v27540_v50 = vpop.f32.mrb[126].mxu0 }
 0x647   :  { %v14263_v33 = vadd.f32 %v14262_v14, %v27540_v50  ;;  %v27543_v27 = vpop.f32.mrb[127].mxu0 }
 0x648   :  { %30182 = vst [vmem:[#allocation16_spill] sm:$0xff] %v27543_v27  ;;  %v14304_v30 = vadd.f32 %v14303_v15, %v27543_v27 }
 0x64c   :  { %v27546_v16 = vpop.f32.mrb[128].mxu0 }
 0x64d   :  { %v14264_v13 = vadd.f32 %v14263_v33, %v27546_v16  ;;  %v27549_v59 = vpop.f32.mrb[129].mxu0 }
 0x64e   :  { %30183 = vst [vmem:[#allocation116_spill] sm:$0xff] %v27549_v59  ;;  %v14305_v47 = vadd.f32 %v14304_v30, %v27549_v59  ;;  %v27552_v48 = vpop.f32.mrb[130].mxu0 }
 0x64f   :  { %v14265_v40 = vadd.f32 %v14264_v13, %v27552_v48  ;;  %v27555_v57 = vpop.f32.mrb[131].mxu0 }
 0x650   :  { %30184 = vst [vmem:[#allocation118_spill] sm:$0xff] %v27555_v57  ;;  %v14306_v14 = vadd.f32 %v14305_v47, %v27555_v57 }
 0x654   :  { %v27558_v46 = vpop.f32.mrb[132].mxu0 }
 0x655   :  { %v14266_v15 = vadd.f32 %v14265_v40, %v27558_v46  ;;  %v27561_v27 = vpop.f32.mrb[133].mxu0 }
 0x656   :  { %30185 = vst [vmem:[#allocation47_spill] sm:$0xff] %v27561_v27  ;;  %v14307_v33 = vadd.f32 %v14306_v14, %v27561_v27  ;;  %v27564_v58 = vpop.f32.mrb[134].mxu0 }
 0x657   :  { %v14267_v30 = vadd.f32 %v14266_v15, %v27564_v58  ;;  %v27567_v59 = vpop.f32.mrb[135].mxu0 }
 0x658   :  { %30186 = vst [vmem:[#allocation48_spill] sm:$0xff] %v27567_v59  ;;  %v14308_v13 = vadd.f32 %v14307_v33, %v27567_v59 }
 0x65c   :  { %v27570_v52 = vpop.f32.mrb[136].mxu0 }
 0x65d   :  { %v14268_v47 = vadd.f32 %v14267_v30, %v27570_v52  ;;  %v27573_v57 = vpop.f32.mrb[137].mxu0 }
 0x65e   :  { %30187 = vst [vmem:[#allocation119_spill] sm:$0xff] %v27573_v57  ;;  %v14309_v40 = vadd.f32 %v14308_v13, %v27573_v57  ;;  %v27576_v1 = vpop.f32.mrb[138].mxu0 }
 0x65f   :  { %v14269_v14 = vadd.f32 %v14268_v47, %v27576_v1  ;;  %v27579_v27 = vpop.f32.mrb[139].mxu0 }
 0x660   :  { %30188 = vst [vmem:[#allocation120_spill] sm:$0xff] %v27579_v27  ;;  %v14310_v15 = vadd.f32 %v14309_v40, %v27579_v27 }
 0x664   :  { %v27582_v54 = vpop.f32.mrb[140].mxu0 }
 0x665   :  { %v14270_v33 = vadd.f32 %v14269_v14, %v27582_v54  ;;  %v27585_v59 = vpop.f32.mrb[141].mxu0 }
 0x666   :  { %30189 = vst [vmem:[#allocation49_spill] sm:$0xff] %v27585_v59  ;;  %v14311_v30 = vadd.f32 %v14310_v15, %v27585_v59  ;;  %v27588_v63 = vpop.f32.mrb[142].mxu0  ;;  %v20909_v15 = vld [vmem:[%s29211_s5 + $0x10] sm:$0xff]  }
 0x667   :  { %v14271_v13 = vadd.f32 %v14270_v33, %v27588_v63  ;;  %v27591_v57 = vpop.f32.mrb[143].mxu0  ;;  %19965 = vmatpush1.bf16.msra.mxu1 %v20909_v15  ;;  %15032 = vmatpush1.bf16.msra.mxu0 %v20909_v15 }
 0x668   :  { %v14312_v47 = vadd.f32 %v14311_v30, %v27591_v57  ;;  %19950 = vmatprep.subr.bf16.mxu1 %v30190_v44  ;;  %15033 = vmatprep.subr.bf16.mxu0 %v30190_v44 }
 0x669   :  { %v14272_v9 = vrot.slane %v14271_v13, 4 }
 0x66a   :  { %v14313_v43 = vrot.slane %v14312_v47, 4 }
 0x66b   :  { %v14273_v55 = vadd.f32 %v14272_v9, %v14271_v13 }
 0x66c   :  { %v14314_v40 = vadd.f32 %v14313_v43, %v14312_v47  ;;  %v20910_v43 = vld [vmem:[%s29211_s5 + $0x18] sm:$0xff]  }
 0x66d   :  { %v14274_v27 = vrot.slane %v14273_v55, 2  ;;  %19966 = vmatpush1.bf16.msra.mxu1 %v20910_v43  ;;  %15034 = vmatpush1.bf16.msra.mxu0 %v20910_v43 }
 0x66e   :  { %v14315_v2 = vrot.slane %v14314_v40, 2  ;;  %19951 = vmatprep.subr.bf16.mxu1 %v30190_v44  ;;  %15035 = vmatprep.subr.bf16.mxu0 %v30190_v44 }
 0x66f   :  { %v14275_v36 = vadd.f32 %v14274_v27, %v14273_v55 }
 0x670   :  { %v14316_v18 = vadd.f32 %v14315_v2, %v14314_v40 }
 0x671   :  { %v14276_v14 = vrot.slane %v14275_v36, 1 }
 0x672   :  { %v14317_v30 = vrot.slane %v14316_v18, 1 }
 0x673   :  { %v14277_v59 = vadd.f32 %v14276_v14, %v14275_v36 }
 0x675   :  { %v14319_v33 = vmul.f32 0.0034722222, %v14277_v59 }
 0x677   :  { %v27603_v55 = vsub.f32 %v27373_v51, %v14319_v33  ;;  %v27606_v2 = vsub.f32 %v27377_v62, %v14319_v33  ;;  %v27609_v36 = vsub.f32 %v27390_v32, %v14319_v33  ;;  %v27612_v9 = vsub.f32 %v27396_v61, %v14319_v33 }
 0x678   :  { %v27615_v59 = vsub.f32 %v27402_v17, %v14319_v33  ;;  %v27618_v27 = vsub.f32 %v27408_v19, %v14319_v33  ;;  %v27621_v13 = vsub.f32 %v27414_v8, %v14319_v33  ;;  %v27624_v51 = vsub.f32 %v27420_v4, %v14319_v33 }
 0x679   :  { %30191 = vst [vmem:[#allocation20_spill] sm:$0xff] %v27603_v55  ;;  %30192 = vst [vmem:[#allocation121_spill] sm:$0xff] %v27606_v2  ;;  %v27627_v62 = vsub.f32 %v27426_v56, %v14319_v33  ;;  %v27630_v32 = vsub.f32 %v27432_v41, %v14319_v33  ;;  %v27633_v61 = vsub.f32 %v27438_v35, %v14319_v33  ;;  %v20911_v41 = vld [vmem:[%s29211_s5 + $0x20] sm:$0xff]  }
 0x67a   :  { %30193 = vst [vmem:[#allocation122_spill] sm:$0xff] %v27609_v36  ;;  %30194 = vst [vmem:[#allocation50_spill] sm:$0xff] %v27612_v9  ;;  %v27636_v17 = vsub.f32 %v27444_v7, %v14319_v33  ;;  %v27640_v19 = vsub.f32 %v27450_v21, %v14319_v33  ;;  %v27643_v8 = vsub.f32 %v27456_v12, %v14319_v33  ;;  %19967 = vmatpush1.bf16.msra.mxu1 %v20911_v41 }
 0x67b   :  { %30195 = vst [vmem:[#allocation22_spill] sm:$0xff] %v27615_v59  ;;  %30196 = vst [vmem:[#allocation123_spill] sm:$0xff] %v27618_v27  ;;  %v27646_v4 = vsub.f32 %v27462_v3, %v14319_v33  ;;  %v27649_v56 = vsub.f32 %v27468_v31, %v14319_v33  ;;  %v27655_v35 = vsub.f32 %v27474_v24, %v14319_v33  ;;  %19952 = vmatprep.subr.bf16.mxu1 %v30190_v44 }
 0x67c   :  { %30197 = vst [vmem:[#allocation124_spill] sm:$0xff] %v27621_v13  ;;  %30198 = vst [vmem:[#allocation24_spill] sm:$0xff] %v27624_v51  ;;  %v27658_v7 = vsub.f32 %v27480_v25, %v14319_v33  ;;  %v27661_v21 = vsub.f32 %v27486_v49, %v14319_v33  ;;  %v27664_v12 = vsub.f32 %v27492_v11, %v14319_v33  ;;  %15036 = vmatpush1.bf16.msra.mxu0 %v20911_v41 }
 0x67d   :  { %30199 = vst [vmem:[#allocation40_spill] sm:$0xff] %v27636_v17  ;;  %v27668_v3 = vsub.f32 %v27498_v53, %v14319_v33  ;;  %v27671_v31 = vsub.f32 %v27504_v6, %v14319_v33  ;;  %v27674_v24 = vsub.f32 %v27510_v5, %v14319_v33  ;;  %v27677_v25 = vsub.f32 %v27516_v22, %v14319_v33 }
 0x67e   :  { %v27680_v49 = vsub.f32 %v27522_v0, %v14319_v33  ;;  %v27683_v11 = vsub.f32 %v27528_v26, %v14319_v33  ;;  %v27686_v47 = vsub.f32 %v27534_v29, %v14319_v33  ;;  %v27689_v53 = vsub.f32 %v27540_v50, %v14319_v33  ;;  %v20912_v26 = vld [vmem:[%s29211_s5 + $0x28] sm:$0xff]   ;;  %15037 = vmatprep.subr.bf16.mxu0 %v30190_v44 }
 0x67f   :  { %30200 = vst [vmem:[#allocation36_spill] sm:$0xff] %v27668_v3  ;;  %30201 = vst [vmem:[#allocation110_spill] sm:$0xff] %v27671_v31  ;;  %v27693_v6 = vsub.f32 %v27546_v16, %v14319_v33  ;;  %v27696_v5 = vsub.f32 %v27552_v48, %v14319_v33  ;;  %v27699_v22 = vsub.f32 %v27558_v46, %v14319_v33  ;;  %19968 = vmatpush1.bf16.msra.mxu1 %v20912_v26 }
 0x680   :  { %30202 = vst [vmem:[#allocation17_spill] sm:$0xff] %v27674_v24  ;;  %30203 = vst [vmem:[#allocation82_spill] sm:$0xff] %v27677_v25  ;;  %v27702_v0 = vsub.f32 %v27564_v58, %v14319_v33  ;;  %v27708_v29 = vsub.f32 %v27570_v52, %v14319_v33  ;;  %v27711_v16 = vsub.f32 %v27576_v1, %v14319_v33  ;;  %19953 = vmatprep.subr.bf16.mxu1 %v30190_v44  ;;  %v20913_v52 = vld [vmem:[%s29211_s5 + $0x30] sm:$0xff]  }
 0x681   :  { %v27714_v48 = vsub.f32 %v27582_v54, %v14319_v33  ;;  %v27717_v46 = vsub.f32 %v27588_v63, %v14319_v33  ;;  %v14318_v58 = vadd.f32 %v14317_v30, %v14316_v18  ;;  %15038 = vmatpush1.bf16.msra.mxu0 %v20912_v26  ;;  %v14393_v54 = vmul.f32 %v27603_v55, %v27603_v55  ;;  %v20914_v18 = vld [vmem:[%s29211_s5 + $0x38] sm:$0xff]  }
 0x682   :  { %30204 = vst [vmem:[#allocation85_spill] sm:$0xff] %v27708_v29  ;;  %30205 = vst [vmem:[#allocation8_spill] sm:$0xff] %v27711_v16  ;;  %15039 = vmatprep.subr.bf16.mxu0 %v30190_v44  ;;  %v14395_v63 = vmul.f32 %v27606_v2, %v27606_v2  ;;  %v14397_v50 = vmul.f32 %v27609_v36, %v27609_v36  ;;  %v14399_v40 = vmul.f32 %v27612_v9, %v27612_v9 }
 0x683   :  { %30206 = vst [vmem:[#allocation5_spill] sm:$0xff] %v27714_v48  ;;  %30207 = vst [vmem:[#allocation87_spill] sm:$0xff] %v27717_v46  ;;  %19969 = vmatpush1.bf16.msra.mxu1 %v20913_v52  ;;  %v27729_v1 = vmul.f32 0.0034722222, %v14318_v58  ;;  %v14401_v14 = vmul.f32 %v27615_v59, %v27615_v59  ;;  %v14403_v15 = vmul.f32 %v27618_v27, %v27618_v27 }
 0x684   :  { %19954 = vmatprep.subr.bf16.mxu1 %v30190_v44  ;;  %v14405_v33 = vmul.f32 %v27621_v13, %v27621_v13  ;;  %v14465_v30 = vadd.f32 %v14395_v63, %v14393_v54  ;;  %v30210_v63 = vld [vmem:[#allocation34_spill] sm:$0xff]  ;;  %v30213_v13 = vld [vmem:[#allocation59_spill] sm:$0xff] }
 0x685   :  { %15040 = vmatpush1.bf16.msra.mxu0 %v20913_v52  ;;  %v27748_v43 = vsub.f32 %v27375_v23, %v27729_v1  ;;  %v27752_v41 = vsub.f32 %v27381_v28, %v27729_v1  ;;  %v27756_v26 = vsub.f32 %v27393_v60, %v27729_v1  ;;  %v27761_v58 = vsub.f32 %v27399_v20, %v27729_v1  ;;  %v20915_v60 = vld [vmem:[%s29211_s5 + $0x40] sm:$0xff]  }
 0x686   :  { %15041 = vmatprep.subr.bf16.mxu0 %v30190_v44  ;;  %v27765_v52 = vsub.f32 %v27405_v34, %v27729_v1  ;;  %v27769_v23 = vsub.f32 %v27411_v38, %v27729_v1  ;;  %v27773_v28 = vsub.f32 %v27417_v45, %v27729_v1  ;;  %v14466_v54 = vadd.f32 %v14465_v30, %v14397_v50 }
 0x687   :  { %19970 = vmatpush1.bf16.msra.mxu1 %v20914_v18  ;;  %30208 = vst [vmem:[#allocation83_spill] sm:$0xff] %v27748_v43  ;;  %30209 = vst [vmem:[#allocation18_spill] sm:$0xff] %v27752_v41  ;;  %v27780_v20 = vsub.f32 %v27423_v42, %v27729_v1  ;;  %v27784_v34 = vsub.f32 %v27429_v10, %v27729_v1  ;;  %v27788_v38 = vsub.f32 %v27435_v37, %v27729_v1  ;;  %v30211_v42 = vld [vmem:[#allocation23_spill] sm:$0xff]  ;;  %v30212_v10 = vld [vmem:[#allocation58_spill] sm:$0xff] }
 0x688   :  { %19955 = vmatprep.subr.bf16.mxu1 %v30190_v44  ;;  %v27793_v45 = vsub.f32 %v27441_v39, %v27729_v1  ;;  %v27801_v50 = vsub.f32 %v30211_v42, %v27729_v1  ;;  %v27805_v30 = vsub.f32 %v30212_v10, %v27729_v1  ;;  %v14467_v37 = vadd.f32 %v14466_v54, %v14399_v40  ;;  %v30214_v39 = vld [vmem:[#allocation92_spill] sm:$0xff]  ;;  %v30218_v42 = vld [vmem:[#allocation70_spill] sm:$0xff]  ;;  %v30220_v40 = vld [vmem:[#allocation113_spill] sm:$0xff] }
 0x689   :  { %15042 = vmatpush1.bf16.msra.mxu0 %v20914_v18  ;;  %v27797_v18 = vsub.f32 %v30210_v63, %v27729_v1  ;;  %v27809_v27 = vsub.f32 %v30213_v13, %v27729_v1  ;;  %v27813_v59 = vsub.f32 %v30214_v39, %v27729_v1  ;;  %v30216_v63 = vld [vmem:[#allocation35_spill] sm:$0xff]  ;;  %v27822_v10 = vsub.f32 %v30218_v42, %v27729_v1  ;;  %v30222_v13 = vld [vmem:[#allocation94_spill] sm:$0xff]  ;;  %v30224_v39 = vld [vmem:[#allocation60_spill] sm:$0xff] }
 0x68a   :  { %15043 = vmatprep.subr.bf16.mxu0 %v30190_v44  ;;  %v27817_v9 = vsub.f32 %v30216_v63, %v27729_v1  ;;  %v27826_v54 = vsub.f32 %v30220_v40, %v27729_v1  ;;  %v27830_v36 = vsub.f32 %v30222_v13, %v27729_v1  ;;  %v27834_v2 = vsub.f32 %v30224_v39, %v27729_v1  ;;  %v20916_v63 = vld [vmem:[%s29211_s5 + $0x48] sm:$0xff]   ;;  %v30226_v42 = vld [vmem:[#allocation12_spill] sm:$0xff]  ;;  %v30232_v39 = vld [vmem:[#allocation115_spill] sm:$0xff] }
 0x68b   :  { %19971 = vmatpush1.bf16.msra.mxu1 %v20915_v60  ;;  %30215 = vst [vmem:[#allocation11_spill] sm:$0xff] %v27813_v59  ;;  %30219 = vst [vmem:[#allocation15_spill] sm:$0xff] %v27822_v10  ;;  %v14468_v55 = vadd.f32 %v14467_v37, %v14401_v14  ;;  %v27841_v46 = vsub.f32 %v30226_v42, %v27729_v1  ;;  %v30228_v40 = vld [vmem:[#allocation96_spill] sm:$0xff]  ;;  %v30230_v13 = vld [vmem:[#allocation114_spill] sm:$0xff]  ;;  %v27854_v29 = vsub.f32 %v30232_v39, %v27729_v1 }
 0x68c   :  { %30217 = vst [vmem:[#allocation19_spill] sm:$0xff] %v27817_v9  ;;  %19956 = vmatprep.subr.bf16.mxu1 %v30190_v44  ;;  %30221 = vst [vmem:[#allocation84_spill] sm:$0xff] %v27826_v54  ;;  %v27845_v48 = vsub.f32 %v30228_v40, %v27729_v1  ;;  %v27849_v16 = vsub.f32 %v30230_v13, %v27729_v1  ;;  %v30234_v14 = vld [vmem:[#allocation98_spill] sm:$0xff]  ;;  %v30237_v40 = vld [vmem:[#allocation16_spill] sm:$0xff] }
 0x68d   :  { %30223 = vst [vmem:[#allocation86_spill] sm:$0xff] %v27830_v36  ;;  %30225 = vst [vmem:[#allocation10_spill] sm:$0xff] %v27834_v2  ;;  %15044 = vmatpush1.bf16.msra.mxu0 %v20915_v60  ;;  %v27858_v60 = vsub.f32 %v30234_v14, %v27729_v1  ;;  %v30236_v37 = vld [vmem:[#allocation14_spill] sm:$0xff]  ;;  %v14469_v13 = vadd.f32 %v14468_v55, %v14403_v15  ;;  %v30242_v14 = vld [vmem:[#allocation47_spill] sm:$0xff] }
 0x68e   :  { %30227 = vst [vmem:[#allocation88_spill] sm:$0xff] %v27841_v46  ;;  %30229 = vst [vmem:[#allocation89_spill] sm:$0xff] %v27845_v48  ;;  %15045 = vmatprep.subr.bf16.mxu0 %v30190_v44  ;;  %v27862_v42 = vsub.f32 %v30236_v37, %v27729_v1  ;;  %v27866_v48 = vsub.f32 %v30237_v40, %v27729_v1  ;;  %v30240_v39 = vld [vmem:[#allocation118_spill] sm:$0xff]  ;;  %v30243_v37 = vld [vmem:[#allocation48_spill] sm:$0xff] }
 0x68f   :  { %30231 = vst [vmem:[#allocation90_spill] sm:$0xff] %v27849_v16  ;;  %30233 = vst [vmem:[#allocation51_spill] sm:$0xff] %v27854_v29  ;;  %19972 = vmatpush1.bf16.msra.mxu1 %v20916_v63  ;;  %v30238_v16 = vld [vmem:[#allocation116_spill] sm:$0xff]  ;;  %v27874_v29 = vsub.f32 %v30240_v39, %v27729_v1  ;;  %v27883_v40 = vsub.f32 %v30243_v37, %v27729_v1  ;;  %v30245_v55 = vld [vmem:[#allocation119_spill] sm:$0xff]  ;;  %v14407_v37 = vmul.f32 %v27624_v51, %v27624_v51 }
 0x690   :  { %30235 = vst [vmem:[#allocation91_spill] sm:$0xff] %v27858_v60  ;;  %v27870_v46 = vsub.f32 %v30238_v16, %v27729_v1  ;;  %v27878_v60 = vsub.f32 %v30242_v14, %v27729_v1  ;;  %19957 = vmatprep.subr.bf16.mxu1 %v30190_v44  ;;  %v27887_v15 = vsub.f32 %v30245_v55, %v27729_v1  ;;  %v30246_v16 = vld [vmem:[#allocation120_spill] sm:$0xff]  ;;  %v30247_v39 = vld [vmem:[#allocation49_spill] sm:$0xff]  ;;  %v20917_v14 = vld [vmem:[%s29211_s5 + $0x50] sm:$0xff]  }
 0x691   :  { %30241 = vst [vmem:[#allocation41_spill] sm:$0xff] %v27874_v29  ;;  %30244 = vst [vmem:[#allocation45_spill] sm:$0xff] %v27883_v40  ;;  %v27895_v29 = vsub.f32 %v30247_v39, %v27729_v1  ;;  %15046 = vmatpush1.bf16.msra.mxu0 %v20916_v63  ;;  %v14470_v40 = vadd.f32 %v14469_v13, %v14405_v33  ;;  %v27904_v55 = vsub.f32 %v27591_v57, %v27729_v1  ;;  %v20918_v63 = vld [vmem:[%s29211_s5 + $0x58] sm:$0xff]   ;;  %v20919_v57 = vld [vmem:[%s29211_s5 + $0x60] sm:$0xff]  }
 0x692   :  { %30239 = vst [vmem:[#allocation25_spill] sm:$0xff] %v27870_v46  ;;  %v27891_v46 = vsub.f32 %v30246_v16, %v27729_v1  ;;  %15047 = vmatprep.subr.bf16.mxu0 %v30190_v44  ;;  %v14409_v16 = vmul.f32 %v27627_v62, %v27627_v62  ;;  %v14411_v33 = vmul.f32 %v27630_v32, %v27630_v32 }
 0x693   :  { %19973 = vmatpush1.bf16.msra.mxu1 %v20917_v14  ;;  %v14471_v39 = vadd.f32 %v14470_v40, %v14407_v37  ;;  %v14413_v1 = vmul.f32 %v27633_v61, %v27633_v61  ;;  %v14394_v37 = vmul.f32 %v27748_v43, %v27748_v43 }
 0x694   :  { %19958 = vmatprep.subr.bf16.mxu1 %v30190_v44 }
 0x695   :  { %15048 = vmatpush1.bf16.msra.mxu0 %v20917_v14  ;;  %v14472_v13 = vadd.f32 %v14471_v39, %v14409_v16  ;;  %v14396_v14 = vmul.f32 %v27752_v41, %v27752_v41  ;;  %v14415_v16 = vmul.f32 %v27636_v17, %v27636_v17  ;;  %v14398_v41 = vmul.f32 %v27756_v26, %v27756_v26 }
 0x696   :  { %15049 = vmatprep.subr.bf16.mxu0 %v30190_v44 }
 0x697   :  { %19974 = vmatpush1.bf16.msra.mxu1 %v20918_v63  ;;  %v14473_v40 = vadd.f32 %v14472_v13, %v14411_v33  ;;  %v20920_v33 = vld [vmem:[%s29211_s5 + $0x68] sm:$0xff]   ;;  %v14417_v13 = vmul.f32 %v27640_v19, %v27640_v19  ;;  %v14506_v51 = vadd.f32 %v14396_v14, %v14394_v37  ;;  %v14421_v37 = vmul.f32 %v27646_v4, %v27646_v4 }
 0x698   :  { %19959 = vmatprep.subr.bf16.mxu1 %v30190_v44 }
 0x699   :  { %15050 = vmatpush1.bf16.msra.mxu0 %v20918_v63  ;;  %v14474_v39 = vadd.f32 %v14473_v40, %v14413_v1  ;;  %v14419_v63 = vmul.f32 %v27643_v8, %v27643_v8  ;;  %v14400_v40 = vmul.f32 %v27761_v58, %v27761_v58  ;;  %v14507_v17 = vadd.f32 %v14506_v51, %v14398_v41 }
 0x69a   :  { %15051 = vmatprep.subr.bf16.mxu0 %v30190_v44  ;;  %v14423_v51 = vmul.f32 %v27649_v56, %v27649_v56  ;;  %v14404_v41 = vmul.f32 %v27769_v23, %v27769_v23 }
 0x69b   :  { %19975 = vmatpush1.bf16.msra.mxu1 %v20919_v57  ;;  %v14475_v43 = vadd.f32 %v14474_v39, %v14415_v16  ;;  %v20921_v16 = vld [vmem:[%s29211_s5 + $0x70] sm:$0xff]   ;;  %v14508_v39 = vadd.f32 %v14507_v17, %v14400_v40  ;;  %v14425_v17 = vmul.f32 %v27655_v35, %v27655_v35 }
 0x69c   :  { %19960 = vmatprep.subr.bf16.mxu1 %v30190_v44 }
 0x69d   :  { %15052 = vmatpush1.bf16.msra.mxu0 %v20919_v57  ;;  %v14476_v1 = vadd.f32 %v14475_v43, %v14417_v13  ;;  %v14402_v57 = vmul.f32 %v27765_v52, %v27765_v52 }
 0x69e   :  { %15053 = vmatprep.subr.bf16.mxu0 %v30190_v44 }
 0x69f   :  { %19976 = vmatpush1.bf16.msra.mxu1 %v20920_v33  ;;  %v14477_v14 = vadd.f32 %v14476_v1, %v14419_v63  ;;  %v14509_v13 = vadd.f32 %v14508_v39, %v14402_v57  ;;  %v20922_v63 = vld [vmem:[%s29211_s5 + $0x78] sm:$0xff]   ;;  %v14408_v57 = vmul.f32 %v27780_v20, %v27780_v20  ;;  %s21038_s5 = smov 16  }
 0x6a0   :  { %19961 = vmatprep.subr.bf16.mxu1 %v30190_v44 }
 0x6a1   :  { %15054 = vmatpush1.bf16.msra.mxu0 %v20920_v33  ;;  %v14478_v43 = vadd.f32 %v14477_v14, %v14421_v37  ;;  %v14406_v33 = vmul.f32 %v27773_v28, %v27773_v28  ;;  %v14510_v40 = vadd.f32 %v14509_v13, %v14404_v41  ;;  %v14427_v37 = vmul.f32 %v27658_v7, %v27658_v7 }
 0x6a2   :  { %15055 = vmatprep.subr.bf16.mxu0 %v30190_v44  ;;  %v14410_v41 = vmul.f32 %v27784_v34, %v27784_v34 }
 0x6a3   :  { %19977 = vmatpush1.bf16.msra.mxu1 %v20921_v16  ;;  %v14479_v1 = vadd.f32 %v14478_v43, %v14423_v51  ;;  %v14511_v39 = vadd.f32 %v14510_v40, %v14406_v33  ;;  %v14429_v51 = vmul.f32 %v27661_v21, %v27661_v21 }
 0x6a4   :  { %19962 = vmatprep.subr.bf16.mxu1 %v30190_v44 }
 0x6a5   :  { %15056 = vmatpush1.bf16.msra.mxu0 %v20921_v16  ;;  %v14480_v14 = vadd.f32 %v14479_v1, %v14425_v17  ;;  %v14512_v13 = vadd.f32 %v14511_v39, %v14408_v57  ;;  %v14431_v16 = vmul.f32 %v27664_v12, %v27664_v12  ;;  %v14412_v1 = vmul.f32 %v27788_v38, %v27788_v38 }
 0x6a6   :  { %15057 = vmatprep.subr.bf16.mxu0 %v30190_v44  ;;  %v14433_v44 = vmul.f32 %v27668_v3, %v27668_v3  ;;  %v14435_v57 = vmul.f32 %v27671_v31, %v27671_v31  ;;  %v14416_v39 = vmul.f32 %v27797_v18, %v27797_v18 }
 0x6a7   :  { %19978 = vmatpush1.bf16.msra.mxu1 %v20922_v63  ;;  %v14481_v43 = vadd.f32 %v14480_v14, %v14427_v37  ;;  %v14513_v33 = vadd.f32 %v14512_v13, %v14410_v41  ;;  %v14414_v37 = vmul.f32 %v27793_v45, %v27793_v45  ;;  %v14418_v13 = vmul.f32 %v27801_v50, %v27801_v50 }
 0x6a9   :  { %15058 = vmatpush1.bf16.msra.mxu0 %v20922_v63  ;;  %v14482_v17 = vadd.f32 %v14481_v43, %v14429_v51  ;;  %v14514_v14 = vadd.f32 %v14513_v33, %v14412_v1  ;;  %v14437_v43 = vmul.f32 %v27674_v24, %v27674_v24  ;;  %v14420_v33 = vmul.f32 %v27805_v30, %v27805_v30 }
 0x6ab   :  { %v14483_v40 = vadd.f32 %v14482_v17, %v14431_v16  ;;  %v14515_v51 = vadd.f32 %v14514_v14, %v14414_v37  ;;  %v14439_v17 = vmul.f32 %v27677_v25, %v27677_v25  ;;  %v14422_v14 = vmul.f32 %v27809_v27, %v27809_v27 }
 0x6ad   :  { %v14484_v63 = vadd.f32 %v14483_v40, %v14433_v44  ;;  %v14516_v16 = vadd.f32 %v14515_v51, %v14416_v39  ;;  %v14441_v40 = vmul.f32 %v27680_v49, %v27680_v49  ;;  %v14424_v51 = vmul.f32 %v27813_v59, %v27813_v59 }
 0x6af   :  { %v14485_v41 = vadd.f32 %v14484_v63, %v14435_v57  ;;  %v14517_v44 = vadd.f32 %v14516_v16, %v14418_v13  ;;  %v14443_v63 = vmul.f32 %v27683_v11, %v27683_v11  ;;  %v14426_v16 = vmul.f32 %v27817_v9, %v27817_v9 }
 0x6b1   :  { %v14486_v1 = vadd.f32 %v14485_v41, %v14437_v43  ;;  %v14518_v57 = vadd.f32 %v14517_v44, %v14420_v33  ;;  %v14445_v41 = vmul.f32 %v27686_v47, %v27686_v47  ;;  %v14428_v44 = vmul.f32 %v27822_v10, %v27822_v10 }
 0x6b3   :  { %v14487_v37 = vadd.f32 %v14486_v1, %v14439_v17  ;;  %v14519_v43 = vadd.f32 %v14518_v57, %v14422_v14  ;;  %v14447_v1 = vmul.f32 %v27689_v53, %v27689_v53  ;;  %v14430_v57 = vmul.f32 %v27826_v54, %v27826_v54 }
 0x6b5   :  { %v14488_v39 = vadd.f32 %v14487_v37, %v14441_v40  ;;  %v14520_v17 = vadd.f32 %v14519_v43, %v14424_v51  ;;  %v14449_v37 = vmul.f32 %v27693_v6, %v27693_v6  ;;  %v14432_v43 = vmul.f32 %v27830_v36, %v27830_v36 }
 0x6b7   :  { %v14489_v13 = vadd.f32 %v14488_v39, %v14443_v63  ;;  %v14521_v40 = vadd.f32 %v14520_v17, %v14426_v16  ;;  %v14451_v39 = vmul.f32 %v27696_v5, %v27696_v5  ;;  %v14434_v17 = vmul.f32 %v27834_v2, %v27834_v2 }
 0x6b9   :  { %v14490_v33 = vadd.f32 %v14489_v13, %v14445_v41  ;;  %v14522_v63 = vadd.f32 %v14521_v40, %v14428_v44  ;;  %v14453_v13 = vmul.f32 %v27699_v22, %v27699_v22  ;;  %v30248_v40 = vld [vmem:[#allocation88_spill] sm:$0xff] }
 0x6ba   :  { %v14436_v25 = vmul.f32 %v30248_v40, %v30248_v40 }
 0x6bb   :  { %v14491_v14 = vadd.f32 %v14490_v33, %v14447_v1  ;;  %v14523_v41 = vadd.f32 %v14522_v63, %v14430_v57  ;;  %v14455_v33 = vmul.f32 %v27702_v0, %v27702_v0  ;;  %v30250_v63 = vld [vmem:[#allocation89_spill] sm:$0xff] }
 0x6bc   :  { %v14438_v31 = vmul.f32 %v30250_v63, %v30250_v63 }
 0x6bd   :  { %v14492_v51 = vadd.f32 %v14491_v14, %v14449_v37  ;;  %v14524_v1 = vadd.f32 %v14523_v41, %v14432_v43  ;;  %v30249_v14 = vld [vmem:[#allocation85_spill] sm:$0xff]  ;;  %v30252_v41 = vld [vmem:[#allocation90_spill] sm:$0xff] }
 0x6be   :  { %v14457_v24 = vmul.f32 %v30249_v14, %v30249_v14  ;;  %v14440_v2 = vmul.f32 %v30252_v41, %v30252_v41 }
 0x6bf   :  { %v14493_v16 = vadd.f32 %v14492_v51, %v14451_v39  ;;  %v14525_v37 = vadd.f32 %v14524_v1, %v14434_v17  ;;  %v30251_v51 = vld [vmem:[#allocation8_spill] sm:$0xff]  ;;  %v30254_v1 = vld [vmem:[#allocation51_spill] sm:$0xff] }
 0x6c0   :  { %v14459_v3 = vmul.f32 %v30251_v51, %v30251_v51  ;;  %v14442_v36 = vmul.f32 %v30254_v1, %v30254_v1 }
 0x6c1   :  { %v14494_v44 = vadd.f32 %v14493_v16, %v14453_v13  ;;  %v14526_v39 = vadd.f32 %v14525_v37, %v14436_v25  ;;  %v30253_v16 = vld [vmem:[#allocation5_spill] sm:$0xff]  ;;  %v30256_v37 = vld [vmem:[#allocation91_spill] sm:$0xff] }
 0x6c2   :  { %v14461_v40 = vmul.f32 %v30253_v16, %v30253_v16  ;;  %v14444_v54 = vmul.f32 %v30256_v37, %v30256_v37 }
 0x6c3   :  { %v14495_v57 = vadd.f32 %v14494_v44, %v14455_v33  ;;  %v14527_v13 = vadd.f32 %v14526_v39, %v14438_v31  ;;  %v30255_v44 = vld [vmem:[#allocation87_spill] sm:$0xff]  ;;  %v14446_v31 = vmul.f32 %v27862_v42, %v27862_v42 }
 0x6c4   :  { %v14463_v63 = vmul.f32 %v30255_v44, %v30255_v44 }
 0x6c5   :  { %v14496_v43 = vadd.f32 %v14495_v57, %v14457_v24  ;;  %v14528_v33 = vadd.f32 %v14527_v13, %v14440_v2  ;;  %v30257_v2 = vld [vmem:[#allocation25_spill] sm:$0xff] }
 0x6c6   :  { %v14450_v13 = vmul.f32 %v30257_v2, %v30257_v2 }
 0x6c7   :  { %v14497_v17 = vadd.f32 %v14496_v43, %v14459_v3  ;;  %v14529_v24 = vadd.f32 %v14528_v33, %v14442_v36  ;;  %v14448_v3 = vmul.f32 %v27866_v48, %v27866_v48  ;;  %v14454_v33 = vmul.f32 %v27878_v60, %v27878_v60 }
 0x6c9   :  { %v14498_v25 = vadd.f32 %v14497_v17, %v14461_v40  ;;  %v14530_v39 = vadd.f32 %v14529_v24, %v14444_v54  ;;  %v30258_v17 = vld [vmem:[#allocation41_spill] sm:$0xff] }
 0x6ca   :  { %v14452_v37 = vmul.f32 %v30258_v17, %v30258_v17  ;;  %v30259_v24 = vld [vmem:[#allocation45_spill] sm:$0xff] }
 0x6cb   :  { %v14499_v57 = vadd.f32 %v14498_v25, %v14463_v63  ;;  %v14531_v43 = vadd.f32 %v14530_v39, %v14446_v31  ;;  %v14456_v9 = vmul.f32 %v30259_v24, %v30259_v24 }
 0x6cd   :  { %v14500_v41 = vrot.slane %v14499_v57, 4  ;;  %v14532_v10 = vadd.f32 %v14531_v43, %v14448_v3  ;;  %v14460_v43 = vmul.f32 %v27891_v46, %v27891_v46 }
 0x6cf   :  { %v14501_v1 = vadd.f32 %v14500_v41, %v14499_v57  ;;  %v14533_v36 = vadd.f32 %v14532_v10, %v14450_v13  ;;  %v14458_v57 = vmul.f32 %v27887_v15, %v27887_v15  ;;  %v14462_v13 = vmul.f32 %v27895_v29, %v27895_v29 }
 0x6d1   :  { %v14502_v40 = vrot.slane %v14501_v1, 2  ;;  %v14534_v54 = vadd.f32 %v14533_v36, %v14452_v37 }
 0x6d3   :  { %v14503_v63 = vadd.f32 %v14502_v40, %v14501_v1  ;;  %v14535_v31 = vadd.f32 %v14534_v54, %v14454_v33  ;;  %v14464_v40 = vmul.f32 %v27904_v55, %v27904_v55 }
 0x6d5   :  { %v14504_v25 = vrot.slane %v14503_v63, 1  ;;  %v14536_v39 = vadd.f32 %v14535_v31, %v14456_v9  ;;  %v14235_v9 = vld [vmem:[%s29209_s3] sm:$0x3]  ;;  %s21040_s3 = smov 32  }
 0x6d7   :  { %v14505_v41 = vadd.f32 %v14504_v25, %v14503_v63  ;;  %v14537_v10 = vadd.f32 %v14536_v39, %v14458_v57  ;;  %v30260_v25 = vld [vmem:[#allocation102_spill] sm:$0xff] }
 0x6d8   :  { %v28064_v31 = vrot.slane %v14235_v9, %v30260_v25 }
 0x6d9   :  { %v14547_v3 = vmul.f32 0.0034722222, %v14505_v41  ;;  %v14538_v37 = vadd.f32 %v14537_v10, %v14460_v43 }
 0x6da   :  { %30261 = vst [vmem:[#allocation52_spill] sm:$0xff] %v28064_v31 }
 0x6db   :  { %v14549_v1 = vadd.f32 1e-05, %v14547_v3  ;;  %v14539_v36 = vadd.f32 %v14538_v37, %v14462_v13  ;;  %v30265_v37 = vld [vmem:[#allocation121_spill] sm:$0xff] }
 0x6dd   :  { %20978 = vrsqrt.f32 %v14549_v1  ;;  %v14540_v63 = vadd.f32 %v14539_v36, %v14464_v40  ;;  %v30264_v1 = vld [vmem:[#allocation20_spill] sm:$0xff] }
 0x6df   :  { %v14541_v33 = vrot.slane %v14540_v63, 4 }
 0x6e1   :  { %v14542_v54 = vadd.f32 %v14541_v33, %v14540_v63  ;;  %v30266_v63 = vld [vmem:[#allocation122_spill] sm:$0xff] }
 0x6e3   :  { %v14543_v39 = vrot.slane %v14542_v54, 2 }
 0x6e5   :  { %v14544_v43 = vadd.f32 %v14543_v39, %v14542_v54 }
 0x6e7   :  { %v28066_v41 = vpop.eup %20978  ;;  %v14545_v10 = vrot.slane %v14544_v43, 1 }
 0x6e8   :  { %30262 = vst [vmem:[#allocation54_spill] sm:$0xff] %v28066_v41  ;;  %v14623_v57 = vmul.f32 %v28066_v41, %v30255_v44  ;;  %v14553_v13 = vmul.f32 %v28066_v41, %v30264_v1  ;;  %v14555_v40 = vmul.f32 %v28066_v41, %v30265_v37  ;;  %v14557_v33 = vmul.f32 %v28066_v41, %v30266_v63 }
 0x6e9   :  { %v14546_v36 = vadd.f32 %v14545_v10, %v14544_v43  ;;  %v14601_v59 = vmul.f32 %v28066_v41, %v27680_v49  ;;  %v14603_v44 = vmul.f32 %v28066_v41, %v27683_v11  ;;  %v14605_v54 = vmul.f32 %v28066_v41, %v27686_v47 }
 0x6ea   :  { %v28071_v3 = vmul.f32 %v28064_v31, %v14623_v57  ;;  %v14607_v57 = vmul.f32 %v28066_v41, %v27689_v53  ;;  %v14609_v39 = vmul.f32 %v28066_v41, %v27693_v6  ;;  %v14611_v43 = vmul.f32 %v28066_v41, %v27696_v5  ;;  %v30267_v53 = vld [vmem:[#allocation50_spill] sm:$0xff] }
 0x6eb   :  { %v14548_v10 = vmul.f32 0.0034722222, %v14546_v36  ;;  %v14613_v1 = vmul.f32 %v28066_v41, %v27699_v22  ;;  %v14615_v49 = vmul.f32 %v28066_v41, %v27702_v0  ;;  %v14617_v11 = vmul.f32 %v28066_v41, %v30249_v14  ;;  %v14236_v22 = vld [vmem:[%s29210_s4] sm:$0x3]  ;;  %s21042_s4 = smov 80  }
 0x6ec   :  { %30263 = vst [vmem:[#allocation61_spill] sm:$0xff] %v28071_v3  ;;  %v14619_v47 = vmul.f32 %v28066_v41, %v30251_v51  ;;  %v14559_v37 = vmul.f32 %v28066_v41, %v30267_v53  ;;  %v14569_v6 = vmul.f32 %v28066_v41, %v27627_v62  ;;  %v14621_v5 = vmul.f32 %v28066_v41, %v30253_v16 }
 0x6ed   :  { %v14550_v36 = vadd.f32 1e-05, %v14548_v10  ;;  %v14571_v0 = vmul.f32 %v28066_v41, %v27630_v32  ;;  %v28111_v14 = vmul.f32 %v28064_v31, %v14601_v59  ;;  %v28114_v51 = vmul.f32 %v28064_v31, %v14603_v44 }
 0x6ee   :  { %v28117_v63 = vmul.f32 %v28064_v31, %v14605_v54  ;;  %v28120_v62 = vmul.f32 %v28064_v31, %v14607_v57  ;;  %v28123_v16 = vmul.f32 %v28064_v31, %v14609_v39  ;;  %v28126_v10 = vmul.f32 %v28064_v31, %v14611_v43  ;;  %v30274_v43 = vld [vmem:[#allocation105_spill] sm:$0xff] }
 0x6ef   :  { %20980 = vrsqrt.f32 %v14550_v36  ;;  %v28129_v32 = vmul.f32 %v28064_v31, %v14613_v1  ;;  %v28132_v59 = vmul.f32 %v28064_v31, %v14615_v49  ;;  %v28135_v44 = vmul.f32 %v28064_v31, %v14617_v11  ;;  %v30275_v1 = vld [vmem:[#allocation22_spill] sm:$0xff] }
 0x6f0   :  { %30268 = vst [vmem:[#allocation66_spill] sm:$0xff] %v28126_v10  ;;  %v28138_v54 = vmul.f32 %v28064_v31, %v14619_v47  ;;  %v28141_v57 = vrot.slane %v14236_v22, %v30260_v25  ;;  %v28144_v39 = vmul.f32 %v28064_v31, %v14621_v5  ;;  %v28147_v53 = vrot.slane %v14235_v9, %v30274_v43  ;;  %v30276_v47 = vld [vmem:[#allocation40_spill] sm:$0xff]  ;;  %v30277_v9 = vld [vmem:[#allocation123_spill] sm:$0xff] }
 0x6f1   :  { %30269 = vst [vmem:[#allocation75_spill] sm:$0xff] %v28129_v32  ;;  %30270 = vst [vmem:[#allocation77_spill] sm:$0xff] %v28132_v59  ;;  %v14561_v36 = vmul.f32 %v28066_v41, %v30275_v1  ;;  %v14573_v49 = vmul.f32 %v28066_v41, %v27633_v61  ;;  %v28154_v11 = vrot.slane %v14236_v22, %v30274_v43  ;;  %v30278_v22 = vld [vmem:[#allocation124_spill] sm:$0xff] }
 0x6f2   :  { %30271 = vst [vmem:[#allocation79_spill] sm:$0xff] %v28135_v44  ;;  %30272 = vst [vmem:[#allocation81_spill] sm:$0xff] %v28138_v54  ;;  %v14575_v3 = vmul.f32 %v28066_v41, %v30276_v47  ;;  %v14636_v25 = vmul.f32 %v28064_v31, %v14553_v13  ;;  %v14638_v5 = vmul.f32 %v28064_v31, %v14555_v40  ;;  %v30279_v59 = vld [vmem:[#allocation24_spill] sm:$0xff] }
 0x6f3   :  { %30273 = vst [vmem:[#allocation43_spill] sm:$0xff] %v28144_v39  ;;  %v14652_v39 = vmul.f32 %v28064_v31, %v14569_v6  ;;  %v14563_v54 = vmul.f32 %v28066_v41, %v30277_v9  ;;  %v14640_v1 = vmul.f32 %v28064_v31, %v14557_v33  ;;  %v14642_v44 = vmul.f32 %v28064_v31, %v14559_v37 }
 0x6f4   :  { %v14654_v61 = vmul.f32 %v28064_v31, %v14571_v0  ;;  %v14565_v43 = vmul.f32 %v28066_v41, %v30278_v22  ;;  %v14567_v47 = vmul.f32 %v28066_v41, %v30279_v59  ;;  %v14577_v13 = vmul.f32 %v28066_v41, %v27640_v19 }
 0x6f5   :  { %v14579_v40 = vmul.f32 %v28066_v41, %v27643_v8  ;;  %v14581_v6 = vmul.f32 %v28066_v41, %v27646_v4  ;;  %v14583_v33 = vmul.f32 %v28066_v41, %v27649_v56  ;;  %v14585_v37 = vmul.f32 %v28066_v41, %v27655_v35 }
 0x6f6   :  { %v14656_v0 = vmul.f32 %v28064_v31, %v14573_v49  ;;  %v14658_v9 = vmul.f32 %v28064_v31, %v14575_v3  ;;  %v14719_v59 = vadd.f32 %v28141_v57, %v14636_v25  ;;  %v14721_v19 = vadd.f32 %v28141_v57, %v14638_v5 }
 0x6f7   :  { %v14735_v22 = vadd.f32 %v28141_v57, %v14652_v39  ;;  %v14587_v8 = vmul.f32 %v28066_v41, %v27658_v7  ;;  %v14737_v4 = vadd.f32 %v28141_v57, %v14654_v61  ;;  %v14723_v56 = vadd.f32 %v28141_v57, %v14640_v1 }
 0x6f8   :  { %v14725_v32 = vadd.f32 %v28141_v57, %v14642_v44  ;;  %v14589_v3 = vmul.f32 %v28066_v41, %v27661_v21  ;;  %v14591_v25 = vmul.f32 %v28066_v41, %v27664_v12  ;;  %v14644_v49 = vmul.f32 %v28064_v31, %v14561_v36 }
 0x6f9   :  { %v28190_v35 = vpop.eup %20980  ;;  %v14646_v39 = vmul.f32 %v28064_v31, %v14563_v54  ;;  %v28201_v5 = vmul.f32 %v28064_v31, %v14565_v43  ;;  %v14660_v44 = vmul.f32 %v28064_v31, %v14577_v13  ;;  %v28205_v1 = vadd.f32 %v28141_v57, %v14656_v0 }
 0x6fa   :  { %v14624_v7 = vmul.f32 %v28190_v35, %v27904_v55  ;;  %v14791_v61 = vmax.f32 %v14719_v59, 0.0  ;;  %v14793_v21 = vmax.f32 %v14721_v19, 0.0  ;;  %v14807_v10 = vmax.f32 %v14735_v22, 0.0 }
 0x6fb   :  { %v28208_v12 = vadd.f32 %v28141_v57, %v14658_v9  ;;  %v14809_v54 = vmax.f32 %v14737_v4, 0.0  ;;  %v14795_v41 = vmax.f32 %v14723_v56, 0.0  ;;  %v14797_v55 = vmax.f32 %v14725_v32, 0.0 }
 0x6fc   :  { %v28211_v36 = vmul.f32 %v28147_v53, %v14624_v7  ;;  %v28214_v43 = vmul.f32 %v28064_v31, %v14567_v47  ;;  %v14662_v13 = vmul.f32 %v28064_v31, %v14579_v40  ;;  %v28218_v0 = vmul.f32 %v28064_v31, %v14581_v6  ;;  %v30283_v7 = vld [vmem:[#allocation18_spill] sm:$0xff] }
 0x6fd   :  { %v28221_v59 = vmul.f32 %v28064_v31, %v14583_v33  ;;  %v28224_v9 = vmul.f32 %v28064_v31, %v14585_v37  ;;  %v28227_v19 = vmul.f32 %v28064_v31, %v14587_v8  ;;  %v28230_v22 = vmul.f32 %v28064_v31, %v14589_v3  ;;  %v30282_v3 = vld [vmem:[#allocation83_spill] sm:$0xff] }
 0x6fe   :  { %v28233_v32 = vmul.f32 %v28064_v31, %v14591_v25  ;;  %v28235_v47 = vpack.c.bf16 %v14793_v21, %v14791_v61  ;;  %v28240_v33 = vadd.f32 %v28141_v57, %v14644_v49  ;;  %v28242_v37 = vpack.c.bf16 %v14809_v54, %v14807_v10 }
 0x6ff   :  { %30280 = vst [vmem:[#allocation7_spill] sm:$0xff] %v28230_v22  ;;  %v28244_v4 = vpack.c.bf16 %v14797_v55, %v14795_v41  ;;  %v28247_v8 = vadd.f32 %v28141_v57, %v14646_v39  ;;  %v28250_v56 = vadd.f32 %v28141_v57, %v14660_v44  ;;  %v14554_v25 = vmul.f32 %v28190_v35, %v30282_v3  ;;  %v30284_v22 = vld [vmem:[#allocation11_spill] sm:$0xff] }
 0x700   :  { %30281 = vst [vmem:[#allocation9_spill] sm:$0xff] %v28233_v32  ;;  %v14556_v61 = vmul.f32 %v28190_v35, %v30283_v7  ;;  %v14558_v49 = vmul.f32 %v28190_v35, %v27756_v26  ;;  %v28259_v10 = vadd.f32 %v28141_v57, %v14662_v13  ;;  %v14560_v41 = vmul.f32 %v28190_v35, %v27761_v58 }
 0x701   :  { %v14562_v39 = vmul.f32 %v28190_v35, %v27765_v52  ;;  %v14564_v44 = vmul.f32 %v28190_v35, %v27769_v23  ;;  %v28269_v21 = vmul.f32 %v28190_v35, %v27773_v28  ;;  %v14570_v54 = vmul.f32 %v28190_v35, %v27784_v34 }
 0x702   :  { %v14572_v26 = vmul.f32 %v28190_v35, %v27788_v38  ;;  %v14574_v55 = vmul.f32 %v28190_v35, %v27793_v45  ;;  %v14576_v58 = vmul.f32 %v28190_v35, %v27797_v18  ;;  %v14578_v52 = vmul.f32 %v28190_v35, %v27801_v50 }
 0x703   :  { %v14580_v23 = vmul.f32 %v28190_v35, %v27805_v30  ;;  %v14606_v28 = vmul.f32 %v28190_v35, %v27862_v42  ;;  %v14608_v34 = vmul.f32 %v28190_v35, %v27866_v48  ;;  %v14610_v38 = vmul.f32 %v28190_v35, %v30257_v2 }
 0x704   :  { %v14612_v45 = vmul.f32 %v28190_v35, %v30258_v17  ;;  %v14614_v18 = vmul.f32 %v28190_v35, %v27878_v60  ;;  %v14616_v50 = vmul.f32 %v28190_v35, %v30259_v24  ;;  %v14618_v30 = vmul.f32 %v28190_v35, %v27887_v15 }
 0x705   :  { %v14620_v42 = vmul.f32 %v28190_v35, %v27891_v46  ;;  %v14622_v48 = vmul.f32 %v28190_v35, %v27895_v29  ;;  %v14637_v2 = vmul.f32 %v28147_v53, %v14554_v25  ;;  %v14639_v13 = vmul.f32 %v28147_v53, %v14556_v61 }
 0x706   :  { %v14641_v17 = vmul.f32 %v28147_v53, %v14558_v49  ;;  %v14643_v60 = vmul.f32 %v28147_v53, %v14560_v41  ;;  %v14645_v3 = vmul.f32 %v28147_v53, %v14562_v39  ;;  %v14647_v24 = vmul.f32 %v28147_v53, %v14564_v44 }
 0x707   :  { %v14653_v15 = vmul.f32 %v28147_v53, %v14570_v54  ;;  %v14655_v7 = vmul.f32 %v28147_v53, %v14572_v26  ;;  %v14657_v46 = vmul.f32 %v28147_v53, %v14574_v55  ;;  %v14659_v29 = vmul.f32 %v28147_v53, %v14576_v58 }
 0x708   :  { %v14661_v25 = vmul.f32 %v28147_v53, %v14578_v52  ;;  %v14663_v61 = vmul.f32 %v28147_v53, %v14580_v23  ;;  %v28314_v49 = vmul.f32 %v28147_v53, %v14606_v28  ;;  %v28317_v41 = vmul.f32 %v28147_v53, %v14608_v34 }
 0x709   :  { %v28320_v39 = vmul.f32 %v28147_v53, %v14610_v38  ;;  %v28323_v44 = vmul.f32 %v28147_v53, %v14612_v45  ;;  %v28326_v54 = vmul.f32 %v28147_v53, %v14614_v18  ;;  %v28329_v26 = vmul.f32 %v28147_v53, %v14616_v50 }
 0x70a   :  { %v28332_v55 = vmul.f32 %v28147_v53, %v14618_v30  ;;  %v28335_v58 = vmul.f32 %v28147_v53, %v14620_v42  ;;  %v28338_v52 = vmul.f32 %v28147_v53, %v14622_v48  ;;  %v14720_v23 = vadd.f32 %v28154_v11, %v14637_v2 }
 0x70b   :  { %v14722_v28 = vadd.f32 %v28154_v11, %v14639_v13  ;;  %v14736_v34 = vadd.f32 %v28154_v11, %v14653_v15  ;;  %v14738_v38 = vadd.f32 %v28154_v11, %v14655_v7  ;;  %v14724_v45 = vadd.f32 %v28154_v11, %v14641_v17 }
 0x70c   :  { %v14726_v18 = vadd.f32 %v28154_v11, %v14643_v60  ;;  %v14740_v50 = vadd.f32 %v28154_v11, %v14657_v46  ;;  %v14742_v30 = vadd.f32 %v28154_v11, %v14659_v29  ;;  %v14792_v42 = vmax.f32 %v14720_v23, 0.0 }
 0x70d   :  { %v14794_v6 = vmax.f32 %v14722_v28, 0.0  ;;  %v14808_v48 = vmax.f32 %v14736_v34, 0.0  ;;  %v14810_v40 = vmax.f32 %v14738_v38, 0.0  ;;  %v14796_v31 = vmax.f32 %v14724_v45, 0.0  ;;  %v30285_v45 = vld [vmem:[#allocation19_spill] sm:$0xff] }
 0x70e   :  { %v14798_v2 = vmax.f32 %v14726_v18, 0.0  ;;  %v14812_v32 = vmax.f32 %v14740_v50, 0.0  ;;  %v14814_v13 = vmax.f32 %v14742_v30, 0.0  ;;  %v14568_v15 = vmul.f32 %v28190_v35, %v27780_v20 }
 0x70f   :  { %v14582_v17 = vmul.f32 %v28190_v35, %v27809_v27  ;;  %v14896_v7 = vpack.c.bf16 %v14794_v6, %v14792_v42  ;;  %v14904_v60 = vpack.c.bf16 %v14810_v40, %v14808_v48  ;;  %v14584_v46 = vmul.f32 %v28190_v35, %v30284_v22  ;;  %v30286_v6 = vld [vmem:[#allocation15_spill] sm:$0xff] }
 0x710   :  { %v14898_v29 = vpack.c.bf16 %v14798_v2, %v14796_v31  ;;  %v14728_v23 = vadd.f32 %v28154_v11, %v14645_v3  ;;  %v14730_v28 = vadd.f32 %v28154_v11, %v14647_v24  ;;  %v14906_v34 = vpack.c.bf16 %v14814_v13, %v14812_v32  ;;  %v30290_v13 = vld [vmem:[#allocation86_spill] sm:$0xff] }
 0x711   :  { %15059 = vmatprep.mubr.bf16.mxu0 %v14896_v7  ;;  %15091 = vmatprep.mubr.bf16.mxu1 %v14904_v60  ;;  %v14744_v38 = vadd.f32 %v28154_v11, %v14661_v25  ;;  %v14746_v20 = vadd.f32 %v28154_v11, %v14663_v61  ;;  %v14586_v27 = vmul.f32 %v28190_v35, %v30285_v45  ;;  %v30287_v31 = vmax.f32 %v28205_v1, 0.0 }
 0x712   :  { %v14588_v40 = vmul.f32 %v28190_v35, %v30286_v6  ;;  %15060 = vmatmul.mubr.bf16.vlgmr.msra.gmra.mrb[144].mxu0 %v28235_v47  ;;  %15092 = vmatmul.mubr.bf16.vlgmr.msra.gmra.mrb[112].mxu1 %v28242_v37  ;;  %v30288_v22 = vmax.f32 %v28208_v12, 0.0  ;;  %v14799_v32 = vmax.f32 %v28240_v33, 0.0  ;;  %v14649_v24 = vmul.f32 %v28147_v53, %v28269_v21  ;;  %v30289_v37 = vld [vmem:[#allocation84_spill] sm:$0xff] }
 0x713   :  { %v14651_v25 = vmul.f32 %v28147_v53, %v14568_v15  ;;  %15067 = vmatprep.mubr.bf16.mxu0 %v14898_v29  ;;  %15099 = vmatprep.mubr.bf16.mxu1 %v14906_v34  ;;  %v14801_v61 = vmax.f32 %v28247_v8, 0.0  ;;  %v14731_v47 = vadd.f32 %v28141_v57, %v28201_v5  ;;  %v14590_v1 = vmul.f32 %v28190_v35, %v30289_v37  ;;  %v30291_v29 = vld [vmem:[#allocation10_spill] sm:$0xff] }
 0x714   :  { %v14905_v3 = vpack.c.bf16 %v30288_v22, %v30287_v31  ;;  %v14665_v12 = vmul.f32 %v28147_v53, %v14582_v17  ;;  %v14667_v18 = vmul.f32 %v28147_v53, %v14584_v46  ;;  %v14815_v33 = vmax.f32 %v28250_v56, 0.0 }
 0x715   :  { %v14800_v50 = vmax.f32 %v14728_v23, 0.0  ;;  %v14802_v21 = vmax.f32 %v14730_v28, 0.0  ;;  %v14816_v30 = vmax.f32 %v14744_v38, 0.0  ;;  %v14818_v42 = vmax.f32 %v14746_v20, 0.0  ;;  %v30292_v20 = vld [vmem:[#allocation88_spill] sm:$0xff] }
 0x716   :  { %v14669_v48 = vmul.f32 %v28147_v53, %v14586_v27  ;;  %v14671_v8 = vmul.f32 %v28147_v53, %v14588_v40  ;;  %v14817_v2 = vmax.f32 %v28259_v10, 0.0  ;;  %v14733_v5 = vadd.f32 %v28141_v57, %v28214_v43 }
 0x717   :  { %v14592_v15 = vmul.f32 %v28190_v35, %v30290_v13  ;;  %v14732_v17 = vadd.f32 %v28154_v11, %v14649_v24  ;;  %v14734_v56 = vadd.f32 %v28154_v11, %v14651_v25  ;;  %v14747_v7 = vadd.f32 %v28141_v57, %v28218_v0 }
 0x718   :  { %v14748_v60 = vadd.f32 %v28154_v11, %v14665_v12  ;;  %v14750_v46 = vadd.f32 %v28154_v11, %v14667_v18  ;;  %v14749_v10 = vadd.f32 %v28141_v57, %v28221_v59  ;;  %v28397_v43 = vadd.f32 %v28141_v57, %v28224_v9 }
 0x719   :  { %v14594_v23 = vmul.f32 %v28190_v35, %v30291_v29  ;;  %v14673_v28 = vmul.f32 %v28147_v53, %v14590_v1  ;;  %v14900_v34 = vpack.c.bf16 %v14802_v21, %v14800_v50  ;;  %v14908_v38 = vpack.c.bf16 %v14818_v42, %v14816_v30 }
 0x71a   :  { %v14596_v0 = vmul.f32 %v28190_v35, %v30292_v20  ;;  %15068 = vmatmul.mubr.bf16.gmra.mrb[148].mxu0 %v28244_v4  ;;  %15100 = vmatmul.mubr.bf16.gmra.mrb[116].mxu1 %v14905_v3  ;;  %v14803_v45 = vmax.f32 %v14731_v47, 0.0  ;;  %v14752_v59 = vadd.f32 %v28154_v11, %v14669_v48  ;;  %v14754_v27 = vadd.f32 %v28154_v11, %v14671_v8 }
 0x71b   :  { %v14675_v9 = vmul.f32 %v28147_v53, %v14592_v15  ;;  %15075 = vmatprep.mubr.bf16.mxu0 %v14900_v34  ;;  %15107 = vmatprep.mubr.bf16.mxu1 %v14908_v38  ;;  %v14804_v6 = vmax.f32 %v14732_v17, 0.0  ;;  %v14806_v40 = vmax.f32 %v14734_v56, 0.0  ;;  %v14805_v31 = vmax.f32 %v14733_v5, 0.0  ;;  %v30293_v38 = vld [vmem:[#allocation66_spill] sm:$0xff] }
 0x71c   :  { %v14820_v22 = vmax.f32 %v14748_v60, 0.0  ;;  %v14822_v24 = vmax.f32 %v14750_v46, 0.0  ;;  %v14819_v25 = vmax.f32 %v14747_v7, 0.0  ;;  %v14821_v37 = vmax.f32 %v14749_v10, 0.0 }
 0x71d   :  { %v28409_v1 = vmul.f32 %v28147_v53, %v14594_v23  ;;  %v14899_v4 = vpack.c.bf16 %v14801_v61, %v14799_v32  ;;  %v28413_v3 = vadd.f32 %v28141_v57, %v28227_v19  ;;  %v28416_v47 = vadd.f32 %v28154_v11, %v14673_v28 }
 0x71e   :  { %v28419_v12 = vmul.f32 %v28147_v53, %v14596_v0  ;;  %v14907_v18 = vpack.c.bf16 %v14817_v2, %v14815_v33  ;;  %v14824_v50 = vmax.f32 %v14752_v59, 0.0  ;;  %v14826_v21 = vmax.f32 %v14754_v27, 0.0 }
 0x71f   :  { %v14902_v30 = vpack.c.bf16 %v14806_v40, %v14804_v6  ;;  %v14901_v42 = vpack.c.bf16 %v14805_v31, %v14803_v45  ;;  %v28422_v48 = vadd.f32 %v28154_v11, %v14675_v9  ;;  %v14767_v32 = vadd.f32 %v28141_v57, %v28111_v14  ;;  %v30294_v9 = vld [vmem:[#allocation75_spill] sm:$0xff] }
 0x720   :  { %v14910_v61 = vpack.c.bf16 %v14822_v24, %v14820_v22  ;;  %v14909_v19 = vpack.c.bf16 %v14821_v37, %v14819_v25  ;;  %v14823_v8 = vmax.f32 %v28397_v43, 0.0  ;;  %v14769_v5 = vadd.f32 %v28141_v57, %v28114_v51  ;;  %v30295_v22 = vld [vmem:[#allocation77_spill] sm:$0xff]  ;;  %v30307_v43 = vld [vmem:[#allocation52_spill] sm:$0xff] }
 0x721   :  { %v14825_v13 = vmax.f32 %v28413_v3, 0.0  ;;  %v14828_v33 = vmax.f32 %v28416_v47, 0.0  ;;  %v14839_v2 = vmax.f32 %v14767_v32, 0.0  ;;  %v14772_v15 = vadd.f32 %v28154_v11, %v28314_v49 }
 0x722   :  { %15076 = vmatmul.mubr.bf16.gmra.mrb[152].mxu0 %v14899_v4  ;;  %15108 = vmatmul.mubr.bf16.gmra.mrb[120].mxu1 %v14907_v18  ;;  %v14912_v17 = vpack.c.bf16 %v14826_v21, %v14824_v50  ;;  %v14841_v56 = vmax.f32 %v14769_v5, 0.0  ;;  %v14774_v14 = vadd.f32 %v28154_v11, %v28317_v41  ;;  %v14771_v7 = vadd.f32 %v28141_v57, %v28117_v63  ;;  %v30296_v50 = vld [vmem:[#allocation79_spill] sm:$0xff] }
 0x723   :  { %15083 = vmatprep.mubr.bf16.mxu0 %v14902_v30  ;;  %15115 = vmatprep.mubr.bf16.mxu1 %v14910_v61  ;;  %v14830_v51 = vmax.f32 %v28422_v48, 0.0  ;;  %v14844_v60 = vmax.f32 %v14772_v15, 0.0  ;;  %v14773_v46 = vadd.f32 %v28141_v57, %v28120_v62  ;;  %v14776_v49 = vadd.f32 %v28154_v11, %v28320_v39  ;;  %v30297_v30 = vld [vmem:[#allocation81_spill] sm:$0xff] }
 0x724   :  { %v28442_v10 = vpack.c.bf16 %v14841_v56, %v14839_v2  ;;  %v14846_v29 = vmax.f32 %v14774_v14, 0.0  ;;  %v14843_v23 = vmax.f32 %v14771_v7, 0.0  ;;  %v14778_v41 = vadd.f32 %v28154_v11, %v28323_v44  ;;  %v30298_v2 = vld [vmem:[#allocation43_spill] sm:$0xff] }
 0x725   :  { %v14845_v28 = vmax.f32 %v14773_v46, 0.0  ;;  %v14848_v63 = vmax.f32 %v14776_v49, 0.0  ;;  %v14775_v34 = vadd.f32 %v28141_v57, %v28123_v16  ;;  %v14777_v20 = vadd.f32 %v28141_v57, %v30293_v38  ;;  %v30300_v46 = vld [vmem:[#allocation36_spill] sm:$0xff]  ;;  %v30301_v49 = vld [vmem:[#allocation54_spill] sm:$0xff] }
 0x726   :  { %v28450_v0 = vpack.c.bf16 %v14846_v29, %v14844_v60  ;;  %v14850_v62 = vmax.f32 %v14778_v41, 0.0  ;;  %v14780_v39 = vadd.f32 %v28154_v11, %v28326_v54  ;;  %v14782_v45 = vadd.f32 %v28154_v11, %v28329_v26 }
 0x727   :  { %v28456_v59 = vpack.c.bf16 %v14845_v28, %v14843_v23  ;;  %v14847_v44 = vmax.f32 %v14775_v34, 0.0  ;;  %v14849_v27 = vmax.f32 %v14777_v20, 0.0  ;;  %v14779_v6 = vadd.f32 %v28141_v57, %v30294_v9  ;;  %v30302_v23 = vld [vmem:[#allocation110_spill] sm:$0xff]  ;;  %v30303_v28 = vld [vmem:[#allocation89_spill] sm:$0xff] }
 0x728   :  { %v28460_v16 = vpack.c.bf16 %v14850_v62, %v14848_v63  ;;  %v14852_v40 = vmax.f32 %v14780_v39, 0.0  ;;  %v14854_v31 = vmax.f32 %v14782_v45, 0.0  ;;  %v14781_v24 = vadd.f32 %v28141_v57, %v30295_v22  ;;  %v30304_v20 = vld [vmem:[#allocation90_spill] sm:$0xff]  ;;  %v30305_v45 = vld [vmem:[#allocation7_spill] sm:$0xff] }
 0x729   :  { %v28464_v25 = vpack.c.bf16 %v14849_v27, %v14847_v44  ;;  %v14851_v54 = vmax.f32 %v14779_v6, 0.0  ;;  %v14784_v26 = vadd.f32 %v28154_v11, %v28332_v55  ;;  %v14786_v37 = vadd.f32 %v28154_v11, %v28335_v58  ;;  %v30306_v27 = vld [vmem:[#allocation9_spill] sm:$0xff] }
 0x72a   :  { %15084 = vmatmul.mubr.bf16.gmra.mrb[156].mxu0 %v14901_v42  ;;  %15116 = vmatmul.mubr.bf16.gmra.mrb[124].mxu1 %v14909_v19  ;;  %v28470_v4 = vpack.c.bf16 %v14854_v31, %v14852_v40  ;;  %v14853_v18 = vmax.f32 %v14781_v24, 0.0  ;;  %v14783_v21 = vadd.f32 %v28141_v57, %v30296_v50  ;;  %v14785_v48 = vadd.f32 %v28141_v57, %v30297_v30 }
 0x72b   :  { %15123 = vmatprep.mubr.bf16.mxu1 %v14912_v17  ;;  %v14856_v32 = vmax.f32 %v14784_v26, 0.0  ;;  %v14858_v61 = vmax.f32 %v14786_v37, 0.0  ;;  %v14788_v55 = vadd.f32 %v28154_v11, %v28338_v52  ;;  %v14790_v58 = vadd.f32 %v28154_v11, %v28211_v36  ;;  %v30299_v17 = vld [vmem:[#allocation61_spill] sm:$0xff]  ;;  %v30309_v37 = vld [vmem:[#allocation82_spill] sm:$0xff] }
 0x72c   :  { %v28480_v42 = vpack.c.bf16 %v14853_v18, %v14851_v54  ;;  %v14855_v19 = vmax.f32 %v14783_v21, 0.0  ;;  %v14857_v5 = vmax.f32 %v14785_v48, 0.0  ;;  %v14787_v15 = vadd.f32 %v28141_v57, %v30298_v2  ;;  %v30308_v26 = vld [vmem:[#allocation17_spill] sm:$0xff]  ;;  %v30310_v18 = vld [vmem:[#allocation51_spill] sm:$0xff] }
 0x72d   :  { %v28484_v56 = vpack.c.bf16 %v14858_v61, %v14856_v32  ;;  %v14860_v14 = vmax.f32 %v14788_v55, 0.0  ;;  %v14862_v7 = vmax.f32 %v14790_v58, 0.0  ;;  %v14789_v60 = vadd.f32 %v28141_v57, %v30299_v17  ;;  %v30311_v32 = vld [vmem:[#allocation91_spill] sm:$0xff] }
 0x72e   :  { %v14593_v52 = vmul.f32 %v30301_v49, %v30300_v46  ;;  %v28490_v29 = vpack.c.bf16 %v14857_v5, %v14855_v19  ;;  %v14859_v36 = vmax.f32 %v14787_v15, 0.0  ;;  %v14595_v41 = vmul.f32 %v30301_v49, %v30302_v23 }
 0x72f   :  { %v14598_v63 = vmul.f32 %v28190_v35, %v30303_v28  ;;  %v28496_v34 = vpack.c.bf16 %v14862_v7, %v14860_v14  ;;  %v14861_v38 = vmax.f32 %v14789_v60, 0.0  ;;  %v14600_v62 = vmul.f32 %v28190_v35, %v30304_v20 }
 0x730   :  { %v14911_v39 = vpack.c.bf16 %v14825_v13, %v14823_v8  ;;  %v14755_v44 = vadd.f32 %v28141_v57, %v30305_v45  ;;  %v14757_v9 = vadd.f32 %v28141_v57, %v30306_v27  ;;  %v14914_v6 = vpack.c.bf16 %v14830_v51, %v14828_v33 }
 0x731   :  { %v14760_v40 = vadd.f32 %v28154_v11, %v28409_v1  ;;  %v14762_v31 = vadd.f32 %v28154_v11, %v28419_v12  ;;  %v14929_v22 = vpack.c.bf16 %v14861_v38, %v14859_v36  ;;  %v14676_v3 = vmul.f32 %v30307_v43, %v14593_v52 }
 0x732   :  { %15124 = vmatmul.mubr.bf16.gmra.mrb[128].mxu1 %v14911_v39  ;;  %v14678_v8 = vmul.f32 %v30307_v43, %v14595_v41  ;;  %v14827_v13 = vmax.f32 %v14755_v44, 0.0  ;;  %v14829_v24 = vmax.f32 %v14757_v9, 0.0  ;;  %v14681_v54 = vmul.f32 %v28147_v53, %v14598_v63 }
 0x733   :  { %15131 = vmatprep.mubr.bf16.mxu1 %v14914_v6  ;;  %v14683_v47 = vmul.f32 %v28147_v53, %v14600_v62  ;;  %v14832_v33 = vmax.f32 %v14760_v40, 0.0  ;;  %v14834_v51 = vmax.f32 %v14762_v31, 0.0  ;;  %v14597_v1 = vmul.f32 %v30301_v49, %v30308_v26 }
 0x734   :  { %v14599_v12 = vmul.f32 %v30301_v49, %v30309_v37  ;;  %v14602_v50 = vmul.f32 %v28190_v35, %v30310_v18  ;;  %v14913_v21 = vpack.c.bf16 %v14829_v24, %v14827_v13  ;;  %v14759_v30 = vadd.f32 %v28141_v57, %v14676_v3 }
 0x735   :  { %v14761_v48 = vadd.f32 %v28141_v57, %v14678_v8  ;;  %v14604_v61 = vmul.f32 %v28190_v35, %v30311_v32  ;;  %v14916_v55 = vpack.c.bf16 %v14834_v51, %v14832_v33  ;;  %v14764_v58 = vadd.f32 %v28154_v11, %v14681_v54 }
 0x736   :  { %v14766_v19 = vadd.f32 %v28154_v11, %v14683_v47  ;;  %v14680_v5 = vmul.f32 %v30307_v43, %v14597_v1  ;;  %v14682_v2 = vmul.f32 %v30307_v43, %v14599_v12  ;;  %v14831_v15 = vmax.f32 %v14759_v30, 0.0 }
 0x737   :  { %v14833_v14 = vmax.f32 %v14761_v48, 0.0  ;;  %v14685_v7 = vmul.f32 %v28147_v53, %v14602_v50  ;;  %v14687_v17 = vmul.f32 %v28147_v53, %v14604_v61  ;;  %v14836_v60 = vmax.f32 %v14764_v58, 0.0 }
 0x738   :  { %v14838_v46 = vmax.f32 %v14766_v19, 0.0  ;;  %v14763_v49 = vadd.f32 %v28141_v57, %v14680_v5  ;;  %v14765_v52 = vadd.f32 %v28141_v57, %v14682_v2 }
 0x739   :  { %v14915_v35 = vpack.c.bf16 %v14833_v14, %v14831_v15  ;;  %v14768_v23 = vadd.f32 %v28154_v11, %v14685_v7  ;;  %v14770_v41 = vadd.f32 %v28154_v11, %v14687_v17 }
 0x73a   :  { %15132 = vmatmul.mubr.bf16.gmra.mrb[132].mxu1 %v14913_v21  ;;  %v14918_v36 = vpack.c.bf16 %v14838_v46, %v14836_v60  ;;  %v14835_v28 = vmax.f32 %v14763_v49, 0.0  ;;  %v14837_v63 = vmax.f32 %v14765_v52, 0.0 }
 0x73b   :  { %15139 = vmatprep.mubr.bf16.mxu1 %v14916_v55  ;;  %v14840_v38 = vmax.f32 %v14768_v23, 0.0  ;;  %v14842_v20 = vmax.f32 %v14770_v41, 0.0 }
 0x73c   :  { %v14917_v62 = vpack.c.bf16 %v14837_v63, %v14835_v28 }
 0x73d   :  { %v14920_v53 = vpack.c.bf16 %v14842_v20, %v14840_v38 }
 0x742   :  { %15140 = vmatmul.mubr.bf16.gmra.mrb[136].mxu1 %v14915_v35 }
 0x743   :  { %15147 = vmatprep.mubr.bf16.mxu1 %v14918_v36 }
 0x74a   :  { %15148 = vmatmul.mubr.bf16.gmra.mrb[140].mxu1 %v14917_v62 }
 0x74b   :  { %15155 = vmatprep.mubr.bf16.mxu1 %v14920_v53 }
 0x752   :  { %15156 = vmatmul.mubr.bf16.gmra.mrb[144].mxu1 %v28442_v10 }
 0x753   :  { %15163 = vmatprep.mubr.bf16.mxu1 %v28450_v0 }
 0x75a   :  { %15164 = vmatmul.mubr.bf16.gmra.mrb[148].mxu1 %v28456_v59 }
 0x75b   :  { %15171 = vmatprep.mubr.bf16.mxu1 %v28460_v16 }
 0x762   :  { %15172 = vmatmul.mubr.bf16.gmra.mrb[152].mxu1 %v28464_v25 }
 0x763   :  { %15179 = vmatprep.mubr.bf16.mxu1 %v28470_v4 }
 0x76a   :  { %15180 = vmatmul.mubr.bf16.gmra.mrb[156].mxu1 %v28480_v42 }
 0x76b   :  { %15187 = vmatprep.mubr.bf16.mxu1 %v28484_v56 }
 0x772   :  { %15188 = vmatmul.mubr.bf16.gmra.mrb[160].mxu1 %v28490_v29 }
 0x773   :  { %15195 = vmatprep.mubr.bf16.mxu1 %v28496_v34 }
 0x77a   :  { %15196 = vmatmul.mubr.bf16.gmra.mrb[164].mxu1 %v14929_v22 }
 0x7e5   :  { %v28548_v57 = vpop.f32.mrb[144].mxu0  ;;  %v28550_v11 = vpop.f32.mrb[112].mxu1 }
 0x7e6   :  { %v15063_v10 = vpop.f32.mrb[145].mxu0  ;;  %v15095_v0 = vpop.f32.mrb[113].mxu1  ;;  %v15207_v25 = vsel %vm15206_vm0, %v28548_v57, 0.0  ;;  %v15222_v14 = vsel %vm15206_vm0, %v28550_v11, 0.0 }
 0x7e7   :  { %v28552_v59 = vpop.f32.mrb[146].mxu0  ;;  %v28554_v16 = vpop.f32.mrb[114].mxu1 }
 0x7e8   :  { %v15208_v4 = vsel %vm15206_vm0, %v28552_v59, 0.0  ;;  %v15066_v42 = vpop.f32.mrb[147].mxu0  ;;  %v15098_v56 = vpop.f32.mrb[115].mxu1  ;;  %v15224_v17 = vsel %vm15206_vm0, %v28554_v16, 0.0 }
 0x7e9   :  { %v15209_v29 = vadd.f32 %v15208_v4, %v15207_v25 }
 0x7ed   :  { %v28560_v34 = vpop.f32.mrb[148].mxu0  ;;  %v28562_v39 = vpop.f32.mrb[116].mxu1 }
 0x7ee   :  { %v15210_v45 = vsel %vm15206_vm0, %v28560_v34, 0.0  ;;  %v15071_v44 = vpop.f32.mrb[149].mxu0  ;;  %v15103_v27 = vpop.f32.mrb[117].mxu1  ;;  %v15226_v35 = vsel %vm15206_vm0, %v28562_v39, 0.0 }
 0x7ef   :  { %v15211_v9 = vadd.f32 %v15210_v45, %v15209_v29  ;;  %v28566_v6 = vpop.f32.mrb[150].mxu0  ;;  %v28568_v40 = vpop.f32.mrb[118].mxu1 }
 0x7f0   :  { %v15212_v31 = vsel %vm15206_vm0, %v28566_v6, 0.0  ;;  %v15074_v22 = vpop.f32.mrb[151].mxu0  ;;  %v15106_v43 = vpop.f32.mrb[119].mxu1  ;;  %v15228_v23 = vsel %vm15206_vm0, %v28568_v40, 0.0 }
 0x7f1   :  { %v15213_v3 = vadd.f32 %v15212_v31, %v15211_v9 }
 0x7f5   :  { %v28572_v8 = vpop.f32.mrb[152].mxu0  ;;  %v28574_v13 = vpop.f32.mrb[120].mxu1 }
 0x7f6   :  { %v15214_v24 = vsel %vm15206_vm0, %v28572_v8, 0.0  ;;  %v15079_v54 = vpop.f32.mrb[153].mxu0  ;;  %v15111_v47 = vpop.f32.mrb[121].mxu1  ;;  %v15230_v63 = vsel %vm15206_vm0, %v28574_v13, 0.0 }
 0x7f7   :  { %v15215_v33 = vadd.f32 %v15214_v24, %v15213_v3  ;;  %v28578_v51 = vpop.f32.mrb[154].mxu0  ;;  %v28580_v26 = vpop.f32.mrb[122].mxu1 }
 0x7f8   :  { %v15216_v1 = vsel %vm15206_vm0, %v28578_v51, 0.0  ;;  %v15082_v37 = vpop.f32.mrb[155].mxu0  ;;  %v15114_v12 = vpop.f32.mrb[123].mxu1  ;;  %v15232_v20 = vsel %vm15206_vm0, %v28580_v26, 0.0 }
 0x7f9   :  { %v15217_v18 = vadd.f32 %v15216_v1, %v15215_v33 }
 0x7fd   :  { %v28584_v50 = vpop.f32.mrb[156].mxu0  ;;  %v28586_v21 = vpop.f32.mrb[124].mxu1 }
 0x7fe   :  { %v15218_v30 = vsel %vm15206_vm0, %v28584_v50, 0.0  ;;  %v15087_v48 = vpop.f32.mrb[157].mxu0  ;;  %v15119_v32 = vpop.f32.mrb[125].mxu1  ;;  %v15234_v10 = vsel %vm15206_vm0, %v28586_v21, 0.0 }
 0x7ff   :  { %v15219_v61 = vadd.f32 %v15218_v30, %v15217_v18  ;;  %v28590_v55 = vpop.f32.mrb[158].mxu0  ;;  %v28592_v58 = vpop.f32.mrb[126].mxu1 }
 0x800   :  { %v15220_v19 = vsel %vm15206_vm0, %v28590_v55, 0.0  ;;  %v15090_v5 = vpop.f32.mrb[159].mxu0  ;;  %v15122_v2 = vpop.f32.mrb[127].mxu1  ;;  %v15236_v42 = vsel %vm15206_vm0, %v28592_v58, 0.0 }
 0x801   :  { %v15221_v15 = vadd.f32 %v15220_v19, %v15219_v61 }
 0x803   :  { %v15223_v7 = vadd.f32 %v15222_v14, %v15221_v15 }
 0x805   :  { %v15225_v60 = vadd.f32 %v15224_v17, %v15223_v7  ;;  %v28600_v46 = vpop.f32.mrb[128].mxu1 }
 0x806   :  { %v15127_v49 = vpop.f32.mrb[129].mxu1  ;;  %v15238_v45 = vsel %vm15206_vm0, %v28600_v46, 0.0 }
 0x807   :  { %v15227_v52 = vadd.f32 %v15226_v35, %v15225_v60  ;;  %v28604_v36 = vpop.f32.mrb[130].mxu1 }
 0x808   :  { %v15130_v41 = vpop.f32.mrb[131].mxu1  ;;  %v15240_v27 = vsel %vm15206_vm0, %v28604_v36, 0.0 }
 0x809   :  { %v15229_v28 = vadd.f32 %v15228_v23, %v15227_v52 }
 0x80b   :  { %v15231_v38 = vadd.f32 %v15230_v63, %v15229_v28 }
 0x80d   :  { %v15233_v62 = vadd.f32 %v15232_v20, %v15231_v38  ;;  %v28612_v53 = vpop.f32.mrb[132].mxu1 }
 0x80e   :  { %v15135_v0 = vpop.f32.mrb[133].mxu1  ;;  %v15242_v22 = vsel %vm15206_vm0, %v28612_v53, 0.0 }
 0x80f   :  { %v15235_v25 = vadd.f32 %v15234_v10, %v15233_v62  ;;  %v28616_v4 = vpop.f32.mrb[134].mxu1 }
 0x810   :  { %v15138_v56 = vpop.f32.mrb[135].mxu1  ;;  %v15244_v54 = vsel %vm15206_vm0, %v28616_v4, 0.0 }
 0x811   :  { %v15237_v29 = vadd.f32 %v15236_v42, %v15235_v25 }
 0x813   :  { %v15239_v44 = vadd.f32 %v15238_v45, %v15237_v29 }
 0x815   :  { %v15241_v9 = vadd.f32 %v15240_v27, %v15239_v44  ;;  %v28624_v31 = vpop.f32.mrb[136].mxu1 }
 0x816   :  { %v15143_v43 = vpop.f32.mrb[137].mxu1  ;;  %v15246_v1 = vsel %vm15206_vm0, %v28624_v31, 0.0 }
 0x817   :  { %v15243_v3 = vadd.f32 %v15242_v22, %v15241_v9  ;;  %v28628_v24 = vpop.f32.mrb[138].mxu1 }
 0x818   :  { %v15146_v47 = vpop.f32.mrb[139].mxu1  ;;  %v15248_v12 = vsel %vm15206_vm0, %v28628_v24, 0.0 }
 0x819   :  { %v15245_v33 = vadd.f32 %v15244_v54, %v15243_v3 }
 0x81b   :  { %v15247_v37 = vadd.f32 %v15246_v1, %v15245_v33 }
 0x81d   :  { %v15249_v18 = vadd.f32 %v15248_v12, %v15247_v37  ;;  %v28636_v30 = vpop.f32.mrb[140].mxu1 }
 0x81e   :  { %v15250_v48 = vsel %vm15206_vm0, %v28636_v30, 0.0  ;;  %v15151_v32 = vpop.f32.mrb[141].mxu1 }
 0x81f   :  { %v15251_v61 = vadd.f32 %v15250_v48, %v15249_v18  ;;  %v28640_v19 = vpop.f32.mrb[142].mxu1 }
 0x820   :  { %v15252_v5 = vsel %vm15206_vm0, %v28640_v19, 0.0  ;;  %v15154_v2 = vpop.f32.mrb[143].mxu1 }
 0x821   :  { %v15253_v15 = vadd.f32 %v15252_v5, %v15251_v61 }
 0x825   :  { %v28644_v14 = vpop.f32.mrb[144].mxu1 }
 0x826   :  { %v15254_v7 = vsel %vm15206_vm0, %v28644_v14, 0.0  ;;  %v15159_v17 = vpop.f32.mrb[145].mxu1 }
 0x827   :  { %v15255_v60 = vadd.f32 %v15254_v7, %v15253_v15  ;;  %v28648_v35 = vpop.f32.mrb[146].mxu1 }
 0x828   :  { %v15256_v49 = vsel %vm15206_vm0, %v28648_v35, 0.0  ;;  %v15162_v52 = vpop.f32.mrb[147].mxu1 }
 0x829   :  { %v15257_v23 = vadd.f32 %v15256_v49, %v15255_v60 }
 0x82d   :  { %v28652_v41 = vpop.f32.mrb[148].mxu1 }
 0x82e   :  { %v15258_v28 = vsel %vm15206_vm0, %v28652_v41, 0.0  ;;  %v15167_v63 = vpop.f32.mrb[149].mxu1 }
 0x82f   :  { %v15259_v38 = vadd.f32 %v15258_v28, %v15257_v23  ;;  %v28656_v20 = vpop.f32.mrb[150].mxu1 }
 0x830   :  { %v15260_v62 = vsel %vm15206_vm0, %v28656_v20, 0.0  ;;  %v15170_v10 = vpop.f32.mrb[151].mxu1 }
 0x831   :  { %v15261_v0 = vadd.f32 %v15260_v62, %v15259_v38 }
 0x835   :  { %v28660_v25 = vpop.f32.mrb[152].mxu1 }
 0x836   :  { %v15262_v42 = vsel %vm15206_vm0, %v28660_v25, 0.0  ;;  %v15175_v56 = vpop.f32.mrb[153].mxu1 }
 0x837   :  { %v15263_v29 = vadd.f32 %v15262_v42, %v15261_v0  ;;  %v28664_v45 = vpop.f32.mrb[154].mxu1 }
 0x838   :  { %v15264_v44 = vsel %vm15206_vm0, %v28664_v45, 0.0  ;;  %v15178_v27 = vpop.f32.mrb[155].mxu1 }
 0x839   :  { %v15265_v9 = vadd.f32 %v15264_v44, %v15263_v29 }
 0x83d   :  { %v15181_v22 = vpop.f32.mrb[156].mxu1 }
 0x83e   :  { %v15266_v43 = vsel %vm15206_vm0, %v15181_v22, 0.0  ;;  %v15183_v3 = vpop.f32.mrb[157].mxu1 }
 0x83f   :  { %v15267_v54 = vadd.f32 %v15266_v43, %v15265_v9  ;;  %v15184_v47 = vpop.f32.mrb[158].mxu1 }
 0x840   :  { %v15268_v33 = vsel %vm15206_vm0, %v15184_v47, 0.0  ;;  %v15186_v1 = vpop.f32.mrb[159].mxu1 }
 0x841   :  { %v15269_v37 = vadd.f32 %v15268_v33, %v15267_v54 }
 0x845   :  { %v15189_v12 = vpop.f32.mrb[160].mxu1 }
 0x846   :  { %v15270_v18 = vsel %vm15206_vm0, %v15189_v12, 0.0  ;;  %v15191_v48 = vpop.f32.mrb[161].mxu1 }
 0x847   :  { %v15271_v32 = vadd.f32 %v15270_v18, %v15269_v37  ;;  %v15192_v61 = vpop.f32.mrb[162].mxu1 }
 0x848   :  { %v15272_v5 = vsel %vm15206_vm0, %v15192_v61, 0.0  ;;  %v15194_v2 = vpop.f32.mrb[163].mxu1 }
 0x849   :  { %v15273_v15 = vadd.f32 %v15272_v5, %v15271_v32 }
 0x84d   :  { %v15197_v7 = vpop.f32.mrb[164].mxu1 }
 0x84e   :  { %v15274_v17 = vsel %vm15206_vm0, %v15197_v7, 0.0  ;;  %v15199_v60 = vpop.f32.mrb[165].mxu1 }
 0x84f   :  { %v15275_v49 = vadd.f32 %v15274_v17, %v15273_v15  ;;  %v15200_v52 = vpop.f32.mrb[166].mxu1 }
 0x850   :  { %v15276_v23 = vsel %vm15206_vm0, %v15200_v52, 0.0  ;;  %v15202_v28 = vpop.f32.mrb[167].mxu1 }
 0x851   :  { %v15277_v63 = vadd.f32 %v15276_v23, %v15275_v49 }
 0x853   :  { %v15278_v38 = vrot.slane %v15277_v63, 4 }
 0x855   :  { %v15279_v62 = vadd.f32 %v15278_v38, %v15277_v63 }
 0x857   :  { %v15280_v10 = vrot.slane %v15279_v62, 2 }
 0x859   :  { %v15281_v0 = vadd.f32 %v15280_v10, %v15279_v62 }
 0x85b   :  { %v15282_v42 = vrot.slane %v15281_v0, 1 }
 0x85d   :  { %v15283_v56 = vadd.f32 %v15282_v42, %v15281_v0 }
 0x85f   :  { %v15284_v29 = vmul.f32 0.0034722222, %v15283_v56 }
 0x861   :  { %v28675_v44 = vsub.f32 %v28548_v57, %v15284_v29  ;;  %v28678_v27 = vsub.f32 %v28552_v59, %v15284_v29  ;;  %v28681_v9 = vsub.f32 %v28560_v34, %v15284_v29  ;;  %v28684_v43 = vsub.f32 %v28566_v6, %v15284_v29 }
 0x862   :  { %v28687_v3 = vsub.f32 %v28572_v8, %v15284_v29  ;;  %v28690_v54 = vsub.f32 %v28578_v51, %v15284_v29  ;;  %v28693_v33 = vsub.f32 %v28584_v50, %v15284_v29  ;;  %v28696_v57 = vsub.f32 %v28590_v55, %v15284_v29 }
 0x863   :  { %v28699_v59 = vsub.f32 %v28550_v11, %v15284_v29  ;;  %v28702_v34 = vsub.f32 %v28554_v16, %v15284_v29  ;;  %v28705_v6 = vsub.f32 %v28562_v39, %v15284_v29  ;;  %v28708_v8 = vsub.f32 %v28568_v40, %v15284_v29 }
 0x864   :  { %v28711_v51 = vsub.f32 %v28574_v13, %v15284_v29  ;;  %v28714_v50 = vsub.f32 %v28580_v26, %v15284_v29  ;;  %v28717_v55 = vsub.f32 %v28586_v21, %v15284_v29  ;;  %v28720_v11 = vsub.f32 %v28592_v58, %v15284_v29 }
 0x865   :  { %v28723_v16 = vsub.f32 %v28600_v46, %v15284_v29  ;;  %v28726_v39 = vsub.f32 %v28604_v36, %v15284_v29  ;;  %v28729_v40 = vsub.f32 %v28612_v53, %v15284_v29  ;;  %v28732_v13 = vsub.f32 %v28616_v4, %v15284_v29 }
 0x866   :  { %v28735_v26 = vsub.f32 %v28624_v31, %v15284_v29  ;;  %v28738_v21 = vsub.f32 %v28628_v24, %v15284_v29  ;;  %v28741_v58 = vsub.f32 %v28636_v30, %v15284_v29  ;;  %v28744_v46 = vsub.f32 %v28640_v19, %v15284_v29 }
 0x867   :  { %v28747_v36 = vsub.f32 %v28644_v14, %v15284_v29  ;;  %v28750_v53 = vsub.f32 %v28648_v35, %v15284_v29  ;;  %v28753_v4 = vsub.f32 %v28652_v41, %v15284_v29  ;;  %v28756_v31 = vsub.f32 %v28656_v20, %v15284_v29 }
 0x868   :  { %v28759_v24 = vsub.f32 %v28660_v25, %v15284_v29  ;;  %v28762_v30 = vsub.f32 %v28664_v45, %v15284_v29  ;;  %v28764_v19 = vsub.f32 %v15181_v22, %v15284_v29  ;;  %v28766_v1 = vsub.f32 %v15184_v47, %v15284_v29 }
 0x869   :  { %v28768_v14 = vsub.f32 %v15189_v12, %v15284_v29  ;;  %v28770_v35 = vsub.f32 %v15192_v61, %v15284_v29  ;;  %v28772_v37 = vsub.f32 %v15197_v7, %v15284_v29  ;;  %v28774_v41 = vsub.f32 %v15200_v52, %v15284_v29 }
 0x86a   :  { %v15321_v20 = vmul.f32 %v28675_v44, %v28675_v44  ;;  %v15322_v25 = vmul.f32 %v28678_v27, %v28678_v27  ;;  %v15323_v45 = vmul.f32 %v28681_v9, %v28681_v9  ;;  %v15324_v22 = vmul.f32 %v28684_v43, %v28684_v43 }
 0x86b   :  { %v15325_v48 = vmul.f32 %v28687_v3, %v28687_v3  ;;  %v15326_v5 = vmul.f32 %v28690_v54, %v28690_v54  ;;  %v15327_v7 = vmul.f32 %v28693_v33, %v28693_v33  ;;  %v15328_v49 = vmul.f32 %v28696_v57, %v28696_v57 }
 0x86c   :  { %v15357_v47 = vsel %vm15206_vm0, %v15321_v20, 0.0  ;;  %v15358_v12 = vsel %vm15206_vm0, %v15322_v25, 0.0  ;;  %v15360_v32 = vsel %vm15206_vm0, %v15323_v45, 0.0  ;;  %v15362_v2 = vsel %vm15206_vm0, %v15324_v22, 0.0 }
 0x86d   :  { %v15359_v18 = vadd.f32 %v15358_v12, %v15357_v47  ;;  %v15364_v17 = vsel %vm15206_vm0, %v15325_v48, 0.0  ;;  %v15366_v52 = vsel %vm15206_vm0, %v15326_v5, 0.0  ;;  %v15329_v28 = vmul.f32 %v28699_v59, %v28699_v59  ;;  %v20925_v48 = vld [vmem:[%s29223_s17 + $0x4] ss:$8 sps:$4 sm:$0xff]   ;;  %v20928_v5 = vld [vmem:[%s29223_s17 + $0x14] ss:$8 sps:$4 sm:$0xff]  }
 0x86e   :  { %v15368_v63 = vsel %vm15206_vm0, %v15327_v7, 0.0  ;;  %v15330_v62 = vmul.f32 %v28702_v34, %v28702_v34  ;;  %v15370_v10 = vsel %vm15206_vm0, %v15328_v49, 0.0  ;;  %v15331_v42 = vmul.f32 %v28705_v6, %v28705_v6  ;;  %15774 = vmatprep.subr.bf16.mxu1 %v20925_v48  ;;  %v20931_v49 = vld [vmem:[%s29223_s17 + $0x24] ss:$8 sps:$4 sm:$0xff]  }
 0x86f   :  { %v15361_v61 = vadd.f32 %v15360_v32, %v15359_v18  ;;  %v15372_v56 = vsel %vm15206_vm0, %v15329_v28, 0.0  ;;  %v15332_v20 = vmul.f32 %v28708_v8, %v28708_v8  ;;  %v15333_v22 = vmul.f32 %v28711_v51, %v28711_v51  ;;  %v20923_v18 = vld [vmem:[%s29223_s17] ss:$8 sps:$4 sm:$0xff]  }
 0x870   :  { %v15374_v25 = vsel %vm15206_vm0, %v15330_v62, 0.0  ;;  %v15376_v47 = vsel %vm15206_vm0, %v15331_v42, 0.0  ;;  %v15334_v32 = vmul.f32 %v28714_v50, %v28714_v50  ;;  %15775 = vmatpush1.bf16.msra.mxu1 %v20923_v18  ;;  %v20929_v62 = vld [vmem:[%s29223_s17 + $0x20] ss:$8 sps:$4 sm:$0xff]   ;;  %v15338_v42 = vmul.f32 %v28726_v39, %v28726_v39 }
 0x871   :  { %v15363_v15 = vadd.f32 %v15362_v2, %v15361_v61  ;;  %v15378_v61 = vsel %vm15206_vm0, %v15332_v20, 0.0  ;;  %v15380_v7 = vsel %vm15206_vm0, %v15333_v22, 0.0  ;;  %15776 = vmatprep.subr.bf16.mxu1 %v20928_v5  ;;  %v15339_v20 = vmul.f32 %v28729_v40, %v28729_v40  ;;  %v20935_v5 = vld [vmem:[%s29223_s17 + $0x40] ss:$8 sps:$4 sm:$0xff]  }
 0x872   :  { %v15390_v18 = vsel %vm15206_vm0, %v15338_v42, 0.0 }
 0x873   :  { %v15365_v60 = vadd.f32 %v15364_v17, %v15363_v15  ;;  %v15335_v15 = vmul.f32 %v28717_v55, %v28717_v55  ;;  %v20926_v17 = vld [vmem:[%s29223_s17 + $0x10] ss:$8 sps:$4 sm:$0xff]  }
 0x874   :  { %15777 = vmatpush1.bf16.msra.mxu1 %v20926_v17 }
 0x875   :  { %v15367_v23 = vadd.f32 %v15366_v52, %v15365_v60  ;;  %v15336_v52 = vmul.f32 %v28720_v11, %v28720_v11  ;;  %15778 = vmatprep.subr.bf16.mxu1 %v20931_v49  ;;  %v15343_v49 = vmul.f32 %v28741_v58, %v28741_v58 }
 0x877   :  { %v15369_v38 = vadd.f32 %v15368_v63, %v15367_v23  ;;  %v15382_v23 = vsel %vm15206_vm0, %v15334_v32, 0.0  ;;  %v15337_v63 = vmul.f32 %v28723_v16, %v28723_v16  ;;  %v15341_v32 = vmul.f32 %v28735_v26, %v28735_v26 }
 0x878   :  { %15779 = vmatpush1.bf16.msra.mxu1 %v20929_v62  ;;  %v15400_v42 = vsel %vm15206_vm0, %v15343_v49, 0.0 }
 0x879   :  { %v15371_v0 = vadd.f32 %v15370_v10, %v15369_v38  ;;  %v15384_v38 = vsel %vm15206_vm0, %v15335_v15, 0.0  ;;  %v20940_v15 = vld [vmem:[%s29223_s17 + $0x54] ss:$8 sps:$4 sm:$0xff]  }
 0x87b   :  { %v15373_v29 = vadd.f32 %v15372_v56, %v15371_v0  ;;  %v20934_v0 = vld [vmem:[%s29223_s17 + $0x34] ss:$8 sps:$4 sm:$0xff]   ;;  %v15386_v56 = vsel %vm15206_vm0, %v15336_v52, 0.0  ;;  %v15396_v52 = vsel %vm15206_vm0, %v15341_v32, 0.0  ;;  %v15348_v32 = vmul.f32 %v28756_v31, %v28756_v31 }
 0x87c   :  { %15780 = vmatprep.subr.bf16.mxu1 %v20934_v0  ;;  %v15345_v0 = vmul.f32 %v28747_v36, %v28747_v36 }
 0x87d   :  { %v15375_v45 = vadd.f32 %v15374_v25, %v15373_v29  ;;  %v15388_v25 = vsel %vm15206_vm0, %v15337_v63, 0.0  ;;  %v20943_v63 = vld [vmem:[%s29223_s17 + $0x64] ss:$8 sps:$4 sm:$0xff]  }
 0x87f   :  { %v15377_v12 = vadd.f32 %v15376_v47, %v15375_v45  ;;  %v20932_v45 = vld [vmem:[%s29223_s17 + $0x30] ss:$8 sps:$4 sm:$0xff]   ;;  %v20937_v47 = vld [vmem:[%s29223_s17 + $0x44] ss:$8 sps:$4 sm:$0xff]  }
 0x880   :  { %15781 = vmatpush1.bf16.msra.mxu1 %v20932_v45 }
 0x881   :  { %v15379_v2 = vadd.f32 %v15378_v61, %v15377_v12  ;;  %v15340_v12 = vmul.f32 %v28732_v13, %v28732_v13  ;;  %v15392_v61 = vsel %vm15206_vm0, %v15339_v20, 0.0  ;;  %15782 = vmatprep.subr.bf16.mxu1 %v20937_v47  ;;  %v20946_v20 = vld [vmem:[%s29223_s17 + $0x74] ss:$8 sps:$4 sm:$0xff]   ;;  %v15347_v47 = vmul.f32 %v28753_v4, %v28753_v4 }
 0x883   :  { %v15381_v60 = vadd.f32 %v15380_v7, %v15379_v2  ;;  %v15342_v7 = vmul.f32 %v28738_v21, %v28738_v21  ;;  %v15394_v17 = vsel %vm15206_vm0, %v15340_v12, 0.0  ;;  %v15404_v12 = vsel %vm15206_vm0, %v15345_v0, 0.0 }
 0x884   :  { %15783 = vmatpush1.bf16.msra.mxu1 %v20935_v5 }
 0x885   :  { %v15383_v28 = vadd.f32 %v15382_v23, %v15381_v60  ;;  %v20938_v23 = vld [vmem:[%s29223_s17 + $0x50] ss:$8 sps:$4 sm:$0xff]   ;;  %15784 = vmatprep.subr.bf16.mxu1 %v20940_v15  ;;  %v15398_v62 = vsel %vm15206_vm0, %v15342_v7, 0.0  ;;  %v15408_v15 = vsel %vm15206_vm0, %v15347_v47, 0.0  ;;  %v15356_v47 = vmul.f32 %v28774_v41, %v28774_v41 }
 0x887   :  { %v15385_v10 = vadd.f32 %v15384_v38, %v15383_v28  ;;  %v15344_v38 = vmul.f32 %v28744_v46, %v28744_v46 }
 0x888   :  { %15785 = vmatpush1.bf16.msra.mxu1 %v20938_v23 }
 0x889   :  { %v15387_v29 = vadd.f32 %v15386_v56, %v15385_v10  ;;  %v20941_v56 = vld [vmem:[%s29223_s17 + $0x60] ss:$8 sps:$4 sm:$0xff]   ;;  %15786 = vmatprep.subr.bf16.mxu1 %v20943_v63  ;;  %v15402_v45 = vsel %vm15206_vm0, %v15344_v38, 0.0  ;;  %v15352_v63 = vmul.f32 %v28766_v1, %v28766_v1 }
 0x88b   :  { %v15389_v22 = vadd.f32 %v15388_v25, %v15387_v29  ;;  %v15346_v25 = vmul.f32 %v28750_v53, %v28750_v53 }
 0x88c   :  { %15787 = vmatpush1.bf16.msra.mxu1 %v20941_v56  ;;  %v15354_v56 = vmul.f32 %v28770_v35, %v28770_v35 }
 0x88d   :  { %v15391_v48 = vadd.f32 %v15390_v18, %v15389_v22  ;;  %v20944_v18 = vld [vmem:[%s29223_s17 + $0x70] ss:$8 sps:$4 sm:$0xff]   ;;  %15788 = vmatprep.subr.bf16.mxu1 %v20946_v20 }
 0x88f   :  { %v15393_v2 = vadd.f32 %v15392_v61, %v15391_v48  ;;  %v15406_v61 = vsel %vm15206_vm0, %v15346_v25, 0.0  ;;  %v15355_v25 = vmul.f32 %v28772_v37, %v28772_v37 }
 0x890   :  { %15789 = vmatpush1.bf16.msra.mxu1 %v20944_v18 }
 0x891   :  { %v15395_v60 = vadd.f32 %v15394_v17, %v15393_v2  ;;  %v15349_v2 = vmul.f32 %v28759_v24, %v28759_v24  ;;  %v15350_v17 = vmul.f32 %v28762_v30, %v28762_v30 }
 0x893   :  { %v15397_v28 = vadd.f32 %v15396_v52, %v15395_v60  ;;  %v15410_v60 = vsel %vm15206_vm0, %v15348_v32, 0.0  ;;  %v15351_v52 = vmul.f32 %v28764_v19, %v28764_v19  ;;  %v15412_v23 = vsel %vm15206_vm0, %v15349_v2, 0.0 }
 0x894   :  { %v15414_v38 = vsel %vm15206_vm0, %v15350_v17, 0.0 }
 0x895   :  { %v15399_v10 = vadd.f32 %v15398_v62, %v15397_v28  ;;  %v15416_v0 = vsel %vm15206_vm0, %v15351_v52, 0.0 }
 0x897   :  { %v15401_v29 = vadd.f32 %v15400_v42, %v15399_v10  ;;  %v15353_v10 = vmul.f32 %v28768_v14, %v28768_v14 }
 0x899   :  { %v15403_v22 = vadd.f32 %v15402_v45, %v15401_v29  ;;  %v15418_v29 = vsel %vm15206_vm0, %v15352_v63, 0.0  ;;  %v15420_v45 = vsel %vm15206_vm0, %v15353_v10, 0.0  ;;  %v28935_v63 = vld [vmem:[%s29212_s6] ss:$0 sm:$0xff] }
 0x89b   :  { %v15405_v48 = vadd.f32 %v15404_v12, %v15403_v22  ;;  %v15422_v12 = vsel %vm15206_vm0, %v15354_v56, 0.0 }
 0x89d   :  { %v15407_v5 = vadd.f32 %v15406_v61, %v15405_v48  ;;  %v15424_v48 = vsel %vm15206_vm0, %v15355_v25, 0.0  ;;  %v15426_v61 = vsel %vm15206_vm0, %v15356_v47, 0.0 }
 0x89f   :  { %v15409_v7 = vadd.f32 %v15408_v15, %v15407_v5 }
 0x8a1   :  { %v15411_v49 = vadd.f32 %v15410_v60, %v15409_v7 }
 0x8a3   :  { %v15413_v28 = vadd.f32 %v15412_v23, %v15411_v49 }
 0x8a5   :  { %v15415_v62 = vadd.f32 %v15414_v38, %v15413_v28 }
 0x8a7   :  { %v15417_v42 = vadd.f32 %v15416_v0, %v15415_v62 }
 0x8a9   :  { %v15419_v20 = vadd.f32 %v15418_v29, %v15417_v42  ;;  %v28944_v42 = vld [vmem:[%s29213_s7] ss:$0 sm:$0xff] }
 0x8ab   :  { %v15421_v22 = vadd.f32 %v15420_v45, %v15419_v20 }
 0x8ad   :  { %v15423_v18 = vadd.f32 %v15422_v12, %v15421_v22 }
 0x8af   :  { %v15425_v32 = vadd.f32 %v15424_v48, %v15423_v18 }
 0x8b1   :  { %v15427_v5 = vadd.f32 %v15426_v61, %v15425_v32 }
 0x8b3   :  { %v15428_v2 = vrot.slane %v15427_v5, 4 }
 0x8b5   :  { %v15429_v15 = vadd.f32 %v15428_v2, %v15427_v5 }
 0x8b7   :  { %v15430_v7 = vrot.slane %v15429_v15, 2 }
 0x8b9   :  { %v15431_v17 = vadd.f32 %v15430_v7, %v15429_v15 }
 0x8bb   :  { %v15432_v60 = vrot.slane %v15431_v17, 1 }
 0x8bd   :  { %v15433_v49 = vadd.f32 %v15432_v60, %v15431_v17 }
 0x8bf   :  { %v15434_v52 = vmul.f32 0.0034722222, %v15433_v49 }
 0x8c1   :  { %v15435_v23 = vadd.f32 1e-05, %v15434_v52 }
 0x8c3   :  { %20982 = vrsqrt.f32 %v15435_v23 }
 0x8cd   :  { %v20983_v28 = vpop.eup %20982 }
 0x8ce   :  { %v15472_v38 = vmul.f32 %v20983_v28, %v28774_v41  ;;  %v15437_v62 = vmul.f32 %v20983_v28, %v28675_v44  ;;  %v15438_v10 = vmul.f32 %v20983_v28, %v28678_v27  ;;  %v15439_v0 = vmul.f32 %v20983_v28, %v28681_v9 }
 0x8cf   :  { %v15440_v56 = vmul.f32 %v20983_v28, %v28684_v43  ;;  %v15441_v29 = vmul.f32 %v20983_v28, %v28687_v3  ;;  %v15442_v20 = vmul.f32 %v20983_v28, %v28690_v54  ;;  %v15443_v25 = vmul.f32 %v20983_v28, %v28693_v33 }
 0x8d0   :  { %v15514_v41 = vmul.f32 %v28935_v63, %v15472_v38  ;;  %v15444_v44 = vmul.f32 %v20983_v28, %v28696_v57  ;;  %v15445_v27 = vmul.f32 %v20983_v28, %v28699_v59  ;;  %v15446_v9 = vmul.f32 %v20983_v28, %v28702_v34 }
 0x8d1   :  { %v15447_v45 = vmul.f32 %v20983_v28, %v28705_v6  ;;  %v15448_v22 = vmul.f32 %v20983_v28, %v28708_v8  ;;  %v15449_v43 = vmul.f32 %v20983_v28, %v28711_v51  ;;  %v15450_v3 = vmul.f32 %v20983_v28, %v28714_v50 }
 0x8d2   :  { %v28959_v54 = vadd.f32 %v28944_v42, %v15514_v41  ;;  %v15451_v33 = vmul.f32 %v20983_v28, %v28717_v55  ;;  %v15452_v47 = vmul.f32 %v20983_v28, %v28720_v11  ;;  %v15453_v57 = vmul.f32 %v20983_v28, %v28723_v16 }
 0x8d3   :  { %v15454_v59 = vmul.f32 %v20983_v28, %v28726_v39  ;;  %v15455_v34 = vmul.f32 %v20983_v28, %v28729_v40  ;;  %v15456_v6 = vmul.f32 %v20983_v28, %v28732_v13  ;;  %v15457_v8 = vmul.f32 %v20983_v28, %v28735_v26 }
 0x8d4   :  { %v15592_v51 = vmax.f32 %v28959_v54, 0.0  ;;  %v15458_v50 = vmul.f32 %v20983_v28, %v28738_v21  ;;  %v15459_v12 = vmul.f32 %v20983_v28, %v28741_v58  ;;  %v15460_v55 = vmul.f32 %v20983_v28, %v28744_v46 }
 0x8d5   :  { %v15461_v11 = vmul.f32 %v20983_v28, %v28747_v36  ;;  %v15462_v16 = vmul.f32 %v20983_v28, %v28750_v53  ;;  %v15463_v39 = vmul.f32 %v20983_v28, %v28753_v4  ;;  %v15464_v40 = vmul.f32 %v20983_v28, %v28756_v31 }
 0x8d6   :  { %v15465_v13 = vmul.f32 %v20983_v28, %v28759_v24  ;;  %v15466_v26 = vmul.f32 %v20983_v28, %v28762_v30  ;;  %v15467_v18 = vmul.f32 %v20983_v28, %v28764_v19  ;;  %v15468_v21 = vmul.f32 %v20983_v28, %v28766_v1 }
 0x8d7   :  { %v15469_v58 = vmul.f32 %v20983_v28, %v28768_v14  ;;  %v15470_v46 = vmul.f32 %v20983_v28, %v28770_v35  ;;  %v15471_v36 = vmul.f32 %v20983_v28, %v28772_v37  ;;  %v15479_v53 = vmul.f32 %v28935_v63, %v15437_v62 }
 0x8d8   :  { %v15480_v4 = vmul.f32 %v28935_v63, %v15438_v10  ;;  %v28986_v31 = vmul.f32 %v28935_v63, %v15439_v0  ;;  %v28989_v24 = vmul.f32 %v28935_v63, %v15440_v56  ;;  %v15483_v30 = vmul.f32 %v28935_v63, %v15441_v29 }
 0x8d9   :  { %v15484_v19 = vmul.f32 %v28935_v63, %v15442_v20  ;;  %v15485_v1 = vmul.f32 %v28935_v63, %v15443_v25  ;;  %v15486_v14 = vmul.f32 %v28935_v63, %v15444_v44  ;;  %v28996_v35 = vmul.f32 %v28935_v63, %v15445_v27 }
 0x8da   :  { %v28999_v37 = vmul.f32 %v28935_v63, %v15446_v9  ;;  %v15489_v48 = vmul.f32 %v28935_v63, %v15447_v45  ;;  %v15490_v32 = vmul.f32 %v28935_v63, %v15448_v22  ;;  %v15491_v61 = vmul.f32 %v28935_v63, %v15449_v43 }
 0x8db   :  { %v15492_v5 = vmul.f32 %v28935_v63, %v15450_v3  ;;  %v15493_v2 = vmul.f32 %v28935_v63, %v15451_v33  ;;  %v15494_v15 = vmul.f32 %v28935_v63, %v15452_v47  ;;  %v15495_v7 = vmul.f32 %v28935_v63, %v15453_v57 }
 0x8dc   :  { %v15496_v17 = vmul.f32 %v28935_v63, %v15454_v59  ;;  %v15497_v60 = vmul.f32 %v28935_v63, %v15455_v34  ;;  %v15498_v49 = vmul.f32 %v28935_v63, %v15456_v6  ;;  %v15499_v52 = vmul.f32 %v28935_v63, %v15457_v8 }
 0x8dd   :  { %v15500_v23 = vmul.f32 %v28935_v63, %v15458_v50  ;;  %v15501_v28 = vmul.f32 %v28935_v63, %v15459_v12  ;;  %v15502_v38 = vmul.f32 %v28935_v63, %v15460_v55  ;;  %v15503_v62 = vmul.f32 %v28935_v63, %v15461_v11 }
 0x8de   :  { %v15504_v10 = vmul.f32 %v28935_v63, %v15462_v16  ;;  %v15505_v0 = vmul.f32 %v28935_v63, %v15463_v39  ;;  %v15506_v56 = vmul.f32 %v28935_v63, %v15464_v40  ;;  %v15507_v29 = vmul.f32 %v28935_v63, %v15465_v13 }
 0x8df   :  { %v15508_v20 = vmul.f32 %v28935_v63, %v15466_v26  ;;  %v15509_v25 = vmul.f32 %v28935_v63, %v15467_v18  ;;  %v15510_v41 = vmul.f32 %v28935_v63, %v15468_v21  ;;  %v15511_v44 = vmul.f32 %v28935_v63, %v15469_v58  ;;  %v20947_v21 = vld [vmem:[%s29223_s17 + $0x80] ss:$8 sps:$4 sm:$0xff]   ;;  %v20949_v58 = vld [vmem:[%s29223_s17 + $0x84] ss:$8 sps:$4 sm:$0xff]   ;;  %s21037_s17 = smov 48  }
 0x8e0   :  { %v15512_v27 = vmul.f32 %v28935_v63, %v15470_v46  ;;  %v15513_v9 = vmul.f32 %v28935_v63, %v15471_v36  ;;  %v15533_v45 = vadd.f32 %v28944_v42, %v15491_v61  ;;  %v15534_v22 = vadd.f32 %v28944_v42, %v15492_v5  ;;  %15790 = vmatprep.subr.bf16.mxu1 %v20949_v58 }
 0x8e1   :  { %v15539_v43 = vadd.f32 %v28944_v42, %v15497_v60  ;;  %v15540_v3 = vadd.f32 %v28944_v42, %v15498_v49  ;;  %v29031_v33 = vadd.f32 %v28944_v42, %v15479_v53  ;;  %v29034_v47 = vadd.f32 %v28944_v42, %v15480_v4  ;;  %15791 = vmatpush1.bf16.msra.mxu1 %v20947_v21 }
 0x8e2   :  { %v15569_v57 = vmax.f32 %v15533_v45, 0.0  ;;  %v15570_v59 = vmax.f32 %v15534_v22, 0.0  ;;  %v29037_v34 = vadd.f32 %v28944_v42, %v15483_v30  ;;  %v29040_v63 = vadd.f32 %v28944_v42, %v15484_v19 }
 0x8e3   :  { %v15575_v6 = vmax.f32 %v15539_v43, 0.0  ;;  %v15576_v8 = vmax.f32 %v15540_v3, 0.0  ;;  %v29043_v50 = vadd.f32 %v28944_v42, %v15485_v1  ;;  %v29046_v12 = vadd.f32 %v28944_v42, %v15486_v14 }
 0x8e4   :  { %v15599_v55 = vmax.f32 %v15569_v57, %v15570_v59  ;;  %v29049_v11 = vadd.f32 %v28944_v42, %v15489_v48  ;;  %v29052_v16 = vadd.f32 %v28944_v42, %v15490_v32  ;;  %v15535_v39 = vadd.f32 %v28944_v42, %v15493_v2 }
 0x8e5   :  { %v15602_v40 = vmax.f32 %v15575_v6, %v15576_v8  ;;  %v15536_v13 = vadd.f32 %v28944_v42, %v15494_v15  ;;  %v29057_v26 = vadd.f32 %v28944_v42, %v15495_v7  ;;  %v29060_v18 = vadd.f32 %v28944_v42, %v15496_v17 }
 0x8e6   :  { %v15541_v46 = vadd.f32 %v28944_v42, %v15499_v52  ;;  %v15542_v36 = vadd.f32 %v28944_v42, %v15500_v23  ;;  %v29071_v53 = vadd.f32 %v28944_v42, %v15501_v28  ;;  %v29074_v4 = vadd.f32 %v28944_v42, %v15502_v38 }
 0x8e7   :  { %v15614_v30 = vmax.f32 %v15599_v55, %v15602_v40  ;;  %v15545_v19 = vadd.f32 %v28944_v42, %v15503_v62  ;;  %v15546_v1 = vadd.f32 %v28944_v42, %v15504_v10  ;;  %v29079_v14 = vadd.f32 %v28944_v42, %v15505_v0 }
 0x8e8   :  { %v29082_v48 = vadd.f32 %v28944_v42, %v15506_v56  ;;  %v15549_v32 = vadd.f32 %v28944_v42, %v15507_v29  ;;  %v15550_v61 = vadd.f32 %v28944_v42, %v15508_v20  ;;  %v15551_v5 = vadd.f32 %v28944_v42, %v15509_v25 }
 0x8e9   :  { %15629 = vrot.lane.b32.xlu1 %v15614_v30, %s21037_s17  ;;  %v15552_v2 = vadd.f32 %v28944_v42, %v15510_v41  ;;  %v29089_v15 = vadd.f32 %v28944_v42, %v15511_v44  ;;  %v29092_v7 = vadd.f32 %v28944_v42, %v15512_v27  ;;  %v15555_v17 = vadd.f32 %v28944_v42, %v15513_v9 }
 0x8ea   :  { %v15523_v60 = vadd.f32 %v28944_v42, %v28986_v31  ;;  %v15524_v49 = vadd.f32 %v28944_v42, %v28989_v24  ;;  %v15529_v52 = vadd.f32 %v28944_v42, %v28996_v35  ;;  %v15530_v23 = vadd.f32 %v28944_v42, %v28999_v37 }
 0x8eb   :  { %v15557_v28 = vmax.f32 %v29031_v33, 0.0  ;;  %v15558_v38 = vmax.f32 %v29034_v47, 0.0  ;;  %v15563_v62 = vmax.f32 %v29043_v50, 0.0  ;;  %v15564_v10 = vmax.f32 %v29046_v12, 0.0 }
 0x8ec   :  { %v15559_v0 = vmax.f32 %v15523_v60, 0.0  ;;  %v15560_v56 = vmax.f32 %v15524_v49, 0.0  ;;  %v15565_v31 = vmax.f32 %v15529_v52, 0.0  ;;  %v15566_v29 = vmax.f32 %v15530_v23, 0.0 }
 0x8ed   :  { %v15585_v20 = vmax.f32 %v15549_v32, 0.0  ;;  %v15586_v24 = vmax.f32 %v15550_v61, 0.0  ;;  %v15591_v25 = vmax.f32 %v15555_v17, 0.0  ;;  %v15571_v41 = vmax.f32 %v15535_v39, 0.0 }
 0x8ee   :  { %v15594_v35 = vmax.f32 %v15559_v0, %v15560_v56  ;;  %v15597_v44 = vmax.f32 %v15565_v31, %v15566_v29  ;;  %v15572_v27 = vmax.f32 %v15536_v13, 0.0  ;;  %v15577_v42 = vmax.f32 %v15541_v46, 0.0  ;;  %v20950_v29 = vld [vmem:[%s29216_s10 + $0x40] sm:$0xff]  }
 0x8ef   :  { %v15607_v37 = vmax.f32 %v15585_v20, %v15586_v24  ;;  %v15610_v9 = vmax.f32 %v15591_v25, %v15592_v51  ;;  %v15578_v45 = vmax.f32 %v15542_v36, 0.0  ;;  %v15561_v22 = vmax.f32 %v29037_v34, 0.0  ;;  %v20951_v20 = vld [vmem:[%s29216_s10] sm:$0xff]   ;;  %19876 = vmatprep.subr.bf16.mxu1 %v20950_v29  ;;  %v20952_v24 = vld [vmem:[%s29216_s10 + $0x48] sm:$0xff]  }
 0x8f0   :  { %v15612_v43 = vmax.f32 %v15594_v35, %v15597_v44  ;;  %v15600_v3 = vmax.f32 %v15571_v41, %v15572_v27  ;;  %v15562_v33 = vmax.f32 %v29040_v63, 0.0  ;;  %v15567_v47 = vmax.f32 %v29049_v11, 0.0  ;;  %v20953_v25 = vld [vmem:[%s29216_s10 + $0x8] sm:$0xff]   ;;  %v20954_v41 = vld [vmem:[%s29216_s10 + $0x50] sm:$0xff]   ;;  %v20956_v44 = vld [vmem:[%s29216_s10 + $0x58] sm:$0xff]  }
 0x8f1   :  { %v15619_v57 = vmax.f32 %v15607_v37, %v15610_v9  ;;  %v15603_v59 = vmax.f32 %v15577_v42, %v15578_v45  ;;  %v15568_v6 = vmax.f32 %v29052_v16, 0.0  ;;  %v15581_v8 = vmax.f32 %v15545_v19, 0.0  ;;  %v20955_v35 = vld [vmem:[%s29216_s10 + $0x10] sm:$0xff]   ;;  %v20957_v27 = vld [vmem:[%s29216_s10 + $0x18] sm:$0xff]   ;;  %v20958_v42 = vld [vmem:[%s29216_s10 + $0x60] sm:$0xff]  }
 0x8f2   :  { %15621 = vrot.lane.b32.xlu0 %v15612_v43, %s21038_s5  ;;  %v15595_v50 = vmax.f32 %v15561_v22, %v15562_v33  ;;  %v15582_v12 = vmax.f32 %v15546_v1, 0.0  ;;  %v15587_v54 = vmax.f32 %v15551_v5, 0.0  ;;  %v15588_v51 = vmax.f32 %v15552_v2, 0.0  ;;  %v20959_v37 = vld [vmem:[%s29216_s10 + $0x20] sm:$0xff]   ;;  %v20960_v9 = vld [vmem:[%s29216_s10 + $0x68] sm:$0xff]   ;;  %v20962_v22 = vld [vmem:[%s29216_s10 + $0x70] sm:$0xff]  }
 0x8f3   :  { %v15680_v55 = vpack.c.bf16 %v15619_v57, %v15619_v57  ;;  %v15615_v39 = vmax.f32 %v15600_v3, %v15603_v59  ;;  %v15598_v34 = vmax.f32 %v15567_v47, %v15568_v6  ;;  %v15573_v40 = vmax.f32 %v29057_v26, 0.0  ;;  %v20961_v45 = vld [vmem:[%s29216_s10 + $0x28] sm:$0xff]   ;;  %v20963_v43 = vld [vmem:[%s29216_s10 + $0x30] sm:$0xff]   ;;  %v20964_v3 = vld [vmem:[%s29216_s10 + $0x78] sm:$0xff]  }
 0x8f4   :  { %v15605_v13 = vmax.f32 %v15581_v8, %v15582_v12  ;;  %v15608_v63 = vmax.f32 %v15587_v54, %v15588_v51  ;;  %v15574_v11 = vmax.f32 %v29060_v18, 0.0  ;;  %v15579_v21 = vmax.f32 %v29071_v53, 0.0  ;;  %v20965_v33 = vld [vmem:[%s29216_s10 + $0x38] sm:$0xff]  }
 0x8f5   :  { %17547 = vmatprep.mubr.msk.bf16.mxu1 %vm15206_vm0, %v15680_v55  ;;  %15633 = vrot.lane.b32.xlu1 %v15615_v39, %s21039_s16  ;;  %v15613_v16 = vmax.f32 %v15595_v50, %v15598_v34  ;;  %v15580_v58 = vmax.f32 %v29074_v4, 0.0  ;;  %v15583_v46 = vmax.f32 %v29079_v14, 0.0  ;;  %v15584_v36 = vmax.f32 %v29082_v48, 0.0 }
 0x8f6   :  { %v15617_v30 = vmax.f32 %v15605_v13, %v15608_v63  ;;  %v15601_v19 = vmax.f32 %v15573_v40, %v15574_v11  ;;  %v15589_v26 = vmax.f32 %v29089_v15, 0.0  ;;  %v15590_v1 = vmax.f32 %v29092_v7, 0.0 }
 0x8f7   :  { %15625 = vrot.lane.b32.xlu0 %v15613_v16, %s21040_s3  ;;  %v15604_v18 = vmax.f32 %v15579_v21, %v15580_v58  ;;  %v15606_v53 = vmax.f32 %v15583_v46, %v15584_v36  ;;  %v15596_v32 = vmax.f32 %v15563_v62, %v15564_v10  ;;  %v15593_v61 = vmax.f32 %v15557_v28, %v15558_v38 }
 0x8f8   :  { %v15609_v5 = vmax.f32 %v15589_v26, %v15590_v1 }
 0x8f9   :  { %15641 = vrot.lane.b32.xlu1 %v15617_v30, %s21041_s19  ;;  %v15616_v4 = vmax.f32 %v15601_v19, %v15604_v18  ;;  %v15611_v2 = vmax.f32 %v15593_v61, %v15596_v32 }
 0x8fa   :  { %v15618_v14 = vmax.f32 %v15606_v53, %v15609_v5 }
 0x8fb   :  { %15637 = vrot.lane.b32.xlu0 %v15616_v4, %s21042_s4 }
 0x8ff   :  { %15645 = vrot.lane.b32.xlu0 %v15618_v14, %s21043_s24 }
 0x95b   :  { %v15630_v48 = vpop.permute.xlu1 %15629 }
 0x964   :  { %v15622_v15 = vpop.permute.xlu0 %15621 }
 0x965   :  { %v15648_v17 = vsel %vm15206_vm0, %v15611_v2, %v15622_v15 }
 0x967   :  { %v15634_v7 = vpop.permute.xlu1 %15633 }
 0x969   :  { %v15626_v60 = vpop.permute.xlu0 %15625 }
 0x96a   :  { %v15650_v49 = vsel %vm15649_vm1, %v15648_v17, %v15626_v60 }
 0x96b   :  { %v15652_v52 = vsel %vm15651_vm2, %v15650_v49, %v15630_v48  ;;  %v15642_v38 = vpop.permute.xlu1 %15641  ;;  %v15815_v49 = vld [vmem:[%s29214_s8] sm:$0x3] }
 0x96c   :  { %v15654_v23 = vsel %vm15653_vm3, %v15652_v52, %v15634_v7  ;;  %v15816_v52 = vld [vmem:[%s29215_s9] sm:$0x3] }
 0x96d   :  { %v15638_v28 = vpop.permute.xlu0 %15637 }
 0x96e   :  { %v15656_v62 = vsel %vm15655_vm4, %v15654_v23, %v15638_v28  ;;  %v30312_v23 = vld [vmem:[#allocation102_spill] sm:$0xff] }
 0x96f   :  { %v15658_v0 = vsel %vm15657_vm5, %v15656_v62, %v15642_v38  ;;  %v15860_v28 = vrot.slane %v15815_v49, %v30312_v23  ;;  %v30313_v62 = vld [vmem:[#allocation105_spill] sm:$0xff] }
 0x971   :  { %v15646_v10 = vpop.permute.xlu0 %15645 }
 0x972   :  { %v15660_v56 = vsel %vm15659_vm6, %v15658_v0, %v15646_v10  ;;  %v15864_v10 = vrot.slane %v15815_v49, %v30313_v62 }
 0x973   :  { %v15679_v31 = vpack.c.bf16 %v15660_v56, %v15660_v56 }
 0x975   :  { %15807 = vmatmul.mubr.bf16.vlgmr.msra.gmra.mrb[168].mxu1 %v15679_v31  ;;  %v15873_v31 = vrot.slane %v15816_v52, %v30312_v23 }
 0x976   :  { %19877 = vmatpush3.bf16.msra.mxu1 %v20951_v20  ;;  %v15877_v20 = vrot.slane %v15816_v52, %v30313_v62 }
 0x977   :  { %19878 = vmatprep.subr.bf16.mxu1 %v20952_v24 }
 0x97a   :  { %19879 = vmatpush3.bf16.msra.mxu1 %v20953_v25 }
 0x97b   :  { %19880 = vmatprep.subr.bf16.mxu1 %v20954_v41 }
 0x97e   :  { %19881 = vmatpush3.bf16.msra.mxu1 %v20955_v35 }
 0x97f   :  { %19882 = vmatprep.subr.bf16.mxu1 %v20956_v44 }
 0x982   :  { %19883 = vmatpush3.bf16.msra.mxu1 %v20957_v27 }
 0x983   :  { %19884 = vmatprep.subr.bf16.mxu1 %v20958_v42 }
 0x986   :  { %19885 = vmatpush3.bf16.msra.mxu1 %v20959_v37 }
 0x987   :  { %19886 = vmatprep.subr.bf16.mxu1 %v20960_v9  ;;  %v20966_v9 = vld [vmem:[%s29219_s13] sm:$0xff]  }
 0x98a   :  { %19887 = vmatpush3.bf16.msra.mxu1 %v20961_v45  ;;  %v21044_v45 = vmov 0.0  }
 0x98b   :  { %19888 = vmatprep.subr.bf16.mxu1 %v20962_v22  ;;  %v20967_v22 = vld [vmem:[%s29219_s13 + $0x8] sm:$0xff]  }
 0x98e   :  { %19889 = vmatpush3.bf16.msra.mxu1 %v20963_v43  ;;  %v20968_v43 = vld [vmem:[%s29219_s13 + $0x10] sm:$0xff]  }
 0x98f   :  { %19890 = vmatprep.subr.bf16.mxu1 %v20964_v3  ;;  %v20969_v3 = vld [vmem:[%s29219_s13 + $0x18] sm:$0xff]  }
 0x992   :  { %19891 = vmatpush3.bf16.msra.mxu1 %v20965_v33 }
 0x993   :  { %19903 = vmatprep.subr.bf16.mxu1 %v21044_v45 }
 0xa48   :  { %v15808_v47 = vpop.f32.mrb[168].mxu1 }
 0xa49   :  { %v15817_v57 = vrot.slane %v15808_v47, 4  ;;  %v15810_v59 = vpop.f32.mrb[169].mxu1 }
 0xa4a   :  { %v15823_v6 = vrot.slane %v15810_v59, 4  ;;  %v15812_v8 = vpop.f32.mrb[170].mxu1 }
 0xa4b   :  { %v15818_v50 = vadd.f32 %v15817_v57, %v15808_v47  ;;  %v15813_v12 = vpop.f32.mrb[171].mxu1 }
 0xa4c   :  { %v15824_v54 = vadd.f32 %v15823_v6, %v15810_v59 }
 0xa4d   :  { %v15819_v51 = vrot.slane %v15818_v50, 2 }
 0xa4e   :  { %v15825_v55 = vrot.slane %v15824_v54, 2 }
 0xa4f   :  { %v15820_v39 = vadd.f32 %v15819_v51, %v15818_v50 }
 0xa50   :  { %v15826_v34 = vadd.f32 %v15825_v55, %v15824_v54 }
 0xa51   :  { %v15821_v40 = vrot.slane %v15820_v39, 1 }
 0xa52   :  { %v15827_v13 = vrot.slane %v15826_v34, 1 }
 0xa53   :  { %v15822_v63 = vadd.f32 %v15821_v40, %v15820_v39 }
 0xa54   :  { %v15828_v11 = vadd.f32 %v15827_v13, %v15826_v34 }
 0xa55   :  { %v15830_v21 = vmul.f32 0.125, %v15822_v63 }
 0xa56   :  { %v15831_v16 = vmul.f32 0.125, %v15828_v11 }
 0xa57   :  { %v15832_v58 = vsub.f32 %v15808_v47, %v15830_v21 }
 0xa58   :  { %v15833_v46 = vsub.f32 %v15810_v59, %v15831_v16 }
 0xa59   :  { %v15834_v36 = vmul.f32 %v15832_v58, %v15832_v58 }
 0xa5a   :  { %v15835_v30 = vmul.f32 %v15833_v46, %v15833_v46 }
 0xa5b   :  { %v15836_v19 = vrot.slane %v15834_v36, 4 }
 0xa5c   :  { %v15842_v26 = vrot.slane %v15835_v30, 4 }
 0xa5d   :  { %v15837_v1 = vadd.f32 %v15836_v19, %v15834_v36 }
 0xa5e   :  { %v15843_v18 = vadd.f32 %v15842_v26, %v15835_v30 }
 0xa5f   :  { %v15838_v53 = vrot.slane %v15837_v1, 2 }
 0xa60   :  { %v15844_v32 = vrot.slane %v15843_v18, 2 }
 0xa61   :  { %v15839_v61 = vadd.f32 %v15838_v53, %v15837_v1  ;;  %v17564_v1 = vld [vmem:[%s29217_s11] ss:$0 sm:$0xff] }
 0xa62   :  { %v15845_v5 = vadd.f32 %v15844_v32, %v15843_v18  ;;  %v17565_v53 = vld [vmem:[%s29218_s12] ss:$0 sm:$0xff] }
 0xa63   :  { %v15840_v4 = vrot.slane %v15839_v61, 1 }
 0xa64   :  { %v15846_v2 = vrot.slane %v15845_v5, 1 }
 0xa65   :  { %v15841_v14 = vadd.f32 %v15840_v4, %v15839_v61 }
 0xa66   :  { %v15847_v48 = vadd.f32 %v15846_v2, %v15845_v5  ;;  %v17566_v2 = vld [vmem:[#allocation2] ss:$0 sm:$0xff] }
 0xa67   :  { %v15848_v15 = vmul.f32 0.125, %v15841_v14 }
 0xa68   :  { %v15849_v7 = vmul.f32 0.125, %v15847_v48 }
 0xa69   :  { %v15850_v17 = vadd.f32 1e-05, %v15848_v15 }
 0xa6a   :  { %v15851_v60 = vadd.f32 1e-05, %v15849_v7 }
 0xa6b   :  { %20984 = vrsqrt.f32 %v15850_v17 }
 0xa6c   :  { %20986 = vrsqrt.f32 %v15851_v60 }
 0xa75   :  { %v20985_v38 = vpop.eup %20984 }
 0xa76   :  { %v20987_v0 = vpop.eup %20986  ;;  %v15854_v56 = vmul.f32 %v20985_v38, %v15832_v58 }
 0xa77   :  { %v15855_v29 = vmul.f32 %v20987_v0, %v15833_v46 }
 0xa78   :  { %v15867_v24 = vmul.f32 %v15860_v28, %v15854_v56 }
 0xa79   :  { %v15868_v25 = vmul.f32 %v15864_v10, %v15855_v29 }
 0xa7a   :  { %v15880_v41 = vadd.f32 %v15873_v31, %v15867_v24 }
 0xa7b   :  { %v15881_v35 = vadd.f32 %v15877_v20, %v15868_v25 }
 0xa7c   :  { %v15882_v44 = vmax.f32 %v15880_v41, 0.0 }
 0xa7d   :  { %v15883_v27 = vmax.f32 %v15881_v35, 0.0 }
 0xa7e   :  { %v15916_v37 = vpack.c.bf16 %v15882_v44, %v15882_v44 }
 0xa7f   :  { %v15917_v42 = vpack.c.bf16 %v15883_v27, %v15883_v27 }
 0xa81   :  { %16046 = vmatprep.mubr.bf16.mxu1 %v15917_v42 }
 0xa82   :  { %16047 = vmatmul.mubr.bf16.vlgmr.msra.gmra.mrb[172].mxu1 %v15916_v37 }
 0xa83   :  { %19904 = vmatpush3.bf16.msra.mxu1 %v20966_v9  ;;  %19911 = vmatprep.mubr.msk.bf16.mxu1 %vm21045_vm7, %v21044_v45 }
 0xa84   :  { %19905 = vmatprep.subr.bf16.mxu1 %v21044_v45 }
 0xa87   :  { %19906 = vmatpush3.bf16.msra.mxu1 %v20967_v22 }
 0xa88   :  { %19907 = vmatprep.subr.bf16.mxu1 %v21044_v45 }
 0xa8b   :  { %19908 = vmatpush3.bf16.msra.mxu1 %v20968_v43 }
 0xa8c   :  { %19909 = vmatprep.subr.bf16.mxu1 %v21044_v45 }
 0xa8f   :  { %19910 = vmatpush3.bf16.msra.mxu1 %v20969_v3 }
 0xb55   :  { %v19892_v33 = vpop.f32.mrb[172].mxu1 }
 0xb56   :  { %v19893_v47 = vpop.f32.mrb[173].mxu1 }
 0xb57   :  { %v19894_v57 = vadd.f32 %v19893_v47, %v19892_v33  ;;  %v19895_v59 = vpop.f32.mrb[174].mxu1 }
 0xb58   :  { %v19896_v6 = vpop.f32.mrb[175].mxu1 }
 0xb59   :  { %v16056_v8 = vsel %vm15653_vm3, %v19894_v57, 0.0 }
 0xb5a   :  { %v16057_v50 = vrot.slane %v16056_v8, 4 }
 0xb5c   :  { %v16058_v12 = vadd.f32 %v16057_v50, %v16056_v8 }
 0xb5e   :  { %v16059_v54 = vrot.slane %v16058_v12, 2 }
 0xb60   :  { %v16060_v51 = vadd.f32 %v16059_v54, %v16058_v12 }
 0xb62   :  { %v16061_v55 = vrot.slane %v16060_v51, 1 }
 0xb64   :  { %v16062_v39 = vadd.f32 %v16061_v55, %v16060_v51 }
 0xb66   :  { %v16063_v34 = vmul.f32 0.125, %v16062_v39 }
 0xb68   :  { %v16064_v40 = vsub.f32 %v19894_v57, %v16063_v34 }
 0xb6a   :  { %v16065_v13 = vmul.f32 %v16064_v40, %v16064_v40 }
 0xb6c   :  { %v16066_v63 = vsel %vm15653_vm3, %v16065_v13, 0.0 }
 0xb6d   :  { %v16067_v11 = vrot.slane %v16066_v63, 4 }
 0xb6f   :  { %v16068_v21 = vadd.f32 %v16067_v11, %v16066_v63 }
 0xb71   :  { %v16069_v16 = vrot.slane %v16068_v21, 2 }
 0xb73   :  { %v16070_v58 = vadd.f32 %v16069_v16, %v16068_v21 }
 0xb75   :  { %v16071_v46 = vrot.slane %v16070_v58, 1 }
 0xb77   :  { %v16072_v36 = vadd.f32 %v16071_v46, %v16070_v58 }
 0xb79   :  { %v16073_v30 = vmul.f32 0.125, %v16072_v36 }
 0xb7b   :  { %v16074_v19 = vadd.f32 1e-05, %v16073_v30 }
 0xb7d   :  { %20988 = vrsqrt.f32 %v16074_v19 }
 0xb87   :  { %v20989_v26 = vpop.eup %20988 }
 0xb88   :  { %v16076_v18 = vmul.f32 %v20989_v26, %v16064_v40 }
 0xb8a   :  { %v16083_v32 = vmul.f32 %v17564_v1, %v16076_v18 }
 0xb8c   :  { %v16090_v61 = vadd.f32 %v17565_v53, %v16083_v32 }
 0xb8e   :  { %v16091_v5 = vmax.f32 %v16090_v61, 0.0 }
 0xb90   :  { %v16100_v4 = vpack.c.bf16 %v16091_v5, %v16091_v5 }
 0xb92   :  { %19912 = vmatmul.mubr.msk.bf16.vlgmr.msra.gmra.mrb[176].mxu1 %vm15653_vm3, %v16100_v4 }
 0xc65   :  { %v16169_v14 = vpop.f32.mrb[176].mxu1 }
 0xc66   :  { %v16170_v48 = vadd.f32 %v17566_v2, %v16169_v14  ;;  %v19913_v15 = vpop.f32.mrb[177].mxu1 }
 0xc67   :  { %v16172_v7 = vpop.f32.mrb[178].mxu1 }
 0xc68   :  { %16176 = vst.msk [vmem:[%s29224_s18] sm:$0xff] %vm16175_vm8, %v16170_v48  ;;  %v19914_v17 = vpop.f32.mrb[179].mxu1 }

</bundles_post_ra>
